<compile_context>
chip_gen: v6e
topology: v6e:2x2x1
jax: 0.10.0
libtpu: 0.0.40
codegen_flags: <defaults>
</compile_context>

<pallas_src>
import functools

import jax
import jax.numpy as jnp
from jax import lax
from jax.experimental import pallas as pl
from jax.experimental.pallas import tpu as pltpu


# ----------------------------------------------------------------------------
# Kernel 1: fused Conv2d(4x4, stride=1) + bias + optional LeakyReLU(0.2)
# ----------------------------------------------------------------------------
def _conv4x4_kernel(x_ref, w_ref, b_ref, o_ref, *, apply_lrelu):
    # x_ref: (H_pad, W_pad, C_in)   bf16  zero-padded image for one batch element (VMEM resident)
    # w_ref: (16*C_in, TC)          bf16  weight slice, K-order = (kh, kw, ci)
    # b_ref: (1, TC)                f32
    # o_ref: (H_out, W_out, TC)     bf16
    h_out, w_out, _ = o_ref.shape
    bias = b_ref[...]                                        # (1, TC) f32

    @pl.loop(0, h_out)
    def _row(h):
        # Build the patch matrix for output row `h` in-kernel (no XLA im2col).
        segs = []
        for kh in range(4):
            row = x_ref[h + kh]                              # (W_pad, C_in) bf16
            for kw in range(4):
                segs.append(row[kw:kw + w_out, :])           # (W_out, C_in)
        patches = jnp.concatenate(segs, axis=-1)             # (W_out, 16*C_in) bf16
        # MXU matmul in bf16, f32 accumulation.
        y = jnp.dot(patches, w_ref[...], preferred_element_type=jnp.float32)
        y = y + bias
        if apply_lrelu:
            y = jnp.maximum(y, 0.2 * y)                      # LeakyReLU(0.2)
        o_ref[h] = y.astype(o_ref.dtype)


def conv4x4_s1(x, w_hwio, bias, *, pad, lrelu):
    """x: (N,H,W,C_in) bf16 NHWC; w_hwio: (4,4,C_in,C_out) f32; bias: (C_out,) f32 or None."""
    n, _h, _w, c_in = x.shape
    c_out = w_hwio.shape[-1]
    xp = jnp.pad(x, ((0, 0), pad[0], pad[1], (0, 0)))        # zero padding of the conv
    hp, wp = xp.shape[1], xp.shape[2]
    hc, wc = hp - 3, wp - 3

    w_mat = w_hwio.reshape(16 * c_in, c_out).astype(jnp.bfloat16)
    if bias is None:
        bias = jnp.zeros((c_out,), jnp.float32)
    b_mat = bias.reshape(1, c_out).astype(jnp.float32)

    tc = c_out if c_out <= 128 else 128                      # lane-dense C_out tiles
    assert c_out % tc == 0
    grid = (n, c_out // tc)

    return pl.pallas_call(
        functools.partial(_conv4x4_kernel, apply_lrelu=lrelu),
        out_shape=jax.ShapeDtypeStruct((n, hc, wc, c_out), jnp.bfloat16),
        grid=grid,
        in_specs=[
            # Full per-batch image: same block index across the C_out axis -> stays VMEM resident.
            pl.BlockSpec((None, hp, wp, c_in), lambda b, co: (b, 0, 0, 0)),
            pl.BlockSpec((16 * c_in, tc), lambda b, co: (0, co)),
            pl.BlockSpec((1, tc), lambda b, co: (0, co)),
        ],
        out_specs=pl.BlockSpec((None, hc, wc, tc), lambda b, co: (b, 0, 0, co)),
        compiler_params=pltpu.CompilerParams(
            dimension_semantics=("parallel", "parallel"),
            vmem_limit_bytes=48 * 1024 * 1024,
        ),
    )(xp, w_mat, b_mat)


# ----------------------------------------------------------------------------
# Kernel 2: anti-aliased BlurPool (depthwise 4x4 binomial filter, stride 2)
# ----------------------------------------------------------------------------
_BLUR_A = (1.0, 3.0, 3.0, 1.0)   # filt = outer(a, a) / 64


def _blurpool_kernel(x_ref, o_ref):
    # x_ref: (H_pad, W_pad//2, 2*C) bf16  width-paired reflect-padded activation:
    #        x_ref[h, m, r*C + ci] == x_padded[h, 2*m + r, ci]
    # o_ref: (H_tile, W_out, C)     bf16  rows [s*H_tile, (s+1)*H_tile) of the blurred output
    h_tile, w_out, c = o_ref.shape
    s = pl.program_id(1)

    @pl.loop(0, h_tile)
    def _row(i):
        g = s * h_tile + i                                   # global output row
        acc = jnp.zeros((w_out, c), jnp.float32)
        for u in range(4):
            row = x_ref[2 * g + u].astype(jnp.float32)       # (W_pad//2, 2*C)
            for v in range(4):
                tap = _BLUR_A[u] * _BLUR_A[v] / 64.0
                # column 2*j + v  ->  pair index j + v//2, sub-index v%2 : static slices only.
                seg = row[v // 2:v // 2 + w_out, (v % 2) * c:(v % 2) * c + c]
                acc = acc + tap * seg
        o_ref[i] = acc.astype(o_ref.dtype)


def blurpool_s2(x):
    """antialiased_cnns.BlurPool(filt_size=4, stride=2, reflect pad) on NHWC bf16 input."""
    n, hc, wc, c = x.shape
    xp = jnp.pad(x, ((0, 0), (1, 2), (1, 2), (0, 0)), mode="reflect")
    hp, wp = hc + 3, wc + 3
    if wp % 2 == 1:                                          # make width even for the pair-reshape
        xp = jnp.pad(xp, ((0, 0), (0, 0), (0, 1), (0, 0)))
        wp += 1
    xp2 = xp.reshape(n, hp, wp // 2, 2 * c)                  # free reshape (no transpose)

    hb = (hc - 1) // 2 + 1
    wb = (wc - 1) // 2 + 1
    r = 2 if hb % 2 == 0 else 1                              # second parallel grid axis
    h_tile = hb // r

    return pl.pallas_call(
        _blurpool_kernel,
        out_shape=jax.ShapeDtypeStruct((n, hb, wb, c), jnp.bfloat16),
        grid=(n, r),
        in_specs=[pl.BlockSpec((None, hp, wp // 2, 2 * c), lambda b, s: (b, 0, 0, 0))],
        out_specs=pl.BlockSpec((None, h_tile, wb, c), lambda b, s: (b, s, 0, 0)),
        compiler_params=pltpu.CompilerParams(
            dimension_semantics=("parallel", "parallel"),
            vmem_limit_bytes=48 * 1024 * 1024,
        ),
    )(xp2)


# ----------------------------------------------------------------------------
# Discriminator forward (Pallas path)
# ----------------------------------------------------------------------------
def discriminator_forward(img_a, img_b, params):
    """img_a, img_b: (N, C, H, W) f32.  Returns (N, 1, H', W') bf16 (autocast/HalfTensor analog)."""
    x = jnp.concatenate([img_a, img_b], axis=1)              # (N, 2C, H, W)
    x = jnp.transpose(x, (0, 2, 3, 1)).astype(jnp.bfloat16)  # NHWC bf16 activations
    for w_hwio, b in params["blocks"]:
        x = conv4x4_s1(x, w_hwio, b, pad=((1, 1), (1, 1)), lrelu=True)
        x = blurpool_s2(x)
    # nn.ZeroPad2d((1,0,1,0)) + Conv2d(512,1,4,padding=1,bias=False) == asymmetric zero pad (2,1)
    x = conv4x4_s1(x, params["final_w"], None, pad=((2, 1), (2, 1)), lrelu=False)
    return jnp.transpose(x, (0, 3, 1, 2))


# ----------------------------------------------------------------------------
# Weight preparation (spectral norm is a weight reparametrization -> wrapper-side)
# ----------------------------------------------------------------------------
def _spectral_normalize(w_oihw, n_iter=8):
    # TODO(synk): torch's spectral_norm keeps a persistent `u` and does 1 power-iteration per
    # forward; here we converge it once wrapper-side (same semantics: W / sigma_max(W_mat)).
    c_out = w_oihw.shape[0]
    wm = w_oihw.reshape(c_out, -1).astype(jnp.float32)
    u = jnp.ones((c_out,), jnp.float32) / jnp.sqrt(jnp.float32(c_out))

    def body(_, u):
        v = wm.T @ u
        v = v / (jnp.linalg.norm(v) + 1e-12)
        u_new = wm @ v
        return u_new / (jnp.linalg.norm(u_new) + 1e-12)

    u = lax.fori_loop(0, n_iter, body, u)
    sigma = jnp.linalg.norm(wm.T @ u)
    return w_oihw / sigma


def make_params(key, in_channels):
    sizes = [(2 * in_channels, 64), (64, 128), (128, 256), (256, 512)]
    blocks = []
    for i, (ci, co) in enumerate(sizes):
        kw_, kb_ = jax.random.split(jax.random.fold_in(key, i))
        w = jax.random.normal(kw_, (co, ci, 4, 4), jnp.float32) / jnp.sqrt(ci * 16.0)
        w = _spectral_normalize(w)
        w_hwio = jnp.transpose(w, (2, 3, 1, 0))              # OIHW -> HWIO
        b = 0.01 * jax.random.normal(kb_, (co,), jnp.float32)
        blocks.append((w_hwio, b))
    kf = jax.random.fold_in(key, 100)
    wf = jax.random.normal(kf, (1, 512, 4, 4), jnp.float32) / jnp.sqrt(512 * 16.0)
    return {"blocks": blocks, "final_w": jnp.transpose(wf, (2, 3, 1, 0))}


# ----------------------------------------------------------------------------
# Pure-JAX reference (mirrors the same bf16 cast points)
# ----------------------------------------------------------------------------
def reference_forward(img_a, img_b, params):
    dn = ("NHWC", "HWIO", "NHWC")
    x = jnp.concatenate([img_a, img_b], axis=1)
    x = jnp.transpose(x, (0, 2, 3, 1)).astype(jnp.bfloat16)
    a = jnp.array(_BLUR_A, jnp.float32)
    filt = jnp.outer(a, a)
    filt = filt / jnp.sum(filt)
    for w_hwio, b in params["blocks"]:
        y = lax.conv_general_dilated(x, w_hwio.astype(jnp.bfloat16), (1, 1), ((1, 1), (1, 1)),
                                     dimension_numbers=dn, preferred_element_type=jnp.float32)
        y = y + b.reshape(1, 1, 1, -1)
        y = jnp.maximum(y, 0.2 * y).astype(jnp.bfloat16)
        c = y.shape[-1]
        yp = jnp.pad(y, ((0, 0), (1, 2), (1, 2), (0, 0)), mode="reflect").astype(jnp.float32)
        fw = jnp.broadcast_to(filt[:, :, None, None], (4, 4, 1, c))
        x = lax.conv_general_dilated(yp, fw, (2, 2), ((0, 0), (0, 0)), dimension_numbers=dn,
                                     feature_group_count=c,
                                     preferred_element_type=jnp.float32).astype(jnp.bfloat16)
    y = lax.conv_general_dilated(x, params["final_w"].astype(jnp.bfloat16), (1, 1),
                                 ((2, 1), (2, 1)), dimension_numbers=dn,
                                 preferred_element_type=jnp.float32)
    return jnp.transpose(y.astype(jnp.bfloat16), (0, 3, 1, 2))


if __name__ == "__main__":
    key = jax.random.PRNGKey(0)
    k_a, k_b, k_p = jax.random.split(key, 3)

    # Smallest spatial size the 4-stage (conv s1 + blur s2) stack supports is 32.
    N, C, H, W = 2, 3, 32, 32
    img_a = jax.random.normal(k_a, (N, C, H, W), jnp.float32)
    img_b = jax.random.normal(k_b, (N, C, H, W), jnp.float32)
    params = make_params(k_p, C)

    out = jax.block_until_ready(jax.jit(discriminator_forward)(img_a, img_b, params))
    assert out.shape == (N, 1, 2, 2), out.shape
    assert out.dtype == jnp.bfloat16, out.dtype

    ref = jax.block_until_ready(jax.jit(reference_forward)(img_a, img_b, params))
    out_f = out.astype(jnp.float32)
    ref_f = ref.astype(jnp.float32)
    max_err = float(jnp.max(jnp.abs(out_f - ref_f)))
    tol = 0.05 * max(1.0, float(jnp.max(jnp.abs(ref_f))))
    assert max_err <= tol, (max_err, tol)

    print("KERNEL_OK")
</pallas_src>

<mosaic_0001>
module attributes {stable_mosaic.version = 11 : i64} {
  func.func @_conv4x4_kernel(%arg0: i32, %arg1: i32, %arg2: memref<1x34x34x6xbf16, #tpu.memory_space<vmem>>, %arg3: memref<96x64xbf16, #tpu.memory_space<vmem>>, %arg4: memref<1x64xf32, #tpu.memory_space<vmem>>, %arg5: memref<1x31x31x64xbf16, #tpu.memory_space<vmem>>) attributes {dimension_semantics = [#tpu.dimension_semantics<parallel>, #tpu.dimension_semantics<parallel>], iteration_bounds = array<i64: 2, 1>, scalar_prefetch = 0 : i64, scratch_operands = 0 : i64, tpu.core_type = #tpu.core_type<tc>, window_params = [{transform_indices = @transform_0, window_bounds = array<i64: 1, 34, 34, 6>}, {transform_indices = @transform_1, window_bounds = array<i64: 96, 64>}, {transform_indices = @transform_2, window_bounds = array<i64: 1, 64>}, {transform_indices = @transform_3, window_bounds = array<i64: 1, 31, 31, 64>}]} {
    %c0 = arith.constant 0 : index
    %c0_0 = arith.constant 0 : index
    %0 = vector.load %arg4[%c0, %c0_0] : memref<1x64xf32, #tpu.memory_space<vmem>>, vector<1x64xf32>
    %c0_i32 = arith.constant 0 : i32
    %c31_i32 = arith.constant 31 : i32
    %1 = arith.addi %c0_i32, %c31_i32 : i32
    %c1_i32 = arith.constant 1 : i32
    scf.for %arg6 = %c0_i32 to %1 step %c1_i32  : i32 {
      %c1_i32_2 = arith.constant 1 : i32
      %2 = arith.muli %arg6, %c1_i32_2 : i32
      %c0_i32_3 = arith.constant 0 : i32
      %3 = arith.addi %c0_i32_3, %2 : i32
      %c0_i32_4 = arith.constant 0 : i32
      %4 = arith.addi %3, %c0_i32_4 : i32
      %c0_5 = arith.constant 0 : index
      %5 = arith.index_cast %4 : i32 to index
      %c0_6 = arith.constant 0 : index
      %c0_7 = arith.constant 0 : index
      %6 = vector.load %arg2[%c0_5, %5, %c0_6, %c0_7] : memref<1x34x34x6xbf16, #tpu.memory_space<vmem>>, vector<1x1x34x6xbf16>
      %7 = vector.shape_cast %6 : vector<1x1x34x6xbf16> to vector<34x6xbf16>
      %8 = vector.extract_strided_slice %7 {offsets = [0, 0], sizes = [31, 6], strides = [1, 1]} : vector<34x6xbf16> to vector<31x6xbf16>
      %9 = vector.extract_strided_slice %7 {offsets = [1, 0], sizes = [31, 6], strides = [1, 1]} : vector<34x6xbf16> to vector<31x6xbf16>
      %10 = vector.extract_strided_slice %7 {offsets = [2, 0], sizes = [31, 6], strides = [1, 1]} : vector<34x6xbf16> to vector<31x6xbf16>
      %11 = vector.extract_strided_slice %7 {offsets = [3, 0], sizes = [31, 6], strides = [1, 1]} : vector<34x6xbf16> to vector<31x6xbf16>
      %c1_i32_8 = arith.constant 1 : i32
      %12 = arith.addi %3, %c1_i32_8 : i32
      %c0_9 = arith.constant 0 : index
      %13 = arith.index_cast %12 : i32 to index
      %c0_10 = arith.constant 0 : index
      %c0_11 = arith.constant 0 : index
      %14 = vector.load %arg2[%c0_9, %13, %c0_10, %c0_11] : memref<1x34x34x6xbf16, #tpu.memory_space<vmem>>, vector<1x1x34x6xbf16>
      %15 = vector.shape_cast %14 : vector<1x1x34x6xbf16> to vector<34x6xbf16>
      %16 = vector.extract_strided_slice %15 {offsets = [0, 0], sizes = [31, 6], strides = [1, 1]} : vector<34x6xbf16> to vector<31x6xbf16>
      %17 = vector.extract_strided_slice %15 {offsets = [1, 0], sizes = [31, 6], strides = [1, 1]} : vector<34x6xbf16> to vector<31x6xbf16>
      %18 = vector.extract_strided_slice %15 {offsets = [2, 0], sizes = [31, 6], strides = [1, 1]} : vector<34x6xbf16> to vector<31x6xbf16>
      %19 = vector.extract_strided_slice %15 {offsets = [3, 0], sizes = [31, 6], strides = [1, 1]} : vector<34x6xbf16> to vector<31x6xbf16>
      %c2_i32 = arith.constant 2 : i32
      %20 = arith.addi %3, %c2_i32 : i32
      %c0_12 = arith.constant 0 : index
      %21 = arith.index_cast %20 : i32 to index
      %c0_13 = arith.constant 0 : index
      %c0_14 = arith.constant 0 : index
      %22 = vector.load %arg2[%c0_12, %21, %c0_13, %c0_14] : memref<1x34x34x6xbf16, #tpu.memory_space<vmem>>, vector<1x1x34x6xbf16>
      %23 = vector.shape_cast %22 : vector<1x1x34x6xbf16> to vector<34x6xbf16>
      %24 = vector.extract_strided_slice %23 {offsets = [0, 0], sizes = [31, 6], strides = [1, 1]} : vector<34x6xbf16> to vector<31x6xbf16>
      %25 = vector.extract_strided_slice %23 {offsets = [1, 0], sizes = [31, 6], strides = [1, 1]} : vector<34x6xbf16> to vector<31x6xbf16>
      %26 = vector.extract_strided_slice %23 {offsets = [2, 0], sizes = [31, 6], strides = [1, 1]} : vector<34x6xbf16> to vector<31x6xbf16>
      %27 = vector.extract_strided_slice %23 {offsets = [3, 0], sizes = [31, 6], strides = [1, 1]} : vector<34x6xbf16> to vector<31x6xbf16>
      %c3_i32 = arith.constant 3 : i32
      %28 = arith.addi %3, %c3_i32 : i32
      %c0_15 = arith.constant 0 : index
      %29 = arith.index_cast %28 : i32 to index
      %c0_16 = arith.constant 0 : index
      %c0_17 = arith.constant 0 : index
      %30 = vector.load %arg2[%c0_15, %29, %c0_16, %c0_17] : memref<1x34x34x6xbf16, #tpu.memory_space<vmem>>, vector<1x1x34x6xbf16>
      %31 = vector.shape_cast %30 : vector<1x1x34x6xbf16> to vector<34x6xbf16>
      %32 = vector.extract_strided_slice %31 {offsets = [0, 0], sizes = [31, 6], strides = [1, 1]} : vector<34x6xbf16> to vector<31x6xbf16>
      %33 = vector.extract_strided_slice %31 {offsets = [1, 0], sizes = [31, 6], strides = [1, 1]} : vector<34x6xbf16> to vector<31x6xbf16>
      %34 = vector.extract_strided_slice %31 {offsets = [2, 0], sizes = [31, 6], strides = [1, 1]} : vector<34x6xbf16> to vector<31x6xbf16>
      %35 = vector.extract_strided_slice %31 {offsets = [3, 0], sizes = [31, 6], strides = [1, 1]} : vector<34x6xbf16> to vector<31x6xbf16>
      %36 = tpu.concatenate %8, %9, %10, %11, %16, %17, %18, %19, %24, %25, %26, %27, %32, %33, %34, %35 in 1 : vector<31x6xbf16>, vector<31x6xbf16>, vector<31x6xbf16>, vector<31x6xbf16>, vector<31x6xbf16>, vector<31x6xbf16>, vector<31x6xbf16>, vector<31x6xbf16>, vector<31x6xbf16>, vector<31x6xbf16>, vector<31x6xbf16>, vector<31x6xbf16>, vector<31x6xbf16>, vector<31x6xbf16>, vector<31x6xbf16>, vector<31x6xbf16> -> vector<31x96xbf16>
      %c0_18 = arith.constant 0 : index
      %c0_19 = arith.constant 0 : index
      %37 = vector.load %arg3[%c0_18, %c0_19] : memref<96x64xbf16, #tpu.memory_space<vmem>>, vector<96x64xbf16>
      %cst = arith.constant dense<0.000000e+00> : vector<31x64xf32>
      %38 = tpu.matmul %36, %37, %cst {dimension_numbers = #tpu.dot_dimension_numbers<[1], [0], [0], [1], [0, 0, 1, 1], [], []>} : vector<31x96xbf16>, vector<96x64xbf16>, vector<31x64xf32> -> vector<31x64xf32>
      %39 = vector.broadcast %0 : vector<1x64xf32> to vector<31x64xf32>
      %40 = arith.addf %38, %39 : vector<31x64xf32>
      %cst_20 = arith.constant 2.000000e-01 : f32
      %41 = vector.broadcast %cst_20 : f32 to vector<31x64xf32>
      %42 = arith.mulf %41, %40 : vector<31x64xf32>
      %43 = arith.maximumf %40, %42 : vector<31x64xf32>
      %44 = arith.truncf %43 : vector<31x64xf32> to vector<31x64xbf16>
      %c0_21 = arith.constant 0 : index
      %45 = arith.index_cast %3 : i32 to index
      %c0_22 = arith.constant 0 : index
      %c0_23 = arith.constant 0 : index
      %46 = vector.load %arg5[%c0_21, %45, %c0_22, %c0_23] : memref<1x31x31x64xbf16, #tpu.memory_space<vmem>>, vector<1x1x31x64xbf16>
      %47 = vector.shape_cast %46 : vector<1x1x31x64xbf16> to vector<31x64xbf16>
      %48 = vector.shape_cast %44 : vector<31x64xbf16> to vector<1x1x31x64xbf16>
      tpu.vector_store %arg5[%c0_21, %45, %c0_22, %c0_23], %48 {strides = array<i32>} : memref<1x31x31x64xbf16, #tpu.memory_space<vmem>>, vector<1x1x31x64xbf16>,
    }
    %c31_i32_1 = arith.constant 31 : i32
    return
  }
  func.func @transform_0(%arg0: i32, %arg1: i32) -> (i32, i32, i32, i32) {
    %c0_i32 = arith.constant 0 : i32
    %c0_i32_0 = arith.constant 0 : i32
    %c0_i32_1 = arith.constant 0 : i32
    %c0_i32_2 = arith.constant 0 : i32
    return %arg0, %c0_i32, %c0_i32_0, %c0_i32_1 : i32, i32, i32, i32
  }
  func.func @transform_1(%arg0: i32, %arg1: i32) -> (i32, i32) {
    %c0_i32 = arith.constant 0 : i32
    %c0_i32_0 = arith.constant 0 : i32
    return %c0_i32, %arg1 : i32, i32
  }
  func.func @transform_2(%arg0: i32, %arg1: i32) -> (i32, i32) {
    %c0_i32 = arith.constant 0 : i32
    %c0_i32_0 = arith.constant 0 : i32
    return %c0_i32, %arg1 : i32, i32
  }
  func.func @transform_3(%arg0: i32, %arg1: i32) -> (i32, i32, i32, i32) {
    %c0_i32 = arith.constant 0 : i32
    %c0_i32_0 = arith.constant 0 : i32
    %c0_i32_1 = arith.constant 0 : i32
    return %arg0, %c0_i32, %c0_i32_0, %arg1 : i32, i32, i32, i32
  }
}

module attributes {stable_mosaic.version = 11 : i64} {
  func.func @_blurpool_kernel(%arg0: i32, %arg1: i32, %arg2: memref<1x34x17x128xbf16, #tpu.memory_space<vmem>>, %arg3: memref<1x8x16x64xbf16, #tpu.memory_space<vmem>>) attributes {dimension_semantics = [#tpu.dimension_semantics<parallel>, #tpu.dimension_semantics<parallel>], iteration_bounds = array<i64: 2, 2>, scalar_prefetch = 0 : i64, scratch_operands = 0 : i64, tpu.core_type = #tpu.core_type<tc>, window_params = [{transform_indices = @transform_0, window_bounds = array<i64: 1, 34, 17, 128>}, {transform_indices = @transform_1, window_bounds = array<i64: 1, 8, 16, 64>}]} {
    %c0_i32 = arith.constant 0 : i32
    %c8_i32 = arith.constant 8 : i32
    %0 = arith.addi %c0_i32, %c8_i32 : i32
    %c1_i32 = arith.constant 1 : i32
    scf.for %arg4 = %c0_i32 to %0 step %c1_i32  : i32 {
      %c1_i32_1 = arith.constant 1 : i32
      %1 = arith.muli %arg4, %c1_i32_1 : i32
      %c0_i32_2 = arith.constant 0 : i32
      %2 = arith.addi %c0_i32_2, %1 : i32
      %c8_i32_3 = arith.constant 8 : i32
      %3 = arith.muli %arg1, %c8_i32_3 : i32
      %4 = arith.addi %3, %2 : i32
      %cst = arith.constant 0.000000e+00 : f32
      %5 = vector.broadcast %cst : f32 to vector<16x64xf32>
      %c2_i32 = arith.constant 2 : i32
      %6 = arith.muli %c2_i32, %4 : i32
      %c0_i32_4 = arith.constant 0 : i32
      %7 = arith.addi %6, %c0_i32_4 : i32
      %c0 = arith.constant 0 : index
      %8 = arith.index_cast %7 : i32 to index
      %c0_5 = arith.constant 0 : index
      %c0_6 = arith.constant 0 : index
      %9 = vector.load %arg2[%c0, %8, %c0_5, %c0_6] : memref<1x34x17x128xbf16, #tpu.memory_space<vmem>>, vector<1x1x17x128xbf16>
      %10 = vector.shape_cast %9 : vector<1x1x17x128xbf16> to vector<17x128xbf16>
      %11 = arith.extf %10 : vector<17x128xbf16> to vector<17x128xf32>
      %12 = vector.extract_strided_slice %11 {offsets = [0, 0], sizes = [16, 64], strides = [1, 1]} : vector<17x128xf32> to vector<16x64xf32>
      %cst_7 = arith.constant 1.562500e-02 : f32
      %13 = vector.broadcast %cst_7 : f32 to vector<16x64xf32>
      %14 = arith.mulf %13, %12 : vector<16x64xf32>
      %15 = arith.addf %5, %14 : vector<16x64xf32>
      %16 = vector.extract_strided_slice %11 {offsets = [0, 64], sizes = [16, 64], strides = [1, 1]} : vector<17x128xf32> to vector<16x64xf32>
      %cst_8 = arith.constant 4.687500e-02 : f32
      %17 = vector.broadcast %cst_8 : f32 to vector<16x64xf32>
      %18 = arith.mulf %17, %16 : vector<16x64xf32>
      %19 = arith.addf %15, %18 : vector<16x64xf32>
      %20 = vector.extract_strided_slice %11 {offsets = [1, 0], sizes = [16, 64], strides = [1, 1]} : vector<17x128xf32> to vector<16x64xf32>
      %cst_9 = arith.constant 4.687500e-02 : f32
      %21 = vector.broadcast %cst_9 : f32 to vector<16x64xf32>
      %22 = arith.mulf %21, %20 : vector<16x64xf32>
      %23 = arith.addf %19, %22 : vector<16x64xf32>
      %24 = vector.extract_strided_slice %11 {offsets = [1, 64], sizes = [16, 64], strides = [1, 1]} : vector<17x128xf32> to vector<16x64xf32>
      %cst_10 = arith.constant 1.562500e-02 : f32
      %25 = vector.broadcast %cst_10 : f32 to vector<16x64xf32>
      %26 = arith.mulf %25, %24 : vector<16x64xf32>
      %27 = arith.addf %23, %26 : vector<16x64xf32>
      %c2_i32_11 = arith.constant 2 : i32
      %28 = arith.muli %c2_i32_11, %4 : i32
      %c1_i32_12 = arith.constant 1 : i32
      %29 = arith.addi %28, %c1_i32_12 : i32
      %c0_13 = arith.constant 0 : index
      %30 = arith.index_cast %29 : i32 to index
      %c0_14 = arith.constant 0 : index
      %c0_15 = arith.constant 0 : index
      %31 = vector.load %arg2[%c0_13, %30, %c0_14, %c0_15] : memref<1x34x17x128xbf16, #tpu.memory_space<vmem>>, vector<1x1x17x128xbf16>
      %32 = vector.shape_cast %31 : vector<1x1x17x128xbf16> to vector<17x128xbf16>
      %33 = arith.extf %32 : vector<17x128xbf16> to vector<17x128xf32>
      %34 = vector.extract_strided_slice %33 {offsets = [0, 0], sizes = [16, 64], strides = [1, 1]} : vector<17x128xf32> to vector<16x64xf32>
      %cst_16 = arith.constant 4.687500e-02 : f32
      %35 = vector.broadcast %cst_16 : f32 to vector<16x64xf32>
      %36 = arith.mulf %35, %34 : vector<16x64xf32>
      %37 = arith.addf %27, %36 : vector<16x64xf32>
      %38 = vector.extract_strided_slice %33 {offsets = [0, 64], sizes = [16, 64], strides = [1, 1]} : vector<17x128xf32> to vector<16x64xf32>
      %cst_17 = arith.constant 1.406250e-01 : f32
      %39 = vector.broadcast %cst_17 : f32 to vector<16x64xf32>
      %40 = arith.mulf %39, %38 : vector<16x64xf32>
      %41 = arith.addf %37, %40 : vector<16x64xf32>
      %42 = vector.extract_strided_slice %33 {offsets = [1, 0], sizes = [16, 64], strides = [1, 1]} : vector<17x128xf32> to vector<16x64xf32>
      %cst_18 = arith.constant 1.406250e-01 : f32
      %43 = vector.broadcast %cst_18 : f32 to vector<16x64xf32>
      %44 = arith.mulf %43, %42 : vector<16x64xf32>
      %45 = arith.addf %41, %44 : vector<16x64xf32>
      %46 = vector.extract_strided_slice %33 {offsets = [1, 64], sizes = [16, 64], strides = [1, 1]} : vector<17x128xf32> to vector<16x64xf32>
      %cst_19 = arith.constant 4.687500e-02 : f32
      %47 = vector.broadcast %cst_19 : f32 to vector<16x64xf32>
      %48 = arith.mulf %47, %46 : vector<16x64xf32>
      %49 = arith.addf %45, %48 : vector<16x64xf32>
      %c2_i32_20 = arith.constant 2 : i32
      %50 = arith.muli %c2_i32_20, %4 : i32
      %c2_i32_21 = arith.constant 2 : i32
      %51 = arith.addi %50, %c2_i32_21 : i32
      %c0_22 = arith.constant 0 : index
      %52 = arith.index_cast %51 : i32 to index
      %c0_23 = arith.constant 0 : index
      %c0_24 = arith.constant 0 : index
      %53 = vector.load %arg2[%c0_22, %52, %c0_23, %c0_24] : memref<1x34x17x128xbf16, #tpu.memory_space<vmem>>, vector<1x1x17x128xbf16>
      %54 = vector.shape_cast %53 : vector<1x1x17x128xbf16> to vector<17x128xbf16>
      %55 = arith.extf %54 : vector<17x128xbf16> to vector<17x128xf32>
      %56 = vector.extract_strided_slice %55 {offsets = [0, 0], sizes = [16, 64], strides = [1, 1]} : vector<17x128xf32> to vector<16x64xf32>
      %cst_25 = arith.constant 4.687500e-02 : f32
      %57 = vector.broadcast %cst_25 : f32 to vector<16x64xf32>
      %58 = arith.mulf %57, %56 : vector<16x64xf32>
      %59 = arith.addf %49, %58 : vector<16x64xf32>
      %60 = vector.extract_strided_slice %55 {offsets = [0, 64], sizes = [16, 64], strides = [1, 1]} : vector<17x128xf32> to vector<16x64xf32>
      %cst_26 = arith.constant 1.406250e-01 : f32
      %61 = vector.broadcast %cst_26 : f32 to vector<16x64xf32>
      %62 = arith.mulf %61, %60 : vector<16x64xf32>
      %63 = arith.addf %59, %62 : vector<16x64xf32>
      %64 = vector.extract_strided_slice %55 {offsets = [1, 0], sizes = [16, 64], strides = [1, 1]} : vector<17x128xf32> to vector<16x64xf32>
      %cst_27 = arith.constant 1.406250e-01 : f32
      %65 = vector.broadcast %cst_27 : f32 to vector<16x64xf32>
      %66 = arith.mulf %65, %64 : vector<16x64xf32>
      %67 = arith.addf %63, %66 : vector<16x64xf32>
      %68 = vector.extract_strided_slice %55 {offsets = [1, 64], sizes = [16, 64], strides = [1, 1]} : vector<17x128xf32> to vector<16x64xf32>
      %cst_28 = arith.constant 4.687500e-02 : f32
      %69 = vector.broadcast %cst_28 : f32 to vector<16x64xf32>
      %70 = arith.mulf %69, %68 : vector<16x64xf32>
      %71 = arith.addf %67, %70 : vector<16x64xf32>
      %c2_i32_29 = arith.constant 2 : i32
      %72 = arith.muli %c2_i32_29, %4 : i32
      %c3_i32 = arith.constant 3 : i32
      %73 = arith.addi %72, %c3_i32 : i32
      %c0_30 = arith.constant 0 : index
      %74 = arith.index_cast %73 : i32 to index
      %c0_31 = arith.constant 0 : index
      %c0_32 = arith.constant 0 : index
      %75 = vector.load %arg2[%c0_30, %74, %c0_31, %c0_32] : memref<1x34x17x128xbf16, #tpu.memory_space<vmem>>, vector<1x1x17x128xbf16>
      %76 = vector.shape_cast %75 : vector<1x1x17x128xbf16> to vector<17x128xbf16>
      %77 = arith.extf %76 : vector<17x128xbf16> to vector<17x128xf32>
      %78 = vector.extract_strided_slice %77 {offsets = [0, 0], sizes = [16, 64], strides = [1, 1]} : vector<17x128xf32> to vector<16x64xf32>
      %cst_33 = arith.constant 1.562500e-02 : f32
      %79 = vector.broadcast %cst_33 : f32 to vector<16x64xf32>
      %80 = arith.mulf %79, %78 : vector<16x64xf32>
      %81 = arith.addf %71, %80 : vector<16x64xf32>
      %82 = vector.extract_strided_slice %77 {offsets = [0, 64], sizes = [16, 64], strides = [1, 1]} : vector<17x128xf32> to vector<16x64xf32>
      %cst_34 = arith.constant 4.687500e-02 : f32
      %83 = vector.broadcast %cst_34 : f32 to vector<16x64xf32>
      %84 = arith.mulf %83, %82 : vector<16x64xf32>
      %85 = arith.addf %81, %84 : vector<16x64xf32>
      %86 = vector.extract_strided_slice %77 {offsets = [1, 0], sizes = [16, 64], strides = [1, 1]} : vector<17x128xf32> to vector<16x64xf32>
      %cst_35 = arith.constant 4.687500e-02 : f32
      %87 = vector.broadcast %cst_35 : f32 to vector<16x64xf32>
      %88 = arith.mulf %87, %86 : vector<16x64xf32>
      %89 = arith.addf %85, %88 : vector<16x64xf32>
      %90 = vector.extract_strided_slice %77 {offsets = [1, 64], sizes = [16, 64], strides = [1, 1]} : vector<17x128xf32> to vector<16x64xf32>
      %cst_36 = arith.constant 1.562500e-02 : f32
      %91 = vector.broadcast %cst_36 : f32 to vector<16x64xf32>
      %92 = arith.mulf %91, %90 : vector<16x64xf32>
      %93 = arith.addf %89, %92 : vector<16x64xf32>
      %94 = arith.truncf %93 : vector<16x64xf32> to vector<16x64xbf16>
      %c0_37 = arith.constant 0 : index
      %95 = arith.index_cast %2 : i32 to index
      %c0_38 = arith.constant 0 : index
      %c0_39 = arith.constant 0 : index
      %96 = vector.load %arg3[%c0_37, %95, %c0_38, %c0_39] : memref<1x8x16x64xbf16, #tpu.memory_space<vmem>>, vector<1x1x16x64xbf16>
      %97 = vector.shape_cast %96 : vector<1x1x16x64xbf16> to vector<16x64xbf16>
      %98 = vector.shape_cast %94 : vector<16x64xbf16> to vector<1x1x16x64xbf16>
      tpu.vector_store %arg3[%c0_37, %95, %c0_38, %c0_39], %98 {strides = array<i32>} : memref<1x8x16x64xbf16, #tpu.memory_space<vmem>>, vector<1x1x16x64xbf16>,
    }
    %c8_i32_0 = arith.constant 8 : i32
    return
  }
  func.func @transform_0(%arg0: i32, %arg1: i32) -> (i32, i32, i32, i32) {
    %c0_i32 = arith.constant 0 : i32
    %c0_i32_0 = arith.constant 0 : i32
    %c0_i32_1 = arith.constant 0 : i32
    %c0_i32_2 = arith.constant 0 : i32
    return %arg0, %c0_i32, %c0_i32_0, %c0_i32_1 : i32, i32, i32, i32
  }
  func.func @transform_1(%arg0: i32, %arg1: i32) -> (i32, i32, i32, i32) {
    %c0_i32 = arith.constant 0 : i32
    %c0_i32_0 = arith.constant 0 : i32
    %c0_i32_1 = arith.constant 0 : i32
    return %arg0, %arg1, %c0_i32, %c0_i32_0 : i32, i32, i32, i32
  }
}

module attributes {stable_mosaic.version = 11 : i64} {
  func.func @_conv4x4_kernel(%arg0: i32, %arg1: i32, %arg2: memref<1x18x18x64xbf16, #tpu.memory_space<vmem>>, %arg3: memref<1024x128xbf16, #tpu.memory_space<vmem>>, %arg4: memref<1x128xf32, #tpu.memory_space<vmem>>, %arg5: memref<1x15x15x128xbf16, #tpu.memory_space<vmem>>) attributes {dimension_semantics = [#tpu.dimension_semantics<parallel>, #tpu.dimension_semantics<parallel>], iteration_bounds = array<i64: 2, 1>, scalar_prefetch = 0 : i64, scratch_operands = 0 : i64, tpu.core_type = #tpu.core_type<tc>, window_params = [{transform_indices = @transform_0, window_bounds = array<i64: 1, 18, 18, 64>}, {transform_indices = @transform_1, window_bounds = array<i64: 1024, 128>}, {transform_indices = @transform_2, window_bounds = array<i64: 1, 128>}, {transform_indices = @transform_3, window_bounds = array<i64: 1, 15, 15, 128>}]} {
    %c0 = arith.constant 0 : index
    %c0_0 = arith.constant 0 : index
    %0 = vector.load %arg4[%c0, %c0_0] : memref<1x128xf32, #tpu.memory_space<vmem>>, vector<1x128xf32>
    %c0_i32 = arith.constant 0 : i32
    %c15_i32 = arith.constant 15 : i32
    %1 = arith.addi %c0_i32, %c15_i32 : i32
    %c1_i32 = arith.constant 1 : i32
    scf.for %arg6 = %c0_i32 to %1 step %c1_i32  : i32 {
      %c1_i32_2 = arith.constant 1 : i32
      %2 = arith.muli %arg6, %c1_i32_2 : i32
      %c0_i32_3 = arith.constant 0 : i32
      %3 = arith.addi %c0_i32_3, %2 : i32
      %c0_i32_4 = arith.constant 0 : i32
      %4 = arith.addi %3, %c0_i32_4 : i32
      %c0_5 = arith.constant 0 : index
      %5 = arith.index_cast %4 : i32 to index
      %c0_6 = arith.constant 0 : index
      %c0_7 = arith.constant 0 : index
      %6 = vector.load %arg2[%c0_5, %5, %c0_6, %c0_7] : memref<1x18x18x64xbf16, #tpu.memory_space<vmem>>, vector<1x1x18x64xbf16>
      %7 = vector.shape_cast %6 : vector<1x1x18x64xbf16> to vector<18x64xbf16>
      %8 = vector.extract_strided_slice %7 {offsets = [0, 0], sizes = [15, 64], strides = [1, 1]} : vector<18x64xbf16> to vector<15x64xbf16>
      %9 = vector.extract_strided_slice %7 {offsets = [1, 0], sizes = [15, 64], strides = [1, 1]} : vector<18x64xbf16> to vector<15x64xbf16>
      %10 = vector.extract_strided_slice %7 {offsets = [2, 0], sizes = [15, 64], strides = [1, 1]} : vector<18x64xbf16> to vector<15x64xbf16>
      %11 = vector.extract_strided_slice %7 {offsets = [3, 0], sizes = [15, 64], strides = [1, 1]} : vector<18x64xbf16> to vector<15x64xbf16>
      %c1_i32_8 = arith.constant 1 : i32
      %12 = arith.addi %3, %c1_i32_8 : i32
      %c0_9 = arith.constant 0 : index
      %13 = arith.index_cast %12 : i32 to index
      %c0_10 = arith.constant 0 : index
      %c0_11 = arith.constant 0 : index
      %14 = vector.load %arg2[%c0_9, %13, %c0_10, %c0_11] : memref<1x18x18x64xbf16, #tpu.memory_space<vmem>>, vector<1x1x18x64xbf16>
      %15 = vector.shape_cast %14 : vector<1x1x18x64xbf16> to vector<18x64xbf16>
      %16 = vector.extract_strided_slice %15 {offsets = [0, 0], sizes = [15, 64], strides = [1, 1]} : vector<18x64xbf16> to vector<15x64xbf16>
      %17 = vector.extract_strided_slice %15 {offsets = [1, 0], sizes = [15, 64], strides = [1, 1]} : vector<18x64xbf16> to vector<15x64xbf16>
      %18 = vector.extract_strided_slice %15 {offsets = [2, 0], sizes = [15, 64], strides = [1, 1]} : vector<18x64xbf16> to vector<15x64xbf16>
      %19 = vector.extract_strided_slice %15 {offsets = [3, 0], sizes = [15, 64], strides = [1, 1]} : vector<18x64xbf16> to vector<15x64xbf16>
      %c2_i32 = arith.constant 2 : i32
      %20 = arith.addi %3, %c2_i32 : i32
      %c0_12 = arith.constant 0 : index
      %21 = arith.index_cast %20 : i32 to index
      %c0_13 = arith.constant 0 : index
      %c0_14 = arith.constant 0 : index
      %22 = vector.load %arg2[%c0_12, %21, %c0_13, %c0_14] : memref<1x18x18x64xbf16, #tpu.memory_space<vmem>>, vector<1x1x18x64xbf16>
      %23 = vector.shape_cast %22 : vector<1x1x18x64xbf16> to vector<18x64xbf16>
      %24 = vector.extract_strided_slice %23 {offsets = [0, 0], sizes = [15, 64], strides = [1, 1]} : vector<18x64xbf16> to vector<15x64xbf16>
      %25 = vector.extract_strided_slice %23 {offsets = [1, 0], sizes = [15, 64], strides = [1, 1]} : vector<18x64xbf16> to vector<15x64xbf16>
      %26 = vector.extract_strided_slice %23 {offsets = [2, 0], sizes = [15, 64], strides = [1, 1]} : vector<18x64xbf16> to vector<15x64xbf16>
      %27 = vector.extract_strided_slice %23 {offsets = [3, 0], sizes = [15, 64], strides = [1, 1]} : vector<18x64xbf16> to vector<15x64xbf16>
      %c3_i32 = arith.constant 3 : i32
      %28 = arith.addi %3, %c3_i32 : i32
      %c0_15 = arith.constant 0 : index
      %29 = arith.index_cast %28 : i32 to index
      %c0_16 = arith.constant 0 : index
      %c0_17 = arith.constant 0 : index
      %30 = vector.load %arg2[%c0_15, %29, %c0_16, %c0_17] : memref<1x18x18x64xbf16, #tpu.memory_space<vmem>>, vector<1x1x18x64xbf16>
      %31 = vector.shape_cast %30 : vector<1x1x18x64xbf16> to vector<18x64xbf16>
      %32 = vector.extract_strided_slice %31 {offsets = [0, 0], sizes = [15, 64], strides = [1, 1]} : vector<18x64xbf16> to vector<15x64xbf16>
      %33 = vector.extract_strided_slice %31 {offsets = [1, 0], sizes = [15, 64], strides = [1, 1]} : vector<18x64xbf16> to vector<15x64xbf16>
      %34 = vector.extract_strided_slice %31 {offsets = [2, 0], sizes = [15, 64], strides = [1, 1]} : vector<18x64xbf16> to vector<15x64xbf16>
      %35 = vector.extract_strided_slice %31 {offsets = [3, 0], sizes = [15, 64], strides = [1, 1]} : vector<18x64xbf16> to vector<15x64xbf16>
      %36 = tpu.concatenate %8, %9, %10, %11, %16, %17, %18, %19, %24, %25, %26, %27, %32, %33, %34, %35 in 1 : vector<15x64xbf16>, vector<15x64xbf16>, vector<15x64xbf16>, vector<15x64xbf16>, vector<15x64xbf16>, vector<15x64xbf16>, vector<15x64xbf16>, vector<15x64xbf16>, vector<15x64xbf16>, vector<15x64xbf16>, vector<15x64xbf16>, vector<15x64xbf16>, vector<15x64xbf16>, vector<15x64xbf16>, vector<15x64xbf16>, vector<15x64xbf16> -> vector<15x1024xbf16>
      %c0_18 = arith.constant 0 : index
      %c0_19 = arith.constant 0 : index
      %37 = vector.load %arg3[%c0_18, %c0_19] : memref<1024x128xbf16, #tpu.memory_space<vmem>>, vector<1024x128xbf16>
      %cst = arith.constant dense<0.000000e+00> : vector<15x128xf32>
      %38 = tpu.matmul %36, %37, %cst {dimension_numbers = #tpu.dot_dimension_numbers<[1], [0], [0], [1], [0, 0, 1, 1], [], []>} : vector<15x1024xbf16>, vector<1024x128xbf16>, vector<15x128xf32> -> vector<15x128xf32>
      %39 = vector.broadcast %0 : vector<1x128xf32> to vector<15x128xf32>
      %40 = arith.addf %38, %39 : vector<15x128xf32>
      %cst_20 = arith.constant 2.000000e-01 : f32
      %41 = vector.broadcast %cst_20 : f32 to vector<15x128xf32>
      %42 = arith.mulf %41, %40 : vector<15x128xf32>
      %43 = arith.maximumf %40, %42 : vector<15x128xf32>
      %44 = arith.truncf %43 : vector<15x128xf32> to vector<15x128xbf16>
      %c0_21 = arith.constant 0 : index
      %45 = arith.index_cast %3 : i32 to index
      %c0_22 = arith.constant 0 : index
      %c0_23 = arith.constant 0 : index
      %46 = vector.load %arg5[%c0_21, %45, %c0_22, %c0_23] : memref<1x15x15x128xbf16, #tpu.memory_space<vmem>>, vector<1x1x15x128xbf16>
      %47 = vector.shape_cast %46 : vector<1x1x15x128xbf16> to vector<15x128xbf16>
      %48 = vector.shape_cast %44 : vector<15x128xbf16> to vector<1x1x15x128xbf16>
      tpu.vector_store %arg5[%c0_21, %45, %c0_22, %c0_23], %48 {strides = array<i32>} : memref<1x15x15x128xbf16, #tpu.memory_space<vmem>>, vector<1x1x15x128xbf16>,
    }
    %c15_i32_1 = arith.constant 15 : i32
    return
  }
  func.func @transform_0(%arg0: i32, %arg1: i32) -> (i32, i32, i32, i32) {
    %c0_i32 = arith.constant 0 : i32
    %c0_i32_0 = arith.constant 0 : i32
    %c0_i32_1 = arith.constant 0 : i32
    %c0_i32_2 = arith.constant 0 : i32
    return %arg0, %c0_i32, %c0_i32_0, %c0_i32_1 : i32, i32, i32, i32
  }
  func.func @transform_1(%arg0: i32, %arg1: i32) -> (i32, i32) {
    %c0_i32 = arith.constant 0 : i32
    %c0_i32_0 = arith.constant 0 : i32
    return %c0_i32, %arg1 : i32, i32
  }
  func.func @transform_2(%arg0: i32, %arg1: i32) -> (i32, i32) {
    %c0_i32 = arith.constant 0 : i32
    %c0_i32_0 = arith.constant 0 : i32
    return %c0_i32, %arg1 : i32, i32
  }
  func.func @transform_3(%arg0: i32, %arg1: i32) -> (i32, i32, i32, i32) {
    %c0_i32 = arith.constant 0 : i32
    %c0_i32_0 = arith.constant 0 : i32
    %c0_i32_1 = arith.constant 0 : i32
    return %arg0, %c0_i32, %c0_i32_0, %arg1 : i32, i32, i32, i32
  }
}

module attributes {stable_mosaic.version = 11 : i64} {
  func.func @_blurpool_kernel(%arg0: i32, %arg1: i32, %arg2: memref<1x18x9x256xbf16, #tpu.memory_space<vmem>>, %arg3: memref<1x4x8x128xbf16, #tpu.memory_space<vmem>>) attributes {dimension_semantics = [#tpu.dimension_semantics<parallel>, #tpu.dimension_semantics<parallel>], iteration_bounds = array<i64: 2, 2>, scalar_prefetch = 0 : i64, scratch_operands = 0 : i64, tpu.core_type = #tpu.core_type<tc>, window_params = [{transform_indices = @transform_0, window_bounds = array<i64: 1, 18, 9, 256>}, {transform_indices = @transform_1, window_bounds = array<i64: 1, 4, 8, 128>}]} {
    %c0_i32 = arith.constant 0 : i32
    %c4_i32 = arith.constant 4 : i32
    %0 = arith.addi %c0_i32, %c4_i32 : i32
    %c1_i32 = arith.constant 1 : i32
    scf.for %arg4 = %c0_i32 to %0 step %c1_i32  : i32 {
      %c1_i32_1 = arith.constant 1 : i32
      %1 = arith.muli %arg4, %c1_i32_1 : i32
      %c0_i32_2 = arith.constant 0 : i32
      %2 = arith.addi %c0_i32_2, %1 : i32
      %c4_i32_3 = arith.constant 4 : i32
      %3 = arith.muli %arg1, %c4_i32_3 : i32
      %4 = arith.addi %3, %2 : i32
      %cst = arith.constant 0.000000e+00 : f32
      %5 = vector.broadcast %cst : f32 to vector<8x128xf32>
      %c2_i32 = arith.constant 2 : i32
      %6 = arith.muli %c2_i32, %4 : i32
      %c0_i32_4 = arith.constant 0 : i32
      %7 = arith.addi %6, %c0_i32_4 : i32
      %c0 = arith.constant 0 : index
      %8 = arith.index_cast %7 : i32 to index
      %c0_5 = arith.constant 0 : index
      %c0_6 = arith.constant 0 : index
      %9 = vector.load %arg2[%c0, %8, %c0_5, %c0_6] : memref<1x18x9x256xbf16, #tpu.memory_space<vmem>>, vector<1x1x9x256xbf16>
      %10 = vector.shape_cast %9 : vector<1x1x9x256xbf16> to vector<9x256xbf16>
      %11 = arith.extf %10 : vector<9x256xbf16> to vector<9x256xf32>
      %12 = vector.extract_strided_slice %11 {offsets = [0, 0], sizes = [8, 128], strides = [1, 1]} : vector<9x256xf32> to vector<8x128xf32>
      %cst_7 = arith.constant 1.562500e-02 : f32
      %13 = vector.broadcast %cst_7 : f32 to vector<8x128xf32>
      %14 = arith.mulf %13, %12 : vector<8x128xf32>
      %15 = arith.addf %5, %14 : vector<8x128xf32>
      %16 = vector.extract_strided_slice %11 {offsets = [0, 128], sizes = [8, 128], strides = [1, 1]} : vector<9x256xf32> to vector<8x128xf32>
      %cst_8 = arith.constant 4.687500e-02 : f32
      %17 = vector.broadcast %cst_8 : f32 to vector<8x128xf32>
      %18 = arith.mulf %17, %16 : vector<8x128xf32>
      %19 = arith.addf %15, %18 : vector<8x128xf32>
      %20 = vector.extract_strided_slice %11 {offsets = [1, 0], sizes = [8, 128], strides = [1, 1]} : vector<9x256xf32> to vector<8x128xf32>
      %cst_9 = arith.constant 4.687500e-02 : f32
      %21 = vector.broadcast %cst_9 : f32 to vector<8x128xf32>
      %22 = arith.mulf %21, %20 : vector<8x128xf32>
      %23 = arith.addf %19, %22 : vector<8x128xf32>
      %24 = vector.extract_strided_slice %11 {offsets = [1, 128], sizes = [8, 128], strides = [1, 1]} : vector<9x256xf32> to vector<8x128xf32>
      %cst_10 = arith.constant 1.562500e-02 : f32
      %25 = vector.broadcast %cst_10 : f32 to vector<8x128xf32>
      %26 = arith.mulf %25, %24 : vector<8x128xf32>
      %27 = arith.addf %23, %26 : vector<8x128xf32>
      %c2_i32_11 = arith.constant 2 : i32
      %28 = arith.muli %c2_i32_11, %4 : i32
      %c1_i32_12 = arith.constant 1 : i32
      %29 = arith.addi %28, %c1_i32_12 : i32
      %c0_13 = arith.constant 0 : index
      %30 = arith.index_cast %29 : i32 to index
      %c0_14 = arith.constant 0 : index
      %c0_15 = arith.constant 0 : index
      %31 = vector.load %arg2[%c0_13, %30, %c0_14, %c0_15] : memref<1x18x9x256xbf16, #tpu.memory_space<vmem>>, vector<1x1x9x256xbf16>
      %32 = vector.shape_cast %31 : vector<1x1x9x256xbf16> to vector<9x256xbf16>
      %33 = arith.extf %32 : vector<9x256xbf16> to vector<9x256xf32>
      %34 = vector.extract_strided_slice %33 {offsets = [0, 0], sizes = [8, 128], strides = [1, 1]} : vector<9x256xf32> to vector<8x128xf32>
      %cst_16 = arith.constant 4.687500e-02 : f32
      %35 = vector.broadcast %cst_16 : f32 to vector<8x128xf32>
      %36 = arith.mulf %35, %34 : vector<8x128xf32>
      %37 = arith.addf %27, %36 : vector<8x128xf32>
      %38 = vector.extract_strided_slice %33 {offsets = [0, 128], sizes = [8, 128], strides = [1, 1]} : vector<9x256xf32> to vector<8x128xf32>
      %cst_17 = arith.constant 1.406250e-01 : f32
      %39 = vector.broadcast %cst_17 : f32 to vector<8x128xf32>
      %40 = arith.mulf %39, %38 : vector<8x128xf32>
      %41 = arith.addf %37, %40 : vector<8x128xf32>
      %42 = vector.extract_strided_slice %33 {offsets = [1, 0], sizes = [8, 128], strides = [1, 1]} : vector<9x256xf32> to vector<8x128xf32>
      %cst_18 = arith.constant 1.406250e-01 : f32
      %43 = vector.broadcast %cst_18 : f32 to vector<8x128xf32>
      %44 = arith.mulf %43, %42 : vector<8x128xf32>
      %45 = arith.addf %41, %44 : vector<8x128xf32>
      %46 = vector.extract_strided_slice %33 {offsets = [1, 128], sizes = [8, 128], strides = [1, 1]} : vector<9x256xf32> to vector<8x128xf32>
      %cst_19 = arith.constant 4.687500e-02 : f32
      %47 = vector.broadcast %cst_19 : f32 to vector<8x128xf32>
      %48 = arith.mulf %47, %46 : vector<8x128xf32>
      %49 = arith.addf %45, %48 : vector<8x128xf32>
      %c2_i32_20 = arith.constant 2 : i32
      %50 = arith.muli %c2_i32_20, %4 : i32
      %c2_i32_21 = arith.constant 2 : i32
      %51 = arith.addi %50, %c2_i32_21 : i32
      %c0_22 = arith.constant 0 : index
      %52 = arith.index_cast %51 : i32 to index
      %c0_23 = arith.constant 0 : index
      %c0_24 = arith.constant 0 : index
      %53 = vector.load %arg2[%c0_22, %52, %c0_23, %c0_24] : memref<1x18x9x256xbf16, #tpu.memory_space<vmem>>, vector<1x1x9x256xbf16>
      %54 = vector.shape_cast %53 : vector<1x1x9x256xbf16> to vector<9x256xbf16>
      %55 = arith.extf %54 : vector<9x256xbf16> to vector<9x256xf32>
      %56 = vector.extract_strided_slice %55 {offsets = [0, 0], sizes = [8, 128], strides = [1, 1]} : vector<9x256xf32> to vector<8x128xf32>
      %cst_25 = arith.constant 4.687500e-02 : f32
      %57 = vector.broadcast %cst_25 : f32 to vector<8x128xf32>
      %58 = arith.mulf %57, %56 : vector<8x128xf32>
      %59 = arith.addf %49, %58 : vector<8x128xf32>
      %60 = vector.extract_strided_slice %55 {offsets = [0, 128], sizes = [8, 128], strides = [1, 1]} : vector<9x256xf32> to vector<8x128xf32>
      %cst_26 = arith.constant 1.406250e-01 : f32
      %61 = vector.broadcast %cst_26 : f32 to vector<8x128xf32>
      %62 = arith.mulf %61, %60 : vector<8x128xf32>
      %63 = arith.addf %59, %62 : vector<8x128xf32>
      %64 = vector.extract_strided_slice %55 {offsets = [1, 0], sizes = [8, 128], strides = [1, 1]} : vector<9x256xf32> to vector<8x128xf32>
      %cst_27 = arith.constant 1.406250e-01 : f32
      %65 = vector.broadcast %cst_27 : f32 to vector<8x128xf32>
      %66 = arith.mulf %65, %64 : vector<8x128xf32>
      %67 = arith.addf %63, %66 : vector<8x128xf32>
      %68 = vector.extract_strided_slice %55 {offsets = [1, 128], sizes = [8, 128], strides = [1, 1]} : vector<9x256xf32> to vector<8x128xf32>
      %cst_28 = arith.constant 4.687500e-02 : f32
      %69 = vector.broadcast %cst_28 : f32 to vector<8x128xf32>
      %70 = arith.mulf %69, %68 : vector<8x128xf32>
      %71 = arith.addf %67, %70 : vector<8x128xf32>
      %c2_i32_29 = arith.constant 2 : i32
      %72 = arith.muli %c2_i32_29, %4 : i32
      %c3_i32 = arith.constant 3 : i32
      %73 = arith.addi %72, %c3_i32 : i32
      %c0_30 = arith.constant 0 : index
      %74 = arith.index_cast %73 : i32 to index
      %c0_31 = arith.constant 0 : index
      %c0_32 = arith.constant 0 : index
      %75 = vector.load %arg2[%c0_30, %74, %c0_31, %c0_32] : memref<1x18x9x256xbf16, #tpu.memory_space<vmem>>, vector<1x1x9x256xbf16>
      %76 = vector.shape_cast %75 : vector<1x1x9x256xbf16> to vector<9x256xbf16>
      %77 = arith.extf %76 : vector<9x256xbf16> to vector<9x256xf32>
      %78 = vector.extract_strided_slice %77 {offsets = [0, 0], sizes = [8, 128], strides = [1, 1]} : vector<9x256xf32> to vector<8x128xf32>
      %cst_33 = arith.constant 1.562500e-02 : f32
      %79 = vector.broadcast %cst_33 : f32 to vector<8x128xf32>
      %80 = arith.mulf %79, %78 : vector<8x128xf32>
      %81 = arith.addf %71, %80 : vector<8x128xf32>
      %82 = vector.extract_strided_slice %77 {offsets = [0, 128], sizes = [8, 128], strides = [1, 1]} : vector<9x256xf32> to vector<8x128xf32>
      %cst_34 = arith.constant 4.687500e-02 : f32
      %83 = vector.broadcast %cst_34 : f32 to vector<8x128xf32>
      %84 = arith.mulf %83, %82 : vector<8x128xf32>
      %85 = arith.addf %81, %84 : vector<8x128xf32>
      %86 = vector.extract_strided_slice %77 {offsets = [1, 0], sizes = [8, 128], strides = [1, 1]} : vector<9x256xf32> to vector<8x128xf32>
      %cst_35 = arith.constant 4.687500e-02 : f32
      %87 = vector.broadcast %cst_35 : f32 to vector<8x128xf32>
      %88 = arith.mulf %87, %86 : vector<8x128xf32>
      %89 = arith.addf %85, %88 : vector<8x128xf32>
      %90 = vector.extract_strided_slice %77 {offsets = [1, 128], sizes = [8, 128], strides = [1, 1]} : vector<9x256xf32> to vector<8x128xf32>
      %cst_36 = arith.constant 1.562500e-02 : f32
      %91 = vector.broadcast %cst_36 : f32 to vector<8x128xf32>
      %92 = arith.mulf %91, %90 : vector<8x128xf32>
      %93 = arith.addf %89, %92 : vector<8x128xf32>
      %94 = arith.truncf %93 : vector<8x128xf32> to vector<8x128xbf16>
      %c0_37 = arith.constant 0 : index
      %95 = arith.index_cast %2 : i32 to index
      %c0_38 = arith.constant 0 : index
      %c0_39 = arith.constant 0 : index
      %96 = vector.load %arg3[%c0_37, %95, %c0_38, %c0_39] : memref<1x4x8x128xbf16, #tpu.memory_space<vmem>>, vector<1x1x8x128xbf16>
      %97 = vector.shape_cast %96 : vector<1x1x8x128xbf16> to vector<8x128xbf16>
      %98 = vector.shape_cast %94 : vector<8x128xbf16> to vector<1x1x8x128xbf16>
      tpu.vector_store %arg3[%c0_37, %95, %c0_38, %c0_39], %98 {strides = array<i32>} : memref<1x4x8x128xbf16, #tpu.memory_space<vmem>>, vector<1x1x8x128xbf16>,
    }
    %c4_i32_0 = arith.constant 4 : i32
    return
  }
  func.func @transform_0(%arg0: i32, %arg1: i32) -> (i32, i32, i32, i32) {
    %c0_i32 = arith.constant 0 : i32
    %c0_i32_0 = arith.constant 0 : i32
    %c0_i32_1 = arith.constant 0 : i32
    %c0_i32_2 = arith.constant 0 : i32
    return %arg0, %c0_i32, %c0_i32_0, %c0_i32_1 : i32, i32, i32, i32
  }
  func.func @transform_1(%arg0: i32, %arg1: i32) -> (i32, i32, i32, i32) {
    %c0_i32 = arith.constant 0 : i32
    %c0_i32_0 = arith.constant 0 : i32
    %c0_i32_1 = arith.constant 0 : i32
    return %arg0, %arg1, %c0_i32, %c0_i32_0 : i32, i32, i32, i32
  }
}

module attributes {stable_mosaic.version = 11 : i64} {
  func.func @_conv4x4_kernel(%arg0: i32, %arg1: i32, %arg2: memref<1x10x10x128xbf16, #tpu.memory_space<vmem>>, %arg3: memref<2048x128xbf16, #tpu.memory_space<vmem>>, %arg4: memref<1x128xf32, #tpu.memory_space<vmem>>, %arg5: memref<1x7x7x128xbf16, #tpu.memory_space<vmem>>) attributes {dimension_semantics = [#tpu.dimension_semantics<parallel>, #tpu.dimension_semantics<parallel>], iteration_bounds = array<i64: 2, 2>, scalar_prefetch = 0 : i64, scratch_operands = 0 : i64, tpu.core_type = #tpu.core_type<tc>, window_params = [{transform_indices = @transform_0, window_bounds = array<i64: 1, 10, 10, 128>}, {transform_indices = @transform_1, window_bounds = array<i64: 2048, 128>}, {transform_indices = @transform_2, window_bounds = array<i64: 1, 128>}, {transform_indices = @transform_3, window_bounds = array<i64: 1, 7, 7, 128>}]} {
    %c0 = arith.constant 0 : index
    %c0_0 = arith.constant 0 : index
    %0 = vector.load %arg4[%c0, %c0_0] : memref<1x128xf32, #tpu.memory_space<vmem>>, vector<1x128xf32>
    %c0_i32 = arith.constant 0 : i32
    %c7_i32 = arith.constant 7 : i32
    %1 = arith.addi %c0_i32, %c7_i32 : i32
    %c1_i32 = arith.constant 1 : i32
    scf.for %arg6 = %c0_i32 to %1 step %c1_i32  : i32 {
      %c1_i32_2 = arith.constant 1 : i32
      %2 = arith.muli %arg6, %c1_i32_2 : i32
      %c0_i32_3 = arith.constant 0 : i32
      %3 = arith.addi %c0_i32_3, %2 : i32
      %c0_i32_4 = arith.constant 0 : i32
      %4 = arith.addi %3, %c0_i32_4 : i32
      %c0_5 = arith.constant 0 : index
      %5 = arith.index_cast %4 : i32 to index
      %c0_6 = arith.constant 0 : index
      %c0_7 = arith.constant 0 : index
      %6 = vector.load %arg2[%c0_5, %5, %c0_6, %c0_7] : memref<1x10x10x128xbf16, #tpu.memory_space<vmem>>, vector<1x1x10x128xbf16>
      %7 = vector.shape_cast %6 : vector<1x1x10x128xbf16> to vector<10x128xbf16>
      %8 = vector.extract_strided_slice %7 {offsets = [0, 0], sizes = [7, 128], strides = [1, 1]} : vector<10x128xbf16> to vector<7x128xbf16>
      %9 = vector.extract_strided_slice %7 {offsets = [1, 0], sizes = [7, 128], strides = [1, 1]} : vector<10x128xbf16> to vector<7x128xbf16>
      %10 = vector.extract_strided_slice %7 {offsets = [2, 0], sizes = [7, 128], strides = [1, 1]} : vector<10x128xbf16> to vector<7x128xbf16>
      %11 = vector.extract_strided_slice %7 {offsets = [3, 0], sizes = [7, 128], strides = [1, 1]} : vector<10x128xbf16> to vector<7x128xbf16>
      %c1_i32_8 = arith.constant 1 : i32
      %12 = arith.addi %3, %c1_i32_8 : i32
      %c0_9 = arith.constant 0 : index
      %13 = arith.index_cast %12 : i32 to index
      %c0_10 = arith.constant 0 : index
      %c0_11 = arith.constant 0 : index
      %14 = vector.load %arg2[%c0_9, %13, %c0_10, %c0_11] : memref<1x10x10x128xbf16, #tpu.memory_space<vmem>>, vector<1x1x10x128xbf16>
      %15 = vector.shape_cast %14 : vector<1x1x10x128xbf16> to vector<10x128xbf16>
      %16 = vector.extract_strided_slice %15 {offsets = [0, 0], sizes = [7, 128], strides = [1, 1]} : vector<10x128xbf16> to vector<7x128xbf16>
      %17 = vector.extract_strided_slice %15 {offsets = [1, 0], sizes = [7, 128], strides = [1, 1]} : vector<10x128xbf16> to vector<7x128xbf16>
      %18 = vector.extract_strided_slice %15 {offsets = [2, 0], sizes = [7, 128], strides = [1, 1]} : vector<10x128xbf16> to vector<7x128xbf16>
      %19 = vector.extract_strided_slice %15 {offsets = [3, 0], sizes = [7, 128], strides = [1, 1]} : vector<10x128xbf16> to vector<7x128xbf16>
      %c2_i32 = arith.constant 2 : i32
      %20 = arith.addi %3, %c2_i32 : i32
      %c0_12 = arith.constant 0 : index
      %21 = arith.index_cast %20 : i32 to index
      %c0_13 = arith.constant 0 : index
      %c0_14 = arith.constant 0 : index
      %22 = vector.load %arg2[%c0_12, %21, %c0_13, %c0_14] : memref<1x10x10x128xbf16, #tpu.memory_space<vmem>>, vector<1x1x10x128xbf16>
      %23 = vector.shape_cast %22 : vector<1x1x10x128xbf16> to vector<10x128xbf16>
      %24 = vector.extract_strided_slice %23 {offsets = [0, 0], sizes = [7, 128], strides = [1, 1]} : vector<10x128xbf16> to vector<7x128xbf16>
      %25 = vector.extract_strided_slice %23 {offsets = [1, 0], sizes = [7, 128], strides = [1, 1]} : vector<10x128xbf16> to vector<7x128xbf16>
      %26 = vector.extract_strided_slice %23 {offsets = [2, 0], sizes = [7, 128], strides = [1, 1]} : vector<10x128xbf16> to vector<7x128xbf16>
      %27 = vector.extract_strided_slice %23 {offsets = [3, 0], sizes = [7, 128], strides = [1, 1]} : vector<10x128xbf16> to vector<7x128xbf16>
      %c3_i32 = arith.constant 3 : i32
      %28 = arith.addi %3, %c3_i32 : i32
      %c0_15 = arith.constant 0 : index
      %29 = arith.index_cast %28 : i32 to index
      %c0_16 = arith.constant 0 : index
      %c0_17 = arith.constant 0 : index
      %30 = vector.load %arg2[%c0_15, %29, %c0_16, %c0_17] : memref<1x10x10x128xbf16, #tpu.memory_space<vmem>>, vector<1x1x10x128xbf16>
      %31 = vector.shape_cast %30 : vector<1x1x10x128xbf16> to vector<10x128xbf16>
      %32 = vector.extract_strided_slice %31 {offsets = [0, 0], sizes = [7, 128], strides = [1, 1]} : vector<10x128xbf16> to vector<7x128xbf16>
      %33 = vector.extract_strided_slice %31 {offsets = [1, 0], sizes = [7, 128], strides = [1, 1]} : vector<10x128xbf16> to vector<7x128xbf16>
      %34 = vector.extract_strided_slice %31 {offsets = [2, 0], sizes = [7, 128], strides = [1, 1]} : vector<10x128xbf16> to vector<7x128xbf16>
      %35 = vector.extract_strided_slice %31 {offsets = [3, 0], sizes = [7, 128], strides = [1, 1]} : vector<10x128xbf16> to vector<7x128xbf16>
      %36 = tpu.concatenate %8, %9, %10, %11, %16, %17, %18, %19, %24, %25, %26, %27, %32, %33, %34, %35 in 1 : vector<7x128xbf16>, vector<7x128xbf16>, vector<7x128xbf16>, vector<7x128xbf16>, vector<7x128xbf16>, vector<7x128xbf16>, vector<7x128xbf16>, vector<7x128xbf16>, vector<7x128xbf16>, vector<7x128xbf16>, vector<7x128xbf16>, vector<7x128xbf16>, vector<7x128xbf16>, vector<7x128xbf16>, vector<7x128xbf16>, vector<7x128xbf16> -> vector<7x2048xbf16>
      %c0_18 = arith.constant 0 : index
      %c0_19 = arith.constant 0 : index
      %37 = vector.load %arg3[%c0_18, %c0_19] : memref<2048x128xbf16, #tpu.memory_space<vmem>>, vector<2048x128xbf16>
      %cst = arith.constant dense<0.000000e+00> : vector<7x128xf32>
      %38 = tpu.matmul %36, %37, %cst {dimension_numbers = #tpu.dot_dimension_numbers<[1], [0], [0], [1], [0, 0, 1, 1], [], []>} : vector<7x2048xbf16>, vector<2048x128xbf16>, vector<7x128xf32> -> vector<7x128xf32>
      %39 = vector.broadcast %0 : vector<1x128xf32> to vector<7x128xf32>
      %40 = arith.addf %38, %39 : vector<7x128xf32>
      %cst_20 = arith.constant 2.000000e-01 : f32
      %41 = vector.broadcast %cst_20 : f32 to vector<7x128xf32>
      %42 = arith.mulf %41, %40 : vector<7x128xf32>
      %43 = arith.maximumf %40, %42 : vector<7x128xf32>
      %44 = arith.truncf %43 : vector<7x128xf32> to vector<7x128xbf16>
      %c0_21 = arith.constant 0 : index
      %45 = arith.index_cast %3 : i32 to index
      %c0_22 = arith.constant 0 : index
      %c0_23 = arith.constant 0 : index
      %46 = vector.load %arg5[%c0_21, %45, %c0_22, %c0_23] : memref<1x7x7x128xbf16, #tpu.memory_space<vmem>>, vector<1x1x7x128xbf16>
      %47 = vector.shape_cast %46 : vector<1x1x7x128xbf16> to vector<7x128xbf16>
      %48 = vector.shape_cast %44 : vector<7x128xbf16> to vector<1x1x7x128xbf16>
      tpu.vector_store %arg5[%c0_21, %45, %c0_22, %c0_23], %48 {strides = array<i32>} : memref<1x7x7x128xbf16, #tpu.memory_space<vmem>>, vector<1x1x7x128xbf16>,
    }
    %c7_i32_1 = arith.constant 7 : i32
    return
  }
  func.func @transform_0(%arg0: i32, %arg1: i32) -> (i32, i32, i32, i32) {
    %c0_i32 = arith.constant 0 : i32
    %c0_i32_0 = arith.constant 0 : i32
    %c0_i32_1 = arith.constant 0 : i32
    %c0_i32_2 = arith.constant 0 : i32
    return %arg0, %c0_i32, %c0_i32_0, %c0_i32_1 : i32, i32, i32, i32
  }
  func.func @transform_1(%arg0: i32, %arg1: i32) -> (i32, i32) {
    %c0_i32 = arith.constant 0 : i32
    %c0_i32_0 = arith.constant 0 : i32
    return %c0_i32, %arg1 : i32, i32
  }
  func.func @transform_2(%arg0: i32, %arg1: i32) -> (i32, i32) {
    %c0_i32 = arith.constant 0 : i32
    %c0_i32_0 = arith.constant 0 : i32
    return %c0_i32, %arg1 : i32, i32
  }
  func.func @transform_3(%arg0: i32, %arg1: i32) -> (i32, i32, i32, i32) {
    %c0_i32 = arith.constant 0 : i32
    %c0_i32_0 = arith.constant 0 : i32
    %c0_i32_1 = arith.constant 0 : i32
    return %arg0, %c0_i32, %c0_i32_0, %arg1 : i32, i32, i32, i32
  }
}

module attributes {stable_mosaic.version = 11 : i64} {
  func.func @_blurpool_kernel(%arg0: i32, %arg1: i32, %arg2: memref<1x10x5x512xbf16, #tpu.memory_space<vmem>>, %arg3: memref<1x2x4x256xbf16, #tpu.memory_space<vmem>>) attributes {dimension_semantics = [#tpu.dimension_semantics<parallel>, #tpu.dimension_semantics<parallel>], iteration_bounds = array<i64: 2, 2>, scalar_prefetch = 0 : i64, scratch_operands = 0 : i64, tpu.core_type = #tpu.core_type<tc>, window_params = [{transform_indices = @transform_0, window_bounds = array<i64: 1, 10, 5, 512>}, {transform_indices = @transform_1, window_bounds = array<i64: 1, 2, 4, 256>}]} {
    %c0_i32 = arith.constant 0 : i32
    %c2_i32 = arith.constant 2 : i32
    %0 = arith.addi %c0_i32, %c2_i32 : i32
    %c1_i32 = arith.constant 1 : i32
    scf.for %arg4 = %c0_i32 to %0 step %c1_i32  : i32 {
      %c1_i32_1 = arith.constant 1 : i32
      %1 = arith.muli %arg4, %c1_i32_1 : i32
      %c0_i32_2 = arith.constant 0 : i32
      %2 = arith.addi %c0_i32_2, %1 : i32
      %c2_i32_3 = arith.constant 2 : i32
      %3 = arith.muli %arg1, %c2_i32_3 : i32
      %4 = arith.addi %3, %2 : i32
      %cst = arith.constant 0.000000e+00 : f32
      %5 = vector.broadcast %cst : f32 to vector<4x256xf32>
      %c2_i32_4 = arith.constant 2 : i32
      %6 = arith.muli %c2_i32_4, %4 : i32
      %c0_i32_5 = arith.constant 0 : i32
      %7 = arith.addi %6, %c0_i32_5 : i32
      %c0 = arith.constant 0 : index
      %8 = arith.index_cast %7 : i32 to index
      %c0_6 = arith.constant 0 : index
      %c0_7 = arith.constant 0 : index
      %9 = vector.load %arg2[%c0, %8, %c0_6, %c0_7] : memref<1x10x5x512xbf16, #tpu.memory_space<vmem>>, vector<1x1x5x512xbf16>
      %10 = vector.shape_cast %9 : vector<1x1x5x512xbf16> to vector<5x512xbf16>
      %11 = arith.extf %10 : vector<5x512xbf16> to vector<5x512xf32>
      %12 = vector.extract_strided_slice %11 {offsets = [0, 0], sizes = [4, 256], strides = [1, 1]} : vector<5x512xf32> to vector<4x256xf32>
      %cst_8 = arith.constant 1.562500e-02 : f32
      %13 = vector.broadcast %cst_8 : f32 to vector<4x256xf32>
      %14 = arith.mulf %13, %12 : vector<4x256xf32>
      %15 = arith.addf %5, %14 : vector<4x256xf32>
      %16 = vector.extract_strided_slice %11 {offsets = [0, 256], sizes = [4, 256], strides = [1, 1]} : vector<5x512xf32> to vector<4x256xf32>
      %cst_9 = arith.constant 4.687500e-02 : f32
      %17 = vector.broadcast %cst_9 : f32 to vector<4x256xf32>
      %18 = arith.mulf %17, %16 : vector<4x256xf32>
      %19 = arith.addf %15, %18 : vector<4x256xf32>
      %20 = vector.extract_strided_slice %11 {offsets = [1, 0], sizes = [4, 256], strides = [1, 1]} : vector<5x512xf32> to vector<4x256xf32>
      %cst_10 = arith.constant 4.687500e-02 : f32
      %21 = vector.broadcast %cst_10 : f32 to vector<4x256xf32>
      %22 = arith.mulf %21, %20 : vector<4x256xf32>
      %23 = arith.addf %19, %22 : vector<4x256xf32>
      %24 = vector.extract_strided_slice %11 {offsets = [1, 256], sizes = [4, 256], strides = [1, 1]} : vector<5x512xf32> to vector<4x256xf32>
      %cst_11 = arith.constant 1.562500e-02 : f32
      %25 = vector.broadcast %cst_11 : f32 to vector<4x256xf32>
      %26 = arith.mulf %25, %24 : vector<4x256xf32>
      %27 = arith.addf %23, %26 : vector<4x256xf32>
      %c2_i32_12 = arith.constant 2 : i32
      %28 = arith.muli %c2_i32_12, %4 : i32
      %c1_i32_13 = arith.constant 1 : i32
      %29 = arith.addi %28, %c1_i32_13 : i32
      %c0_14 = arith.constant 0 : index
      %30 = arith.index_cast %29 : i32 to index
      %c0_15 = arith.constant 0 : index
      %c0_16 = arith.constant 0 : index
      %31 = vector.load %arg2[%c0_14, %30, %c0_15, %c0_16] : memref<1x10x5x512xbf16, #tpu.memory_space<vmem>>, vector<1x1x5x512xbf16>
      %32 = vector.shape_cast %31 : vector<1x1x5x512xbf16> to vector<5x512xbf16>
      %33 = arith.extf %32 : vector<5x512xbf16> to vector<5x512xf32>
      %34 = vector.extract_strided_slice %33 {offsets = [0, 0], sizes = [4, 256], strides = [1, 1]} : vector<5x512xf32> to vector<4x256xf32>
      %cst_17 = arith.constant 4.687500e-02 : f32
      %35 = vector.broadcast %cst_17 : f32 to vector<4x256xf32>
      %36 = arith.mulf %35, %34 : vector<4x256xf32>
      %37 = arith.addf %27, %36 : vector<4x256xf32>
      %38 = vector.extract_strided_slice %33 {offsets = [0, 256], sizes = [4, 256], strides = [1, 1]} : vector<5x512xf32> to vector<4x256xf32>
      %cst_18 = arith.constant 1.406250e-01 : f32
      %39 = vector.broadcast %cst_18 : f32 to vector<4x256xf32>
      %40 = arith.mulf %39, %38 : vector<4x256xf32>
      %41 = arith.addf %37, %40 : vector<4x256xf32>
      %42 = vector.extract_strided_slice %33 {offsets = [1, 0], sizes = [4, 256], strides = [1, 1]} : vector<5x512xf32> to vector<4x256xf32>
      %cst_19 = arith.constant 1.406250e-01 : f32
      %43 = vector.broadcast %cst_19 : f32 to vector<4x256xf32>
      %44 = arith.mulf %43, %42 : vector<4x256xf32>
      %45 = arith.addf %41, %44 : vector<4x256xf32>
      %46 = vector.extract_strided_slice %33 {offsets = [1, 256], sizes = [4, 256], strides = [1, 1]} : vector<5x512xf32> to vector<4x256xf32>
      %cst_20 = arith.constant 4.687500e-02 : f32
      %47 = vector.broadcast %cst_20 : f32 to vector<4x256xf32>
      %48 = arith.mulf %47, %46 : vector<4x256xf32>
      %49 = arith.addf %45, %48 : vector<4x256xf32>
      %c2_i32_21 = arith.constant 2 : i32
      %50 = arith.muli %c2_i32_21, %4 : i32
      %c2_i32_22 = arith.constant 2 : i32
      %51 = arith.addi %50, %c2_i32_22 : i32
      %c0_23 = arith.constant 0 : index
      %52 = arith.index_cast %51 : i32 to index
      %c0_24 = arith.constant 0 : index
      %c0_25 = arith.constant 0 : index
      %53 = vector.load %arg2[%c0_23, %52, %c0_24, %c0_25] : memref<1x10x5x512xbf16, #tpu.memory_space<vmem>>, vector<1x1x5x512xbf16>
      %54 = vector.shape_cast %53 : vector<1x1x5x512xbf16> to vector<5x512xbf16>
      %55 = arith.extf %54 : vector<5x512xbf16> to vector<5x512xf32>
      %56 = vector.extract_strided_slice %55 {offsets = [0, 0], sizes = [4, 256], strides = [1, 1]} : vector<5x512xf32> to vector<4x256xf32>
      %cst_26 = arith.constant 4.687500e-02 : f32
      %57 = vector.broadcast %cst_26 : f32 to vector<4x256xf32>
      %58 = arith.mulf %57, %56 : vector<4x256xf32>
      %59 = arith.addf %49, %58 : vector<4x256xf32>
      %60 = vector.extract_strided_slice %55 {offsets = [0, 256], sizes = [4, 256], strides = [1, 1]} : vector<5x512xf32> to vector<4x256xf32>
      %cst_27 = arith.constant 1.406250e-01 : f32
      %61 = vector.broadcast %cst_27 : f32 to vector<4x256xf32>
      %62 = arith.mulf %61, %60 : vector<4x256xf32>
      %63 = arith.addf %59, %62 : vector<4x256xf32>
      %64 = vector.extract_strided_slice %55 {offsets = [1, 0], sizes = [4, 256], strides = [1, 1]} : vector<5x512xf32> to vector<4x256xf32>
      %cst_28 = arith.constant 1.406250e-01 : f32
      %65 = vector.broadcast %cst_28 : f32 to vector<4x256xf32>
      %66 = arith.mulf %65, %64 : vector<4x256xf32>
      %67 = arith.addf %63, %66 : vector<4x256xf32>
      %68 = vector.extract_strided_slice %55 {offsets = [1, 256], sizes = [4, 256], strides = [1, 1]} : vector<5x512xf32> to vector<4x256xf32>
      %cst_29 = arith.constant 4.687500e-02 : f32
      %69 = vector.broadcast %cst_29 : f32 to vector<4x256xf32>
      %70 = arith.mulf %69, %68 : vector<4x256xf32>
      %71 = arith.addf %67, %70 : vector<4x256xf32>
      %c2_i32_30 = arith.constant 2 : i32
      %72 = arith.muli %c2_i32_30, %4 : i32
      %c3_i32 = arith.constant 3 : i32
      %73 = arith.addi %72, %c3_i32 : i32
      %c0_31 = arith.constant 0 : index
      %74 = arith.index_cast %73 : i32 to index
      %c0_32 = arith.constant 0 : index
      %c0_33 = arith.constant 0 : index
      %75 = vector.load %arg2[%c0_31, %74, %c0_32, %c0_33] : memref<1x10x5x512xbf16, #tpu.memory_space<vmem>>, vector<1x1x5x512xbf16>
      %76 = vector.shape_cast %75 : vector<1x1x5x512xbf16> to vector<5x512xbf16>
      %77 = arith.extf %76 : vector<5x512xbf16> to vector<5x512xf32>
      %78 = vector.extract_strided_slice %77 {offsets = [0, 0], sizes = [4, 256], strides = [1, 1]} : vector<5x512xf32> to vector<4x256xf32>
      %cst_34 = arith.constant 1.562500e-02 : f32
      %79 = vector.broadcast %cst_34 : f32 to vector<4x256xf32>
      %80 = arith.mulf %79, %78 : vector<4x256xf32>
      %81 = arith.addf %71, %80 : vector<4x256xf32>
      %82 = vector.extract_strided_slice %77 {offsets = [0, 256], sizes = [4, 256], strides = [1, 1]} : vector<5x512xf32> to vector<4x256xf32>
      %cst_35 = arith.constant 4.687500e-02 : f32
      %83 = vector.broadcast %cst_35 : f32 to vector<4x256xf32>
      %84 = arith.mulf %83, %82 : vector<4x256xf32>
      %85 = arith.addf %81, %84 : vector<4x256xf32>
      %86 = vector.extract_strided_slice %77 {offsets = [1, 0], sizes = [4, 256], strides = [1, 1]} : vector<5x512xf32> to vector<4x256xf32>
      %cst_36 = arith.constant 4.687500e-02 : f32
      %87 = vector.broadcast %cst_36 : f32 to vector<4x256xf32>
      %88 = arith.mulf %87, %86 : vector<4x256xf32>
      %89 = arith.addf %85, %88 : vector<4x256xf32>
      %90 = vector.extract_strided_slice %77 {offsets = [1, 256], sizes = [4, 256], strides = [1, 1]} : vector<5x512xf32> to vector<4x256xf32>
      %cst_37 = arith.constant 1.562500e-02 : f32
      %91 = vector.broadcast %cst_37 : f32 to vector<4x256xf32>
      %92 = arith.mulf %91, %90 : vector<4x256xf32>
      %93 = arith.addf %89, %92 : vector<4x256xf32>
      %94 = arith.truncf %93 : vector<4x256xf32> to vector<4x256xbf16>
      %c0_38 = arith.constant 0 : index
      %95 = arith.index_cast %2 : i32 to index
      %c0_39 = arith.constant 0 : index
      %c0_40 = arith.constant 0 : index
      %96 = vector.load %arg3[%c0_38, %95, %c0_39, %c0_40] : memref<1x2x4x256xbf16, #tpu.memory_space<vmem>>, vector<1x1x4x256xbf16>
      %97 = vector.shape_cast %96 : vector<1x1x4x256xbf16> to vector<4x256xbf16>
      %98 = vector.shape_cast %94 : vector<4x256xbf16> to vector<1x1x4x256xbf16>
      tpu.vector_store %arg3[%c0_38, %95, %c0_39, %c0_40], %98 {strides = array<i32>} : memref<1x2x4x256xbf16, #tpu.memory_space<vmem>>, vector<1x1x4x256xbf16>,
    }
    %c2_i32_0 = arith.constant 2 : i32
    return
  }
  func.func @transform_0(%arg0: i32, %arg1: i32) -> (i32, i32, i32, i32) {
    %c0_i32 = arith.constant 0 : i32
    %c0_i32_0 = arith.constant 0 : i32
    %c0_i32_1 = arith.constant 0 : i32
    %c0_i32_2 = arith.constant 0 : i32
    return %arg0, %c0_i32, %c0_i32_0, %c0_i32_1 : i32, i32, i32, i32
  }
  func.func @transform_1(%arg0: i32, %arg1: i32) -> (i32, i32, i32, i32) {
    %c0_i32 = arith.constant 0 : i32
    %c0_i32_0 = arith.constant 0 : i32
    %c0_i32_1 = arith.constant 0 : i32
    return %arg0, %arg1, %c0_i32, %c0_i32_0 : i32, i32, i32, i32
  }
}

module attributes {stable_mosaic.version = 11 : i64} {
  func.func @_conv4x4_kernel(%arg0: i32, %arg1: i32, %arg2: memref<1x6x6x256xbf16, #tpu.memory_space<vmem>>, %arg3: memref<4096x128xbf16, #tpu.memory_space<vmem>>, %arg4: memref<1x128xf32, #tpu.memory_space<vmem>>, %arg5: memref<1x3x3x128xbf16, #tpu.memory_space<vmem>>) attributes {dimension_semantics = [#tpu.dimension_semantics<parallel>, #tpu.dimension_semantics<parallel>], iteration_bounds = array<i64: 2, 4>, scalar_prefetch = 0 : i64, scratch_operands = 0 : i64, tpu.core_type = #tpu.core_type<tc>, window_params = [{transform_indices = @transform_0, window_bounds = array<i64: 1, 6, 6, 256>}, {transform_indices = @transform_1, window_bounds = array<i64: 4096, 128>}, {transform_indices = @transform_2, window_bounds = array<i64: 1, 128>}, {transform_indices = @transform_3, window_bounds = array<i64: 1, 3, 3, 128>}]} {
    %c0 = arith.constant 0 : index
    %c0_0 = arith.constant 0 : index
    %0 = vector.load %arg4[%c0, %c0_0] : memref<1x128xf32, #tpu.memory_space<vmem>>, vector<1x128xf32>
    %c0_i32 = arith.constant 0 : i32
    %c3_i32 = arith.constant 3 : i32
    %1 = arith.addi %c0_i32, %c3_i32 : i32
    %c1_i32 = arith.constant 1 : i32
    scf.for %arg6 = %c0_i32 to %1 step %c1_i32  : i32 {
      %c1_i32_2 = arith.constant 1 : i32
      %2 = arith.muli %arg6, %c1_i32_2 : i32
      %c0_i32_3 = arith.constant 0 : i32
      %3 = arith.addi %c0_i32_3, %2 : i32
      %c0_i32_4 = arith.constant 0 : i32
      %4 = arith.addi %3, %c0_i32_4 : i32
      %c0_5 = arith.constant 0 : index
      %5 = arith.index_cast %4 : i32 to index
      %c0_6 = arith.constant 0 : index
      %c0_7 = arith.constant 0 : index
      %6 = vector.load %arg2[%c0_5, %5, %c0_6, %c0_7] : memref<1x6x6x256xbf16, #tpu.memory_space<vmem>>, vector<1x1x6x256xbf16>
      %7 = vector.shape_cast %6 : vector<1x1x6x256xbf16> to vector<6x256xbf16>
      %8 = vector.extract_strided_slice %7 {offsets = [0, 0], sizes = [3, 256], strides = [1, 1]} : vector<6x256xbf16> to vector<3x256xbf16>
      %9 = vector.extract_strided_slice %7 {offsets = [1, 0], sizes = [3, 256], strides = [1, 1]} : vector<6x256xbf16> to vector<3x256xbf16>
      %10 = vector.extract_strided_slice %7 {offsets = [2, 0], sizes = [3, 256], strides = [1, 1]} : vector<6x256xbf16> to vector<3x256xbf16>
      %11 = vector.extract_strided_slice %7 {offsets = [3, 0], sizes = [3, 256], strides = [1, 1]} : vector<6x256xbf16> to vector<3x256xbf16>
      %c1_i32_8 = arith.constant 1 : i32
      %12 = arith.addi %3, %c1_i32_8 : i32
      %c0_9 = arith.constant 0 : index
      %13 = arith.index_cast %12 : i32 to index
      %c0_10 = arith.constant 0 : index
      %c0_11 = arith.constant 0 : index
      %14 = vector.load %arg2[%c0_9, %13, %c0_10, %c0_11] : memref<1x6x6x256xbf16, #tpu.memory_space<vmem>>, vector<1x1x6x256xbf16>
      %15 = vector.shape_cast %14 : vector<1x1x6x256xbf16> to vector<6x256xbf16>
      %16 = vector.extract_strided_slice %15 {offsets = [0, 0], sizes = [3, 256], strides = [1, 1]} : vector<6x256xbf16> to vector<3x256xbf16>
      %17 = vector.extract_strided_slice %15 {offsets = [1, 0], sizes = [3, 256], strides = [1, 1]} : vector<6x256xbf16> to vector<3x256xbf16>
      %18 = vector.extract_strided_slice %15 {offsets = [2, 0], sizes = [3, 256], strides = [1, 1]} : vector<6x256xbf16> to vector<3x256xbf16>
      %19 = vector.extract_strided_slice %15 {offsets = [3, 0], sizes = [3, 256], strides = [1, 1]} : vector<6x256xbf16> to vector<3x256xbf16>
      %c2_i32 = arith.constant 2 : i32
      %20 = arith.addi %3, %c2_i32 : i32
      %c0_12 = arith.constant 0 : index
      %21 = arith.index_cast %20 : i32 to index
      %c0_13 = arith.constant 0 : index
      %c0_14 = arith.constant 0 : index
      %22 = vector.load %arg2[%c0_12, %21, %c0_13, %c0_14] : memref<1x6x6x256xbf16, #tpu.memory_space<vmem>>, vector<1x1x6x256xbf16>
      %23 = vector.shape_cast %22 : vector<1x1x6x256xbf16> to vector<6x256xbf16>
      %24 = vector.extract_strided_slice %23 {offsets = [0, 0], sizes = [3, 256], strides = [1, 1]} : vector<6x256xbf16> to vector<3x256xbf16>
      %25 = vector.extract_strided_slice %23 {offsets = [1, 0], sizes = [3, 256], strides = [1, 1]} : vector<6x256xbf16> to vector<3x256xbf16>
      %26 = vector.extract_strided_slice %23 {offsets = [2, 0], sizes = [3, 256], strides = [1, 1]} : vector<6x256xbf16> to vector<3x256xbf16>
      %27 = vector.extract_strided_slice %23 {offsets = [3, 0], sizes = [3, 256], strides = [1, 1]} : vector<6x256xbf16> to vector<3x256xbf16>
      %c3_i32_15 = arith.constant 3 : i32
      %28 = arith.addi %3, %c3_i32_15 : i32
      %c0_16 = arith.constant 0 : index
      %29 = arith.index_cast %28 : i32 to index
      %c0_17 = arith.constant 0 : index
      %c0_18 = arith.constant 0 : index
      %30 = vector.load %arg2[%c0_16, %29, %c0_17, %c0_18] : memref<1x6x6x256xbf16, #tpu.memory_space<vmem>>, vector<1x1x6x256xbf16>
      %31 = vector.shape_cast %30 : vector<1x1x6x256xbf16> to vector<6x256xbf16>
      %32 = vector.extract_strided_slice %31 {offsets = [0, 0], sizes = [3, 256], strides = [1, 1]} : vector<6x256xbf16> to vector<3x256xbf16>
      %33 = vector.extract_strided_slice %31 {offsets = [1, 0], sizes = [3, 256], strides = [1, 1]} : vector<6x256xbf16> to vector<3x256xbf16>
      %34 = vector.extract_strided_slice %31 {offsets = [2, 0], sizes = [3, 256], strides = [1, 1]} : vector<6x256xbf16> to vector<3x256xbf16>
      %35 = vector.extract_strided_slice %31 {offsets = [3, 0], sizes = [3, 256], strides = [1, 1]} : vector<6x256xbf16> to vector<3x256xbf16>
      %36 = tpu.concatenate %8, %9, %10, %11, %16, %17, %18, %19, %24, %25, %26, %27, %32, %33, %34, %35 in 1 : vector<3x256xbf16>, vector<3x256xbf16>, vector<3x256xbf16>, vector<3x256xbf16>, vector<3x256xbf16>, vector<3x256xbf16>, vector<3x256xbf16>, vector<3x256xbf16>, vector<3x256xbf16>, vector<3x256xbf16>, vector<3x256xbf16>, vector<3x256xbf16>, vector<3x256xbf16>, vector<3x256xbf16>, vector<3x256xbf16>, vector<3x256xbf16> -> vector<3x4096xbf16>
      %c0_19 = arith.constant 0 : index
      %c0_20 = arith.constant 0 : index
      %37 = vector.load %arg3[%c0_19, %c0_20] : memref<4096x128xbf16, #tpu.memory_space<vmem>>, vector<4096x128xbf16>
      %cst = arith.constant dense<0.000000e+00> : vector<3x128xf32>
      %38 = tpu.matmul %36, %37, %cst {dimension_numbers = #tpu.dot_dimension_numbers<[1], [0], [0], [1], [0, 0, 1, 1], [], []>} : vector<3x4096xbf16>, vector<4096x128xbf16>, vector<3x128xf32> -> vector<3x128xf32>
      %39 = vector.broadcast %0 : vector<1x128xf32> to vector<3x128xf32>
      %40 = arith.addf %38, %39 : vector<3x128xf32>
      %cst_21 = arith.constant 2.000000e-01 : f32
      %41 = vector.broadcast %cst_21 : f32 to vector<3x128xf32>
      %42 = arith.mulf %41, %40 : vector<3x128xf32>
      %43 = arith.maximumf %40, %42 : vector<3x128xf32>
      %44 = arith.truncf %43 : vector<3x128xf32> to vector<3x128xbf16>
      %c0_22 = arith.constant 0 : index
      %45 = arith.index_cast %3 : i32 to index
      %c0_23 = arith.constant 0 : index
      %c0_24 = arith.constant 0 : index
      %46 = vector.load %arg5[%c0_22, %45, %c0_23, %c0_24] : memref<1x3x3x128xbf16, #tpu.memory_space<vmem>>, vector<1x1x3x128xbf16>
      %47 = vector.shape_cast %46 : vector<1x1x3x128xbf16> to vector<3x128xbf16>
      %48 = vector.shape_cast %44 : vector<3x128xbf16> to vector<1x1x3x128xbf16>
      tpu.vector_store %arg5[%c0_22, %45, %c0_23, %c0_24], %48 {strides = array<i32>} : memref<1x3x3x128xbf16, #tpu.memory_space<vmem>>, vector<1x1x3x128xbf16>,
    }
    %c3_i32_1 = arith.constant 3 : i32
    return
  }
  func.func @transform_0(%arg0: i32, %arg1: i32) -> (i32, i32, i32, i32) {
    %c0_i32 = arith.constant 0 : i32
    %c0_i32_0 = arith.constant 0 : i32
    %c0_i32_1 = arith.constant 0 : i32
    %c0_i32_2 = arith.constant 0 : i32
    return %arg0, %c0_i32, %c0_i32_0, %c0_i32_1 : i32, i32, i32, i32
  }
  func.func @transform_1(%arg0: i32, %arg1: i32) -> (i32, i32) {
    %c0_i32 = arith.constant 0 : i32
    %c0_i32_0 = arith.constant 0 : i32
    return %c0_i32, %arg1 : i32, i32
  }
  func.func @transform_2(%arg0: i32, %arg1: i32) -> (i32, i32) {
    %c0_i32 = arith.constant 0 : i32
    %c0_i32_0 = arith.constant 0 : i32
    return %c0_i32, %arg1 : i32, i32
  }
  func.func @transform_3(%arg0: i32, %arg1: i32) -> (i32, i32, i32, i32) {
    %c0_i32 = arith.constant 0 : i32
    %c0_i32_0 = arith.constant 0 : i32
    %c0_i32_1 = arith.constant 0 : i32
    return %arg0, %c0_i32, %c0_i32_0, %arg1 : i32, i32, i32, i32
  }
}

module attributes {stable_mosaic.version = 11 : i64} {
  func.func @_blurpool_kernel(%arg0: i32, %arg1: i32, %arg2: memref<1x6x3x1024xbf16, #tpu.memory_space<vmem>>, %arg3: memref<1x1x2x512xbf16, #tpu.memory_space<vmem>>) attributes {dimension_semantics = [#tpu.dimension_semantics<parallel>, #tpu.dimension_semantics<parallel>], iteration_bounds = array<i64: 2, 2>, scalar_prefetch = 0 : i64, scratch_operands = 0 : i64, tpu.core_type = #tpu.core_type<tc>, window_params = [{transform_indices = @transform_0, window_bounds = array<i64: 1, 6, 3, 1024>}, {transform_indices = @transform_1, window_bounds = array<i64: 1, 1, 2, 512>}]} {
    %c0_i32 = arith.constant 0 : i32
    %c1_i32 = arith.constant 1 : i32
    %0 = arith.muli %c0_i32, %c1_i32 : i32
    %c0_i32_0 = arith.constant 0 : i32
    %1 = arith.addi %c0_i32_0, %0 : i32
    %c1_i32_1 = arith.constant 1 : i32
    %2 = arith.muli %arg1, %c1_i32_1 : i32
    %3 = arith.addi %2, %1 : i32
    %cst = arith.constant 0.000000e+00 : f32
    %4 = vector.broadcast %cst : f32 to vector<2x512xf32>
    %c2_i32 = arith.constant 2 : i32
    %5 = arith.muli %c2_i32, %3 : i32
    %c0_i32_2 = arith.constant 0 : i32
    %6 = arith.addi %5, %c0_i32_2 : i32
    %c0 = arith.constant 0 : index
    %7 = arith.index_cast %6 : i32 to index
    %c0_3 = arith.constant 0 : index
    %c0_4 = arith.constant 0 : index
    %8 = vector.load %arg2[%c0, %7, %c0_3, %c0_4] : memref<1x6x3x1024xbf16, #tpu.memory_space<vmem>>, vector<1x1x3x1024xbf16>
    %9 = vector.shape_cast %8 : vector<1x1x3x1024xbf16> to vector<3x1024xbf16>
    %10 = arith.extf %9 : vector<3x1024xbf16> to vector<3x1024xf32>
    %11 = vector.extract_strided_slice %10 {offsets = [0, 0], sizes = [2, 512], strides = [1, 1]} : vector<3x1024xf32> to vector<2x512xf32>
    %cst_5 = arith.constant 1.562500e-02 : f32
    %12 = vector.broadcast %cst_5 : f32 to vector<2x512xf32>
    %13 = arith.mulf %12, %11 : vector<2x512xf32>
    %14 = arith.addf %4, %13 : vector<2x512xf32>
    %15 = vector.extract_strided_slice %10 {offsets = [0, 512], sizes = [2, 512], strides = [1, 1]} : vector<3x1024xf32> to vector<2x512xf32>
    %cst_6 = arith.constant 4.687500e-02 : f32
    %16 = vector.broadcast %cst_6 : f32 to vector<2x512xf32>
    %17 = arith.mulf %16, %15 : vector<2x512xf32>
    %18 = arith.addf %14, %17 : vector<2x512xf32>
    %19 = vector.extract_strided_slice %10 {offsets = [1, 0], sizes = [2, 512], strides = [1, 1]} : vector<3x1024xf32> to vector<2x512xf32>
    %cst_7 = arith.constant 4.687500e-02 : f32
    %20 = vector.broadcast %cst_7 : f32 to vector<2x512xf32>
    %21 = arith.mulf %20, %19 : vector<2x512xf32>
    %22 = arith.addf %18, %21 : vector<2x512xf32>
    %23 = vector.extract_strided_slice %10 {offsets = [1, 512], sizes = [2, 512], strides = [1, 1]} : vector<3x1024xf32> to vector<2x512xf32>
    %cst_8 = arith.constant 1.562500e-02 : f32
    %24 = vector.broadcast %cst_8 : f32 to vector<2x512xf32>
    %25 = arith.mulf %24, %23 : vector<2x512xf32>
    %26 = arith.addf %22, %25 : vector<2x512xf32>
    %c2_i32_9 = arith.constant 2 : i32
    %27 = arith.muli %c2_i32_9, %3 : i32
    %c1_i32_10 = arith.constant 1 : i32
    %28 = arith.addi %27, %c1_i32_10 : i32
    %c0_11 = arith.constant 0 : index
    %29 = arith.index_cast %28 : i32 to index
    %c0_12 = arith.constant 0 : index
    %c0_13 = arith.constant 0 : index
    %30 = vector.load %arg2[%c0_11, %29, %c0_12, %c0_13] : memref<1x6x3x1024xbf16, #tpu.memory_space<vmem>>, vector<1x1x3x1024xbf16>
    %31 = vector.shape_cast %30 : vector<1x1x3x1024xbf16> to vector<3x1024xbf16>
    %32 = arith.extf %31 : vector<3x1024xbf16> to vector<3x1024xf32>
    %33 = vector.extract_strided_slice %32 {offsets = [0, 0], sizes = [2, 512], strides = [1, 1]} : vector<3x1024xf32> to vector<2x512xf32>
    %cst_14 = arith.constant 4.687500e-02 : f32
    %34 = vector.broadcast %cst_14 : f32 to vector<2x512xf32>
    %35 = arith.mulf %34, %33 : vector<2x512xf32>
    %36 = arith.addf %26, %35 : vector<2x512xf32>
    %37 = vector.extract_strided_slice %32 {offsets = [0, 512], sizes = [2, 512], strides = [1, 1]} : vector<3x1024xf32> to vector<2x512xf32>
    %cst_15 = arith.constant 1.406250e-01 : f32
    %38 = vector.broadcast %cst_15 : f32 to vector<2x512xf32>
    %39 = arith.mulf %38, %37 : vector<2x512xf32>
    %40 = arith.addf %36, %39 : vector<2x512xf32>
    %41 = vector.extract_strided_slice %32 {offsets = [1, 0], sizes = [2, 512], strides = [1, 1]} : vector<3x1024xf32> to vector<2x512xf32>
    %cst_16 = arith.constant 1.406250e-01 : f32
    %42 = vector.broadcast %cst_16 : f32 to vector<2x512xf32>
    %43 = arith.mulf %42, %41 : vector<2x512xf32>
    %44 = arith.addf %40, %43 : vector<2x512xf32>
    %45 = vector.extract_strided_slice %32 {offsets = [1, 512], sizes = [2, 512], strides = [1, 1]} : vector<3x1024xf32> to vector<2x512xf32>
    %cst_17 = arith.constant 4.687500e-02 : f32
    %46 = vector.broadcast %cst_17 : f32 to vector<2x512xf32>
    %47 = arith.mulf %46, %45 : vector<2x512xf32>
    %48 = arith.addf %44, %47 : vector<2x512xf32>
    %c2_i32_18 = arith.constant 2 : i32
    %49 = arith.muli %c2_i32_18, %3 : i32
    %c2_i32_19 = arith.constant 2 : i32
    %50 = arith.addi %49, %c2_i32_19 : i32
    %c0_20 = arith.constant 0 : index
    %51 = arith.index_cast %50 : i32 to index
    %c0_21 = arith.constant 0 : index
    %c0_22 = arith.constant 0 : index
    %52 = vector.load %arg2[%c0_20, %51, %c0_21, %c0_22] : memref<1x6x3x1024xbf16, #tpu.memory_space<vmem>>, vector<1x1x3x1024xbf16>
    %53 = vector.shape_cast %52 : vector<1x1x3x1024xbf16> to vector<3x1024xbf16>
    %54 = arith.extf %53 : vector<3x1024xbf16> to vector<3x1024xf32>
    %55 = vector.extract_strided_slice %54 {offsets = [0, 0], sizes = [2, 512], strides = [1, 1]} : vector<3x1024xf32> to vector<2x512xf32>
    %cst_23 = arith.constant 4.687500e-02 : f32
    %56 = vector.broadcast %cst_23 : f32 to vector<2x512xf32>
    %57 = arith.mulf %56, %55 : vector<2x512xf32>
    %58 = arith.addf %48, %57 : vector<2x512xf32>
    %59 = vector.extract_strided_slice %54 {offsets = [0, 512], sizes = [2, 512], strides = [1, 1]} : vector<3x1024xf32> to vector<2x512xf32>
    %cst_24 = arith.constant 1.406250e-01 : f32
    %60 = vector.broadcast %cst_24 : f32 to vector<2x512xf32>
    %61 = arith.mulf %60, %59 : vector<2x512xf32>
    %62 = arith.addf %58, %61 : vector<2x512xf32>
    %63 = vector.extract_strided_slice %54 {offsets = [1, 0], sizes = [2, 512], strides = [1, 1]} : vector<3x1024xf32> to vector<2x512xf32>
    %cst_25 = arith.constant 1.406250e-01 : f32
    %64 = vector.broadcast %cst_25 : f32 to vector<2x512xf32>
    %65 = arith.mulf %64, %63 : vector<2x512xf32>
    %66 = arith.addf %62, %65 : vector<2x512xf32>
    %67 = vector.extract_strided_slice %54 {offsets = [1, 512], sizes = [2, 512], strides = [1, 1]} : vector<3x1024xf32> to vector<2x512xf32>
    %cst_26 = arith.constant 4.687500e-02 : f32
    %68 = vector.broadcast %cst_26 : f32 to vector<2x512xf32>
    %69 = arith.mulf %68, %67 : vector<2x512xf32>
    %70 = arith.addf %66, %69 : vector<2x512xf32>
    %c2_i32_27 = arith.constant 2 : i32
    %71 = arith.muli %c2_i32_27, %3 : i32
    %c3_i32 = arith.constant 3 : i32
    %72 = arith.addi %71, %c3_i32 : i32
    %c0_28 = arith.constant 0 : index
    %73 = arith.index_cast %72 : i32 to index
    %c0_29 = arith.constant 0 : index
    %c0_30 = arith.constant 0 : index
    %74 = vector.load %arg2[%c0_28, %73, %c0_29, %c0_30] : memref<1x6x3x1024xbf16, #tpu.memory_space<vmem>>, vector<1x1x3x1024xbf16>
    %75 = vector.shape_cast %74 : vector<1x1x3x1024xbf16> to vector<3x1024xbf16>
    %76 = arith.extf %75 : vector<3x1024xbf16> to vector<3x1024xf32>
    %77 = vector.extract_strided_slice %76 {offsets = [0, 0], sizes = [2, 512], strides = [1, 1]} : vector<3x1024xf32> to vector<2x512xf32>
    %cst_31 = arith.constant 1.562500e-02 : f32
    %78 = vector.broadcast %cst_31 : f32 to vector<2x512xf32>
    %79 = arith.mulf %78, %77 : vector<2x512xf32>
    %80 = arith.addf %70, %79 : vector<2x512xf32>
    %81 = vector.extract_strided_slice %76 {offsets = [0, 512], sizes = [2, 512], strides = [1, 1]} : vector<3x1024xf32> to vector<2x512xf32>
    %cst_32 = arith.constant 4.687500e-02 : f32
    %82 = vector.broadcast %cst_32 : f32 to vector<2x512xf32>
    %83 = arith.mulf %82, %81 : vector<2x512xf32>
    %84 = arith.addf %80, %83 : vector<2x512xf32>
    %85 = vector.extract_strided_slice %76 {offsets = [1, 0], sizes = [2, 512], strides = [1, 1]} : vector<3x1024xf32> to vector<2x512xf32>
    %cst_33 = arith.constant 4.687500e-02 : f32
    %86 = vector.broadcast %cst_33 : f32 to vector<2x512xf32>
    %87 = arith.mulf %86, %85 : vector<2x512xf32>
    %88 = arith.addf %84, %87 : vector<2x512xf32>
    %89 = vector.extract_strided_slice %76 {offsets = [1, 512], sizes = [2, 512], strides = [1, 1]} : vector<3x1024xf32> to vector<2x512xf32>
    %cst_34 = arith.constant 1.562500e-02 : f32
    %90 = vector.broadcast %cst_34 : f32 to vector<2x512xf32>
    %91 = arith.mulf %90, %89 : vector<2x512xf32>
    %92 = arith.addf %88, %91 : vector<2x512xf32>
    %93 = arith.truncf %92 : vector<2x512xf32> to vector<2x512xbf16>
    %c0_35 = arith.constant 0 : index
    %94 = arith.index_cast %1 : i32 to index
    %c0_36 = arith.constant 0 : index
    %c0_37 = arith.constant 0 : index
    %95 = vector.load %arg3[%c0_35, %94, %c0_36, %c0_37] : memref<1x1x2x512xbf16, #tpu.memory_space<vmem>>, vector<1x1x2x512xbf16>
    %96 = vector.shape_cast %95 : vector<1x1x2x512xbf16> to vector<2x512xbf16>
    %97 = vector.shape_cast %93 : vector<2x512xbf16> to vector<1x1x2x512xbf16>
    tpu.vector_store %arg3[%c0_35, %94, %c0_36, %c0_37], %97 {strides = array<i32>} : memref<1x1x2x512xbf16, #tpu.memory_space<vmem>>, vector<1x1x2x512xbf16>,
    %c1_i32_38 = arith.constant 1 : i32
    return
  }
  func.func @transform_0(%arg0: i32, %arg1: i32) -> (i32, i32, i32, i32) {
    %c0_i32 = arith.constant 0 : i32
    %c0_i32_0 = arith.constant 0 : i32
    %c0_i32_1 = arith.constant 0 : i32
    %c0_i32_2 = arith.constant 0 : i32
    return %arg0, %c0_i32, %c0_i32_0, %c0_i32_1 : i32, i32, i32, i32
  }
  func.func @transform_1(%arg0: i32, %arg1: i32) -> (i32, i32, i32, i32) {
    %c0_i32 = arith.constant 0 : i32
    %c0_i32_0 = arith.constant 0 : i32
    %c0_i32_1 = arith.constant 0 : i32
    return %arg0, %arg1, %c0_i32, %c0_i32_0 : i32, i32, i32, i32
  }
}

module attributes {stable_mosaic.version = 11 : i64} {
  func.func @_conv4x4_kernel(%arg0: i32, %arg1: i32, %arg2: memref<1x5x5x512xbf16, #tpu.memory_space<vmem>>, %arg3: memref<8192x1xbf16, #tpu.memory_space<vmem>>, %arg4: memref<1x1xf32, #tpu.memory_space<vmem>>, %arg5: memref<1x2x2x1xbf16, #tpu.memory_space<vmem>>) attributes {dimension_semantics = [#tpu.dimension_semantics<parallel>, #tpu.dimension_semantics<parallel>], iteration_bounds = array<i64: 2, 1>, scalar_prefetch = 0 : i64, scratch_operands = 0 : i64, tpu.core_type = #tpu.core_type<tc>, window_params = [{transform_indices = @transform_0, window_bounds = array<i64: 1, 5, 5, 512>}, {transform_indices = @transform_1, window_bounds = array<i64: 8192, 1>}, {transform_indices = @transform_2, window_bounds = array<i64: 1, 1>}, {transform_indices = @transform_3, window_bounds = array<i64: 1, 2, 2, 1>}]} {
    %c0 = arith.constant 0 : index
    %c0_0 = arith.constant 0 : index
    %0 = vector.load %arg4[%c0, %c0_0] : memref<1x1xf32, #tpu.memory_space<vmem>>, vector<1x1xf32>
    %c0_i32 = arith.constant 0 : i32
    %c2_i32 = arith.constant 2 : i32
    %1 = arith.addi %c0_i32, %c2_i32 : i32
    %c1_i32 = arith.constant 1 : i32
    scf.for %arg6 = %c0_i32 to %1 step %c1_i32  : i32 {
      %c1_i32_2 = arith.constant 1 : i32
      %2 = arith.muli %arg6, %c1_i32_2 : i32
      %c0_i32_3 = arith.constant 0 : i32
      %3 = arith.addi %c0_i32_3, %2 : i32
      %c0_i32_4 = arith.constant 0 : i32
      %4 = arith.addi %3, %c0_i32_4 : i32
      %c0_5 = arith.constant 0 : index
      %5 = arith.index_cast %4 : i32 to index
      %c0_6 = arith.constant 0 : index
      %c0_7 = arith.constant 0 : index
      %6 = vector.load %arg2[%c0_5, %5, %c0_6, %c0_7] : memref<1x5x5x512xbf16, #tpu.memory_space<vmem>>, vector<1x1x5x512xbf16>
      %7 = vector.shape_cast %6 : vector<1x1x5x512xbf16> to vector<5x512xbf16>
      %8 = vector.extract_strided_slice %7 {offsets = [0, 0], sizes = [2, 512], strides = [1, 1]} : vector<5x512xbf16> to vector<2x512xbf16>
      %9 = vector.extract_strided_slice %7 {offsets = [1, 0], sizes = [2, 512], strides = [1, 1]} : vector<5x512xbf16> to vector<2x512xbf16>
      %10 = vector.extract_strided_slice %7 {offsets = [2, 0], sizes = [2, 512], strides = [1, 1]} : vector<5x512xbf16> to vector<2x512xbf16>
      %11 = vector.extract_strided_slice %7 {offsets = [3, 0], sizes = [2, 512], strides = [1, 1]} : vector<5x512xbf16> to vector<2x512xbf16>
      %c1_i32_8 = arith.constant 1 : i32
      %12 = arith.addi %3, %c1_i32_8 : i32
      %c0_9 = arith.constant 0 : index
      %13 = arith.index_cast %12 : i32 to index
      %c0_10 = arith.constant 0 : index
      %c0_11 = arith.constant 0 : index
      %14 = vector.load %arg2[%c0_9, %13, %c0_10, %c0_11] : memref<1x5x5x512xbf16, #tpu.memory_space<vmem>>, vector<1x1x5x512xbf16>
      %15 = vector.shape_cast %14 : vector<1x1x5x512xbf16> to vector<5x512xbf16>
      %16 = vector.extract_strided_slice %15 {offsets = [0, 0], sizes = [2, 512], strides = [1, 1]} : vector<5x512xbf16> to vector<2x512xbf16>
      %17 = vector.extract_strided_slice %15 {offsets = [1, 0], sizes = [2, 512], strides = [1, 1]} : vector<5x512xbf16> to vector<2x512xbf16>
      %18 = vector.extract_strided_slice %15 {offsets = [2, 0], sizes = [2, 512], strides = [1, 1]} : vector<5x512xbf16> to vector<2x512xbf16>
      %19 = vector.extract_strided_slice %15 {offsets = [3, 0], sizes = [2, 512], strides = [1, 1]} : vector<5x512xbf16> to vector<2x512xbf16>
      %c2_i32_12 = arith.constant 2 : i32
      %20 = arith.addi %3, %c2_i32_12 : i32
      %c0_13 = arith.constant 0 : index
      %21 = arith.index_cast %20 : i32 to index
      %c0_14 = arith.constant 0 : index
      %c0_15 = arith.constant 0 : index
      %22 = vector.load %arg2[%c0_13, %21, %c0_14, %c0_15] : memref<1x5x5x512xbf16, #tpu.memory_space<vmem>>, vector<1x1x5x512xbf16>
      %23 = vector.shape_cast %22 : vector<1x1x5x512xbf16> to vector<5x512xbf16>
      %24 = vector.extract_strided_slice %23 {offsets = [0, 0], sizes = [2, 512], strides = [1, 1]} : vector<5x512xbf16> to vector<2x512xbf16>
      %25 = vector.extract_strided_slice %23 {offsets = [1, 0], sizes = [2, 512], strides = [1, 1]} : vector<5x512xbf16> to vector<2x512xbf16>
      %26 = vector.extract_strided_slice %23 {offsets = [2, 0], sizes = [2, 512], strides = [1, 1]} : vector<5x512xbf16> to vector<2x512xbf16>
      %27 = vector.extract_strided_slice %23 {offsets = [3, 0], sizes = [2, 512], strides = [1, 1]} : vector<5x512xbf16> to vector<2x512xbf16>
      %c3_i32 = arith.constant 3 : i32
      %28 = arith.addi %3, %c3_i32 : i32
      %c0_16 = arith.constant 0 : index
      %29 = arith.index_cast %28 : i32 to index
      %c0_17 = arith.constant 0 : index
      %c0_18 = arith.constant 0 : index
      %30 = vector.load %arg2[%c0_16, %29, %c0_17, %c0_18] : memref<1x5x5x512xbf16, #tpu.memory_space<vmem>>, vector<1x1x5x512xbf16>
      %31 = vector.shape_cast %30 : vector<1x1x5x512xbf16> to vector<5x512xbf16>
      %32 = vector.extract_strided_slice %31 {offsets = [0, 0], sizes = [2, 512], strides = [1, 1]} : vector<5x512xbf16> to vector<2x512xbf16>
      %33 = vector.extract_strided_slice %31 {offsets = [1, 0], sizes = [2, 512], strides = [1, 1]} : vector<5x512xbf16> to vector<2x512xbf16>
      %34 = vector.extract_strided_slice %31 {offsets = [2, 0], sizes = [2, 512], strides = [1, 1]} : vector<5x512xbf16> to vector<2x512xbf16>
      %35 = vector.extract_strided_slice %31 {offsets = [3, 0], sizes = [2, 512], strides = [1, 1]} : vector<5x512xbf16> to vector<2x512xbf16>
      %36 = tpu.concatenate %8, %9, %10, %11, %16, %17, %18, %19, %24, %25, %26, %27, %32, %33, %34, %35 in 1 : vector<2x512xbf16>, vector<2x512xbf16>, vector<2x512xbf16>, vector<2x512xbf16>, vector<2x512xbf16>, vector<2x512xbf16>, vector<2x512xbf16>, vector<2x512xbf16>, vector<2x512xbf16>, vector<2x512xbf16>, vector<2x512xbf16>, vector<2x512xbf16>, vector<2x512xbf16>, vector<2x512xbf16>, vector<2x512xbf16>, vector<2x512xbf16> -> vector<2x8192xbf16>
      %c0_19 = arith.constant 0 : index
      %c0_20 = arith.constant 0 : index
      %37 = vector.load %arg3[%c0_19, %c0_20] : memref<8192x1xbf16, #tpu.memory_space<vmem>>, vector<8192x1xbf16>
      %cst = arith.constant dense<0.000000e+00> : vector<2x1xf32>
      %38 = tpu.matmul %36, %37, %cst {dimension_numbers = #tpu.dot_dimension_numbers<[1], [0], [0], [1], [0, 0, 1, 1], [], []>} : vector<2x8192xbf16>, vector<8192x1xbf16>, vector<2x1xf32> -> vector<2x1xf32>
      %39 = vector.broadcast %0 : vector<1x1xf32> to vector<2x1xf32>
      %40 = arith.addf %38, %39 : vector<2x1xf32>
      %41 = arith.truncf %40 : vector<2x1xf32> to vector<2x1xbf16>
      %c0_21 = arith.constant 0 : index
      %42 = arith.index_cast %3 : i32 to index
      %c0_22 = arith.constant 0 : index
      %c0_23 = arith.constant 0 : index
      %43 = vector.load %arg5[%c0_21, %42, %c0_22, %c0_23] : memref<1x2x2x1xbf16, #tpu.memory_space<vmem>>, vector<1x1x2x1xbf16>
      %44 = vector.shape_cast %43 : vector<1x1x2x1xbf16> to vector<2x1xbf16>
      %45 = vector.shape_cast %41 : vector<2x1xbf16> to vector<1x1x2x1xbf16>
      tpu.vector_store %arg5[%c0_21, %42, %c0_22, %c0_23], %45 {strides = array<i32>} : memref<1x2x2x1xbf16, #tpu.memory_space<vmem>>, vector<1x1x2x1xbf16>,
    }
    %c2_i32_1 = arith.constant 2 : i32
    return
  }
  func.func @transform_0(%arg0: i32, %arg1: i32) -> (i32, i32, i32, i32) {
    %c0_i32 = arith.constant 0 : i32
    %c0_i32_0 = arith.constant 0 : i32
    %c0_i32_1 = arith.constant 0 : i32
    %c0_i32_2 = arith.constant 0 : i32
    return %arg0, %c0_i32, %c0_i32_0, %c0_i32_1 : i32, i32, i32, i32
  }
  func.func @transform_1(%arg0: i32, %arg1: i32) -> (i32, i32) {
    %c0_i32 = arith.constant 0 : i32
    %c0_i32_0 = arith.constant 0 : i32
    return %c0_i32, %arg1 : i32, i32
  }
  func.func @transform_2(%arg0: i32, %arg1: i32) -> (i32, i32) {
    %c0_i32 = arith.constant 0 : i32
    %c0_i32_0 = arith.constant 0 : i32
    return %c0_i32, %arg1 : i32, i32
  }
  func.func @transform_3(%arg0: i32, %arg1: i32) -> (i32, i32, i32, i32) {
    %c0_i32 = arith.constant 0 : i32
    %c0_i32_0 = arith.constant 0 : i32
    %c0_i32_1 = arith.constant 0 : i32
    return %arg0, %c0_i32, %c0_i32_0, %arg1 : i32, i32, i32, i32
  }
}

</mosaic_0001>

<bundles_post_ra>
// kernel: discriminator_forward.9
= control target key start
LH: loop header
LB: loop body
LE: loop exit
PB: predicated region body
PF: predicated region fallthrough
CT: control target
= control target key end

     0   :  { %s1085_s12 = smov 0   ;;  %s1087_s13 = smov 0   ;;  %s1235_s0 = inlined_call_operand.vmem [shape: bf16[2,34,34,6], index: 0, kind: input, shape index: {}]   ;;  %s1236_s1 = inlined_call_operand.vmem [shape: bf16[96,64], index: 1, kind: input, shape index: {}]   ;;  %s1237_s2 = inlined_call_operand.vmem [shape: f32[1,64], index: 2, kind: input, shape index: {}]   ;;  %s1238_s3 = inlined_call_operand.vmem [shape: bf16[2,31,31,64], index: 3, kind: output, shape index: {}]  }
   0x1   :  { %s1089_s14 = smov 0  }
   0x2 LB: > { %s25_s15 = sadd.s32 1, %s1040_s13  ;;  %p873_p0 = scmp.ge.s32.totalorder %s1044_s14, 1  ;;  %s1044_s14 = sphi %s1089_s14, %s13_s14   ;;  %s1040_s13 = sphi %s1087_s13, %s1240_s13   ;;  %s1036_s12 = sphi %s1085_s12, %s1239_s12  }
   0x3   : > { %p27_p1 = scmp.ge.s32.totalorder %s25_s15, 2  ;;  %p168_p2 = scmp.lt.s32.totalorder %s1044_s14, 3 }
   0x5   : > { %s1242_s15 = smov (%p27_p1, %s25_s15), 0  ;;  %p169_p3 = pnand %p873_p0, %p168_p2 }
   0x6   : > { %p202_p4 = scmp.lt.s32.totalorder (!%p169_p3), %s1036_s12, 1  ;;  %s1118_s26 = smov (!%p169_p3), 0  }
   0x7   : > { %172 = sbr.rel (%p169_p3) target bundleno = 404 (0x194), region = 32 }
   0xc   : > { %v1106_v0 = vld [vmem:[%s1237_s2] ss:$0 sm:$0xff]  ;;  %s1244_s12 = smov (!%p202_p4, %s1036_s12), 1 }
   0xd   : > { %s951_s18 = smul.u32 680, %s1244_s12 }
   0xe   : > { %s952_s19 = smul.u32 496, %s1244_s12 }
   0xf   : > { %s1111_s22 = scalar_lea.vmem %s1235_s0, %s951_s18 }
  0x10   : > { %s1116_s25 = scalar_lea.vmem %s1238_s3, %s952_s19 }
  0x11 LB: >> { %s921_s27 = smul.u32 20, %s1048_s26  ;;  %vm298_vm0 = vcmask 1046528   ;;  %s1050_s29 = smov 24   ;;  %vm275_vm1 = vsmask.f32 7424  ;;  %vm524_vm3 = vcmask 48128   ;;  %s1048_s26 = sphi %s1118_s26, %s229_s26  }
  0x12   : >> { %s1051_s30 = smov 12   ;;  %vm308_vm2 = vsmask.f32 6400  ;;  %s1052_s4 = smov 6   ;;  %vm529_vm4 = vcmask 97280   ;;  %vm534_vm5 = vcmask 146432  }
  0x13   : >> { %s1125_s28 = scalar_lea.vmem %s1111_s22, %s921_s27  ;;  %s1053_s5 = smov 18   ;;  %vm539_vm6 = vcmask 195584   ;;  %vm544_vm7 = vcmask 244736   ;;  %vm549_vm8 = vcmask 293888   ;;  %vm554_vm9 = vcmask 343040  }
  0x14   : >> { %v1128_v1 = vld [vmem:[%s1125_s28 + $0x1c] sm:$0xff]   ;;  %v1131_v2 = vld [vmem:[%s1125_s28 + $0x14] sm:$0xff]   ;;  %v1139_v4 = vld [vmem:[%s1125_s28 + $0x8] sm:$0xff]   ;;  %s1054_s6 = smov 30   ;;  %s1055_s7 = smov 36   ;;  %vm559_vm10 = vcmask 392192  }
  0x15   : >> { %341 = vrot.lane.b32.xlu1 %v1128_v1, %s1050_s29  ;;  %339 = vrot.lane.b32.xlu0 %v1131_v2, %s1050_s29  ;;  %v1136_v3 = vld [vmem:[%s1125_s28] sm:$0xff]   ;;  %v1004_v5 = vld [vmem:[%s1125_s28 + $0x10] ss:$0 sps:$4 sm:$0x11]   ;;  %v300_v7 = vrot.slane %v1139_v4, 1  ;;  %v284_v8 = vshll.u32 %v1139_v4, 16 }
  0x16   : >> { %v299_v6 = vrot.slane %v1136_v3, 1  ;;  %v288_v9 = vshrl.u32 %v1139_v4, 16  ;;  %v302_v10 = vrot.slane %v1004_v5, 1  ;;  %v277_v11 = vshrl.u32 %v1136_v3, 16  ;;  %v1161_v51 = vld [vmem:[%s1125_s28 + $0x30] sm:$0xff]   ;;  %v1164_v52 = vld [vmem:[%s1125_s28 + $0x28] sm:$0xff]  }
  0x17   : >> { %v279_v12 = vshll.u32 %v1136_v3, 16  ;;  %v317_v13 = vshrl.u32 %v1004_v5, 16  ;;  %v286_v15 = vrot.slane %v284_v8, 1  ;;  %v313_v17 = vrot.slane %v284_v8, 2  ;;  %s1056_s10 = smov 42   ;;  %s1057_s16 = smov 48  }
  0x18   : >> { %v301_v14 = vsel %vm298_vm0, %v299_v6, %v300_v7  ;;  %v312_v16 = vrot.slane %v288_v9, 1  ;;  %v320_v20 = vshll.u32 %v1004_v5, 16  ;;  %v351_v21 = vshll.u32 %v1128_v1, 16  ;;  %v1005_v29 = vld [vmem:[%s1125_s28 + $0x24] ss:$0 sps:$4 sm:$0x11]  }
  0x19   : >> { %304 = vrot.lane.b32.xlu1 %v301_v14, %s1051_s30  ;;  %v281_v18 = vrot.slane %v279_v12, 1  ;;  %v319_v19 = vrot.slane %v317_v13, 1  ;;  %v290_v22 = vor.u32 %v288_v9, %v286_v15  ;;  %v303_v23 = vsel %vm298_vm0, %v300_v7, %v302_v10  ;;  %s1058_s19 = smov 54   ;;  %s1059_s23 = smov 60  }
  0x1a   : >> { %v309_v24 = vrot.slane %v277_v11, 1  ;;  %v310_v25 = vrot.slane %v279_v12, 2  ;;  %v314_v27 = vor.u32 %v313_v17, %v312_v16  ;;  %v322_v28 = vrot.slane %v320_v20, 2  ;;  %v1013_v12 = vld [vmem:[%s1236_s1 + $0x20] sm:$0xff]   ;;  %s1060_s29 = smov 66   ;;  %s926_s8 = sshll.u32 %s1048_s26, 4 }
  0x1b   : >> { %v282_v26 = vor.u32 %v281_v18, %v277_v11  ;;  %293 = vrot.lane.b32.xlu0 %v290_v22, %s1052_s4  ;;  %v355_v30 = vshrl.u32 %v1128_v1, 16  ;;  %v344_v31 = vshrl.u32 %v1131_v2, 16  ;;  %v346_v32 = vshll.u32 %v1131_v2, 16  ;;  %s733_s9 = scalar_lea.vmem %s1116_s25, %s926_s8  ;;  %s229_s26 = sadd.s32 1, %s1048_s26  }
  0x1c   : >> { %v323_v34 = vor.u32 %v322_v28, %v319_v19  ;;  %v311_v35 = vor.u32 %v310_v25, %v309_v24  ;;  %v353_v36 = vrot.slane %v351_v21, 1  ;;  %v382_v39 = vshrl.u32 %v1005_v29, 16  ;;  %p226_p5 = scmp.ge.s32.totalorder %s229_s26, 31  }
  0x1d   : >> { %306 = vrot.lane.b32.xlu1 %v303_v23, %s1051_s30  ;;  %v287_v33 = vsel %vm275_vm1, %v282_v26, %v286_v15  ;;  %v348_v37 = vrot.slane %v346_v32, 1  ;;  %v385_v40 = vshll.u32 %v1005_v29, 16  ;;  %v377_v41 = vrot.slane %v355_v30, 1  ;;  %v1009_v26 = vld [vmem:[%s1125_s28 + $0x44] sm:$0xff]  }
  0x1e   : >> { %v324_v38 = vsel %vm308_vm2, %v314_v27, %v323_v34  ;;  %v315_v42 = vsel %vm308_vm2, %v311_v35, %v314_v27  ;;  %v357_v43 = vor.u32 %v355_v30, %v353_v36  ;;  %v366_v45 = vrot.slane %v1128_v1, 1  ;;  %v1008_v1 = vld [vmem:[%s1125_s28 + $0x38] ss:$0 sps:$4 sm:$0x11]   ;;  %v1010_v27 = vld [vmem:[%s1125_s28 + $0x3c] sm:$0xff]  }
  0x1f   : >> { %291 = vrot.lane.b32.xlu0 %v287_v33, %s1052_s4  ;;  %v349_v44 = vor.u32 %v348_v37, %v344_v31  ;;  %v368_v46 = vrot.slane %v1005_v29, 1  ;;  %v378_v47 = vrot.slane %v351_v21, 2  ;;  %v384_v48 = vrot.slane %v382_v39, 1  ;;  %v1014_v21 = vld [vmem:[%s1236_s1 + $0x18] sm:$0xff]   ;;  %s1061_s4 = smov 72  }
  0x20   : >> { %v387_v49 = vrot.slane %v385_v40, 2  ;;  %v365_v50 = vrot.slane %v1131_v2, 1  ;;  %v374_v54 = vrot.slane %v344_v31, 1  ;;  %v375_v55 = vrot.slane %v346_v32, 2  ;;  %v1012_v2 = vld [vmem:[%s1236_s1 + $0x28] sm:$0xff]   ;;  %v1015_v31 = vld [vmem:[%s1236_s1 + $0x10] sm:$0xff]  }
  0x21   : >> { %327 = vrot.lane.b32.xlu1 %v324_v38, %s1053_s5  ;;  %v354_v53 = vsel %vm275_vm1, %v349_v44, %v353_v36  ;;  %v369_v56 = vsel %vm298_vm0, %v366_v45, %v368_v46  ;;  %v379_v57 = vor.u32 %v378_v47, %v377_v41  ;;  %v416_v61 = vshll.u32 %v1161_v51, 16  ;;  %935 = vmatprep.subr.bf16.mxu0 %v1012_v2  ;;  %v1011_v37 = vld [vmem:[%s1125_s28 + $0x4c] ss:$0 sps:$4 sm:$0x11]   ;;  %v1017_v46 = vld [vmem:[%s1236_s1] sm:$0xff]  }
  0x22   : >> { %v388_v58 = vor.u32 %v387_v49, %v384_v48  ;;  %v367_v59 = vsel %vm298_vm0, %v365_v50, %v366_v45  ;;  %v376_v60 = vor.u32 %v375_v55, %v374_v54  ;;  %v411_v62 = vshll.u32 %v1164_v52, 16  ;;  %936 = vmatpush3.bf16.msra.mxu0 %v1012_v2  ;;  %v1016_v38 = vld [vmem:[%s1236_s1 + $0x8] sm:$0xff]  }
  0x23   : >> { %325 = vrot.lane.b32.xlu0 %v315_v42, %s1053_s5  ;;  %v420_v5 = vshrl.u32 %v1161_v51, 16  ;;  %v418_v7 = vrot.slane %v416_v61, 1  ;;  %v409_v8 = vshrl.u32 %v1164_v52, 16  ;;  %v447_v10 = vshrl.u32 %v1008_v1, 16  ;;  %937 = vmatprep.subr.bf16.mxu0 %v1013_v12  ;;  %s1062_s5 = smov 78  }
  0x24   : >> { %v389_v63 = vsel %vm308_vm2, %v379_v57, %v388_v58  ;;  %v380_v6 = vsel %vm308_vm2, %v376_v60, %v379_v57  ;;  %v413_v9 = vrot.slane %v411_v62, 1  ;;  %v450_v11 = vshll.u32 %v1008_v1, 16 }
  0x25   : >> { %360 = vrot.lane.b32.xlu1 %v357_v43, %s1054_s6  ;;  %v422_v13 = vor.u32 %v420_v5, %v418_v7  ;;  %v442_v14 = vrot.slane %v420_v5, 1  ;;  %v431_v16 = vrot.slane %v1161_v51, 1  ;;  %v433_v17 = vrot.slane %v1008_v1, 1 }
  0x26   : >> { %v414_v15 = vor.u32 %v413_v9, %v409_v8  ;;  %v443_v18 = vrot.slane %v416_v61, 2  ;;  %v449_v19 = vrot.slane %v447_v10, 1  ;;  %v452_v20 = vrot.slane %v450_v11, 2  ;;  %938 = vmatpush3.bf16.msra.mxu0 %v1013_v12 }
  0x27   : >> { %358 = vrot.lane.b32.xlu0 %v354_v53, %s1054_s6  ;;  %v430_v23 = vrot.slane %v1164_v52, 1  ;;  %v439_v24 = vrot.slane %v409_v8, 1  ;;  %v440_v25 = vrot.slane %v411_v62, 2  ;;  %939 = vmatprep.subr.bf16.mxu0 %v1014_v21  ;;  %v434_v28 = vsel %vm298_vm0, %v431_v16, %v433_v17  ;;  %s1063_s6 = smov 84  }
  0x28   : >> { %v419_v22 = vsel %vm275_vm1, %v414_v15, %v418_v7  ;;  %v444_v29 = vor.u32 %v443_v18, %v442_v14  ;;  %v453_v30 = vor.u32 %v452_v20, %v449_v19  ;;  %v481_v34 = vshll.u32 %v1009_v26, 16 }
  0x29   : >> { %372 = vrot.lane.b32.xlu1 %v369_v56, %s1055_s7  ;;  %v432_v32 = vsel %vm298_vm0, %v430_v23, %v431_v16  ;;  %v441_v33 = vor.u32 %v440_v25, %v439_v24  ;;  %v476_v35 = vshll.u32 %v1010_v27, 16  ;;  %v485_v39 = vshrl.u32 %v1009_v26, 16 }
  0x2a   : >> { %940 = vmatpush3.bf16.msra.mxu0 %v1014_v21  ;;  %v454_v36 = vsel %vm308_vm2, %v444_v29, %v453_v30  ;;  %v483_v41 = vrot.slane %v481_v34, 1  ;;  %v474_v42 = vshrl.u32 %v1010_v27, 16  ;;  %v512_v44 = vshrl.u32 %v1011_v37, 16 }
  0x2b   : >> { %370 = vrot.lane.b32.xlu0 %v367_v59, %s1055_s7  ;;  %941 = vmatprep.subr.bf16.mxu0 %v1015_v31  ;;  %v445_v40 = vsel %vm308_vm2, %v441_v33, %v444_v29  ;;  %v478_v43 = vrot.slane %v476_v35, 1  ;;  %v515_v45 = vshll.u32 %v1011_v37, 16  ;;  %v507_v48 = vrot.slane %v485_v39, 1  ;;  %s1064_s7 = smov 90  }
  0x2c   : >> { %v487_v47 = vor.u32 %v485_v39, %v483_v41  ;;  %v496_v50 = vrot.slane %v1009_v26, 1  ;;  %v514_v53 = vrot.slane %v512_v44, 1  ;;  %v495_v56 = vrot.slane %v1010_v27, 1 }
  0x2d   : >> { %392 = vrot.lane.b32.xlu1 %v389_v63, %s1056_s10  ;;  %v479_v49 = vor.u32 %v478_v43, %v474_v42  ;;  %v517_v54 = vrot.slane %v515_v45, 2  ;;  %v504_v57 = vrot.slane %v474_v42, 1  ;;  %v505_v58 = vrot.slane %v476_v35, 2 }
  0x2e   : >> { %942 = vmatpush3.bf16.msra.mxu0 %v1015_v31  ;;  %v497_v62 = vsel %vm298_vm0, %v495_v56, %v496_v50  ;;  %vm564_vm11 = vcmask 441344   ;;  %vm569_vm12 = vcmask 490496   ;;  %vm574_vm13 = vcmask 539648  }
  0x2f   : >> { %390 = vrot.lane.b32.xlu0 %v380_v6, %s1056_s10  ;;  %943 = vmatprep.subr.bf16.mxu0 %v1016_v38  ;;  %v484_v55 = vsel %vm275_vm1, %v479_v49, %v483_v41  ;;  %v518_v61 = vor.u32 %v517_v54, %v514_v53  ;;  %v506_v63 = vor.u32 %v505_v58, %v504_v57  ;;  %vm579_vm14 = vcmask 588800  }
  0x30   : >> { %vm584_vm15 = vcmask 637952   ;;  %vm594_vm1 = vcmask 736256  }
  0x31   : >> { %406 = vrot.lane.b32.xlu1 %v1161_v51, %s1057_s16  ;;  %v498_v51 = vrot.slane %v1011_v37, 1 }
  0x32   : >> { %944 = vmatpush3.bf16.msra.mxu0 %v1016_v38 }
  0x33   : >> { %404 = vrot.lane.b32.xlu0 %v1164_v52, %s1057_s16  ;;  %945 = vmatprep.subr.bf16.mxu0 %v1017_v46  ;;  %v508_v52 = vrot.slane %v481_v34, 2  ;;  %v499_v59 = vsel %vm298_vm0, %v496_v50, %v498_v51  ;;  %vm589_vm0 = vcmask 687104  }
  0x35   : >> { %425 = vrot.lane.b32.xlu1 %v422_v13, %s1058_s19  ;;  %v509_v60 = vor.u32 %v508_v52, %v507_v48 }
  0x36   : >> { %946 = vmatpush3.bf16.msra.mxu0 %v1017_v46 }
  0x37   : >> { %423 = vrot.lane.b32.xlu0 %v419_v22, %s1058_s19  ;;  %v519_v1 = vsel %vm308_vm2, %v509_v60, %v518_v61  ;;  %v510_v2 = vsel %vm308_vm2, %v506_v63, %v509_v60  ;;  %vm653_vm2 = vcmask 785408  }
  0x39   : >> { %437 = vrot.lane.b32.xlu1 %v434_v28, %s1059_s23 }
  0x3b   : >> { %435 = vrot.lane.b32.xlu0 %v432_v32, %s1059_s23 }
  0x3d   : >> { %457 = vrot.lane.b32.xlu1 %v454_v36, %s1060_s29 }
  0x3f   : >> { %455 = vrot.lane.b32.xlu0 %v445_v40, %s1060_s29 }
  0x41   : >> { %471 = vrot.lane.b32.xlu1 %v1009_v26, %s1061_s4 }
  0x43   : >> { %469 = vrot.lane.b32.xlu0 %v1010_v27, %s1061_s4 }
  0x45   : >> { %490 = vrot.lane.b32.xlu1 %v487_v47, %s1062_s5 }
  0x47   : >> { %488 = vrot.lane.b32.xlu0 %v484_v55, %s1062_s5 }
  0x49   : >> { %502 = vrot.lane.b32.xlu1 %v499_v59, %s1063_s6 }
  0x4b   : >> { %500 = vrot.lane.b32.xlu0 %v497_v62, %s1063_s6 }
  0x4d   : >> { %522 = vrot.lane.b32.xlu1 %v519_v1, %s1064_s7 }
  0x4f   : >> { %520 = vrot.lane.b32.xlu0 %v510_v2, %s1064_s7 }
  0x87   : >> { %v342_v5 = vpop.permute.xlu1 %341  ;;  %v340_v6 = vpop.permute.xlu0 %339 }
  0x8b   : >> { %v305_v7 = vpop.permute.xlu1 %304 }
  0x8d   : >> { %v294_v8 = vpop.permute.xlu0 %293 }
  0x8e   : >> { %v528_v27 = vsel %vm524_vm3, %v1139_v4, %v294_v8 }
  0x8f   : >> { %v307_v9 = vpop.permute.xlu1 %306 }
  0x90   : >> { %v533_v31 = vsel %vm529_vm4, %v528_v27, %v307_v9 }
  0x91   : >> { %v292_v10 = vpop.permute.xlu0 %291 }
  0x92   : >> { %v526_v26 = vsel %vm524_vm3, %v1136_v3, %v292_v10  ;;  %vm734_vm3 = vcmask 519168  }
  0x93   : >> { %v328_v11 = vpop.permute.xlu1 %327  ;;  %v531_v30 = vsel %vm529_vm4, %v526_v26, %v305_v7  ;;  %vm739_vm4 = vsmask.f32 3328 }
  0x94   : >> { %v538_v33 = vsel %vm534_vm5, %v533_v31, %v328_v11 }
  0x95   : >> { %v326_v12 = vpop.permute.xlu0 %325  ;;  %v543_v37 = vsel %vm539_vm6, %v538_v33, %v342_v5 }
  0x96   : >> { %v536_v32 = vsel %vm534_vm5, %v531_v30, %v326_v12  ;;  %vm740_vm5 = vmand %vm734_vm3, %vm739_vm4 }
  0x97   : >> { %v361_v13 = vpop.permute.xlu1 %360  ;;  %v541_v36 = vsel %vm539_vm6, %v536_v32, %v340_v6 }
  0x98   : >> { %v548_v3 = vsel %vm544_vm7, %v543_v37, %v361_v13 }
  0x99   : >> { %v359_v14 = vpop.permute.xlu0 %358 }
  0x9a   : >> { %v546_v38 = vsel %vm544_vm7, %v541_v36, %v359_v14 }
  0x9b   : >> { %v373_v15 = vpop.permute.xlu1 %372 }
  0x9c   : >> { %v553_v40 = vsel %vm549_vm8, %v548_v3, %v373_v15 }
  0x9d   : >> { %v371_v16 = vpop.permute.xlu0 %370 }
  0x9e   : >> { %v551_v39 = vsel %vm549_vm8, %v546_v38, %v371_v16 }
  0x9f   : >> { %v393_v17 = vpop.permute.xlu1 %392 }
  0xa0   : >> { %v558_v43 = vsel %vm554_vm9, %v553_v40, %v393_v17 }
  0xa1   : >> { %v391_v18 = vpop.permute.xlu0 %390 }
  0xa2   : >> { %v556_v41 = vsel %vm554_vm9, %v551_v39, %v391_v18 }
  0xa3   : >> { %v407_v19 = vpop.permute.xlu1 %406 }
  0xa4   : >> { %v563_v45 = vsel %vm559_vm10, %v558_v43, %v407_v19  ;;  %v741_v19 = vld [vmem:[%s733_s9 + $0xc] sm:$0xf] }
  0xa5   : >> { %v405_v20 = vpop.permute.xlu0 %404 }
  0xa6   : >> { %v561_v44 = vsel %vm559_vm10, %v556_v41, %v405_v20 }
  0xa7   : >> { %v426_v21 = vpop.permute.xlu1 %425 }
  0xa8   : >> { %v568_v47 = vsel %vm564_vm11, %v563_v45, %v426_v21 }
  0xa9   : >> { %v424_v22 = vpop.permute.xlu0 %423 }
  0xaa   : >> { %v566_v46 = vsel %vm564_vm11, %v561_v44, %v424_v22 }
  0xab   : >> { %v438_v23 = vpop.permute.xlu1 %437 }
  0xac   : >> { %v573_v50 = vsel %vm569_vm12, %v568_v47, %v438_v23 }
  0xad   : >> { %v436_v24 = vpop.permute.xlu0 %435 }
  0xae   : >> { %v571_v48 = vsel %vm569_vm12, %v566_v46, %v436_v24 }
  0xaf   : >> { %v458_v25 = vpop.permute.xlu1 %457 }
  0xb0   : >> { %v578_v52 = vsel %vm574_vm13, %v573_v50, %v458_v25 }
  0xb1   : >> { %v456_v28 = vpop.permute.xlu0 %455 }
  0xb2   : >> { %v576_v51 = vsel %vm574_vm13, %v571_v48, %v456_v28 }
  0xb3   : >> { %v472_v29 = vpop.permute.xlu1 %471 }
  0xb4   : >> { %v583_v54 = vsel %vm579_vm14, %v578_v52, %v472_v29 }
  0xb5   : >> { %v470_v34 = vpop.permute.xlu0 %469 }
  0xb6   : >> { %v581_v53 = vsel %vm579_vm14, %v576_v51, %v470_v34 }
  0xb7   : >> { %v491_v35 = vpop.permute.xlu1 %490 }
  0xb8   : >> { %v588_v57 = vsel %vm584_vm15, %v583_v54, %v491_v35 }
  0xb9   : >> { %v489_v4 = vpop.permute.xlu0 %488 }
  0xba   : >> { %v586_v55 = vsel %vm584_vm15, %v581_v53, %v489_v4 }
  0xbb   : >> { %v503_v42 = vpop.permute.xlu1 %502 }
  0xbc   : >> { %v593_v60 = vsel %vm589_vm0, %v588_v57, %v503_v42 }
  0xbd   : >> { %v501_v49 = vpop.permute.xlu0 %500 }
  0xbe   : >> { %v591_v58 = vsel %vm589_vm0, %v586_v55, %v501_v49 }
  0xbf   : >> { %v523_v56 = vpop.permute.xlu1 %522 }
  0xc0   : >> { %v598_v62 = vsel %vm594_vm1, %v593_v60, %v523_v56 }
  0xc1   : >> { %v521_v59 = vpop.permute.xlu0 %520 }
  0xc2   : >> { %v596_v61 = vsel %vm594_vm1, %v591_v58, %v521_v59 }
  0xc3   : >> { %947 = vmatprep.mubr.msk.bf16.mxu0 %vm653_vm2, %v596_v61 }
  0xc4   : >> { %948 = vmatmul.mubr.msk.bf16.vlgmr.msra.gmra.mxu0 %vm653_vm2, %v598_v62 }
 0x184   : >> { %v949_v63 = vpop.f32.mrf.mxu0 }
 0x185   : >> { %v701_v1 = vadd.f32 %v949_v63, %v1106_v0 }
 0x186   : >> { %v692_v2 = vpop.f32.mrf.mxu0 }
 0x187   : >> { %v709_v5 = vmul.f32 0.2, %v701_v1  ;;  %v693_v6 = vadd.f32 %v1106_v0, %v692_v2 }
 0x188   : >> { %v950_v7 = vpop.f32.mrf.mxu0 }
 0x189   : >> { %v713_v8 = vmax.f32 %v701_v1, %v709_v5  ;;  %v707_v9 = vmul.f32 0.2, %v693_v6  ;;  %v704_v10 = vadd.f32 %v950_v7, %v1106_v0 }
 0x18a   : >> { %v695_v11 = vpop.f32.mrf.mxu0 }
 0x18b   : >> { %v924_v12 = vpack.c.bf16 %v713_v8, %v713_v8  ;;  %v711_v13 = vmax.f32 %v693_v6, %v707_v9  ;;  %v710_v14 = vmul.f32 0.2, %v704_v10  ;;  %v696_v15 = vadd.f32 %v1106_v0, %v695_v11 }
 0x18d   : >> { %737 = vst.msk [vmem:[%s733_s9 + $0x8] sm:$0xf] %vm734_vm3, %v924_v12  ;;  %v922_v16 = vpack.c.bf16 %v711_v13, %v711_v13  ;;  %v714_v17 = vmax.f32 %v704_v10, %v710_v14  ;;  %v708_v18 = vmul.f32 0.2, %v696_v15 }
 0x18f   : >> { %735 = vst.msk [vmem:[%s733_s9] sm:$0xf] %vm734_vm3, %v922_v16  ;;  %v925_v20 = vpack.c.bf16 %v714_v17, %v714_v17  ;;  %v712_v21 = vmax.f32 %v696_v15, %v708_v18  ;;  %228 = sbr.rel (!%p226_p5) target bundleno = 17 (0x11), region = 80 }
 0x191   : >> { %v742_v22 = vsel %vm740_vm5, %v925_v20, %v741_v19  ;;  %v923_v23 = vpack.c.bf16 %v712_v21, %v712_v21 }
 0x192   : >> { %743 = vst [vmem:[%s733_s9 + $0xc] sm:$0xf] %v742_v22 }
 0x193   : >> { %736 = vst.msk [vmem:[%s733_s9 + $0x4] sm:$0xf] %vm734_vm3, %v923_v23 }
 0x194 PF: > { %s13_s14 = sadd.s32 1, %s1044_s14   ;;  %s1239_s12 = smov %s1040_s13 }
 0x195   : > { %p10_p6 = scmp.ge.s32.totalorder %s13_s14, 4   ;;  %s1240_s13 = smov %s1242_s15 }
 0x197   :  { %12 = sbr.rel (!%p10_p6) target bundleno = 2 (0x2), region = 91 }

// kernel: discriminator_forward.10
= control target key start
LH: loop header
LB: loop body
LE: loop exit
PB: predicated region body
PF: predicated region fallthrough
CT: control target
= control target key end

     0   :  { %s660_s6 = smov 0   ;;  %s662_s7 = smov 0   ;;  %s805_s0 = inlined_call_operand.vmem [shape: bf16[2,34,17,128], index: 0, kind: input, shape index: {}]   ;;  %s806_s1 = inlined_call_operand.vmem [shape: bf16[2,16,16,64], index: 1, kind: output, shape index: {}]  }
   0x1   :  { %s664_s8 = smov 0   ;;  %s666_s9 = smov 0  }
   0x2   :  { %s668_s10 = smov 0  }
   0x3 LB: > { %s20_s11 = sadd.s32 1, %s635_s8  ;;  %s23_s12 = sadd.s32 1, %s639_s9  ;;  %s643_s10 = sphi %s668_s10, %s11_s10   ;;  %s639_s9 = sphi %s666_s9, %s810_s9   ;;  %s635_s8 = sphi %s664_s8, %s809_s8   ;;  %s631_s7 = sphi %s662_s7, %s808_s7   ;;  %s627_s6 = sphi %s660_s6, %s807_s6  }
   0x4   : > { %p21_p0 = scmp.ge.s32.totalorder %s20_s11, 2  ;;  %p504_p1 = scmp.ge.s32.totalorder %s643_s10, 1 }
   0x5   : > { %p101_p2 = scmp.lt.s32.totalorder %s643_s10, 5 }
   0x6   : > { %s812_s11 = smov (%p21_p0, %s20_s11), 0  ;;  %s814_s12 = smov (!%p21_p0, %s23_s12), %s639_s9 }
   0x7   : > { %p102_p3 = pnand %p504_p1, %p101_p2  ;;  %p25_p4 = scmp.ge.s32.totalorder %s814_s12, 2 }
   0x8   : > { %p126_p5 = scmp.lt.s32.totalorder (!%p102_p3), %s631_s7, 1  ;;  %s690_s13 = sshll.u32 (!%p102_p3), %s627_s6, 3 }
   0x9   : > { %s816_s12 = smov (%p25_p4, %s814_s12), 0  ;;  %105 = sbr.rel (%p102_p3) target bundleno = 182 (0xb6), region = 24 }
   0xa   : > { %p134_p6 = scmp.lt.s32.totalorder (!%p102_p3), %s690_s13, 15  ;;  %s704_s26 = smov (!%p102_p3), 0  }
   0xe   : > { %s818_s7 = smov (!%p126_p5, %s631_s7), 1 }
   0xf   : > { %s135_s14 = scalar_select %p134_p6, %s690_s13, 15 }
  0x10   : > { %s551_s15 = smul.u32 408, %s818_s7  ;;  %s508_s16 = sshll.u32 %s818_s7, 5 }
  0x11   : > { %s507_s17 = sshll.u32 %s135_s14, 1 }
  0x12   : > { %s697_s20 = scalar_lea.vmem %s805_s0, %s551_s15  ;;  %s138_s21 = sadd.s32 %s508_s16, %s507_s17 }
  0x13   : > { %s509_s22 = sshll.u32 %s138_s21, 2 }
  0x14   : > { %s702_s25 = scalar_lea.vmem %s806_s1, %s509_s22 }
  0x15 LB: >> { %s149_s27 = sadd.s32 %s647_s26, %s690_s13  ;;  %vm178_vm0 = vcmask 1046528   ;;  %s649_s30 = smov 64   ;;  %vm378_vm1 = vcmask 519168   ;;  %s647_s26 = sphi %s704_s26, %s147_s26  }
  0x16   : >> { %s538_s28 = smul.u32 24, %s149_s27  ;;  %s541_s2 = sshll.u32 %s647_s26, 3 }
  0x17   : >> { %s377_s3 = scalar_lea.vmem %s702_s25, %s541_s2  ;;  %s147_s26 = sadd.s32 1, %s647_s26  }
  0x18   : >> { %s712_s29 = scalar_lea.vmem %s697_s20, %s538_s28  ;;  %p144_p7 = scmp.ge.s32.totalorder %s147_s26, 8  }
  0x19   : >> { %v543_v0 = vld [vmem:[%s712_s29] sm:$0xff]   ;;  %v517_v1 = vld [vmem:[%s712_s29 + $0xc] sm:$0xff]   ;;  %v156_v2 = vld [vmem:[%s712_s29 + $0x8] sm:$0x1] }
  0x1a   : >> { %v544_v3 = vunpack.c.l.bf16 %v543_v0  ;;  %v545_v4 = vunpack.c.h.bf16 %v543_v0  ;;  %v212_v5 = vunpack.c.l.bf16 %v517_v1  ;;  %v159_v6 = vunpack.c.l.bf16 %v156_v2  ;;  %v519_v7 = vld [vmem:[%s712_s29 + $0x14] sm:$0x1]  ;;  %v550_v12 = vld [vmem:[%s712_s29 + $0x18] sm:$0xff]   ;;  %v529_v26 = vld [vmem:[%s712_s29 + $0x24] sm:$0xff]  }
  0x1b   : >> { %v213_v8 = vunpack.c.h.bf16 %v517_v1  ;;  %v214_v15 = vunpack.c.l.bf16 %v519_v7  ;;  %v548_v22 = vunpack.c.l.bf16 %v550_v12  ;;  %v549_v29 = vunpack.c.h.bf16 %v550_v12  ;;  %v525_v38 = vld [vmem:[%s712_s29 + $0x20] sm:$0x1]  ;;  %v531_v51 = vld [vmem:[%s712_s29 + $0x2c] sm:$0x1] }
  0x1c   : >> { %v164_v9 = vmul.f32 0.046875, %v544_v3  ;;  %v718_v10 = vmul.f32 0.015625, %v544_v3  ;;  %v720_v11 = vmul.f32 0.015625, %v545_v4  ;;  %v723_v13 = vmul.f32 0.046875, %v545_v4 }
  0x1d   : >> { %v188_v14 = vmul.f32 0.015625, %v159_v6  ;;  %v728_v18 = vmul.f32 0.046875, %v212_v5  ;;  %v730_v19 = vmul.f32 0.046875, %v213_v8  ;;  %v219_v20 = vmul.f32 0.140625, %v212_v5 }
  0x1e   : >> { %168 = vrot.lane.b32.xlu0 %v164_v9, %s649_s30  ;;  %v192_v16 = vrot.slane %v718_v10, 1  ;;  %v193_v17 = vrot.slane %v720_v11, 1  ;;  %v179_v23 = vrot.slane %v164_v9, 1  ;;  %v180_v24 = vrot.slane %v723_v13, 1 }
  0x1f   : >> { %v195_v21 = vrot.slane %v188_v14, 1  ;;  %v233_v27 = vrot.slane %v219_v20, 1  ;;  %v220_v28 = vmul.f32 0.140625, %v213_v8  ;;  %v246_v31 = vrot.slane %v728_v18, 1 }
  0x20   : >> { %v194_v25 = vsel %vm178_vm0, %v192_v16, %v193_v17  ;;  %v247_v32 = vrot.slane %v730_v19, 1  ;;  %v242_v33 = vmul.f32 0.046875, %v214_v15  ;;  %v273_v35 = vmul.f32 0.140625, %v548_v22 }
  0x21   : >> { %197 = vrot.lane.b32.xlu1 %v194_v25, %s649_s30  ;;  %v196_v30 = vsel %vm178_vm0, %v193_v17, %v195_v21  ;;  %v234_v34 = vrot.slane %v220_v28, 1  ;;  %v274_v36 = vmul.f32 0.140625, %v549_v29  ;;  %v320_v37 = vunpack.c.l.bf16 %v529_v26 }
  0x22   : >> { %170 = vrot.lane.b32.xlu0 %v723_v13, %s649_s30  ;;  %v742_v39 = vmul.f32 0.046875, %v548_v22  ;;  %v321_v40 = vunpack.c.h.bf16 %v529_v26  ;;  %v181_v41 = vsel %vm178_vm0, %v179_v23, %v180_v24  ;;  %v287_v42 = vrot.slane %v273_v35, 1 }
  0x23   : >> { %v288_v43 = vrot.slane %v274_v36, 1  ;;  %v327_v44 = vmul.f32 0.046875, %v320_v37  ;;  %v248_v45 = vsel %vm178_vm0, %v246_v31, %v247_v32  ;;  %v249_v46 = vrot.slane %v242_v33, 1 }
  0x24   : >> { %v268_v47 = vunpack.c.l.bf16 %v525_v38  ;;  %v328_v48 = vmul.f32 0.046875, %v321_v40  ;;  %v748_v49 = vmul.f32 0.046875, %v549_v29  ;;  %v176_v52 = vmul.f32 0.046875, %v159_v6 }
  0x25   : >> { %199 = vrot.lane.b32.xlu1 %v196_v30, %s649_s30  ;;  %v341_v50 = vrot.slane %v327_v44, 1  ;;  %v235_v53 = vsel %vm178_vm0, %v233_v27, %v234_v34  ;;  %v300_v54 = vrot.slane %v742_v39, 1  ;;  %v231_v57 = vmul.f32 0.140625, %v214_v15 }
  0x26   : >> { %223 = vrot.lane.b32.xlu0 %v219_v20, %s649_s30  ;;  %v342_v55 = vrot.slane %v328_v48, 1  ;;  %v182_v56 = vrot.slane %v176_v52, 1  ;;  %v289_v58 = vsel %vm178_vm0, %v287_v42, %v288_v43  ;;  %v285_v59 = vmul.f32 0.140625, %v268_v47 }
  0x27   : >> { %v250_v60 = vsel %vm178_vm0, %v247_v32, %v249_v46  ;;  %v296_v61 = vmul.f32 0.046875, %v268_v47  ;;  %v322_v62 = vunpack.c.l.bf16 %v531_v51  ;;  %v301_v0 = vrot.slane %v748_v49, 1 }
  0x28   : >> { %v758_v63 = vsel %vm178_vm0, %v341_v50, %v342_v55  ;;  %v183_v1 = vsel %vm178_vm0, %v180_v24, %v182_v56  ;;  %v236_v2 = vrot.slane %v231_v57, 1  ;;  %v290_v3 = vrot.slane %v285_v59, 1 }
  0x29   : >> { %225 = vrot.lane.b32.xlu1 %v220_v28, %s649_s30  ;;  %v339_v4 = vmul.f32 0.046875, %v322_v62  ;;  %v303_v7 = vrot.slane %v296_v61, 1  ;;  %v302_v9 = vsel %vm178_vm0, %v300_v54, %v301_v0  ;;  %v323_v12 = vmul.f32 0.015625, %v320_v37 }
  0x2a   : >> { %251 = vrot.lane.b32.xlu0 %v248_v45, %s649_s30  ;;  %v237_v5 = vsel %vm178_vm0, %v234_v34, %v236_v2  ;;  %v291_v6 = vsel %vm178_vm0, %v288_v43, %v290_v3  ;;  %v324_v13 = vmul.f32 0.015625, %v321_v40  ;;  %v350_v16 = vmul.f32 0.015625, %v322_v62 }
  0x2b   : >> { %v344_v8 = vrot.slane %v339_v4, 1  ;;  %v304_v15 = vsel %vm178_vm0, %v301_v0, %v303_v7  ;;  %v354_v17 = vrot.slane %v323_v12, 1 }
  0x2c   : >> { %v355_v20 = vrot.slane %v324_v13, 1  ;;  %v357_v21 = vrot.slane %v350_v16, 1 }
  0x2d   : >> { %253 = vrot.lane.b32.xlu1 %v250_v60, %s649_s30  ;;  %v345_v14 = vsel %vm178_vm0, %v342_v55, %v344_v8 }
  0x2e   : >> { %277 = vrot.lane.b32.xlu0 %v273_v35, %s649_s30  ;;  %v356_v22 = vsel %vm178_vm0, %v354_v17, %v355_v20  ;;  %v358_v23 = vsel %vm178_vm0, %v355_v20, %v357_v21 }
  0x31   : >> { %279 = vrot.lane.b32.xlu1 %v274_v36, %s649_s30 }
  0x32   : >> { %305 = vrot.lane.b32.xlu0 %v302_v9, %s649_s30 }
  0x35   : >> { %307 = vrot.lane.b32.xlu1 %v304_v15, %s649_s30 }
  0x36   : >> { %331 = vrot.lane.b32.xlu0 %v327_v44, %s649_s30 }
  0x39   : >> { %333 = vrot.lane.b32.xlu1 %v328_v48, %s649_s30 }
  0x3a   : >> { %359 = vrot.lane.b32.xlu0 %v356_v22, %s649_s30 }
  0x3d   : >> { %361 = vrot.lane.b32.xlu1 %v358_v23, %s649_s30 }
  0x90   : >> { %v169_v24 = vpop.permute.xlu0 %168 }
  0x91   : >> { %v174_v25 = vadd.f32 %v169_v24, %v718_v10 }
  0x93   : >> { %v198_v26 = vpop.permute.xlu1 %197  ;;  %v186_v27 = vadd.f32 %v181_v41, %v174_v25 }
  0x94   : >> { %v171_v28 = vpop.permute.xlu0 %170 }
  0x95   : >> { %v175_v29 = vadd.f32 %v171_v28, %v720_v11  ;;  %v203_v30 = vadd.f32 %v198_v26, %v186_v27 }
  0x97   : >> { %v217_v31 = vadd.f32 %v728_v18, %v203_v30  ;;  %v187_v32 = vadd.f32 %v183_v1, %v175_v29  ;;  %v200_v33 = vpop.permute.xlu1 %199 }
  0x98   : >> { %v224_v34 = vpop.permute.xlu0 %223 }
  0x99   : >> { %v229_v35 = vadd.f32 %v224_v34, %v217_v31  ;;  %v204_v36 = vadd.f32 %v200_v33, %v187_v32 }
  0x9b   : >> { %v240_v37 = vadd.f32 %v235_v53, %v229_v35  ;;  %v218_v38 = vadd.f32 %v730_v19, %v204_v36  ;;  %v226_v40 = vpop.permute.xlu1 %225 }
  0x9c   : >> { %v252_v42 = vpop.permute.xlu0 %251 }
  0x9d   : >> { %v257_v43 = vadd.f32 %v252_v42, %v240_v37  ;;  %v230_v10 = vadd.f32 %v226_v40, %v218_v38 }
  0x9f   : >> { %v271_v41 = vadd.f32 %v742_v39, %v257_v43  ;;  %v241_v44 = vadd.f32 %v237_v5, %v230_v10  ;;  %v254_v45 = vpop.permute.xlu1 %253 }
  0xa0   : >> { %v278_v11 = vpop.permute.xlu0 %277 }
  0xa1   : >> { %v283_v46 = vadd.f32 %v278_v11, %v271_v41  ;;  %v258_v18 = vadd.f32 %v254_v45, %v241_v44 }
  0xa3   : >> { %v294_v47 = vadd.f32 %v289_v58, %v283_v46  ;;  %v272_v48 = vadd.f32 %v748_v49, %v258_v18  ;;  %v280_v50 = vpop.permute.xlu1 %279 }
  0xa4   : >> { %v306_v51 = vpop.permute.xlu0 %305 }
  0xa5   : >> { %v311_v52 = vadd.f32 %v306_v51, %v294_v47  ;;  %v284_v19 = vadd.f32 %v280_v50, %v272_v48 }
  0xa7   : >> { %v325_v53 = vadd.f32 %v323_v12, %v311_v52  ;;  %v295_v54 = vadd.f32 %v291_v6, %v284_v19  ;;  %v308_v55 = vpop.permute.xlu1 %307 }
  0xa8   : >> { %v332_v56 = vpop.permute.xlu0 %331 }
  0xa9   : >> { %v337_v57 = vadd.f32 %v332_v56, %v325_v53  ;;  %v312_v39 = vadd.f32 %v308_v55, %v295_v54 }
  0xab   : >> { %v348_v59 = vadd.f32 %v758_v63, %v337_v57  ;;  %v326_v60 = vadd.f32 %v324_v13, %v312_v39  ;;  %v334_v61 = vpop.permute.xlu1 %333 }
  0xac   : >> { %v360_v62 = vpop.permute.xlu0 %359 }
  0xad   : >> { %v365_v58 = vadd.f32 %v360_v62, %v348_v59  ;;  %v338_v0 = vadd.f32 %v334_v61, %v326_v60 }
  0xaf   : >> { %v539_v49 = vpack.c.bf16 %v365_v58, %v365_v58  ;;  %v349_v1 = vadd.f32 %v345_v14, %v338_v0  ;;  %v362_v2 = vpop.permute.xlu1 %361 }
  0xb1   : >> { %379 = vst.msk [vmem:[%s377_s3] sm:$0xf] %vm378_vm1, %v539_v49  ;;  %v366_v3 = vadd.f32 %v362_v2, %v349_v1  ;;  %146 = sbr.rel (!%p144_p7) target bundleno = 21 (0x15), region = 66 }
  0xb3   : >> { %v540_v4 = vpack.c.bf16 %v366_v3, %v366_v3 }
  0xb5   : >> { %380 = vst.msk [vmem:[%s377_s3 + $0x4] sm:$0xf] %vm378_vm1, %v540_v4 }
  0xb6 PF: > { %s11_s10 = sadd.s32 1, %s643_s10   ;;  %s807_s6 = smov %s635_s8 }
  0xb7   : > { %p8_p8 = scmp.ge.s32.totalorder %s11_s10, 6   ;;  %s808_s7 = smov %s639_s9 }
  0xb8   : > { %s809_s8 = smov %s812_s11  ;;  %s810_s9 = smov %s816_s12 }
  0xb9   :  { %10 = sbr.rel (!%p8_p8) target bundleno = 3 (0x3), region = 77 }

// kernel: discriminator_forward.11
= control target key start
LH: loop header
LB: loop body
LE: loop exit
PB: predicated region body
PF: predicated region fallthrough
CT: control target
= control target key end

     0   :  { %s1601_s12 = smov 0   ;;  %s1603_s13 = smov 0   ;;  %s1927_s0 = inlined_call_operand.vmem [shape: bf16[2,18,18,64], index: 0, kind: input, shape index: {}]   ;;  %s1928_s1 = inlined_call_operand.vmem [shape: bf16[1024,128], index: 1, kind: input, shape index: {}]   ;;  %s1929_s2 = inlined_call_operand.vmem [shape: f32[1,128], index: 2, kind: input, shape index: {}]   ;;  %s1930_s3 = inlined_call_operand.vmem [shape: bf16[2,15,15,128], index: 3, kind: output, shape index: {}]  }
   0x1   :  { %s1605_s14 = smov 0  }
   0x2 LB: > { %s25_s15 = sadd.s32 1, %s1570_s13  ;;  %p1257_p0 = scmp.ge.s32.totalorder %s1574_s14, 1  ;;  %s1574_s14 = sphi %s1605_s14, %s13_s14   ;;  %s1570_s13 = sphi %s1603_s13, %s1932_s13   ;;  %s1566_s12 = sphi %s1601_s12, %s1931_s12  }
   0x3   : > { %p27_p1 = scmp.ge.s32.totalorder %s25_s15, 2  ;;  %p168_p2 = scmp.lt.s32.totalorder %s1574_s14, 3 }
   0x5   : > { %s1934_s15 = smov (%p27_p1, %s25_s15), 0  ;;  %p169_p3 = pnand %p1257_p0, %p168_p2 }
   0x6   : > { %p202_p4 = scmp.lt.s32.totalorder (!%p169_p3), %s1566_s12, 1  ;;  %s1634_s26 = smov (!%p169_p3), 0  }
   0x7   : > { %172 = sbr.rel (%p169_p3) target bundleno = 396 (0x18c), region = 32 }
   0xc   : > { %v1622_v0 = vld [vmem:[%s1929_s2] ss:$0 sm:$0xff]  ;;  %s1936_s12 = smov (!%p202_p4, %s1566_s12), 1 }
   0xd   : > { %s1441_s18 = smul.u32 216, %s1936_s12 }
   0xe   : > { %s1442_s19 = smul.u32 120, %s1936_s12 }
   0xf   : > { %s1627_s22 = scalar_lea.vmem %s1927_s0, %s1441_s18 }
  0x10   : > { %s1632_s25 = scalar_lea.vmem %s1930_s3, %s1442_s19 }
  0x11 LB: >> { %v1484_v1 = vld [vmem:[%s1928_s1 + $0x78] sm:$0xff]   ;;  %s1349_s29 = smul.u32 12, %s1578_s26  ;;  %vm278_vm0 = vsmask.f32 6400  ;;  %v1488_v34 = vld [vmem:[%s1928_s1 + $0x70] sm:$0xff]   ;;  %s1580_s17 = smov 64   ;;  %s1578_s26 = sphi %s1634_s26, %s229_s26  }
  0x12   : >> { %1353 = vmatprep.subr.bf16.mxu0 %v1484_v1  ;;  %v1485_v2 = vld [vmem:[%s1928_s1 + $0xf8] sm:$0xff]   ;;  %v1489_v39 = vld [vmem:[%s1928_s1 + $0xf0] sm:$0xff]   ;;  %v1492_v1 = vld [vmem:[%s1928_s1 + $0x68] sm:$0xff]   ;;  %vm274_vm1 = vcmask 1046528   ;;  %vm395_vm2 = vcmask 523264   ;;  %s1352_s5 = sshll.u32 %s1578_s26, 3 }
  0x13   : >> { %v1486_v3 = vld [vmem:[%s1928_s1 + $0x38] sm:$0xff]   ;;  %s1650_s7 = scalar_lea.vmem %s1627_s22, %s1349_s29  ;;  %1375 = vmatprep.subr.bf16.mxu1 %v1485_v2  ;;  %v1490_v53 = vld [vmem:[%s1928_s1 + $0x30] sm:$0xff]   ;;  %s1120_s6 = scalar_lea.vmem %s1632_s25, %s1352_s5  ;;  %vm1122_vm3 = vcmask 1043456   ;;  %vm1123_vm4 = vsmask.f32 3328 }
  0x14   : >> { %v1487_v4 = vld [vmem:[%s1928_s1 + $0xb8] sm:$0xff]   ;;  %1354 = vmatpush3.bf16.msra.mxu0 %v1486_v3  ;;  %v1656_v5 = vld [vmem:[%s1650_s7 + $0xc] sm:$0xff]   ;;  %v1659_v6 = vld [vmem:[%s1650_s7 + $0x14] ss:$0 sps:$4 sm:$0x11]   ;;  %s229_s26 = sadd.s32 1, %s1578_s26  }
  0x15   : >> { %1376 = vmatpush3.bf16.msra.mxu1 %v1487_v4  ;;  %v1662_v7 = vld [vmem:[%s1650_s7] sm:$0xff]   ;;  %v299_v8 = vshrl.u32 %v1656_v5, 16  ;;  %v301_v9 = vshll.u32 %v1656_v5, 16  ;;  %v317_v10 = vshrl.u32 %v1659_v6, 16  ;;  %v320_v11 = vshll.u32 %v1659_v6, 16  ;;  %v1674_v15 = vld [vmem:[%s1650_s7 + $0x18] sm:$0xff]   ;;  %1355 = vmatprep.subr.bf16.mxu0 %v1488_v34  ;;  %vm1124_vm5 = vmand %vm1122_vm3, %vm1123_vm4 }
  0x16   : >> { %v263_v12 = vshrl.u32 %v1662_v7, 16  ;;  %v265_v13 = vshll.u32 %v1662_v7, 16  ;;  %v1671_v14 = vld [vmem:[%s1650_s7 + $0x8] ss:$0 sps:$4 sm:$0x11]   ;;  %v333_v33 = vshrl.u32 %v1674_v15, 16  ;;  %1377 = vmatprep.subr.bf16.mxu1 %v1489_v39 }
  0x17   : >> { %v313_v16 = vrot.slane %v299_v8, 1  ;;  %v314_v17 = vrot.slane %v301_v9, 2  ;;  %v319_v18 = vrot.slane %v317_v10, 1  ;;  %v322_v19 = vrot.slane %v320_v11, 2  ;;  %v1682_v29 = vld [vmem:[%s1650_s7 + $0x24] sm:$0xff]   ;;  %v1491_v62 = vld [vmem:[%s1928_s1 + $0xb0] sm:$0xff]  }
  0x18   : >> { %v279_v20 = vrot.slane %v263_v12, 1  ;;  %v280_v21 = vrot.slane %v265_v13, 2  ;;  %v283_v22 = vshrl.u32 %v1671_v14, 16  ;;  %v286_v23 = vshll.u32 %v1671_v14, 16  ;;  %1356 = vmatpush3.bf16.msra.mxu0 %v1490_v53  ;;  %v1493_v3 = vld [vmem:[%s1928_s1 + $0xe8] sm:$0xff]   ;;  %v1513_v34 = vld [vmem:[%s1928_s1 + $0xc0] sm:$0xff]  }
  0x19   : >> { %v315_v24 = vor.u32 %v314_v17, %v313_v16  ;;  %v323_v25 = vor.u32 %v322_v19, %v319_v18  ;;  %v303_v26 = vrot.slane %v301_v9, 1  ;;  %v267_v27 = vrot.slane %v265_v13, 1  ;;  %v1679_v28 = vld [vmem:[%s1650_s7 + $0x20] ss:$0 sps:$4 sm:$0x11]   ;;  %1378 = vmatpush3.bf16.msra.mxu1 %v1491_v62  ;;  %1357 = vmatprep.subr.bf16.mxu0 %v1492_v1  ;;  %v1494_v10 = vld [vmem:[%s1928_s1 + $0x28] sm:$0xff]  }
  0x1a   : >> { %v281_v30 = vor.u32 %v280_v21, %v279_v20  ;;  %v285_v31 = vrot.slane %v283_v22, 1  ;;  %v288_v32 = vrot.slane %v286_v23, 2  ;;  %v335_v38 = vshll.u32 %v1674_v15, 16  ;;  %v1697_v44 = vld [vmem:[%s1650_s7 + $0x2c] ss:$0 sps:$4 sm:$0x11]   ;;  %1379 = vmatprep.subr.bf16.mxu1 %v1493_v3 }
  0x1b   : >> { %v324_v35 = vsel %vm278_vm0, %v315_v24, %v323_v25  ;;  %v304_v36 = vor.u32 %v303_v26, %v299_v8  ;;  %v268_v37 = vor.u32 %v267_v27, %v263_v12  ;;  %v347_v41 = vrot.slane %v333_v33, 1  ;;  %v1495_v11 = vld [vmem:[%s1928_s1 + $0xa8] sm:$0xff]   ;;  %v1496_v12 = vld [vmem:[%s1928_s1 + $0x60] sm:$0xff]   ;;  %v1500_v19 = vld [vmem:[%s1928_s1 + $0x58] sm:$0xff]   ;;  %p226_p5 = scmp.ge.s32.totalorder %s229_s26, 15  }
  0x1c   : >> { %325 = vrot.lane.b32.xlu1 %v324_v35, %s1580_s17  ;;  %v289_v40 = vor.u32 %v288_v32, %v285_v31  ;;  %v351_v42 = vshrl.u32 %v1679_v28, 16  ;;  %v354_v43 = vshll.u32 %v1679_v28, 16  ;;  %v348_v45 = vrot.slane %v335_v38, 2  ;;  %1358 = vmatpush3.bf16.msra.mxu0 %v1494_v10  ;;  %v1497_v13 = vld [vmem:[%s1928_s1 + $0xe0] sm:$0xff]   ;;  %v1501_v20 = vld [vmem:[%s1928_s1 + $0xd8] sm:$0xff]   ;;  %v1504_v23 = vld [vmem:[%s1928_s1 + $0x50] sm:$0xff]  }
  0x1d   : >> { %v337_v46 = vrot.slane %v335_v38, 1  ;;  %v367_v47 = vshrl.u32 %v1682_v29, 16  ;;  %v369_v48 = vshll.u32 %v1682_v29, 16  ;;  %v385_v52 = vshrl.u32 %v1697_v44, 16  ;;  %1380 = vmatpush3.bf16.msra.mxu1 %v1495_v11  ;;  %1359 = vmatprep.subr.bf16.mxu0 %v1496_v12  ;;  %v1498_v17 = vld [vmem:[%s1928_s1 + $0x20] sm:$0xff]   ;;  %v1502_v21 = vld [vmem:[%s1928_s1 + $0x18] sm:$0xff]  }
  0x1e   : >> { %v290_v49 = vsel %vm278_vm0, %v281_v30, %v289_v40  ;;  %v353_v50 = vrot.slane %v351_v42, 1  ;;  %v356_v51 = vrot.slane %v354_v43, 2  ;;  %v349_v54 = vor.u32 %v348_v45, %v347_v41  ;;  %1381 = vmatprep.subr.bf16.mxu1 %v1497_v13  ;;  %v1499_v18 = vld [vmem:[%s1928_s1 + $0xa0] sm:$0xff]   ;;  %v1503_v22 = vld [vmem:[%s1928_s1 + $0x98] sm:$0xff]   ;;  %v1505_v24 = vld [vmem:[%s1928_s1 + $0xd0] sm:$0xff]  }
  0x1f   : >> { %291 = vrot.lane.b32.xlu0 %v290_v49, %s1580_s17  ;;  %v338_v55 = vor.u32 %v337_v46, %v333_v33  ;;  %v381_v56 = vrot.slane %v367_v47, 1  ;;  %v382_v57 = vrot.slane %v369_v48, 2  ;;  %v387_v59 = vrot.slane %v385_v52, 1  ;;  %v1506_v25 = vld [vmem:[%s1928_s1 + $0x10] sm:$0xff]   ;;  %v1508_v27 = vld [vmem:[%s1928_s1 + $0x48] sm:$0xff]   ;;  %v1512_v33 = vld [vmem:[%s1928_s1 + $0x40] sm:$0xff]  }
  0x20   : >> { %305 = vrot.lane.b32.xlu1 %v304_v36, %s1580_s17  ;;  %v357_v58 = vor.u32 %v356_v51, %v353_v50  ;;  %v388_v60 = vshll.u32 %v1697_v44, 16  ;;  %v371_v61 = vrot.slane %v369_v48, 1  ;;  %1360 = vmatpush3.bf16.msra.mxu0 %v1498_v17  ;;  %v1507_v26 = vld [vmem:[%s1928_s1 + $0x90] sm:$0xff]   ;;  %v1509_v30 = vld [vmem:[%s1928_s1 + $0xc8] sm:$0xff]   ;;  %v1514_v35 = vld [vmem:[%s1928_s1] sm:$0xff]   ;;  %v310_v39 = vrot.slane %v1656_v5, 1 }
  0x21   : >> { %v383_v2 = vor.u32 %v382_v57, %v381_v56  ;;  %1382 = vmatpush3.bf16.msra.mxu1 %v1499_v18  ;;  %1361 = vmatprep.subr.bf16.mxu0 %v1500_v19  ;;  %v1510_v31 = vld [vmem:[%s1928_s1 + $0x8] sm:$0xff]   ;;  %v1515_v36 = vld [vmem:[%s1928_s1 + $0x80] sm:$0xff]   ;;  %v1517_v38 = vld [vmem:[%s1928_s1 + $0x1f8] sm:$0xff]   ;;  %v311_v40 = vrot.slane %v1659_v6, 1  ;;  %v275_v41 = vrot.slane %v1662_v7, 1  ;;  %v276_v42 = vrot.slane %v1671_v14, 1 }
  0x22   : >> { %v390_v63 = vrot.slane %v388_v60, 2  ;;  %v358_v4 = vsel %vm278_vm0, %v349_v54, %v357_v58  ;;  %v372_v9 = vor.u32 %v371_v61, %v367_v47  ;;  %1383 = vmatprep.subr.bf16.mxu1 %v1501_v20  ;;  %v1511_v32 = vld [vmem:[%s1928_s1 + $0x88] sm:$0xff]   ;;  %v1519_v49 = vld [vmem:[%s1928_s1 + $0x1b8] sm:$0xff]   ;;  %v1521_v14 = vld [vmem:[%s1928_s1 + $0x1f0] sm:$0xff]   ;;  %v344_v52 = vrot.slane %v1674_v15, 1 }
  0x23   : >> { %269 = vrot.lane.b32.xlu0 %v268_v37, %s1580_s17  ;;  %v1516_v37 = vld [vmem:[%s1928_s1 + $0x178] sm:$0xff]   ;;  %v312_v43 = vsel %vm274_vm1, %v310_v39, %v311_v40  ;;  %v277_v46 = vsel %vm274_vm1, %v275_v41, %v276_v42  ;;  %v345_v53 = vrot.slane %v1679_v28, 1  ;;  %v1520_v56 = vld [vmem:[%s1928_s1 + $0x170] sm:$0xff]   ;;  %v1525_v28 = vld [vmem:[%s1928_s1 + $0x1e8] sm:$0xff]   ;;  %v379_v60 = vrot.slane %v1697_v44, 1 }
  0x24   : >> { %339 = vrot.lane.b32.xlu1 %v338_v55, %s1580_s17  ;;  %v391_v8 = vor.u32 %v390_v63, %v387_v59  ;;  %1362 = vmatpush3.bf16.msra.mxu0 %v1502_v21  ;;  %v1518_v54 = vld [vmem:[%s1928_s1 + $0x138] sm:$0xff]   ;;  %v1523_v57 = vld [vmem:[%s1928_s1 + $0x1b0] sm:$0xff]   ;;  %v378_v59 = vrot.slane %v1682_v29, 1  ;;  %v1527_v62 = vld [vmem:[%s1928_s1 + $0x1a8] sm:$0xff]  }
  0x25   : >> { %1384 = vmatpush3.bf16.msra.mxu1 %v1503_v22  ;;  %1363 = vmatprep.subr.bf16.mxu0 %v1504_v23  ;;  %v346_v58 = vsel %vm274_vm1, %v344_v52, %v345_v53  ;;  %v1522_v61 = vld [vmem:[%s1928_s1 + $0x130] sm:$0xff]   ;;  %v1529_v44 = vld [vmem:[%s1928_s1 + $0x1e0] sm:$0xff]   ;;  %v1526_v3 = vld [vmem:[%s1928_s1 + $0x128] sm:$0xff]  }
  0x26   : >> { %v392_v16 = vsel %vm278_vm0, %v383_v2, %v391_v8  ;;  %1385 = vmatprep.subr.bf16.mxu1 %v1505_v24  ;;  %v380_v2 = vsel %vm274_vm1, %v378_v59, %v379_v60  ;;  %v1531_v8 = vld [vmem:[%s1928_s1 + $0x1a0] sm:$0xff]   ;;  %v1533_v10 = vld [vmem:[%s1928_s1 + $0x1d8] sm:$0xff]   ;;  %v1537_v17 = vld [vmem:[%s1928_s1 + $0x1d0] sm:$0xff]  }
  0x27   : >> { %359 = vrot.lane.b32.xlu0 %v358_v4, %s1580_s17  ;;  %v1528_v4 = vld [vmem:[%s1928_s1 + $0x160] sm:$0xff]   ;;  %v1532_v13 = vld [vmem:[%s1928_s1 + $0x158] sm:$0xff]   ;;  %v1536_v19 = vld [vmem:[%s1928_s1 + $0x150] sm:$0xff]  }
  0x28   : >> { %373 = vrot.lane.b32.xlu1 %v372_v9, %s1580_s17  ;;  %1364 = vmatpush3.bf16.msra.mxu0 %v1506_v25  ;;  %v1530_v12 = vld [vmem:[%s1928_s1 + $0x120] sm:$0xff]   ;;  %v1534_v18 = vld [vmem:[%s1928_s1 + $0x118] sm:$0xff]   ;;  %v1539_v20 = vld [vmem:[%s1928_s1 + $0x190] sm:$0xff]  }
  0x29   : >> { %1386 = vmatpush3.bf16.msra.mxu1 %v1507_v26  ;;  %1365 = vmatprep.subr.bf16.mxu0 %v1508_v27  ;;  %v1541_v21 = vld [vmem:[%s1928_s1 + $0x1c8] sm:$0xff]   ;;  %v1538_v22 = vld [vmem:[%s1928_s1 + $0x110] sm:$0xff]   ;;  %v1545_v26 = vld [vmem:[%s1928_s1 + $0x1c0] sm:$0xff]  }
  0x2a   : >> { %1387 = vmatprep.subr.bf16.mxu1 %v1509_v30  ;;  %v1540_v24 = vld [vmem:[%s1928_s1 + $0x148] sm:$0xff]   ;;  %v1544_v30 = vld [vmem:[%s1928_s1 + $0x140] sm:$0xff]  }
  0x2b   : >> { %393 = vrot.lane.b32.xlu0 %v392_v16, %s1580_s17  ;;  %v1535_v16 = vld [vmem:[%s1928_s1 + $0x198] sm:$0xff]   ;;  %v1543_v25 = vld [vmem:[%s1928_s1 + $0x188] sm:$0xff]  }
  0x2c   : >> { %1366 = vmatpush3.bf16.msra.mxu0 %v1510_v31  ;;  %v1542_v27 = vld [vmem:[%s1928_s1 + $0x108] sm:$0xff]   ;;  %v1547_v31 = vld [vmem:[%s1928_s1 + $0x180] sm:$0xff]  }
  0x2d   : >> { %1388 = vmatpush3.bf16.msra.mxu1 %v1511_v32  ;;  %1367 = vmatprep.subr.bf16.mxu0 %v1512_v33  ;;  %v1546_v33 = vld [vmem:[%s1928_s1 + $0x100] sm:$0xff]  }
  0x2e   : >> { %1389 = vmatprep.subr.bf16.mxu1 %v1513_v34 }
  0x30   : >> { %1368 = vmatpush3.bf16.msra.mxu0 %v1514_v35 }
  0x31   : >> { %1390 = vmatpush3.bf16.msra.mxu1 %v1515_v36  ;;  %1397 = vmatprep.subr.bf16.mxu0 %v1516_v37 }
  0x32   : >> { %1419 = vmatprep.subr.bf16.mxu1 %v1517_v38 }
  0x8e   : >> { %v326_v45 = vpop.permute.xlu1 %325 }
  0x8f   : >> { %v408_v47 = vsel %vm395_vm2, %v312_v43, %v326_v45 }
  0x90   : >> { %1015 = vmatprep.mubr.bf16.mxu1 %v408_v47 }
  0x91   : >> { %v292_v48 = vpop.permute.xlu0 %291 }
  0x92   : >> { %v401_v6 = vsel %vm395_vm2, %v277_v46, %v292_v48  ;;  %v306_v50 = vpop.permute.xlu1 %305 }
  0x93   : >> { %974 = vmatprep.mubr.bf16.mxu0 %v401_v6  ;;  %v404_v51 = vsel %vm395_vm2, %v1656_v5, %v306_v50 }
  0x94   : >> { %1016 = vmatmul.mubr.bf16.vlgmr.msra.gmra.mxu1 %v404_v51 }
  0x95   : >> { %v270_v55 = vpop.permute.xlu0 %269  ;;  %1420 = vmatpush3.bf16.msra.mxu1 %v1519_v49 }
  0x96   : >> { %v397_v5 = vsel %vm395_vm2, %v1662_v7, %v270_v55  ;;  %1421 = vmatprep.subr.bf16.mxu1 %v1521_v14  ;;  %v1524_v7 = vld [vmem:[%s1928_s1 + $0x168] sm:$0xff]   ;;  %v340_v23 = vpop.permute.xlu1 %339 }
  0x97   : >> { %975 = vmatmul.mubr.bf16.vlgmr.msra.gmra.mxu0 %v397_v5  ;;  %v411_v35 = vsel %vm395_vm2, %v1674_v15, %v340_v23 }
  0x98   : >> { %1398 = vmatpush3.bf16.msra.mxu0 %v1518_v54 }
  0x99   : >> { %1399 = vmatprep.subr.bf16.mxu0 %v1520_v56  ;;  %1422 = vmatpush3.bf16.msra.mxu1 %v1523_v57  ;;  %v360_v63 = vpop.permute.xlu0 %359 }
  0x9a   : >> { %1423 = vmatprep.subr.bf16.mxu1 %v1525_v28  ;;  %v415_v1 = vsel %vm395_vm2, %v346_v58, %v360_v63  ;;  %v374_v32 = vpop.permute.xlu1 %373 }
  0x9b   : >> { %1056 = vmatprep.mubr.bf16.mxu0 %v415_v1  ;;  %v418_v34 = vsel %vm395_vm2, %v1682_v29, %v374_v32 }
  0x9c   : >> { %1400 = vmatpush3.bf16.msra.mxu0 %v1522_v61 }
  0x9d   : >> { %1401 = vmatprep.subr.bf16.mxu0 %v1524_v7  ;;  %1424 = vmatpush3.bf16.msra.mxu1 %v1527_v62  ;;  %v394_v9 = vpop.permute.xlu0 %393 }
  0x9e   : >> { %1425 = vmatprep.subr.bf16.mxu1 %v1529_v44  ;;  %v422_v11 = vsel %vm395_vm2, %v380_v2, %v394_v9 }
  0x9f   : >> { %1097 = vmatprep.mubr.bf16.mxu1 %v422_v11 }
  0xa0   : >> { %1402 = vmatpush3.bf16.msra.mxu0 %v1526_v3  ;;  %v1125_v3 = vld [vmem:[%s1120_s6 + $0x4] sm:$0xf] }
  0xa1   : >> { %1403 = vmatprep.subr.bf16.mxu0 %v1528_v4  ;;  %1426 = vmatpush3.bf16.msra.mxu1 %v1531_v8 }
  0xa2   : >> { %1427 = vmatprep.subr.bf16.mxu1 %v1533_v10 }
  0xa4   : >> { %1404 = vmatpush3.bf16.msra.mxu0 %v1530_v12 }
  0xa5   : >> { %1405 = vmatprep.subr.bf16.mxu0 %v1532_v13  ;;  %1428 = vmatpush3.bf16.msra.mxu1 %v1535_v16 }
  0xa6   : >> { %1429 = vmatprep.subr.bf16.mxu1 %v1537_v17 }
  0xa8   : >> { %1406 = vmatpush3.bf16.msra.mxu0 %v1534_v18 }
  0xa9   : >> { %1407 = vmatprep.subr.bf16.mxu0 %v1536_v19  ;;  %1430 = vmatpush3.bf16.msra.mxu1 %v1539_v20 }
  0xaa   : >> { %1431 = vmatprep.subr.bf16.mxu1 %v1541_v21 }
  0xac   : >> { %1408 = vmatpush3.bf16.msra.mxu0 %v1538_v22 }
  0xad   : >> { %1409 = vmatprep.subr.bf16.mxu0 %v1540_v24  ;;  %1432 = vmatpush3.bf16.msra.mxu1 %v1543_v25 }
  0xae   : >> { %1433 = vmatprep.subr.bf16.mxu1 %v1545_v26 }
  0xb0   : >> { %1410 = vmatpush3.bf16.msra.mxu0 %v1542_v27 }
  0xb1   : >> { %1411 = vmatprep.subr.bf16.mxu0 %v1544_v30  ;;  %1434 = vmatpush3.bf16.msra.mxu1 %v1547_v31 }
  0xb4   : >> { %1412 = vmatpush3.bf16.msra.mxu0 %v1546_v33  ;;  %1098 = vmatmul.mubr.bf16.vlgmr.msra.gmra.mxu1 %v418_v34 }
  0xb7   : >> { %1057 = vmatmul.mubr.bf16.vlgmr.msra.gmra.mxu0 %v411_v35 }
 0x154   : >> { %v1391_v36 = vpop.f32.mrf.mxu1 }
 0x156   : >> { %v1392_v38 = vpop.f32.mrf.mxu1 }
 0x157   : >> { %v1369_v37 = vpop.f32.mrf.mxu0  ;;  %v1393_v6 = vadd.f32 %v1392_v38, %v1391_v36 }
 0x158   : >> { %v1394_v40 = vpop.f32.mrf.mxu1 }
 0x159   : >> { %v1370_v39 = vpop.f32.mrf.mxu0 }
 0x15a   : >> { %v1371_v42 = vadd.f32 %v1370_v39, %v1369_v37  ;;  %v1395_v43 = vpop.f32.mrf.mxu1 }
 0x15b   : >> { %v1372_v41 = vpop.f32.mrf.mxu0  ;;  %v1396_v54 = vadd.f32 %v1395_v43, %v1394_v40 }
 0x15c   : >> { %v977_v47 = vadd.f32 %v1371_v42, %v1622_v0 }
 0x15d   : >> { %v1373_v45 = vpop.f32.mrf.mxu0 }
 0x15e   : >> { %v1374_v48 = vadd.f32 %v1373_v45, %v1372_v41  ;;  %v1018_v14 = vadd.f32 %v1393_v6, %v977_v47 }
 0x160   : >> { %v980_v51 = vadd.f32 %v1374_v48, %v1622_v0 }
 0x162   : >> { %v1021_v28 = vadd.f32 %v1396_v54, %v980_v51 }
 0x174   : >> { %v1435_v46 = vpop.f32.mrf.mxu1 }
 0x176   : >> { %v1436_v29 = vpop.f32.mrf.mxu1 }
 0x177   : >> { %v1413_v49 = vpop.f32.mrf.mxu0  ;;  %v1437_v56 = vadd.f32 %v1436_v29, %v1435_v46 }
 0x178   : >> { %v1438_v15 = vpop.f32.mrf.mxu1 }
 0x179   : >> { %v1414_v50 = vpop.f32.mrf.mxu0 }
 0x17a   : >> { %v1415_v52 = vadd.f32 %v1414_v50, %v1413_v49  ;;  %v1439_v5 = vpop.f32.mrf.mxu1 }
 0x17b   : >> { %v1416_v53 = vpop.f32.mrf.mxu0  ;;  %v1440_v7 = vadd.f32 %v1439_v5, %v1438_v15 }
 0x17c   : >> { %v1059_v55 = vadd.f32 %v1415_v52, %v1018_v14 }
 0x17d   : >> { %v1417_v57 = vpop.f32.mrf.mxu0 }
 0x17e   : >> { %v1100_v58 = vadd.f32 %v1437_v56, %v1059_v55  ;;  %v1418_v59 = vadd.f32 %v1417_v57, %v1416_v53 }
 0x180   : >> { %v1106_v60 = vmul.f32 0.2, %v1100_v58  ;;  %v1062_v61 = vadd.f32 %v1418_v59, %v1021_v28 }
 0x182   : >> { %v1108_v62 = vmax.f32 %v1100_v58, %v1106_v60  ;;  %v1103_v63 = vadd.f32 %v1440_v7, %v1062_v61 }
 0x184   : >> { %v1350_v44 = vpack.c.bf16 %v1108_v62, %v1108_v62  ;;  %v1107_v1 = vmul.f32 0.2, %v1103_v63 }
 0x186   : >> { %1121 = vst [vmem:[%s1120_s6] sm:$0xf] %v1350_v44  ;;  %v1109_v2 = vmax.f32 %v1103_v63, %v1107_v1 }
 0x187   : > { %228 = sbr.rel (!%p226_p5) target bundleno = 17 (0x11), region = 80 }
 0x188   : >> { %v1351_v4 = vpack.c.bf16 %v1109_v2, %v1109_v2 }
 0x18a   : >> { %v1126_v8 = vsel %vm1124_vm5, %v1351_v4, %v1125_v3 }
 0x18b   : >> { %1127 = vst [vmem:[%s1120_s6 + $0x4] sm:$0xf] %v1126_v8 }
 0x18c PF: > { %s13_s14 = sadd.s32 1, %s1574_s14   ;;  %s1931_s12 = smov %s1570_s13 }
 0x18d   : > { %p10_p6 = scmp.ge.s32.totalorder %s13_s14, 4   ;;  %s1932_s13 = smov %s1934_s15 }
 0x18f   :  { %12 = sbr.rel (!%p10_p6) target bundleno = 2 (0x2), region = 91 }

// kernel: discriminator_forward.12
= control target key start
LH: loop header
LB: loop body
LE: loop exit
PB: predicated region body
PF: predicated region fallthrough
CT: control target
= control target key end

     0   :  { %s537_s6 = smov 0   ;;  %s539_s7 = smov 0   ;;  %s627_s0 = inlined_call_operand.vmem [shape: bf16[2,18,9,256], index: 0, kind: input, shape index: {}]   ;;  %s628_s1 = inlined_call_operand.vmem [shape: bf16[2,8,8,128], index: 1, kind: output, shape index: {}]  }
   0x1   :  { %s541_s8 = smov 0   ;;  %s543_s9 = smov 0  }
   0x2   :  { %s545_s10 = smov 0  }
   0x3 LB: > { %s20_s11 = sadd.s32 1, %s513_s8  ;;  %s23_s12 = sadd.s32 1, %s517_s9  ;;  %s521_s10 = sphi %s545_s10, %s11_s10   ;;  %s517_s9 = sphi %s543_s9, %s632_s9   ;;  %s513_s8 = sphi %s541_s8, %s631_s8   ;;  %s509_s7 = sphi %s539_s7, %s630_s7   ;;  %s505_s6 = sphi %s537_s6, %s629_s6  }
   0x4   : > { %p21_p0 = scmp.ge.s32.totalorder %s20_s11, 2  ;;  %p398_p1 = scmp.ge.s32.totalorder %s521_s10, 1 }
   0x5   : > { %p101_p2 = scmp.lt.s32.totalorder %s521_s10, 5 }
   0x6   : > { %s634_s11 = smov (%p21_p0, %s20_s11), 0  ;;  %s636_s12 = smov (!%p21_p0, %s23_s12), %s517_s9 }
   0x7   : > { %p102_p3 = pnand %p398_p1, %p101_p2  ;;  %p25_p4 = scmp.ge.s32.totalorder %s636_s12, 2 }
   0x8   : > { %p125_p5 = scmp.lt.s32.totalorder (!%p102_p3), %s509_s7, 1  ;;  %s567_s13 = sshll.u32 (!%p102_p3), %s505_s6, 2 }
   0x9   : > { %s638_s12 = smov (%p25_p4, %s636_s12), 0  ;;  %105 = sbr.rel (%p102_p3) target bundleno = 62 (0x3e), region = 24 }
   0xa   : > { %p133_p6 = scmp.lt.s32.totalorder (!%p102_p3), %s567_s13, 7  ;;  %s581_s25 = smov (!%p102_p3), 0  }
   0xe   : > { %s640_s7 = smov (!%p125_p5, %s509_s7), 1 }
   0xf   : > { %s134_s14 = scalar_select %p133_p6, %s567_s13, 7 }
  0x10   : > { %s430_s15 = smul.u32 288, %s640_s7  ;;  %s401_s16 = sshll.u32 %s640_s7, 3 }
  0x11   : > { %s136_s17 = sadd.s32 %s401_s16, %s134_s14 }
  0x12   : > { %s574_s20 = scalar_lea.vmem %s627_s0, %s430_s15  ;;  %s402_s21 = sshll.u32 %s136_s17, 2 }
  0x13   : > { %s579_s24 = scalar_lea.vmem %s628_s1, %s402_s21 }
  0x14 LB: >> { %s147_s26 = sadd.s32 %s525_s25, %s567_s13  ;;  %vm166_vm0 = vcmask 1046528   ;;  %s422_s29 = sshll.u32 %s525_s25, 2  ;;  %s525_s25 = sphi %s581_s25, %s145_s25  }
  0x15   : >> { %s426_s27 = sshll.u32 %s147_s26, 5  ;;  %s279_s30 = scalar_lea.vmem %s579_s24, %s422_s29 }
  0x16   : >> { %s589_s28 = scalar_lea.vmem %s574_s20, %s426_s27  ;;  %s145_s25 = sadd.s32 1, %s525_s25  }
  0x17   : >> { %v152_v0 = vld [vmem:[%s589_s28] sm:$0xff]  ;;  %v153_v1 = vld [vmem:[%s589_s28 + $0x8] sm:$0x11]  ;;  %v410_v2 = vld [vmem:[%s589_s28 + $0x10] sm:$0xff]  ;;  %p142_p7 = scmp.ge.s32.totalorder %s145_s25, 4  }
  0x18   : >> { %v154_v3 = vunpack.c.l.bf16 %v152_v0  ;;  %v155_v4 = vunpack.c.h.bf16 %v152_v0  ;;  %v156_v5 = vunpack.c.l.bf16 %v153_v1  ;;  %v157_v6 = vunpack.c.h.bf16 %v153_v1  ;;  %v411_v7 = vld [vmem:[%s589_s28 + $0x18] sm:$0x11]  ;;  %v415_v25 = vld [vmem:[%s589_s28 + $0x20] sm:$0xff]  ;;  %v416_v26 = vld [vmem:[%s589_s28 + $0x28] sm:$0x11] }
  0x19   : >> { %v187_v8 = vunpack.c.l.bf16 %v410_v2  ;;  %v188_v9 = vunpack.c.h.bf16 %v410_v2  ;;  %v189_v10 = vunpack.c.l.bf16 %v411_v7  ;;  %v190_v11 = vunpack.c.h.bf16 %v411_v7  ;;  %v420_v48 = vld [vmem:[%s589_s28 + $0x30] sm:$0xff]  ;;  %v421_v49 = vld [vmem:[%s589_s28 + $0x38] sm:$0x11] }
  0x1a   : >> { %v158_v12 = vmul.f32 0.015625, %v154_v3  ;;  %v160_v13 = vmul.f32 0.046875, %v155_v4  ;;  %v162_v14 = vmul.f32 0.046875, %v154_v3  ;;  %v163_v15 = vmul.f32 0.046875, %v156_v5 }
  0x1b   : >> { %v172_v16 = vmul.f32 0.015625, %v155_v4  ;;  %v173_v17 = vmul.f32 0.015625, %v157_v6  ;;  %v195_v21 = vmul.f32 0.140625, %v187_v8  ;;  %v196_v24 = vmul.f32 0.140625, %v189_v10 }
  0x1c   : >> { %v161_v18 = vadd.f32 %v160_v13, %v158_v12  ;;  %v167_v19 = vrot.slane %v162_v14, 1  ;;  %v168_v20 = vrot.slane %v163_v15, 1  ;;  %v204_v28 = vmul.f32 0.046875, %v188_v9 }
  0x1d   : >> { %v176_v22 = vrot.slane %v172_v16, 1  ;;  %v177_v23 = vrot.slane %v173_v17, 1  ;;  %v205_v29 = vmul.f32 0.046875, %v190_v11  ;;  %v191_v32 = vmul.f32 0.046875, %v187_v8 }
  0x1e   : >> { %v169_v27 = vsel %vm166_vm0, %v167_v19, %v168_v20  ;;  %v199_v33 = vrot.slane %v195_v21, 1  ;;  %v200_v34 = vrot.slane %v196_v24, 1  ;;  %v219_v35 = vunpack.c.l.bf16 %v415_v25 }
  0x1f   : >> { %v171_v30 = vadd.f32 %v169_v27, %v161_v18  ;;  %v178_v31 = vsel %vm166_vm0, %v176_v22, %v177_v23  ;;  %v221_v36 = vunpack.c.l.bf16 %v416_v26  ;;  %v193_v38 = vmul.f32 0.140625, %v188_v9 }
  0x20   : >> { %v208_v39 = vrot.slane %v204_v28, 1  ;;  %v209_v40 = vrot.slane %v205_v29, 1  ;;  %v220_v41 = vunpack.c.h.bf16 %v415_v25  ;;  %v222_v42 = vunpack.c.h.bf16 %v416_v26 }
  0x21   : >> { %v180_v37 = vadd.f32 %v178_v31, %v171_v30  ;;  %v201_v44 = vsel %vm166_vm0, %v199_v33, %v200_v34  ;;  %v227_v45 = vmul.f32 0.140625, %v219_v35  ;;  %v228_v46 = vmul.f32 0.140625, %v221_v36 }
  0x22   : >> { %v210_v50 = vsel %vm166_vm0, %v208_v39, %v209_v40  ;;  %v236_v51 = vmul.f32 0.046875, %v220_v41  ;;  %v237_v52 = vmul.f32 0.046875, %v222_v42  ;;  %v223_v54 = vmul.f32 0.046875, %v219_v35 }
  0x23   : >> { %v192_v43 = vadd.f32 %v191_v32, %v180_v37  ;;  %v231_v55 = vrot.slane %v227_v45, 1  ;;  %v232_v56 = vrot.slane %v228_v46, 1  ;;  %v251_v57 = vunpack.c.l.bf16 %v420_v48 }
  0x24   : >> { %v253_v58 = vunpack.c.l.bf16 %v421_v49  ;;  %v225_v60 = vmul.f32 0.140625, %v220_v41  ;;  %v240_v61 = vrot.slane %v236_v51, 1  ;;  %v241_v62 = vrot.slane %v237_v52, 1 }
  0x25   : >> { %v194_v47 = vadd.f32 %v193_v38, %v192_v43  ;;  %v252_v63 = vunpack.c.h.bf16 %v420_v48  ;;  %v254_v0 = vunpack.c.h.bf16 %v421_v49  ;;  %v233_v2 = vsel %vm166_vm0, %v231_v55, %v232_v56 }
  0x26   : >> { %v259_v3 = vmul.f32 0.046875, %v251_v57  ;;  %v260_v4 = vmul.f32 0.046875, %v253_v58  ;;  %v242_v6 = vsel %vm166_vm0, %v240_v61, %v241_v62  ;;  %v255_v10 = vmul.f32 0.015625, %v251_v57 }
  0x27   : >> { %v203_v53 = vadd.f32 %v201_v44, %v194_v47  ;;  %v268_v7 = vmul.f32 0.015625, %v252_v63  ;;  %v269_v8 = vmul.f32 0.015625, %v254_v0  ;;  %v257_v14 = vmul.f32 0.046875, %v252_v63 }
  0x28   : >> { %v263_v11 = vrot.slane %v259_v3, 1  ;;  %v264_v12 = vrot.slane %v260_v4, 1 }
  0x29   : >> { %v212_v59 = vadd.f32 %v210_v50, %v203_v53  ;;  %v272_v15 = vrot.slane %v268_v7, 1  ;;  %v273_v16 = vrot.slane %v269_v8, 1 }
  0x2a   : >> { %v265_v18 = vsel %vm166_vm0, %v263_v11, %v264_v12 }
  0x2b   : >> { %v224_v1 = vadd.f32 %v223_v54, %v212_v59  ;;  %v274_v20 = vsel %vm166_vm0, %v272_v15, %v273_v16 }
  0x2d   : >> { %v226_v5 = vadd.f32 %v225_v60, %v224_v1 }
  0x2f   : >> { %v235_v9 = vadd.f32 %v233_v2, %v226_v5 }
  0x31   : >> { %v244_v13 = vadd.f32 %v242_v6, %v235_v9 }
  0x33   : >> { %v256_v17 = vadd.f32 %v255_v10, %v244_v13 }
  0x35   : >> { %v258_v19 = vadd.f32 %v257_v14, %v256_v17 }
  0x37   : >> { %v267_v21 = vadd.f32 %v265_v18, %v258_v19 }
  0x39   : >> { %v276_v22 = vadd.f32 %v274_v20, %v267_v21  ;;  %144 = sbr.rel (!%p142_p7) target bundleno = 20 (0x14), region = 66 }
  0x3b   : >> { %v277_v23 = vpack.c.bf16 %v276_v22, %v276_v22 }
  0x3d   : >> { %280 = vst [vmem:[%s279_s30] sm:$0xf] %v277_v23 }
  0x3e PF: > { %s11_s10 = sadd.s32 1, %s521_s10   ;;  %s629_s6 = smov %s513_s8 }
  0x3f   : > { %p8_p8 = scmp.ge.s32.totalorder %s11_s10, 6   ;;  %s630_s7 = smov %s517_s9 }
  0x40   : > { %s631_s8 = smov %s634_s11  ;;  %s632_s9 = smov %s638_s12 }
  0x41   :  { %10 = sbr.rel (!%p8_p8) target bundleno = 3 (0x3), region = 77 }

// kernel: discriminator_forward.13
= control target key start
LH: loop header
LB: loop body
LE: loop exit
PB: predicated region body
PF: predicated region fallthrough
CT: control target
= control target key end

     0   :  { %s3610_s12 = smov 0   ;;  %s3612_s13 = smov 0   ;;  %s4420_s0 = inlined_call_operand.vmem [shape: bf16[2,10,10,128], index: 0, kind: input, shape index: {}]   ;;  %s4421_s1 = inlined_call_operand.vmem [shape: bf16[2048,256], index: 1, kind: input, shape index: {}]   ;;  %s4422_s2 = inlined_call_operand.vmem [shape: f32[1,256], index: 2, kind: input, shape index: {}]   ;;  %s4423_s3 = inlined_call_operand.vmem [shape: bf16[2,7,7,256], index: 3, kind: output, shape index: {}]  }
   0x1   :  { %s3614_s14 = smov 0   ;;  %s3616_s15 = smov 0  }
   0x2   :  { %s3618_s16 = smov 0   ;;  %s3620_s17 = smov 0  }
   0x3   :  { %s3622_s18 = smov 0   ;;  %s3624_s19 = smov 0  }
   0x4   :  { %s3626_s20 = smov 0  }
   0x5 LB: > { %s2953_s21 = sadd.s32 4294967295, %s3584_s20   ;;  %s22_s22 = sadd.s32 1, %s3576_s18  ;;  %s3584_s20 = sphi %s3626_s20, %s13_s20   ;;  %s3580_s19 = sphi %s3624_s19, %s4432_s19   ;;  %s3576_s18 = sphi %s3622_s18, %s4431_s18   ;;  %s3572_s17 = sphi %s3620_s17, %s4430_s17   ;;  %s3568_s16 = sphi %s3618_s16, %s4429_s16   ;;  %s3564_s15 = sphi %s3616_s15, %s4428_s15   ;;  %s3560_s14 = sphi %s3614_s14, %s4427_s14   ;;  %s3556_s13 = sphi %s3612_s13, %s4426_s13   ;;  %s3552_s12 = sphi %s3610_s12, %s4425_s12  }
   0x6   : > { %p23_p0 = scmp.ge.s32.totalorder %s22_s22, 2  ;;  %s25_s23 = sadd.s32 1, %s3580_s19 }
   0x7   : > { %s58_s24 = sadd.s32 1, %s3564_s15  ;;  %p65_p1 = scmp.ne.s32.totalorder %s3564_s15, %s3560_s14 }
   0x8   : > { %s4434_s22 = smov (%p23_p0, %s22_s22), 0  ;;  %s4436_s23 = smov (!%p23_p0, %s25_s23), %s3580_s19 }
   0x9   : > { %s55_s25 = ssub.s32 %s3576_s18, %s4434_s22  ;;  %p66_p2 = scmp.eq.s32.totalorder %s3584_s20, 0 }
   0xa   : > { %p27_p3 = scmp.ge.s32.totalorder %s4436_s23, 2  ;;  %p56_p4 = scmp.eq.s32.totalorder %s55_s25, 0 }
   0xb   : > { %p67_p5 = por %p66_p2, %p65_p1  ;;  %s112_s26 = sadd.s32 1, %s3556_s13 }
   0xc   : > { %s4438_s23 = smov (%p27_p3, %s4436_s23), 0  ;;  %p122_p6 = scmp.ne.s32.totalorder %s3556_s13, %s3552_s12 }
   0xd   : > { %s3671_s27 = scalar_select %p56_p4, %s3564_s15, %s58_s24  }
   0xe   : > { %s107_s28 = ssub.s32 %s3580_s19, %s4438_s23  ;;  %p123_p7 = scmp.eq.s32.totalorder %s2953_s21, 3 }
   0xf   : > { %s109_s29 = sor.u32 %s107_s28, %s55_s25  ;;  %p2956_p10 = scmp.ge.s32.totalorder %s3584_s20, 4 }
  0x10   : > { %p110_p8 = scmp.eq.s32.totalorder %s109_s29, 0  ;;  %p3677_p9 = por %p123_p7, %p122_p6 }
  0x11   : > { %145 = sbr.rel (%p2956_p10) target bundleno = 196 (0xc4), region = 16 }
  0x12   : > { %s3682_s4 = scalar_select %p110_p8, %s3556_s13, %s112_s26  }
  0x16   : > { %156 = sbr.rel (!%p67_p5) target bundleno = 196 (0xc4), region = 24  ;;  %s158_s5 = sand.u32 (%p67_p5), 1, %s3564_s15  }
  0x17   : > { %s2958_s6 = sshll.u32 (%p67_p5), %s3576_s18, 2  ;;  %s2957_s7 = sshll.u32 (%p67_p5), %s158_s5, 10 }
  0x18   : > { %s3690_s10 = scalar_lea.vmem (%p67_p5), %s4421_s1, %s2958_s6  ;;  %s3694_s11 = scalar_lea.vmem (%p67_p5), [#allocation2], %s2957_s7 }
  0x19   : > { %v179_v0 = vld [vmem:[%s3690_s10] sm:$0xf] (%p67_p5)  ;;  %v181_v1 = vld [vmem:[%s3690_s10 + $0x8] sm:$0xf] (%p67_p5)  ;;  %v183_v2 = vld [vmem:[%s3690_s10 + $0x10] sm:$0xf] (%p67_p5) }
  0x1a   : > { %180 = vst [vmem:[%s3694_s11] sm:$0xf] (%p67_p5), %v179_v0  ;;  %182 = vst [vmem:[%s3694_s11 + $0x4] sm:$0xf] (%p67_p5), %v181_v1  ;;  %v185_v3 = vld [vmem:[%s3690_s10 + $0x18] sm:$0xf] (%p67_p5) }
  0x1b   : > { %v187_v4 = vld [vmem:[%s3690_s10 + $0x20] sm:$0xf]  ;;  %184 = vst [vmem:[%s3694_s11 + $0x8] sm:$0xf] %v183_v2  ;;  %186 = vst [vmem:[%s3694_s11 + $0xc] sm:$0xf] %v185_v3 }
  0x1c   : > { %188 = vst [vmem:[%s3694_s11 + $0x10] sm:$0xf] %v187_v4  ;;  %v189_v5 = vld [vmem:[%s3690_s10 + $0x28] sm:$0xf]  ;;  %v191_v6 = vld [vmem:[%s3690_s10 + $0x30] sm:$0xf] }
  0x1d   : > { %v193_v7 = vld [vmem:[%s3690_s10 + $0x38] sm:$0xf]  ;;  %190 = vst [vmem:[%s3694_s11 + $0x14] sm:$0xf] %v189_v5  ;;  %192 = vst [vmem:[%s3694_s11 + $0x18] sm:$0xf] %v191_v6 }
  0x1e   : > { %194 = vst [vmem:[%s3694_s11 + $0x1c] sm:$0xf] %v193_v7  ;;  %v195_v8 = vld [vmem:[%s3690_s10 + $0x40] sm:$0xf]  ;;  %v197_v9 = vld [vmem:[%s3690_s10 + $0x48] sm:$0xf] }
  0x1f   : > { %v199_v10 = vld [vmem:[%s3690_s10 + $0x50] sm:$0xf]  ;;  %196 = vst [vmem:[%s3694_s11 + $0x20] sm:$0xf] %v195_v8  ;;  %198 = vst [vmem:[%s3694_s11 + $0x24] sm:$0xf] %v197_v9 }
  0x20   : > { %200 = vst [vmem:[%s3694_s11 + $0x28] sm:$0xf] %v199_v10  ;;  %v201_v11 = vld [vmem:[%s3690_s10 + $0x58] sm:$0xf]  ;;  %v203_v12 = vld [vmem:[%s3690_s10 + $0x60] sm:$0xf] }
  0x21   : > { %v205_v13 = vld [vmem:[%s3690_s10 + $0x68] sm:$0xf]  ;;  %202 = vst [vmem:[%s3694_s11 + $0x2c] sm:$0xf] %v201_v11  ;;  %204 = vst [vmem:[%s3694_s11 + $0x30] sm:$0xf] %v203_v12 }
  0x22   : > { %206 = vst [vmem:[%s3694_s11 + $0x34] sm:$0xf] %v205_v13  ;;  %v207_v14 = vld [vmem:[%s3690_s10 + $0x70] sm:$0xf]  ;;  %v209_v15 = vld [vmem:[%s3690_s10 + $0x78] sm:$0xf] }
  0x23   : > { %v211_v16 = vld [vmem:[%s3690_s10 + $0x80] sm:$0xf]  ;;  %208 = vst [vmem:[%s3694_s11 + $0x38] sm:$0xf] %v207_v14  ;;  %210 = vst [vmem:[%s3694_s11 + $0x3c] sm:$0xf] %v209_v15 }
  0x24   : > { %212 = vst [vmem:[%s3694_s11 + $0x40] sm:$0xf] %v211_v16  ;;  %v213_v17 = vld [vmem:[%s3690_s10 + $0x88] sm:$0xf]  ;;  %v215_v18 = vld [vmem:[%s3690_s10 + $0x90] sm:$0xf] }
  0x25   : > { %v217_v19 = vld [vmem:[%s3690_s10 + $0x98] sm:$0xf]  ;;  %214 = vst [vmem:[%s3694_s11 + $0x44] sm:$0xf] %v213_v17  ;;  %216 = vst [vmem:[%s3694_s11 + $0x48] sm:$0xf] %v215_v18 }
  0x26   : > { %218 = vst [vmem:[%s3694_s11 + $0x4c] sm:$0xf] %v217_v19  ;;  %v219_v20 = vld [vmem:[%s3690_s10 + $0xa0] sm:$0xf]  ;;  %v221_v21 = vld [vmem:[%s3690_s10 + $0xa8] sm:$0xf] }
  0x27   : > { %v223_v22 = vld [vmem:[%s3690_s10 + $0xb0] sm:$0xf]  ;;  %220 = vst [vmem:[%s3694_s11 + $0x50] sm:$0xf] %v219_v20  ;;  %222 = vst [vmem:[%s3694_s11 + $0x54] sm:$0xf] %v221_v21 }
  0x28   : > { %224 = vst [vmem:[%s3694_s11 + $0x58] sm:$0xf] %v223_v22  ;;  %v225_v23 = vld [vmem:[%s3690_s10 + $0xb8] sm:$0xf]  ;;  %v227_v24 = vld [vmem:[%s3690_s10 + $0xc0] sm:$0xf] }
  0x29   : > { %v229_v25 = vld [vmem:[%s3690_s10 + $0xc8] sm:$0xf]  ;;  %226 = vst [vmem:[%s3694_s11 + $0x5c] sm:$0xf] %v225_v23  ;;  %228 = vst [vmem:[%s3694_s11 + $0x60] sm:$0xf] %v227_v24 }
  0x2a   : > { %230 = vst [vmem:[%s3694_s11 + $0x64] sm:$0xf] %v229_v25  ;;  %v231_v26 = vld [vmem:[%s3690_s10 + $0xd0] sm:$0xf]  ;;  %v233_v27 = vld [vmem:[%s3690_s10 + $0xd8] sm:$0xf] }
  0x2b   : > { %v235_v28 = vld [vmem:[%s3690_s10 + $0xe0] sm:$0xf]  ;;  %232 = vst [vmem:[%s3694_s11 + $0x68] sm:$0xf] %v231_v26  ;;  %234 = vst [vmem:[%s3694_s11 + $0x6c] sm:$0xf] %v233_v27 }
  0x2c   : > { %236 = vst [vmem:[%s3694_s11 + $0x70] sm:$0xf] %v235_v28  ;;  %v237_v29 = vld [vmem:[%s3690_s10 + $0xe8] sm:$0xf]  ;;  %v239_v30 = vld [vmem:[%s3690_s10 + $0xf0] sm:$0xf] }
  0x2d   : > { %v241_v31 = vld [vmem:[%s3690_s10 + $0xf8] sm:$0xf]  ;;  %238 = vst [vmem:[%s3694_s11 + $0x74] sm:$0xf] %v237_v29  ;;  %240 = vst [vmem:[%s3694_s11 + $0x78] sm:$0xf] %v239_v30 }
  0x2e   : > { %242 = vst [vmem:[%s3694_s11 + $0x7c] sm:$0xf] %v241_v31  ;;  %v243_v32 = vld [vmem:[%s3690_s10 + $0x100] sm:$0xf]  ;;  %v245_v33 = vld [vmem:[%s3690_s10 + $0x108] sm:$0xf] }
  0x2f   : > { %v247_v34 = vld [vmem:[%s3690_s10 + $0x110] sm:$0xf]  ;;  %244 = vst [vmem:[%s3694_s11 + $0x80] sm:$0xf] %v243_v32  ;;  %246 = vst [vmem:[%s3694_s11 + $0x84] sm:$0xf] %v245_v33 }
  0x30   : > { %248 = vst [vmem:[%s3694_s11 + $0x88] sm:$0xf] %v247_v34  ;;  %v249_v35 = vld [vmem:[%s3690_s10 + $0x118] sm:$0xf]  ;;  %v251_v36 = vld [vmem:[%s3690_s10 + $0x120] sm:$0xf] }
  0x31   : > { %v253_v37 = vld [vmem:[%s3690_s10 + $0x128] sm:$0xf]  ;;  %250 = vst [vmem:[%s3694_s11 + $0x8c] sm:$0xf] %v249_v35  ;;  %252 = vst [vmem:[%s3694_s11 + $0x90] sm:$0xf] %v251_v36 }
  0x32   : > { %254 = vst [vmem:[%s3694_s11 + $0x94] sm:$0xf] %v253_v37  ;;  %v255_v38 = vld [vmem:[%s3690_s10 + $0x130] sm:$0xf]  ;;  %v257_v39 = vld [vmem:[%s3690_s10 + $0x138] sm:$0xf] }
  0x33   : > { %v259_v40 = vld [vmem:[%s3690_s10 + $0x140] sm:$0xf]  ;;  %256 = vst [vmem:[%s3694_s11 + $0x98] sm:$0xf] %v255_v38  ;;  %258 = vst [vmem:[%s3694_s11 + $0x9c] sm:$0xf] %v257_v39 }
  0x34   : > { %260 = vst [vmem:[%s3694_s11 + $0xa0] sm:$0xf] %v259_v40  ;;  %v261_v41 = vld [vmem:[%s3690_s10 + $0x148] sm:$0xf]  ;;  %v263_v42 = vld [vmem:[%s3690_s10 + $0x150] sm:$0xf] }
  0x35   : > { %v265_v43 = vld [vmem:[%s3690_s10 + $0x158] sm:$0xf]  ;;  %262 = vst [vmem:[%s3694_s11 + $0xa4] sm:$0xf] %v261_v41  ;;  %264 = vst [vmem:[%s3694_s11 + $0xa8] sm:$0xf] %v263_v42 }
  0x36   : > { %266 = vst [vmem:[%s3694_s11 + $0xac] sm:$0xf] %v265_v43  ;;  %v267_v44 = vld [vmem:[%s3690_s10 + $0x160] sm:$0xf]  ;;  %v269_v45 = vld [vmem:[%s3690_s10 + $0x168] sm:$0xf] }
  0x37   : > { %v271_v46 = vld [vmem:[%s3690_s10 + $0x170] sm:$0xf]  ;;  %268 = vst [vmem:[%s3694_s11 + $0xb0] sm:$0xf] %v267_v44  ;;  %270 = vst [vmem:[%s3694_s11 + $0xb4] sm:$0xf] %v269_v45 }
  0x38   : > { %272 = vst [vmem:[%s3694_s11 + $0xb8] sm:$0xf] %v271_v46  ;;  %v273_v47 = vld [vmem:[%s3690_s10 + $0x178] sm:$0xf]  ;;  %v275_v48 = vld [vmem:[%s3690_s10 + $0x180] sm:$0xf] }
  0x39   : > { %v277_v49 = vld [vmem:[%s3690_s10 + $0x188] sm:$0xf]  ;;  %274 = vst [vmem:[%s3694_s11 + $0xbc] sm:$0xf] %v273_v47  ;;  %276 = vst [vmem:[%s3694_s11 + $0xc0] sm:$0xf] %v275_v48 }
  0x3a   : > { %278 = vst [vmem:[%s3694_s11 + $0xc4] sm:$0xf] %v277_v49  ;;  %v279_v50 = vld [vmem:[%s3690_s10 + $0x190] sm:$0xf]  ;;  %v281_v51 = vld [vmem:[%s3690_s10 + $0x198] sm:$0xf] }
  0x3b   : > { %v283_v52 = vld [vmem:[%s3690_s10 + $0x1a0] sm:$0xf]  ;;  %280 = vst [vmem:[%s3694_s11 + $0xc8] sm:$0xf] %v279_v50  ;;  %282 = vst [vmem:[%s3694_s11 + $0xcc] sm:$0xf] %v281_v51 }
  0x3c   : > { %284 = vst [vmem:[%s3694_s11 + $0xd0] sm:$0xf] %v283_v52  ;;  %v285_v53 = vld [vmem:[%s3690_s10 + $0x1a8] sm:$0xf]  ;;  %v287_v54 = vld [vmem:[%s3690_s10 + $0x1b0] sm:$0xf] }
  0x3d   : > { %v289_v55 = vld [vmem:[%s3690_s10 + $0x1b8] sm:$0xf]  ;;  %286 = vst [vmem:[%s3694_s11 + $0xd4] sm:$0xf] %v285_v53  ;;  %288 = vst [vmem:[%s3694_s11 + $0xd8] sm:$0xf] %v287_v54 }
  0x3e   : > { %290 = vst [vmem:[%s3694_s11 + $0xdc] sm:$0xf] %v289_v55  ;;  %v291_v56 = vld [vmem:[%s3690_s10 + $0x1c0] sm:$0xf]  ;;  %v293_v57 = vld [vmem:[%s3690_s10 + $0x1c8] sm:$0xf] }
  0x3f   : > { %v295_v58 = vld [vmem:[%s3690_s10 + $0x1d0] sm:$0xf]  ;;  %292 = vst [vmem:[%s3694_s11 + $0xe0] sm:$0xf] %v291_v56  ;;  %294 = vst [vmem:[%s3694_s11 + $0xe4] sm:$0xf] %v293_v57 }
  0x40   : > { %296 = vst [vmem:[%s3694_s11 + $0xe8] sm:$0xf] %v295_v58  ;;  %v297_v59 = vld [vmem:[%s3690_s10 + $0x1d8] sm:$0xf]  ;;  %v299_v60 = vld [vmem:[%s3690_s10 + $0x1e0] sm:$0xf] }
  0x41   : > { %v301_v61 = vld [vmem:[%s3690_s10 + $0x1e8] sm:$0xf]  ;;  %298 = vst [vmem:[%s3694_s11 + $0xec] sm:$0xf] %v297_v59  ;;  %300 = vst [vmem:[%s3694_s11 + $0xf0] sm:$0xf] %v299_v60 }
  0x42   : > { %302 = vst [vmem:[%s3694_s11 + $0xf4] sm:$0xf] %v301_v61  ;;  %v303_v62 = vld [vmem:[%s3690_s10 + $0x1f0] sm:$0xf]  ;;  %v305_v63 = vld [vmem:[%s3690_s10 + $0x1f8] sm:$0xf] }
  0x43   : > { %v307_v0 = vld [vmem:[%s3690_s10 + $0x200] sm:$0xf]  ;;  %304 = vst [vmem:[%s3694_s11 + $0xf8] sm:$0xf] %v303_v62  ;;  %306 = vst [vmem:[%s3694_s11 + $0xfc] sm:$0xf] %v305_v63 }
  0x44   : > { %308 = vst [vmem:[%s3694_s11 + $0x100] sm:$0xf] %v307_v0  ;;  %v309_v1 = vld [vmem:[%s3690_s10 + $0x208] sm:$0xf]  ;;  %v311_v2 = vld [vmem:[%s3690_s10 + $0x210] sm:$0xf] }
  0x45   : > { %v313_v3 = vld [vmem:[%s3690_s10 + $0x218] sm:$0xf]  ;;  %310 = vst [vmem:[%s3694_s11 + $0x104] sm:$0xf] %v309_v1  ;;  %312 = vst [vmem:[%s3694_s11 + $0x108] sm:$0xf] %v311_v2 }
  0x46   : > { %314 = vst [vmem:[%s3694_s11 + $0x10c] sm:$0xf] %v313_v3  ;;  %v315_v4 = vld [vmem:[%s3690_s10 + $0x220] sm:$0xf]  ;;  %v317_v5 = vld [vmem:[%s3690_s10 + $0x228] sm:$0xf] }
  0x47   : > { %v319_v6 = vld [vmem:[%s3690_s10 + $0x230] sm:$0xf]  ;;  %316 = vst [vmem:[%s3694_s11 + $0x110] sm:$0xf] %v315_v4  ;;  %318 = vst [vmem:[%s3694_s11 + $0x114] sm:$0xf] %v317_v5 }
  0x48   : > { %320 = vst [vmem:[%s3694_s11 + $0x118] sm:$0xf] %v319_v6  ;;  %v321_v7 = vld [vmem:[%s3690_s10 + $0x238] sm:$0xf]  ;;  %v323_v8 = vld [vmem:[%s3690_s10 + $0x240] sm:$0xf] }
  0x49   : > { %v325_v9 = vld [vmem:[%s3690_s10 + $0x248] sm:$0xf]  ;;  %322 = vst [vmem:[%s3694_s11 + $0x11c] sm:$0xf] %v321_v7  ;;  %324 = vst [vmem:[%s3694_s11 + $0x120] sm:$0xf] %v323_v8 }
  0x4a   : > { %326 = vst [vmem:[%s3694_s11 + $0x124] sm:$0xf] %v325_v9  ;;  %v327_v10 = vld [vmem:[%s3690_s10 + $0x250] sm:$0xf]  ;;  %v329_v11 = vld [vmem:[%s3690_s10 + $0x258] sm:$0xf] }
  0x4b   : > { %v331_v12 = vld [vmem:[%s3690_s10 + $0x260] sm:$0xf]  ;;  %328 = vst [vmem:[%s3694_s11 + $0x128] sm:$0xf] %v327_v10  ;;  %330 = vst [vmem:[%s3694_s11 + $0x12c] sm:$0xf] %v329_v11 }
  0x4c   : > { %332 = vst [vmem:[%s3694_s11 + $0x130] sm:$0xf] %v331_v12  ;;  %v333_v13 = vld [vmem:[%s3690_s10 + $0x268] sm:$0xf]  ;;  %v335_v14 = vld [vmem:[%s3690_s10 + $0x270] sm:$0xf] }
  0x4d   : > { %v337_v15 = vld [vmem:[%s3690_s10 + $0x278] sm:$0xf]  ;;  %334 = vst [vmem:[%s3694_s11 + $0x134] sm:$0xf] %v333_v13  ;;  %336 = vst [vmem:[%s3694_s11 + $0x138] sm:$0xf] %v335_v14 }
  0x4e   : > { %338 = vst [vmem:[%s3694_s11 + $0x13c] sm:$0xf] %v337_v15  ;;  %v339_v16 = vld [vmem:[%s3690_s10 + $0x280] sm:$0xf]  ;;  %v341_v17 = vld [vmem:[%s3690_s10 + $0x288] sm:$0xf] }
  0x4f   : > { %v343_v18 = vld [vmem:[%s3690_s10 + $0x290] sm:$0xf]  ;;  %340 = vst [vmem:[%s3694_s11 + $0x140] sm:$0xf] %v339_v16  ;;  %342 = vst [vmem:[%s3694_s11 + $0x144] sm:$0xf] %v341_v17 }
  0x50   : > { %344 = vst [vmem:[%s3694_s11 + $0x148] sm:$0xf] %v343_v18  ;;  %v345_v19 = vld [vmem:[%s3690_s10 + $0x298] sm:$0xf]  ;;  %v347_v20 = vld [vmem:[%s3690_s10 + $0x2a0] sm:$0xf] }
  0x51   : > { %v349_v21 = vld [vmem:[%s3690_s10 + $0x2a8] sm:$0xf]  ;;  %346 = vst [vmem:[%s3694_s11 + $0x14c] sm:$0xf] %v345_v19  ;;  %348 = vst [vmem:[%s3694_s11 + $0x150] sm:$0xf] %v347_v20 }
  0x52   : > { %350 = vst [vmem:[%s3694_s11 + $0x154] sm:$0xf] %v349_v21  ;;  %v351_v22 = vld [vmem:[%s3690_s10 + $0x2b0] sm:$0xf]  ;;  %v353_v23 = vld [vmem:[%s3690_s10 + $0x2b8] sm:$0xf] }
  0x53   : > { %v355_v24 = vld [vmem:[%s3690_s10 + $0x2c0] sm:$0xf]  ;;  %352 = vst [vmem:[%s3694_s11 + $0x158] sm:$0xf] %v351_v22  ;;  %354 = vst [vmem:[%s3694_s11 + $0x15c] sm:$0xf] %v353_v23 }
  0x54   : > { %356 = vst [vmem:[%s3694_s11 + $0x160] sm:$0xf] %v355_v24  ;;  %v357_v25 = vld [vmem:[%s3690_s10 + $0x2c8] sm:$0xf]  ;;  %v359_v26 = vld [vmem:[%s3690_s10 + $0x2d0] sm:$0xf] }
  0x55   : > { %v361_v27 = vld [vmem:[%s3690_s10 + $0x2d8] sm:$0xf]  ;;  %358 = vst [vmem:[%s3694_s11 + $0x164] sm:$0xf] %v357_v25  ;;  %360 = vst [vmem:[%s3694_s11 + $0x168] sm:$0xf] %v359_v26 }
  0x56   : > { %362 = vst [vmem:[%s3694_s11 + $0x16c] sm:$0xf] %v361_v27  ;;  %v363_v28 = vld [vmem:[%s3690_s10 + $0x2e0] sm:$0xf]  ;;  %v365_v29 = vld [vmem:[%s3690_s10 + $0x2e8] sm:$0xf] }
  0x57   : > { %v367_v30 = vld [vmem:[%s3690_s10 + $0x2f0] sm:$0xf]  ;;  %364 = vst [vmem:[%s3694_s11 + $0x170] sm:$0xf] %v363_v28  ;;  %366 = vst [vmem:[%s3694_s11 + $0x174] sm:$0xf] %v365_v29 }
  0x58   : > { %368 = vst [vmem:[%s3694_s11 + $0x178] sm:$0xf] %v367_v30  ;;  %v369_v31 = vld [vmem:[%s3690_s10 + $0x2f8] sm:$0xf]  ;;  %v371_v32 = vld [vmem:[%s3690_s10 + $0x300] sm:$0xf] }
  0x59   : > { %v373_v33 = vld [vmem:[%s3690_s10 + $0x308] sm:$0xf]  ;;  %370 = vst [vmem:[%s3694_s11 + $0x17c] sm:$0xf] %v369_v31  ;;  %372 = vst [vmem:[%s3694_s11 + $0x180] sm:$0xf] %v371_v32 }
  0x5a   : > { %374 = vst [vmem:[%s3694_s11 + $0x184] sm:$0xf] %v373_v33  ;;  %v375_v34 = vld [vmem:[%s3690_s10 + $0x310] sm:$0xf]  ;;  %v377_v35 = vld [vmem:[%s3690_s10 + $0x318] sm:$0xf] }
  0x5b   : > { %v379_v36 = vld [vmem:[%s3690_s10 + $0x320] sm:$0xf]  ;;  %376 = vst [vmem:[%s3694_s11 + $0x188] sm:$0xf] %v375_v34  ;;  %378 = vst [vmem:[%s3694_s11 + $0x18c] sm:$0xf] %v377_v35 }
  0x5c   : > { %380 = vst [vmem:[%s3694_s11 + $0x190] sm:$0xf] %v379_v36  ;;  %v381_v37 = vld [vmem:[%s3690_s10 + $0x328] sm:$0xf]  ;;  %v383_v38 = vld [vmem:[%s3690_s10 + $0x330] sm:$0xf] }
  0x5d   : > { %v385_v39 = vld [vmem:[%s3690_s10 + $0x338] sm:$0xf]  ;;  %382 = vst [vmem:[%s3694_s11 + $0x194] sm:$0xf] %v381_v37  ;;  %384 = vst [vmem:[%s3694_s11 + $0x198] sm:$0xf] %v383_v38 }
  0x5e   : > { %386 = vst [vmem:[%s3694_s11 + $0x19c] sm:$0xf] %v385_v39  ;;  %v387_v40 = vld [vmem:[%s3690_s10 + $0x340] sm:$0xf]  ;;  %v389_v41 = vld [vmem:[%s3690_s10 + $0x348] sm:$0xf] }
  0x5f   : > { %v391_v42 = vld [vmem:[%s3690_s10 + $0x350] sm:$0xf]  ;;  %388 = vst [vmem:[%s3694_s11 + $0x1a0] sm:$0xf] %v387_v40  ;;  %390 = vst [vmem:[%s3694_s11 + $0x1a4] sm:$0xf] %v389_v41 }
  0x60   : > { %392 = vst [vmem:[%s3694_s11 + $0x1a8] sm:$0xf] %v391_v42  ;;  %v393_v43 = vld [vmem:[%s3690_s10 + $0x358] sm:$0xf]  ;;  %v395_v44 = vld [vmem:[%s3690_s10 + $0x360] sm:$0xf] }
  0x61   : > { %v397_v45 = vld [vmem:[%s3690_s10 + $0x368] sm:$0xf]  ;;  %394 = vst [vmem:[%s3694_s11 + $0x1ac] sm:$0xf] %v393_v43  ;;  %396 = vst [vmem:[%s3694_s11 + $0x1b0] sm:$0xf] %v395_v44 }
  0x62   : > { %398 = vst [vmem:[%s3694_s11 + $0x1b4] sm:$0xf] %v397_v45  ;;  %v399_v46 = vld [vmem:[%s3690_s10 + $0x370] sm:$0xf]  ;;  %v401_v47 = vld [vmem:[%s3690_s10 + $0x378] sm:$0xf] }
  0x63   : > { %v403_v48 = vld [vmem:[%s3690_s10 + $0x380] sm:$0xf]  ;;  %400 = vst [vmem:[%s3694_s11 + $0x1b8] sm:$0xf] %v399_v46  ;;  %402 = vst [vmem:[%s3694_s11 + $0x1bc] sm:$0xf] %v401_v47 }
  0x64   : > { %404 = vst [vmem:[%s3694_s11 + $0x1c0] sm:$0xf] %v403_v48  ;;  %v405_v49 = vld [vmem:[%s3690_s10 + $0x388] sm:$0xf]  ;;  %v407_v50 = vld [vmem:[%s3690_s10 + $0x390] sm:$0xf] }
  0x65   : > { %v409_v51 = vld [vmem:[%s3690_s10 + $0x398] sm:$0xf]  ;;  %406 = vst [vmem:[%s3694_s11 + $0x1c4] sm:$0xf] %v405_v49  ;;  %408 = vst [vmem:[%s3694_s11 + $0x1c8] sm:$0xf] %v407_v50 }
  0x66   : > { %410 = vst [vmem:[%s3694_s11 + $0x1cc] sm:$0xf] %v409_v51  ;;  %v411_v52 = vld [vmem:[%s3690_s10 + $0x3a0] sm:$0xf]  ;;  %v413_v53 = vld [vmem:[%s3690_s10 + $0x3a8] sm:$0xf] }
  0x67   : > { %v415_v54 = vld [vmem:[%s3690_s10 + $0x3b0] sm:$0xf]  ;;  %412 = vst [vmem:[%s3694_s11 + $0x1d0] sm:$0xf] %v411_v52  ;;  %414 = vst [vmem:[%s3694_s11 + $0x1d4] sm:$0xf] %v413_v53 }
  0x68   : > { %416 = vst [vmem:[%s3694_s11 + $0x1d8] sm:$0xf] %v415_v54  ;;  %v417_v55 = vld [vmem:[%s3690_s10 + $0x3b8] sm:$0xf]  ;;  %v419_v56 = vld [vmem:[%s3690_s10 + $0x3c0] sm:$0xf] }
  0x69   : > { %v421_v57 = vld [vmem:[%s3690_s10 + $0x3c8] sm:$0xf]  ;;  %418 = vst [vmem:[%s3694_s11 + $0x1dc] sm:$0xf] %v417_v55  ;;  %420 = vst [vmem:[%s3694_s11 + $0x1e0] sm:$0xf] %v419_v56 }
  0x6a   : > { %422 = vst [vmem:[%s3694_s11 + $0x1e4] sm:$0xf] %v421_v57  ;;  %v423_v58 = vld [vmem:[%s3690_s10 + $0x3d0] sm:$0xf]  ;;  %v425_v59 = vld [vmem:[%s3690_s10 + $0x3d8] sm:$0xf] }
  0x6b   : > { %v427_v60 = vld [vmem:[%s3690_s10 + $0x3e0] sm:$0xf]  ;;  %424 = vst [vmem:[%s3694_s11 + $0x1e8] sm:$0xf] %v423_v58  ;;  %426 = vst [vmem:[%s3694_s11 + $0x1ec] sm:$0xf] %v425_v59 }
  0x6c   : > { %428 = vst [vmem:[%s3694_s11 + $0x1f0] sm:$0xf] %v427_v60  ;;  %v429_v61 = vld [vmem:[%s3690_s10 + $0x3e8] sm:$0xf]  ;;  %v431_v62 = vld [vmem:[%s3690_s10 + $0x3f0] sm:$0xf] }
  0x6d   : > { %v433_v63 = vld [vmem:[%s3690_s10 + $0x3f8] sm:$0xf]  ;;  %430 = vst [vmem:[%s3694_s11 + $0x1f4] sm:$0xf] %v429_v61  ;;  %432 = vst [vmem:[%s3694_s11 + $0x1f8] sm:$0xf] %v431_v62 }
  0x6e   : > { %434 = vst [vmem:[%s3694_s11 + $0x1fc] sm:$0xf] %v433_v63  ;;  %v435_v0 = vld [vmem:[%s3690_s10 + $0x400] sm:$0xf]  ;;  %v437_v1 = vld [vmem:[%s3690_s10 + $0x408] sm:$0xf] }
  0x6f   : > { %v439_v2 = vld [vmem:[%s3690_s10 + $0x410] sm:$0xf]  ;;  %436 = vst [vmem:[%s3694_s11 + $0x200] sm:$0xf] %v435_v0  ;;  %438 = vst [vmem:[%s3694_s11 + $0x204] sm:$0xf] %v437_v1 }
  0x70   : > { %440 = vst [vmem:[%s3694_s11 + $0x208] sm:$0xf] %v439_v2  ;;  %v441_v3 = vld [vmem:[%s3690_s10 + $0x418] sm:$0xf]  ;;  %v443_v4 = vld [vmem:[%s3690_s10 + $0x420] sm:$0xf] }
  0x71   : > { %v445_v5 = vld [vmem:[%s3690_s10 + $0x428] sm:$0xf]  ;;  %442 = vst [vmem:[%s3694_s11 + $0x20c] sm:$0xf] %v441_v3  ;;  %444 = vst [vmem:[%s3694_s11 + $0x210] sm:$0xf] %v443_v4 }
  0x72   : > { %446 = vst [vmem:[%s3694_s11 + $0x214] sm:$0xf] %v445_v5  ;;  %v447_v6 = vld [vmem:[%s3690_s10 + $0x430] sm:$0xf]  ;;  %v449_v7 = vld [vmem:[%s3690_s10 + $0x438] sm:$0xf] }
  0x73   : > { %v451_v8 = vld [vmem:[%s3690_s10 + $0x440] sm:$0xf]  ;;  %448 = vst [vmem:[%s3694_s11 + $0x218] sm:$0xf] %v447_v6  ;;  %450 = vst [vmem:[%s3694_s11 + $0x21c] sm:$0xf] %v449_v7 }
  0x74   : > { %452 = vst [vmem:[%s3694_s11 + $0x220] sm:$0xf] %v451_v8  ;;  %v453_v9 = vld [vmem:[%s3690_s10 + $0x448] sm:$0xf]  ;;  %v455_v10 = vld [vmem:[%s3690_s10 + $0x450] sm:$0xf] }
  0x75   : > { %v457_v11 = vld [vmem:[%s3690_s10 + $0x458] sm:$0xf]  ;;  %454 = vst [vmem:[%s3694_s11 + $0x224] sm:$0xf] %v453_v9  ;;  %456 = vst [vmem:[%s3694_s11 + $0x228] sm:$0xf] %v455_v10 }
  0x76   : > { %458 = vst [vmem:[%s3694_s11 + $0x22c] sm:$0xf] %v457_v11  ;;  %v459_v12 = vld [vmem:[%s3690_s10 + $0x460] sm:$0xf]  ;;  %v461_v13 = vld [vmem:[%s3690_s10 + $0x468] sm:$0xf] }
  0x77   : > { %v463_v14 = vld [vmem:[%s3690_s10 + $0x470] sm:$0xf]  ;;  %460 = vst [vmem:[%s3694_s11 + $0x230] sm:$0xf] %v459_v12  ;;  %462 = vst [vmem:[%s3694_s11 + $0x234] sm:$0xf] %v461_v13 }
  0x78   : > { %464 = vst [vmem:[%s3694_s11 + $0x238] sm:$0xf] %v463_v14  ;;  %v465_v15 = vld [vmem:[%s3690_s10 + $0x478] sm:$0xf]  ;;  %v467_v16 = vld [vmem:[%s3690_s10 + $0x480] sm:$0xf] }
  0x79   : > { %v469_v17 = vld [vmem:[%s3690_s10 + $0x488] sm:$0xf]  ;;  %466 = vst [vmem:[%s3694_s11 + $0x23c] sm:$0xf] %v465_v15  ;;  %468 = vst [vmem:[%s3694_s11 + $0x240] sm:$0xf] %v467_v16 }
  0x7a   : > { %470 = vst [vmem:[%s3694_s11 + $0x244] sm:$0xf] %v469_v17  ;;  %v471_v18 = vld [vmem:[%s3690_s10 + $0x490] sm:$0xf]  ;;  %v473_v19 = vld [vmem:[%s3690_s10 + $0x498] sm:$0xf] }
  0x7b   : > { %v475_v20 = vld [vmem:[%s3690_s10 + $0x4a0] sm:$0xf]  ;;  %472 = vst [vmem:[%s3694_s11 + $0x248] sm:$0xf] %v471_v18  ;;  %474 = vst [vmem:[%s3694_s11 + $0x24c] sm:$0xf] %v473_v19 }
  0x7c   : > { %476 = vst [vmem:[%s3694_s11 + $0x250] sm:$0xf] %v475_v20  ;;  %v477_v21 = vld [vmem:[%s3690_s10 + $0x4a8] sm:$0xf]  ;;  %v479_v22 = vld [vmem:[%s3690_s10 + $0x4b0] sm:$0xf] }
  0x7d   : > { %v481_v23 = vld [vmem:[%s3690_s10 + $0x4b8] sm:$0xf]  ;;  %478 = vst [vmem:[%s3694_s11 + $0x254] sm:$0xf] %v477_v21  ;;  %480 = vst [vmem:[%s3694_s11 + $0x258] sm:$0xf] %v479_v22 }
  0x7e   : > { %482 = vst [vmem:[%s3694_s11 + $0x25c] sm:$0xf] %v481_v23  ;;  %v483_v24 = vld [vmem:[%s3690_s10 + $0x4c0] sm:$0xf]  ;;  %v485_v25 = vld [vmem:[%s3690_s10 + $0x4c8] sm:$0xf] }
  0x7f   : > { %v487_v26 = vld [vmem:[%s3690_s10 + $0x4d0] sm:$0xf]  ;;  %484 = vst [vmem:[%s3694_s11 + $0x260] sm:$0xf] %v483_v24  ;;  %486 = vst [vmem:[%s3694_s11 + $0x264] sm:$0xf] %v485_v25 }
  0x80   : > { %488 = vst [vmem:[%s3694_s11 + $0x268] sm:$0xf] %v487_v26  ;;  %v489_v27 = vld [vmem:[%s3690_s10 + $0x4d8] sm:$0xf]  ;;  %v491_v28 = vld [vmem:[%s3690_s10 + $0x4e0] sm:$0xf] }
  0x81   : > { %v493_v29 = vld [vmem:[%s3690_s10 + $0x4e8] sm:$0xf]  ;;  %490 = vst [vmem:[%s3694_s11 + $0x26c] sm:$0xf] %v489_v27  ;;  %492 = vst [vmem:[%s3694_s11 + $0x270] sm:$0xf] %v491_v28 }
  0x82   : > { %494 = vst [vmem:[%s3694_s11 + $0x274] sm:$0xf] %v493_v29  ;;  %v495_v30 = vld [vmem:[%s3690_s10 + $0x4f0] sm:$0xf]  ;;  %v497_v31 = vld [vmem:[%s3690_s10 + $0x4f8] sm:$0xf] }
  0x83   : > { %v499_v32 = vld [vmem:[%s3690_s10 + $0x500] sm:$0xf]  ;;  %496 = vst [vmem:[%s3694_s11 + $0x278] sm:$0xf] %v495_v30  ;;  %498 = vst [vmem:[%s3694_s11 + $0x27c] sm:$0xf] %v497_v31 }
  0x84   : > { %500 = vst [vmem:[%s3694_s11 + $0x280] sm:$0xf] %v499_v32  ;;  %v501_v33 = vld [vmem:[%s3690_s10 + $0x508] sm:$0xf]  ;;  %v503_v34 = vld [vmem:[%s3690_s10 + $0x510] sm:$0xf] }
  0x85   : > { %v505_v35 = vld [vmem:[%s3690_s10 + $0x518] sm:$0xf]  ;;  %502 = vst [vmem:[%s3694_s11 + $0x284] sm:$0xf] %v501_v33  ;;  %504 = vst [vmem:[%s3694_s11 + $0x288] sm:$0xf] %v503_v34 }
  0x86   : > { %506 = vst [vmem:[%s3694_s11 + $0x28c] sm:$0xf] %v505_v35  ;;  %v507_v36 = vld [vmem:[%s3690_s10 + $0x520] sm:$0xf]  ;;  %v509_v37 = vld [vmem:[%s3690_s10 + $0x528] sm:$0xf] }
  0x87   : > { %v511_v38 = vld [vmem:[%s3690_s10 + $0x530] sm:$0xf]  ;;  %508 = vst [vmem:[%s3694_s11 + $0x290] sm:$0xf] %v507_v36  ;;  %510 = vst [vmem:[%s3694_s11 + $0x294] sm:$0xf] %v509_v37 }
  0x88   : > { %512 = vst [vmem:[%s3694_s11 + $0x298] sm:$0xf] %v511_v38  ;;  %v513_v39 = vld [vmem:[%s3690_s10 + $0x538] sm:$0xf]  ;;  %v515_v40 = vld [vmem:[%s3690_s10 + $0x540] sm:$0xf] }
  0x89   : > { %v517_v41 = vld [vmem:[%s3690_s10 + $0x548] sm:$0xf]  ;;  %514 = vst [vmem:[%s3694_s11 + $0x29c] sm:$0xf] %v513_v39  ;;  %516 = vst [vmem:[%s3694_s11 + $0x2a0] sm:$0xf] %v515_v40 }
  0x8a   : > { %518 = vst [vmem:[%s3694_s11 + $0x2a4] sm:$0xf] %v517_v41  ;;  %v519_v42 = vld [vmem:[%s3690_s10 + $0x550] sm:$0xf]  ;;  %v521_v43 = vld [vmem:[%s3690_s10 + $0x558] sm:$0xf] }
  0x8b   : > { %v523_v44 = vld [vmem:[%s3690_s10 + $0x560] sm:$0xf]  ;;  %520 = vst [vmem:[%s3694_s11 + $0x2a8] sm:$0xf] %v519_v42  ;;  %522 = vst [vmem:[%s3694_s11 + $0x2ac] sm:$0xf] %v521_v43 }
  0x8c   : > { %524 = vst [vmem:[%s3694_s11 + $0x2b0] sm:$0xf] %v523_v44  ;;  %v525_v45 = vld [vmem:[%s3690_s10 + $0x568] sm:$0xf]  ;;  %v527_v46 = vld [vmem:[%s3690_s10 + $0x570] sm:$0xf] }
  0x8d   : > { %v529_v47 = vld [vmem:[%s3690_s10 + $0x578] sm:$0xf]  ;;  %526 = vst [vmem:[%s3694_s11 + $0x2b4] sm:$0xf] %v525_v45  ;;  %528 = vst [vmem:[%s3694_s11 + $0x2b8] sm:$0xf] %v527_v46 }
  0x8e   : > { %530 = vst [vmem:[%s3694_s11 + $0x2bc] sm:$0xf] %v529_v47  ;;  %v531_v48 = vld [vmem:[%s3690_s10 + $0x580] sm:$0xf]  ;;  %v533_v49 = vld [vmem:[%s3690_s10 + $0x588] sm:$0xf] }
  0x8f   : > { %v535_v50 = vld [vmem:[%s3690_s10 + $0x590] sm:$0xf]  ;;  %532 = vst [vmem:[%s3694_s11 + $0x2c0] sm:$0xf] %v531_v48  ;;  %534 = vst [vmem:[%s3694_s11 + $0x2c4] sm:$0xf] %v533_v49 }
  0x90   : > { %536 = vst [vmem:[%s3694_s11 + $0x2c8] sm:$0xf] %v535_v50  ;;  %v537_v51 = vld [vmem:[%s3690_s10 + $0x598] sm:$0xf]  ;;  %v539_v52 = vld [vmem:[%s3690_s10 + $0x5a0] sm:$0xf] }
  0x91   : > { %v541_v53 = vld [vmem:[%s3690_s10 + $0x5a8] sm:$0xf]  ;;  %538 = vst [vmem:[%s3694_s11 + $0x2cc] sm:$0xf] %v537_v51  ;;  %540 = vst [vmem:[%s3694_s11 + $0x2d0] sm:$0xf] %v539_v52 }
  0x92   : > { %542 = vst [vmem:[%s3694_s11 + $0x2d4] sm:$0xf] %v541_v53  ;;  %v543_v54 = vld [vmem:[%s3690_s10 + $0x5b0] sm:$0xf]  ;;  %v545_v55 = vld [vmem:[%s3690_s10 + $0x5b8] sm:$0xf] }
  0x93   : > { %v547_v56 = vld [vmem:[%s3690_s10 + $0x5c0] sm:$0xf]  ;;  %544 = vst [vmem:[%s3694_s11 + $0x2d8] sm:$0xf] %v543_v54  ;;  %546 = vst [vmem:[%s3694_s11 + $0x2dc] sm:$0xf] %v545_v55 }
  0x94   : > { %548 = vst [vmem:[%s3694_s11 + $0x2e0] sm:$0xf] %v547_v56  ;;  %v549_v57 = vld [vmem:[%s3690_s10 + $0x5c8] sm:$0xf]  ;;  %v551_v58 = vld [vmem:[%s3690_s10 + $0x5d0] sm:$0xf] }
  0x95   : > { %v553_v59 = vld [vmem:[%s3690_s10 + $0x5d8] sm:$0xf]  ;;  %550 = vst [vmem:[%s3694_s11 + $0x2e4] sm:$0xf] %v549_v57  ;;  %552 = vst [vmem:[%s3694_s11 + $0x2e8] sm:$0xf] %v551_v58 }
  0x96   : > { %554 = vst [vmem:[%s3694_s11 + $0x2ec] sm:$0xf] %v553_v59  ;;  %v555_v60 = vld [vmem:[%s3690_s10 + $0x5e0] sm:$0xf]  ;;  %v557_v61 = vld [vmem:[%s3690_s10 + $0x5e8] sm:$0xf] }
  0x97   : > { %v559_v62 = vld [vmem:[%s3690_s10 + $0x5f0] sm:$0xf]  ;;  %556 = vst [vmem:[%s3694_s11 + $0x2f0] sm:$0xf] %v555_v60  ;;  %558 = vst [vmem:[%s3694_s11 + $0x2f4] sm:$0xf] %v557_v61 }
  0x98   : > { %560 = vst [vmem:[%s3694_s11 + $0x2f8] sm:$0xf] %v559_v62  ;;  %v561_v63 = vld [vmem:[%s3690_s10 + $0x5f8] sm:$0xf]  ;;  %v563_v0 = vld [vmem:[%s3690_s10 + $0x600] sm:$0xf] }
  0x99   : > { %v565_v1 = vld [vmem:[%s3690_s10 + $0x608] sm:$0xf]  ;;  %562 = vst [vmem:[%s3694_s11 + $0x2fc] sm:$0xf] %v561_v63  ;;  %564 = vst [vmem:[%s3694_s11 + $0x300] sm:$0xf] %v563_v0 }
  0x9a   : > { %566 = vst [vmem:[%s3694_s11 + $0x304] sm:$0xf] %v565_v1  ;;  %v567_v2 = vld [vmem:[%s3690_s10 + $0x610] sm:$0xf]  ;;  %v569_v3 = vld [vmem:[%s3690_s10 + $0x618] sm:$0xf] }
  0x9b   : > { %v571_v4 = vld [vmem:[%s3690_s10 + $0x620] sm:$0xf]  ;;  %568 = vst [vmem:[%s3694_s11 + $0x308] sm:$0xf] %v567_v2  ;;  %570 = vst [vmem:[%s3694_s11 + $0x30c] sm:$0xf] %v569_v3 }
  0x9c   : > { %572 = vst [vmem:[%s3694_s11 + $0x310] sm:$0xf] %v571_v4  ;;  %v573_v5 = vld [vmem:[%s3690_s10 + $0x628] sm:$0xf]  ;;  %v575_v6 = vld [vmem:[%s3690_s10 + $0x630] sm:$0xf] }
  0x9d   : > { %v577_v7 = vld [vmem:[%s3690_s10 + $0x638] sm:$0xf]  ;;  %574 = vst [vmem:[%s3694_s11 + $0x314] sm:$0xf] %v573_v5  ;;  %576 = vst [vmem:[%s3694_s11 + $0x318] sm:$0xf] %v575_v6 }
  0x9e   : > { %578 = vst [vmem:[%s3694_s11 + $0x31c] sm:$0xf] %v577_v7  ;;  %v579_v8 = vld [vmem:[%s3690_s10 + $0x640] sm:$0xf]  ;;  %v581_v9 = vld [vmem:[%s3690_s10 + $0x648] sm:$0xf] }
  0x9f   : > { %v583_v10 = vld [vmem:[%s3690_s10 + $0x650] sm:$0xf]  ;;  %580 = vst [vmem:[%s3694_s11 + $0x320] sm:$0xf] %v579_v8  ;;  %582 = vst [vmem:[%s3694_s11 + $0x324] sm:$0xf] %v581_v9 }
  0xa0   : > { %584 = vst [vmem:[%s3694_s11 + $0x328] sm:$0xf] %v583_v10  ;;  %v585_v11 = vld [vmem:[%s3690_s10 + $0x658] sm:$0xf]  ;;  %v587_v12 = vld [vmem:[%s3690_s10 + $0x660] sm:$0xf] }
  0xa1   : > { %v589_v13 = vld [vmem:[%s3690_s10 + $0x668] sm:$0xf]  ;;  %586 = vst [vmem:[%s3694_s11 + $0x32c] sm:$0xf] %v585_v11  ;;  %588 = vst [vmem:[%s3694_s11 + $0x330] sm:$0xf] %v587_v12 }
  0xa2   : > { %590 = vst [vmem:[%s3694_s11 + $0x334] sm:$0xf] %v589_v13  ;;  %v591_v14 = vld [vmem:[%s3690_s10 + $0x670] sm:$0xf]  ;;  %v593_v15 = vld [vmem:[%s3690_s10 + $0x678] sm:$0xf] }
  0xa3   : > { %v595_v16 = vld [vmem:[%s3690_s10 + $0x680] sm:$0xf]  ;;  %592 = vst [vmem:[%s3694_s11 + $0x338] sm:$0xf] %v591_v14  ;;  %594 = vst [vmem:[%s3694_s11 + $0x33c] sm:$0xf] %v593_v15 }
  0xa4   : > { %596 = vst [vmem:[%s3694_s11 + $0x340] sm:$0xf] %v595_v16  ;;  %v597_v17 = vld [vmem:[%s3690_s10 + $0x688] sm:$0xf]  ;;  %v599_v18 = vld [vmem:[%s3690_s10 + $0x690] sm:$0xf] }
  0xa5   : > { %v601_v19 = vld [vmem:[%s3690_s10 + $0x698] sm:$0xf]  ;;  %598 = vst [vmem:[%s3694_s11 + $0x344] sm:$0xf] %v597_v17  ;;  %600 = vst [vmem:[%s3694_s11 + $0x348] sm:$0xf] %v599_v18 }
  0xa6   : > { %602 = vst [vmem:[%s3694_s11 + $0x34c] sm:$0xf] %v601_v19  ;;  %v603_v20 = vld [vmem:[%s3690_s10 + $0x6a0] sm:$0xf]  ;;  %v605_v21 = vld [vmem:[%s3690_s10 + $0x6a8] sm:$0xf] }
  0xa7   : > { %v607_v22 = vld [vmem:[%s3690_s10 + $0x6b0] sm:$0xf]  ;;  %604 = vst [vmem:[%s3694_s11 + $0x350] sm:$0xf] %v603_v20  ;;  %606 = vst [vmem:[%s3694_s11 + $0x354] sm:$0xf] %v605_v21 }
  0xa8   : > { %608 = vst [vmem:[%s3694_s11 + $0x358] sm:$0xf] %v607_v22  ;;  %v609_v23 = vld [vmem:[%s3690_s10 + $0x6b8] sm:$0xf]  ;;  %v611_v24 = vld [vmem:[%s3690_s10 + $0x6c0] sm:$0xf] }
  0xa9   : > { %v613_v25 = vld [vmem:[%s3690_s10 + $0x6c8] sm:$0xf]  ;;  %610 = vst [vmem:[%s3694_s11 + $0x35c] sm:$0xf] %v609_v23  ;;  %612 = vst [vmem:[%s3694_s11 + $0x360] sm:$0xf] %v611_v24 }
  0xaa   : > { %614 = vst [vmem:[%s3694_s11 + $0x364] sm:$0xf] %v613_v25  ;;  %v615_v26 = vld [vmem:[%s3690_s10 + $0x6d0] sm:$0xf]  ;;  %v617_v27 = vld [vmem:[%s3690_s10 + $0x6d8] sm:$0xf] }
  0xab   : > { %v619_v28 = vld [vmem:[%s3690_s10 + $0x6e0] sm:$0xf]  ;;  %616 = vst [vmem:[%s3694_s11 + $0x368] sm:$0xf] %v615_v26  ;;  %618 = vst [vmem:[%s3694_s11 + $0x36c] sm:$0xf] %v617_v27 }
  0xac   : > { %620 = vst [vmem:[%s3694_s11 + $0x370] sm:$0xf] %v619_v28  ;;  %v621_v29 = vld [vmem:[%s3690_s10 + $0x6e8] sm:$0xf]  ;;  %v623_v30 = vld [vmem:[%s3690_s10 + $0x6f0] sm:$0xf] }
  0xad   : > { %v625_v31 = vld [vmem:[%s3690_s10 + $0x6f8] sm:$0xf]  ;;  %622 = vst [vmem:[%s3694_s11 + $0x374] sm:$0xf] %v621_v29  ;;  %624 = vst [vmem:[%s3694_s11 + $0x378] sm:$0xf] %v623_v30 }
  0xae   : > { %626 = vst [vmem:[%s3694_s11 + $0x37c] sm:$0xf] %v625_v31  ;;  %v627_v32 = vld [vmem:[%s3690_s10 + $0x700] sm:$0xf]  ;;  %v629_v33 = vld [vmem:[%s3690_s10 + $0x708] sm:$0xf] }
  0xaf   : > { %v631_v34 = vld [vmem:[%s3690_s10 + $0x710] sm:$0xf]  ;;  %628 = vst [vmem:[%s3694_s11 + $0x380] sm:$0xf] %v627_v32  ;;  %630 = vst [vmem:[%s3694_s11 + $0x384] sm:$0xf] %v629_v33 }
  0xb0   : > { %632 = vst [vmem:[%s3694_s11 + $0x388] sm:$0xf] %v631_v34  ;;  %v633_v35 = vld [vmem:[%s3690_s10 + $0x718] sm:$0xf]  ;;  %v635_v36 = vld [vmem:[%s3690_s10 + $0x720] sm:$0xf] }
  0xb1   : > { %v637_v37 = vld [vmem:[%s3690_s10 + $0x728] sm:$0xf]  ;;  %634 = vst [vmem:[%s3694_s11 + $0x38c] sm:$0xf] %v633_v35  ;;  %636 = vst [vmem:[%s3694_s11 + $0x390] sm:$0xf] %v635_v36 }
  0xb2   : > { %638 = vst [vmem:[%s3694_s11 + $0x394] sm:$0xf] %v637_v37  ;;  %v639_v38 = vld [vmem:[%s3690_s10 + $0x730] sm:$0xf]  ;;  %v641_v39 = vld [vmem:[%s3690_s10 + $0x738] sm:$0xf] }
  0xb3   : > { %v643_v40 = vld [vmem:[%s3690_s10 + $0x740] sm:$0xf]  ;;  %640 = vst [vmem:[%s3694_s11 + $0x398] sm:$0xf] %v639_v38  ;;  %642 = vst [vmem:[%s3694_s11 + $0x39c] sm:$0xf] %v641_v39 }
  0xb4   : > { %644 = vst [vmem:[%s3694_s11 + $0x3a0] sm:$0xf] %v643_v40  ;;  %v645_v41 = vld [vmem:[%s3690_s10 + $0x748] sm:$0xf]  ;;  %v647_v42 = vld [vmem:[%s3690_s10 + $0x750] sm:$0xf] }
  0xb5   : > { %v649_v43 = vld [vmem:[%s3690_s10 + $0x758] sm:$0xf]  ;;  %646 = vst [vmem:[%s3694_s11 + $0x3a4] sm:$0xf] %v645_v41  ;;  %648 = vst [vmem:[%s3694_s11 + $0x3a8] sm:$0xf] %v647_v42 }
  0xb6   : > { %650 = vst [vmem:[%s3694_s11 + $0x3ac] sm:$0xf] %v649_v43  ;;  %v651_v44 = vld [vmem:[%s3690_s10 + $0x760] sm:$0xf]  ;;  %v653_v45 = vld [vmem:[%s3690_s10 + $0x768] sm:$0xf] }
  0xb7   : > { %v655_v46 = vld [vmem:[%s3690_s10 + $0x770] sm:$0xf]  ;;  %652 = vst [vmem:[%s3694_s11 + $0x3b0] sm:$0xf] %v651_v44  ;;  %654 = vst [vmem:[%s3694_s11 + $0x3b4] sm:$0xf] %v653_v45 }
  0xb8   : > { %656 = vst [vmem:[%s3694_s11 + $0x3b8] sm:$0xf] %v655_v46  ;;  %v657_v47 = vld [vmem:[%s3690_s10 + $0x778] sm:$0xf]  ;;  %v659_v48 = vld [vmem:[%s3690_s10 + $0x780] sm:$0xf] }
  0xb9   : > { %v661_v49 = vld [vmem:[%s3690_s10 + $0x788] sm:$0xf]  ;;  %658 = vst [vmem:[%s3694_s11 + $0x3bc] sm:$0xf] %v657_v47  ;;  %660 = vst [vmem:[%s3694_s11 + $0x3c0] sm:$0xf] %v659_v48 }
  0xba   : > { %662 = vst [vmem:[%s3694_s11 + $0x3c4] sm:$0xf] %v661_v49  ;;  %v663_v50 = vld [vmem:[%s3690_s10 + $0x790] sm:$0xf]  ;;  %v665_v51 = vld [vmem:[%s3690_s10 + $0x798] sm:$0xf] }
  0xbb   : > { %v667_v52 = vld [vmem:[%s3690_s10 + $0x7a0] sm:$0xf]  ;;  %664 = vst [vmem:[%s3694_s11 + $0x3c8] sm:$0xf] %v663_v50  ;;  %666 = vst [vmem:[%s3694_s11 + $0x3cc] sm:$0xf] %v665_v51 }
  0xbc   : > { %668 = vst [vmem:[%s3694_s11 + $0x3d0] sm:$0xf] %v667_v52  ;;  %v669_v53 = vld [vmem:[%s3690_s10 + $0x7a8] sm:$0xf]  ;;  %v671_v54 = vld [vmem:[%s3690_s10 + $0x7b0] sm:$0xf] }
  0xbd   : > { %v673_v55 = vld [vmem:[%s3690_s10 + $0x7b8] sm:$0xf]  ;;  %670 = vst [vmem:[%s3694_s11 + $0x3d4] sm:$0xf] %v669_v53  ;;  %672 = vst [vmem:[%s3694_s11 + $0x3d8] sm:$0xf] %v671_v54 }
  0xbe   : > { %674 = vst [vmem:[%s3694_s11 + $0x3dc] sm:$0xf] %v673_v55  ;;  %v675_v56 = vld [vmem:[%s3690_s10 + $0x7c0] sm:$0xf]  ;;  %v677_v57 = vld [vmem:[%s3690_s10 + $0x7c8] sm:$0xf] }
  0xbf   : > { %v679_v58 = vld [vmem:[%s3690_s10 + $0x7d0] sm:$0xf]  ;;  %676 = vst [vmem:[%s3694_s11 + $0x3e0] sm:$0xf] %v675_v56  ;;  %678 = vst [vmem:[%s3694_s11 + $0x3e4] sm:$0xf] %v677_v57 }
  0xc0   : > { %680 = vst [vmem:[%s3694_s11 + $0x3e8] sm:$0xf] %v679_v58  ;;  %v681_v59 = vld [vmem:[%s3690_s10 + $0x7d8] sm:$0xf]  ;;  %v683_v60 = vld [vmem:[%s3690_s10 + $0x7e0] sm:$0xf] }
  0xc1   : > { %v685_v61 = vld [vmem:[%s3690_s10 + $0x7e8] sm:$0xf]  ;;  %682 = vst [vmem:[%s3694_s11 + $0x3ec] sm:$0xf] %v681_v59  ;;  %684 = vst [vmem:[%s3694_s11 + $0x3f0] sm:$0xf] %v683_v60 }
  0xc2   : > { %686 = vst [vmem:[%s3694_s11 + $0x3f4] sm:$0xf] %v685_v61  ;;  %v687_v62 = vld [vmem:[%s3690_s10 + $0x7f0] sm:$0xf]  ;;  %v689_v63 = vld [vmem:[%s3690_s10 + $0x7f8] sm:$0xf] }
  0xc3   : > { %688 = vst [vmem:[%s3694_s11 + $0x3f8] sm:$0xf] %v687_v62  ;;  %690 = vst [vmem:[%s3694_s11 + $0x3fc] sm:$0xf] %v689_v63 }
  0xc4 PF: > { %p2959_p11 = scmp.ge.s32.totalorder %s3584_s20, 1  ;;  %p1231_p12 = scmp.lt.s32.totalorder %s3584_s20, 5 }
  0xc6   : > { %p1232_p13 = pnand %p2959_p11, %p1231_p12 }
  0xc7   : > { %s1238_s21 = sand.u32 (!%p1232_p13), 1, %s3560_s14   ;;  %s1265_s24 = sand.u32 (!%p1232_p13), 1, %s3552_s12  }
  0xc8   : > { %1235 = sbr.rel (%p1232_p13) target bundleno = 561 (0x231), region = 69  ;;  %s2960_s25 = sshll.u32 (!%p1232_p13), %s1238_s21, 10 }
  0xc9   : > { %s3291_s26 = smul.u32 (!%p1232_p13), 28, %s1265_s24  ;;  %p1268_p0 = scmp.lt.s32.totalorder (!%p1232_p13), %s3572_s17, 1 }
  0xca   : > { %p1273_p1 = scmp.lt.s32.totalorder (!%p1232_p13), %s3568_s16, 1  ;;  %s4224_s14 = scalar_lea.vmem (!%p1232_p13), [#allocation2], %s2960_s25 }
  0xcb   : > { %s4226_s12 = scalar_lea.vmem (!%p1232_p13), [#allocation3], %s3291_s26  ;;  %s4228_s21 = smov (!%p1232_p13), 0  }
  0xcd   : > { %s1269_s28 = scalar_select %p1268_p0, %s3572_s17, 1 }
  0xce   : > { %s1274_s29 = scalar_select %p1273_p1, %s3568_s16, 1 }
  0xcf   : > { %s3292_s5 = smul.u32 80, %s1269_s28 }
  0xd0   : > { %s1275_s8 = scalar_lea.vmem %s4422_s2, %s1274_s29 }
  0xd1   : > { %s4220_s11 = scalar_lea.vmem %s4420_s0, %s3292_s5  ;;  %v4222_v0 = vld [vmem:[%s1275_s8] ss:$0 sm:$0xff] }
  0xd2 LB: >> { %v3374_v1 = vld [vmem:[%s4224_s14 + $0x78] sm:$0xff]   ;;  %v3378_v5 = vld [vmem:[%s4224_s14 + $0x70] sm:$0xff]   ;;  %v3382_v9 = vld [vmem:[%s4224_s14 + $0x68] sm:$0xff]   ;;  %s3114_s24 = sshll.u32 %s3588_s21, 3  ;;  %s3110_s26 = sshll.u32 %s3588_s21, 2  ;;  %vm2762_vm0 = vcmask 1043456   ;;  %s3588_s21 = sphi %s4228_s21, %s1283_s21  }
  0xd3   : >> { %v3375_v2 = vld [vmem:[%s4224_s14 + $0xf8] sm:$0xff]   ;;  %3115 = vmatprep.subr.bf16.mxu0 %v3374_v1  ;;  %v3379_v6 = vld [vmem:[%s4224_s14 + $0xf0] sm:$0xff]   ;;  %v3383_v10 = vld [vmem:[%s4224_s14 + $0xe8] sm:$0xff]   ;;  %s4265_s25 = scalar_lea.vmem %s4220_s11, %s3114_s24  ;;  %s2761_s28 = scalar_lea.vmem %s4226_s12, %s3110_s26 [#allocation3]  ;;  %vm2763_vm1 = vsmask.f32 3328 }
  0xd4   : >> { %v3376_v3 = vld [vmem:[%s4224_s14 + $0x38] sm:$0xff]   ;;  %3137 = vmatprep.subr.bf16.mxu1 %v3375_v2  ;;  %v3380_v7 = vld [vmem:[%s4224_s14 + $0x30] sm:$0xff]   ;;  %v3384_v11 = vld [vmem:[%s4224_s14 + $0x28] sm:$0xff]   ;;  %s1283_s21 = sadd.s32 1, %s3588_s21  }
  0xd5   : >> { %v3377_v4 = vld [vmem:[%s4224_s14 + $0xb8] sm:$0xff]   ;;  %3116 = vmatpush3.bf16.msra.mxu0 %v3376_v3  ;;  %v3381_v8 = vld [vmem:[%s4224_s14 + $0xb0] sm:$0xff]   ;;  %v3385_v12 = vld [vmem:[%s4224_s14 + $0xa8] sm:$0xff]   ;;  %p1280_p2 = scmp.ge.s32.totalorder %s1283_s21, 7  }
  0xd6   : >> { %3138 = vmatpush3.bf16.msra.mxu1 %v3377_v4  ;;  %3117 = vmatprep.subr.bf16.mxu0 %v3378_v5  ;;  %v3386_v13 = vld [vmem:[%s4224_s14 + $0x60] sm:$0xff]   ;;  %v3390_v17 = vld [vmem:[%s4224_s14 + $0x58] sm:$0xff]   ;;  %v3394_v21 = vld [vmem:[%s4224_s14 + $0x50] sm:$0xff]  }
  0xd7   : >> { %3139 = vmatprep.subr.bf16.mxu1 %v3379_v6  ;;  %v3387_v14 = vld [vmem:[%s4224_s14 + $0xe0] sm:$0xff]   ;;  %v3391_v18 = vld [vmem:[%s4224_s14 + $0xd8] sm:$0xff]   ;;  %v3395_v22 = vld [vmem:[%s4224_s14 + $0xd0] sm:$0xff]  }
  0xd8   : >> { %v3388_v15 = vld [vmem:[%s4224_s14 + $0x20] sm:$0xff]   ;;  %v3392_v19 = vld [vmem:[%s4224_s14 + $0x18] sm:$0xff]   ;;  %v3396_v23 = vld [vmem:[%s4224_s14 + $0x10] sm:$0xff]  }
  0xd9   : >> { %3118 = vmatpush3.bf16.msra.mxu0 %v3380_v7  ;;  %v3389_v16 = vld [vmem:[%s4224_s14 + $0xa0] sm:$0xff]   ;;  %v3393_v20 = vld [vmem:[%s4224_s14 + $0x98] sm:$0xff]   ;;  %v3397_v24 = vld [vmem:[%s4224_s14 + $0x90] sm:$0xff]  }
  0xda   : >> { %3140 = vmatpush3.bf16.msra.mxu1 %v3381_v8  ;;  %3119 = vmatprep.subr.bf16.mxu0 %v3382_v9  ;;  %v3398_v25 = vld [vmem:[%s4224_s14 + $0x48] sm:$0xff]   ;;  %v3402_v29 = vld [vmem:[%s4224_s14 + $0x40] sm:$0xff]   ;;  %v3408_v37 = vld [vmem:[%s4224_s14 + $0x178] sm:$0xff]  }
  0xdb   : >> { %3141 = vmatprep.subr.bf16.mxu1 %v3383_v10  ;;  %v3399_v26 = vld [vmem:[%s4224_s14 + $0xc8] sm:$0xff]   ;;  %v3403_v30 = vld [vmem:[%s4224_s14 + $0xc0] sm:$0xff]   ;;  %v3409_v38 = vld [vmem:[%s4224_s14 + $0x1f8] sm:$0xff]  }
  0xdc   : >> { %v3400_v27 = vld [vmem:[%s4224_s14 + $0x8] sm:$0xff]   ;;  %v3404_v31 = vld [vmem:[%s4224_s14] sm:$0xff]   ;;  %v3410_v46 = vld [vmem:[%s4224_s14 + $0x138] sm:$0xff]  }
  0xdd   : >> { %3120 = vmatpush3.bf16.msra.mxu0 %v3384_v11  ;;  %v3401_v28 = vld [vmem:[%s4224_s14 + $0x88] sm:$0xff]   ;;  %v3405_v32 = vld [vmem:[%s4224_s14 + $0x80] sm:$0xff]   ;;  %v3411_v48 = vld [vmem:[%s4224_s14 + $0x1b8] sm:$0xff]  }
  0xde   : >> { %3142 = vmatpush3.bf16.msra.mxu1 %v3385_v12  ;;  %3121 = vmatprep.subr.bf16.mxu0 %v3386_v13  ;;  %v1287_v33 = vld [vmem:[%s4265_s25] sm:$0xf]  ;;  %v1288_v34 = vld [vmem:[%s4265_s25 + $0x4] sm:$0x1]  ;;  %v3412_v51 = vld [vmem:[%s4224_s14 + $0x170] sm:$0xff]  }
  0xdf   : >> { %3143 = vmatprep.subr.bf16.mxu1 %v3387_v14  ;;  %v2973_v35 = vcombine.low %v1287_v33, %v1287_v33  ;;  %v2974_v36 = vcombine.low %v1287_v33, %v1288_v34  ;;  %v3413_v52 = vld [vmem:[%s4224_s14 + $0x1f0] sm:$0xff]   ;;  %v3416_v55 = vld [vmem:[%s4224_s14 + $0x168] sm:$0xff]   ;;  %v3420_v59 = vld [vmem:[%s4224_s14 + $0x160] sm:$0xff]  }
  0xe0   : >> { %v3414_v53 = vld [vmem:[%s4224_s14 + $0x130] sm:$0xff]   ;;  %v3417_v56 = vld [vmem:[%s4224_s14 + $0x1e8] sm:$0xff]   ;;  %v3421_v60 = vld [vmem:[%s4224_s14 + $0x1e0] sm:$0xff]  }
  0xe1   : >> { %3122 = vmatpush3.bf16.msra.mxu0 %v3388_v15  ;;  %v1311_v39 = vshrl.u32 %v2973_v35, 16  ;;  %v1313_v40 = vshll.u32 %v2973_v35, 16  ;;  %v1324_v41 = vshrl.u32 %v2974_v36, 16  ;;  %v1327_v42 = vshll.u32 %v2974_v36, 16  ;;  %v3415_v54 = vld [vmem:[%s4224_s14 + $0x1b0] sm:$0xff]   ;;  %v3418_v57 = vld [vmem:[%s4224_s14 + $0x128] sm:$0xff]   ;;  %vm2764_vm2 = vmand %vm2762_vm0, %vm2763_vm1 }
  0xe2   : >> { %3144 = vmatpush3.bf16.msra.mxu1 %v3389_v16  ;;  %3123 = vmatprep.subr.bf16.mxu0 %v3390_v17  ;;  %v1321_v47 = vrot.slane %v2974_v36, 1  ;;  %v3419_v58 = vld [vmem:[%s4224_s14 + $0x1a8] sm:$0xff]   ;;  %v3422_v61 = vld [vmem:[%s4224_s14 + $0x120] sm:$0xff]   ;;  %v3424_v63 = vld [vmem:[%s4224_s14 + $0x158] sm:$0xff]  }
  0xe3   : >> { %3145 = vmatprep.subr.bf16.mxu1 %v3391_v18  ;;  %v1315_v43 = vrot.slane %v1313_v40, 1  ;;  %v1326_v44 = vrot.slane %v1324_v41, 1  ;;  %v1329_v45 = vrot.slane %v1327_v42, 2  ;;  %v3423_v62 = vld [vmem:[%s4224_s14 + $0x1a0] sm:$0xff]   ;;  %v3425_v1 = vld [vmem:[%s4224_s14 + $0x1d8] sm:$0xff]   ;;  %v3428_v4 = vld [vmem:[%s4224_s14 + $0x150] sm:$0xff]  }
  0xe4   : >> { %v3426_v2 = vld [vmem:[%s4224_s14 + $0x118] sm:$0xff]   ;;  %v3429_v5 = vld [vmem:[%s4224_s14 + $0x1d0] sm:$0xff]   ;;  %v3432_v8 = vld [vmem:[%s4224_s14 + $0x148] sm:$0xff]  }
  0xe5   : >> { %3124 = vmatpush3.bf16.msra.mxu0 %v3392_v19  ;;  %v1316_v49 = vor.u32 %v1315_v43, %v1311_v39  ;;  %v1330_v50 = vor.u32 %v1329_v45, %v1326_v44  ;;  %v3427_v3 = vld [vmem:[%s4224_s14 + $0x198] sm:$0xff]   ;;  %v3430_v6 = vld [vmem:[%s4224_s14 + $0x110] sm:$0xff]   ;;  %v3433_v9 = vld [vmem:[%s4224_s14 + $0x1c8] sm:$0xff]  }
  0xe6   : >> { %3146 = vmatpush3.bf16.msra.mxu1 %v3393_v20  ;;  %3125 = vmatprep.subr.bf16.mxu0 %v3394_v21  ;;  %v3431_v7 = vld [vmem:[%s4224_s14 + $0x190] sm:$0xff]   ;;  %v3434_v10 = vld [vmem:[%s4224_s14 + $0x108] sm:$0xff]   ;;  %v3436_v12 = vld [vmem:[%s4224_s14 + $0x140] sm:$0xff]  }
  0xe7   : >> { %3147 = vmatprep.subr.bf16.mxu1 %v3395_v22  ;;  %2469 = vmatprep.mubr.bf16.mxu0 %v1316_v49  ;;  %v3435_v11 = vld [vmem:[%s4224_s14 + $0x188] sm:$0xff]   ;;  %v3437_v13 = vld [vmem:[%s4224_s14 + $0x1c0] sm:$0xff]   ;;  %v3442_v22 = vld [vmem:[%s4224_s14 + $0x278] sm:$0xff]  }
  0xe8   : >> { %2509 = vmatprep.mubr.bf16.mxu1 %v1330_v50  ;;  %v3438_v14 = vld [vmem:[%s4224_s14 + $0x100] sm:$0xff]   ;;  %v2965_v15 = vld [vmem:[%s4265_s25 + $0x8] sm:$0xf]  ;;  %v2966_v17 = vld [vmem:[%s4265_s25 + $0xc] sm:$0x1] }
  0xe9   : >> { %3126 = vmatpush3.bf16.msra.mxu0 %v3396_v23  ;;  %v2975_v16 = vcombine.low %v2965_v15, %v2965_v15  ;;  %v3439_v18 = vld [vmem:[%s4224_s14 + $0x180] sm:$0xff]   ;;  %v2976_v19 = vcombine.low %v2965_v15, %v2966_v17  ;;  %v3443_v23 = vld [vmem:[%s4224_s14 + $0x2f8] sm:$0xff]   ;;  %v3447_v35 = vld [vmem:[%s4224_s14 + $0x2f0] sm:$0xff]  }
  0xea   : >> { %3148 = vmatpush3.bf16.msra.mxu1 %v3397_v24  ;;  %3127 = vmatprep.subr.bf16.mxu0 %v3398_v25  ;;  %v3448_v36 = vld [vmem:[%s4224_s14 + $0x230] sm:$0xff]   ;;  %v3451_v39 = vld [vmem:[%s4224_s14 + $0x2e8] sm:$0xff]   ;;  %v3454_v42 = vld [vmem:[%s4224_s14 + $0x260] sm:$0xff]  }
  0xeb   : >> { %3149 = vmatprep.subr.bf16.mxu1 %v3399_v26  ;;  %v1336_v20 = vshrl.u32 %v2975_v16, 16  ;;  %v1338_v21 = vshll.u32 %v2975_v16, 16  ;;  %v1349_v24 = vshrl.u32 %v2976_v19, 16  ;;  %v1352_v25 = vshll.u32 %v2976_v19, 16  ;;  %v3452_v40 = vld [vmem:[%s4224_s14 + $0x228] sm:$0xff]   ;;  %v3455_v43 = vld [vmem:[%s4224_s14 + $0x2e0] sm:$0xff]  }
  0xec   : >> { %v3453_v41 = vld [vmem:[%s4224_s14 + $0x2a8] sm:$0xff]   ;;  %v3456_v44 = vld [vmem:[%s4224_s14 + $0x220] sm:$0xff]   ;;  %v3461_v49 = vld [vmem:[%s4224_s14 + $0x298] sm:$0xff]  }
  0xed   : >> { %3128 = vmatpush3.bf16.msra.mxu0 %v3400_v27  ;;  %v1340_v26 = vrot.slane %v1338_v21, 1  ;;  %v3444_v27 = vld [vmem:[%s4224_s14 + $0x238] sm:$0xff]   ;;  %v3457_v45 = vld [vmem:[%s4224_s14 + $0x2a0] sm:$0xff]   ;;  %v3462_v50 = vld [vmem:[%s4224_s14 + $0x250] sm:$0xff]  }
  0xee   : >> { %3150 = vmatpush3.bf16.msra.mxu1 %v3401_v28  ;;  %3129 = vmatprep.subr.bf16.mxu0 %v3402_v29  ;;  %v1351_v28 = vrot.slane %v1349_v24, 1  ;;  %v1354_v29 = vrot.slane %v1352_v25, 2  ;;  %v3480_v17 = vld [vmem:[%s4224_s14 + $0x370] sm:$0xff]   ;;  %v3484_v21 = vld [vmem:[%s4224_s14 + $0x368] sm:$0xff]   ;;  %v3488_v25 = vld [vmem:[%s4224_s14 + $0x360] sm:$0xff]  }
  0xef   : >> { %3151 = vmatprep.subr.bf16.mxu1 %v3403_v30  ;;  %v3445_v30 = vld [vmem:[%s4224_s14 + $0x2b8] sm:$0xff]   ;;  %v3487_v24 = vld [vmem:[%s4224_s14 + $0x3a8] sm:$0xff]  }
  0xf0   : >> { %v1355_v34 = vor.u32 %v1354_v29, %v1351_v28  ;;  %v3491_v28 = vld [vmem:[%s4224_s14 + $0x3a0] sm:$0xff]   ;;  %v3492_v29 = vld [vmem:[%s4224_s14 + $0x358] sm:$0xff]  }
  0xf1   : >> { %3130 = vmatpush3.bf16.msra.mxu0 %v3404_v31  ;;  %v1341_v31 = vor.u32 %v1340_v26, %v1336_v20  ;;  %v3483_v20 = vld [vmem:[%s4224_s14 + $0x3b0] sm:$0xff]   ;;  %v3489_v26 = vld [vmem:[%s4224_s14 + $0x3e0] sm:$0xff]  }
  0xf2   : >> { %3152 = vmatpush3.bf16.msra.mxu1 %v3405_v32  ;;  %3159 = vmatprep.subr.bf16.mxu0 %v3408_v37  ;;  %v1346_v32 = vrot.slane %v2976_v19, 1  ;;  %v3449_v37 = vld [vmem:[%s4224_s14 + $0x2b0] sm:$0xff]  }
  0xf3   : >> { %3181 = vmatprep.subr.bf16.mxu1 %v3409_v38  ;;  %v3450_v38 = vld [vmem:[%s4224_s14 + $0x268] sm:$0xff]   ;;  %v3482_v19 = vld [vmem:[%s4224_s14 + $0x330] sm:$0xff]  }
  0xf4   : >> { %2470 = vmatmul.mubr.bf16.vlgmr.msra.gmra.mxu0 %v1287_v33  ;;  %v3446_v33 = vld [vmem:[%s4224_s14 + $0x270] sm:$0xff]  }
  0xf5   : >> { %2510 = vmatmul.mubr.bf16.vlgmr.msra.gmra.mxu1 %v1321_v47  ;;  %3160 = vmatpush3.bf16.msra.mxu0 %v3410_v46  ;;  %v3458_v46 = vld [vmem:[%s4224_s14 + $0x258] sm:$0xff]  }
  0xf6   : >> { %3182 = vmatpush3.bf16.msra.mxu1 %v3411_v48  ;;  %3161 = vmatprep.subr.bf16.mxu0 %v3412_v51  ;;  %v3459_v47 = vld [vmem:[%s4224_s14 + $0x2d8] sm:$0xff]   ;;  %v3463_v51 = vld [vmem:[%s4224_s14 + $0x2d0] sm:$0xff]  }
  0xf7   : >> { %3183 = vmatprep.subr.bf16.mxu1 %v3413_v52  ;;  %2549 = vmatprep.mubr.bf16.mxu0 %v1341_v31  ;;  %v3460_v48 = vld [vmem:[%s4224_s14 + $0x218] sm:$0xff]   ;;  %v3464_v52 = vld [vmem:[%s4224_s14 + $0x210] sm:$0xff]  }
  0xf8   : >> { %2589 = vmatprep.mubr.bf16.mxu1 %v1355_v34  ;;  %v3494_v31 = vld [vmem:[%s4224_s14 + $0x318] sm:$0xff]   ;;  %v3497_v34 = vld [vmem:[%s4224_s14 + $0x3d0] sm:$0xff]  }
  0xf9   : >> { %3162 = vmatpush3.bf16.msra.mxu0 %v3414_v53  ;;  %v3465_v53 = vld [vmem:[%s4224_s14 + $0x290] sm:$0xff]  }
  0xfa   : >> { %3184 = vmatpush3.bf16.msra.mxu1 %v3415_v54  ;;  %3163 = vmatprep.subr.bf16.mxu0 %v3416_v55  ;;  %v3466_v54 = vld [vmem:[%s4224_s14 + $0x248] sm:$0xff]  }
  0xfb   : >> { %3185 = vmatprep.subr.bf16.mxu1 %v3417_v56  ;;  %v3467_v55 = vld [vmem:[%s4224_s14 + $0x2c8] sm:$0xff]  }
  0xfc   : >> { %v3468_v56 = vld [vmem:[%s4224_s14 + $0x208] sm:$0xff]  }
  0xfd   : >> { %3164 = vmatpush3.bf16.msra.mxu0 %v3418_v57  ;;  %v3469_v57 = vld [vmem:[%s4224_s14 + $0x288] sm:$0xff]  }
  0xfe   : >> { %3186 = vmatpush3.bf16.msra.mxu1 %v3419_v58  ;;  %3165 = vmatprep.subr.bf16.mxu0 %v3420_v59  ;;  %v3470_v58 = vld [vmem:[%s4224_s14 + $0x240] sm:$0xff]  }
  0xff   : >> { %3187 = vmatprep.subr.bf16.mxu1 %v3421_v60  ;;  %v3471_v59 = vld [vmem:[%s4224_s14 + $0x2c0] sm:$0xff]  }
 0x100   : >> { %v3472_v60 = vld [vmem:[%s4224_s14 + $0x200] sm:$0xff]  }
 0x101   : >> { %3166 = vmatpush3.bf16.msra.mxu0 %v3422_v61  ;;  %v3473_v61 = vld [vmem:[%s4224_s14 + $0x280] sm:$0xff]  }
 0x102   : >> { %3188 = vmatpush3.bf16.msra.mxu1 %v3423_v62  ;;  %3167 = vmatprep.subr.bf16.mxu0 %v3424_v63  ;;  %v2968_v62 = vld [vmem:[%s4265_s25 + $0x10] sm:$0xf]  ;;  %v2969_v63 = vld [vmem:[%s4265_s25 + $0x14] sm:$0x1] }
 0x103   : >> { %3189 = vmatprep.subr.bf16.mxu1 %v3425_v1  ;;  %v2977_v1 = vcombine.low %v2968_v62, %v2968_v62 }
 0x105   : >> { %3168 = vmatpush3.bf16.msra.mxu0 %v3426_v2  ;;  %v2978_v2 = vcombine.low %v2968_v62, %v2969_v63 }
 0x106   : >> { %3190 = vmatpush3.bf16.msra.mxu1 %v3427_v3  ;;  %3169 = vmatprep.subr.bf16.mxu0 %v3428_v4  ;;  %v3476_v3 = vld [vmem:[%s4224_s14 + $0x378] sm:$0xff]  }
 0x107   : >> { %3191 = vmatprep.subr.bf16.mxu1 %v3429_v5  ;;  %v3477_v4 = vld [vmem:[%s4224_s14 + $0x3f8] sm:$0xff]   ;;  %v1361_v5 = vshrl.u32 %v2977_v1, 16 }
 0x109   : >> { %3170 = vmatpush3.bf16.msra.mxu0 %v3430_v6  ;;  %v1363_v6 = vshll.u32 %v2977_v1, 16 }
 0x10a   : >> { %3192 = vmatpush3.bf16.msra.mxu1 %v3431_v7  ;;  %3171 = vmatprep.subr.bf16.mxu0 %v3432_v8  ;;  %v1374_v7 = vshrl.u32 %v2978_v2, 16  ;;  %v1377_v8 = vshll.u32 %v2978_v2, 16 }
 0x10b   : >> { %3193 = vmatprep.subr.bf16.mxu1 %v3433_v9  ;;  %v1365_v9 = vrot.slane %v1363_v6, 1 }
 0x10d   : >> { %3172 = vmatpush3.bf16.msra.mxu0 %v3434_v10  ;;  %v1376_v10 = vrot.slane %v1374_v7, 1 }
 0x10e   : >> { %3194 = vmatpush3.bf16.msra.mxu1 %v3435_v11  ;;  %3173 = vmatprep.subr.bf16.mxu0 %v3436_v12  ;;  %v1379_v11 = vrot.slane %v1377_v8, 2  ;;  %v3478_v12 = vld [vmem:[%s4224_s14 + $0x338] sm:$0xff]  }
 0x10f   : >> { %3195 = vmatprep.subr.bf16.mxu1 %v3437_v13  ;;  %v1371_v13 = vrot.slane %v2978_v2, 1 }
 0x110   : >> { %v1380_v16 = vor.u32 %v1379_v11, %v1376_v10 }
 0x111   : >> { %3174 = vmatpush3.bf16.msra.mxu0 %v3438_v14  ;;  %v3479_v14 = vld [vmem:[%s4224_s14 + $0x3b8] sm:$0xff]  }
 0x112   : >> { %3196 = vmatpush3.bf16.msra.mxu1 %v3439_v18  ;;  %3203 = vmatprep.subr.bf16.mxu0 %v3442_v22  ;;  %v3481_v18 = vld [vmem:[%s4224_s14 + $0x3f0] sm:$0xff]   ;;  %v3485_v22 = vld [vmem:[%s4224_s14 + $0x3e8] sm:$0xff]  }
 0x113   : >> { %3225 = vmatprep.subr.bf16.mxu1 %v3443_v23  ;;  %v3486_v23 = vld [vmem:[%s4224_s14 + $0x328] sm:$0xff]  }
 0x114   : >> { %2550 = vmatmul.mubr.bf16.vlgmr.msra.gmra.mxu0 %v2965_v15  ;;  %v1366_v15 = vor.u32 %v1365_v9, %v1361_v5 }
 0x115   : >> { %2590 = vmatmul.mubr.bf16.vlgmr.msra.gmra.mxu1 %v1346_v32  ;;  %3204 = vmatpush3.bf16.msra.mxu0 %v3444_v27  ;;  %v3490_v27 = vld [vmem:[%s4224_s14 + $0x320] sm:$0xff]   ;;  %v3495_v32 = vld [vmem:[%s4224_s14 + $0x398] sm:$0xff]  }
 0x116   : >> { %3226 = vmatpush3.bf16.msra.mxu1 %v3445_v30  ;;  %3205 = vmatprep.subr.bf16.mxu0 %v3446_v33  ;;  %v3493_v30 = vld [vmem:[%s4224_s14 + $0x3d8] sm:$0xff]   ;;  %v3496_v33 = vld [vmem:[%s4224_s14 + $0x350] sm:$0xff]  }
 0x117   : >> { %3227 = vmatprep.subr.bf16.mxu1 %v3447_v35  ;;  %2629 = vmatprep.mubr.bf16.mxu0 %v1366_v15  ;;  %v3498_v35 = vld [vmem:[%s4224_s14 + $0x310] sm:$0xff]  }
 0x118   : >> { %2669 = vmatprep.mubr.bf16.mxu1 %v1380_v16 }
 0x119   : >> { %3206 = vmatpush3.bf16.msra.mxu0 %v3448_v36  ;;  %v3499_v36 = vld [vmem:[%s4224_s14 + $0x390] sm:$0xff]  }
 0x11a   : >> { %3228 = vmatpush3.bf16.msra.mxu1 %v3449_v37  ;;  %3207 = vmatprep.subr.bf16.mxu0 %v3450_v38  ;;  %v3500_v37 = vld [vmem:[%s4224_s14 + $0x348] sm:$0xff]  }
 0x11b   : >> { %3229 = vmatprep.subr.bf16.mxu1 %v3451_v39  ;;  %v3501_v38 = vld [vmem:[%s4224_s14 + $0x3c8] sm:$0xff]  }
 0x11c   : >> { %v3502_v39 = vld [vmem:[%s4224_s14 + $0x308] sm:$0xff]  }
 0x11d   : >> { %3208 = vmatpush3.bf16.msra.mxu0 %v3452_v40  ;;  %v3503_v40 = vld [vmem:[%s4224_s14 + $0x388] sm:$0xff]  }
 0x11e   : >> { %3230 = vmatpush3.bf16.msra.mxu1 %v3453_v41  ;;  %3209 = vmatprep.subr.bf16.mxu0 %v3454_v42  ;;  %v3504_v41 = vld [vmem:[%s4224_s14 + $0x340] sm:$0xff]  }
 0x11f   : >> { %3231 = vmatprep.subr.bf16.mxu1 %v3455_v43  ;;  %v3505_v42 = vld [vmem:[%s4224_s14 + $0x3c0] sm:$0xff]   ;;  %v2971_v43 = vld [vmem:[%s4265_s25 + $0x18] sm:$0xf] }
 0x121   : >> { %3210 = vmatpush3.bf16.msra.mxu0 %v3456_v44  ;;  %v2979_v44 = vcombine.low %v2971_v43, %v2971_v43 }
 0x122   : >> { %3232 = vmatpush3.bf16.msra.mxu1 %v3457_v45  ;;  %3211 = vmatprep.subr.bf16.mxu0 %v3458_v46  ;;  %v2972_v45 = vld [vmem:[%s4265_s25 + $0x1c] sm:$0x1]  ;;  %v3506_v46 = vld [vmem:[%s4224_s14 + $0x300] sm:$0xff]  }
 0x123   : >> { %3233 = vmatprep.subr.bf16.mxu1 %v3459_v47  ;;  %v3507_v47 = vld [vmem:[%s4224_s14 + $0x380] sm:$0xff]  }
 0x125   : >> { %3212 = vmatpush3.bf16.msra.mxu0 %v3460_v48  ;;  %v2980_v48 = vcombine.low %v2971_v43, %v2972_v45 }
 0x126   : >> { %3234 = vmatpush3.bf16.msra.mxu1 %v3461_v49  ;;  %3213 = vmatprep.subr.bf16.mxu0 %v3462_v50  ;;  %v1386_v49 = vshrl.u32 %v2979_v44, 16  ;;  %v1388_v50 = vshll.u32 %v2979_v44, 16 }
 0x127   : >> { %3235 = vmatprep.subr.bf16.mxu1 %v3463_v51  ;;  %v1399_v51 = vshrl.u32 %v2980_v48, 16 }
 0x129   : >> { %3214 = vmatpush3.bf16.msra.mxu0 %v3464_v52  ;;  %v1402_v52 = vshll.u32 %v2980_v48, 16 }
 0x12a   : >> { %3236 = vmatpush3.bf16.msra.mxu1 %v3465_v53  ;;  %3215 = vmatprep.subr.bf16.mxu0 %v3466_v54  ;;  %v1390_v53 = vrot.slane %v1388_v50, 1  ;;  %v1401_v54 = vrot.slane %v1399_v51, 1 }
 0x12b   : >> { %3237 = vmatprep.subr.bf16.mxu1 %v3467_v55  ;;  %v1404_v55 = vrot.slane %v1402_v52, 2 }
 0x12d   : >> { %3216 = vmatpush3.bf16.msra.mxu0 %v3468_v56  ;;  %v1391_v56 = vor.u32 %v1390_v53, %v1386_v49 }
 0x12e   : >> { %3238 = vmatpush3.bf16.msra.mxu1 %v3469_v57  ;;  %3217 = vmatprep.subr.bf16.mxu0 %v3470_v58  ;;  %v1396_v57 = vrot.slane %v2980_v48, 1  ;;  %v1405_v58 = vor.u32 %v1404_v55, %v1401_v54 }
 0x12f   : >> { %3239 = vmatprep.subr.bf16.mxu1 %v3471_v59 }
 0x131   : >> { %3218 = vmatpush3.bf16.msra.mxu0 %v3472_v60 }
 0x132   : >> { %3240 = vmatpush3.bf16.msra.mxu1 %v3473_v61  ;;  %3247 = vmatprep.subr.bf16.mxu0 %v3476_v3 }
 0x133   : >> { %3269 = vmatprep.subr.bf16.mxu1 %v3477_v4 }
 0x134   : >> { %2630 = vmatmul.mubr.bf16.vlgmr.msra.gmra.mxu0 %v2968_v62 }
 0x135   : >> { %2670 = vmatmul.mubr.bf16.vlgmr.msra.gmra.mxu1 %v1371_v13  ;;  %3248 = vmatpush3.bf16.msra.mxu0 %v3478_v12 }
 0x136   : >> { %3270 = vmatpush3.bf16.msra.mxu1 %v3479_v14  ;;  %3249 = vmatprep.subr.bf16.mxu0 %v3480_v17 }
 0x137   : >> { %3271 = vmatprep.subr.bf16.mxu1 %v3481_v18  ;;  %2709 = vmatprep.mubr.bf16.mxu0 %v1391_v56 }
 0x138   : >> { %2749 = vmatprep.mubr.bf16.mxu1 %v1405_v58 }
 0x139   : >> { %3250 = vmatpush3.bf16.msra.mxu0 %v3482_v19 }
 0x13a   : >> { %3272 = vmatpush3.bf16.msra.mxu1 %v3483_v20  ;;  %3251 = vmatprep.subr.bf16.mxu0 %v3484_v21 }
 0x13b   : >> { %3273 = vmatprep.subr.bf16.mxu1 %v3485_v22 }
 0x13d   : >> { %3252 = vmatpush3.bf16.msra.mxu0 %v3486_v23 }
 0x13e   : >> { %3274 = vmatpush3.bf16.msra.mxu1 %v3487_v24  ;;  %3253 = vmatprep.subr.bf16.mxu0 %v3488_v25 }
 0x13f   : >> { %3275 = vmatprep.subr.bf16.mxu1 %v3489_v26 }
 0x141   : >> { %3254 = vmatpush3.bf16.msra.mxu0 %v3490_v27 }
 0x142   : >> { %3276 = vmatpush3.bf16.msra.mxu1 %v3491_v28  ;;  %3255 = vmatprep.subr.bf16.mxu0 %v3492_v29 }
 0x143   : >> { %3277 = vmatprep.subr.bf16.mxu1 %v3493_v30 }
 0x145   : >> { %3256 = vmatpush3.bf16.msra.mxu0 %v3494_v31 }
 0x146   : >> { %3278 = vmatpush3.bf16.msra.mxu1 %v3495_v32  ;;  %3257 = vmatprep.subr.bf16.mxu0 %v3496_v33 }
 0x147   : >> { %3279 = vmatprep.subr.bf16.mxu1 %v3497_v34 }
 0x149   : >> { %3258 = vmatpush3.bf16.msra.mxu0 %v3498_v35 }
 0x14a   : >> { %3280 = vmatpush3.bf16.msra.mxu1 %v3499_v36  ;;  %3259 = vmatprep.subr.bf16.mxu0 %v3500_v37 }
 0x14b   : >> { %3281 = vmatprep.subr.bf16.mxu1 %v3501_v38 }
 0x14d   : >> { %3260 = vmatpush3.bf16.msra.mxu0 %v3502_v39 }
 0x14e   : >> { %3282 = vmatpush3.bf16.msra.mxu1 %v3503_v40  ;;  %3261 = vmatprep.subr.bf16.mxu0 %v3504_v41 }
 0x14f   : >> { %3283 = vmatprep.subr.bf16.mxu1 %v3505_v42 }
 0x151   : >> { %3262 = vmatpush3.bf16.msra.mxu0 %v3506_v46  ;;  %v2765_v46 = vld [vmem:[%s2761_s28] sm:$0xf] }
 0x152   : >> { %3284 = vmatpush3.bf16.msra.mxu1 %v3507_v47 }
 0x154   : >> { %2710 = vmatmul.mubr.bf16.vlgmr.msra.gmra.mxu0 %v2971_v43 }
 0x155   : >> { %2750 = vmatmul.mubr.bf16.vlgmr.msra.gmra.mxu1 %v1396_v57 }
 0x1b4   : >> { %v3131_v59 = vpop.f32.mrf.mxu0 }
 0x1b5   : >> { %v3153_v60 = vpop.f32.mrf.mxu1 }
 0x1b6   : >> { %v3132_v61 = vpop.f32.mrf.mxu0 }
 0x1b7   : >> { %v3154_v62 = vpop.f32.mrf.mxu1  ;;  %v3133_v63 = vadd.f32 %v3132_v61, %v3131_v59 }
 0x1b8   : >> { %v3155_v1 = vadd.f32 %v3154_v62, %v3153_v60  ;;  %v3134_v2 = vpop.f32.mrf.mxu0 }
 0x1b9   : >> { %v3156_v3 = vpop.f32.mrf.mxu1  ;;  %v2472_v4 = vadd.f32 %v3133_v63, %v4222_v0 }
 0x1ba   : >> { %v3135_v5 = vpop.f32.mrf.mxu0 }
 0x1bb   : >> { %v3157_v6 = vpop.f32.mrf.mxu1  ;;  %v2512_v7 = vadd.f32 %v3155_v1, %v2472_v4 }
 0x1d4   : >> { %v3175_v8 = vpop.f32.mrf.mxu0 }
 0x1d5   : >> { %v3197_v9 = vpop.f32.mrf.mxu1 }
 0x1d6   : >> { %v3176_v10 = vpop.f32.mrf.mxu0 }
 0x1d7   : >> { %v3198_v11 = vpop.f32.mrf.mxu1  ;;  %v3177_v24 = vadd.f32 %v3176_v10, %v3175_v8 }
 0x1d8   : >> { %v3178_v12 = vpop.f32.mrf.mxu0  ;;  %v3199_v26 = vadd.f32 %v3198_v11, %v3197_v9 }
 0x1d9   : >> { %v3200_v13 = vpop.f32.mrf.mxu1  ;;  %v2552_v25 = vadd.f32 %v3177_v24, %v2512_v7 }
 0x1da   : >> { %v3179_v14 = vpop.f32.mrf.mxu0 }
 0x1db   : >> { %v3201_v15 = vpop.f32.mrf.mxu1  ;;  %v2592_v28 = vadd.f32 %v3199_v26, %v2552_v25 }
 0x1f4   : >> { %v3219_v16 = vpop.f32.mrf.mxu0 }
 0x1f5   : >> { %v3241_v17 = vpop.f32.mrf.mxu1 }
 0x1f6   : >> { %v3220_v18 = vpop.f32.mrf.mxu0 }
 0x1f7   : >> { %v3242_v19 = vpop.f32.mrf.mxu1  ;;  %v3221_v27 = vadd.f32 %v3220_v18, %v3219_v16 }
 0x1f8   : >> { %v3222_v20 = vpop.f32.mrf.mxu0  ;;  %v3243_v30 = vadd.f32 %v3242_v19, %v3241_v17 }
 0x1f9   : >> { %v3244_v21 = vpop.f32.mrf.mxu1  ;;  %v2632_v29 = vadd.f32 %v3221_v27, %v2592_v28 }
 0x1fa   : >> { %v3223_v22 = vpop.f32.mrf.mxu0 }
 0x1fb   : >> { %v3245_v23 = vpop.f32.mrf.mxu1  ;;  %v2672_v34 = vadd.f32 %v3243_v30, %v2632_v29 }
 0x214   : >> { %v3263_v31 = vpop.f32.mrf.mxu0 }
 0x215   : >> { %v3285_v32 = vpop.f32.mrf.mxu1 }
 0x216   : >> { %v3264_v33 = vpop.f32.mrf.mxu0 }
 0x217   : >> { %v3265_v35 = vadd.f32 %v3264_v33, %v3263_v31  ;;  %v3286_v36 = vpop.f32.mrf.mxu1 }
 0x218   : >> { %v3266_v37 = vpop.f32.mrf.mxu0  ;;  %v3287_v39 = vadd.f32 %v3286_v36, %v3285_v32 }
 0x219   : >> { %v2712_v38 = vadd.f32 %v3265_v35, %v2672_v34  ;;  %v3288_v40 = vpop.f32.mrf.mxu1 }
 0x21a   : >> { %v3267_v41 = vpop.f32.mrf.mxu0 }
 0x21b   : >> { %v2752_v42 = vadd.f32 %v3287_v39, %v2712_v38  ;;  %v3289_v43 = vpop.f32.mrf.mxu1 }
 0x21d   : >> { %v2757_v44 = vmul.f32 0.2, %v2752_v42 }
 0x21f   : >> { %v2758_v45 = vmax.f32 %v2752_v42, %v2757_v44 }
 0x220   : > { %1282 = sbr.rel (!%p1280_p2) target bundleno = 210 (0xd2), region = 167 }
 0x221   : >> { %v2759_v47 = vpack.c.bf16 %v2758_v45, %v2758_v45 }
 0x223   : >> { %v2766_v48 = vsel %vm2764_vm2, %v2759_v47, %v2765_v46 }
 0x224   : >> { %2767 = vst [vmem:[%s2761_s28] sm:$0xf] %v2766_v48 }
 0x225   : > { %2774 = sbr.rel (!%p3677_p9) target bundleno = 561 (0x231), region = 84 }
 0x226   : > { %s3293_s29 = smul.u32 (%p3677_p9), 14, %s3572_s17 }
 0x228   : > { %s2776_s5 = sadd.s32 (%p3677_p9), %s3568_s16, %s3293_s29 }
 0x229   : > { %s3111_s30 = sshll.u32 (%p3677_p9), %s2776_s5, 2 }
 0x22a   : > { %s2778_s8 = scalar_lea.vmem %s4423_s3, %s3111_s30 }
 0x22b   : > { %v2795_v49 = vld [vmem:[%s4226_s12] sm:$0xf]  ;;  %v2797_v50 = vld [vmem:[%s4226_s12 + $0x4] sm:$0xf]  ;;  %v2799_v51 = vld [vmem:[%s4226_s12 + $0x8] sm:$0xf] }
 0x22c   : > { %v2801_v52 = vld [vmem:[%s4226_s12 + $0xc] sm:$0xf]  ;;  %v2803_v53 = vld [vmem:[%s4226_s12 + $0x10] sm:$0xf]  ;;  %v2805_v54 = vld [vmem:[%s4226_s12 + $0x14] sm:$0xf] }
 0x22d   : > { %v2807_v0 = vld [vmem:[%s4226_s12 + $0x18] sm:$0xf]  ;;  %2796 = vst [vmem:[%s2778_s8] sm:$0xf] %v2795_v49  ;;  %2798 = vst [vmem:[%s2778_s8 + $0x8] sm:$0xf] %v2797_v50 }
 0x22e   : > { %2800 = vst [vmem:[%s2778_s8 + $0x10] sm:$0xf] %v2799_v51  ;;  %2802 = vst [vmem:[%s2778_s8 + $0x18] sm:$0xf] %v2801_v52 }
 0x22f   : > { %2804 = vst [vmem:[%s2778_s8 + $0x20] sm:$0xf] %v2803_v53  ;;  %2806 = vst [vmem:[%s2778_s8 + $0x28] sm:$0xf] %v2805_v54 }
 0x230   : > { %2808 = vst [vmem:[%s2778_s8 + $0x30] sm:$0xf] %v2807_v0 }
 0x231 PF: > { %s13_s20 = sadd.s32 1, %s3584_s20   ;;  %s4425_s12 = smov %s3556_s13 }
 0x232   : > { %p10_p3 = scmp.ge.s32.totalorder %s13_s20, 6   ;;  %s4426_s13 = smov %s3682_s4 }
 0x233   : > { %s4427_s14 = smov %s3564_s15  ;;  %s4428_s15 = smov %s3671_s27 }
 0x234   : > { %s4429_s16 = smov %s3576_s18  ;;  %s4430_s17 = smov %s3580_s19 }
 0x235   : > { %s4431_s18 = smov %s4434_s22  ;;  %s4432_s19 = smov %s4438_s23 }
 0x236   :  { %12 = sbr.rel (!%p10_p3) target bundleno = 5 (0x5), region = 178 }

// kernel: discriminator_forward.14
= control target key start
LH: loop header
LB: loop body
LE: loop exit
PB: predicated region body
PF: predicated region fallthrough
CT: control target
= control target key end

     0   :  { %s586_s6 = smov 0   ;;  %s588_s7 = smov 0   ;;  %s668_s0 = inlined_call_operand.vmem [shape: bf16[2,10,5,512], index: 0, kind: input, shape index: {}]   ;;  %s669_s1 = inlined_call_operand.vmem [shape: bf16[2,4,4,256], index: 1, kind: output, shape index: {}]  }
   0x1   :  { %s590_s8 = smov 0   ;;  %s592_s9 = smov 0  }
   0x2   :  { %s594_s10 = smov 0  }
   0x3 LB: > { %s20_s11 = sadd.s32 1, %s562_s8  ;;  %s23_s12 = sadd.s32 1, %s566_s9  ;;  %s570_s10 = sphi %s594_s10, %s11_s10   ;;  %s566_s9 = sphi %s592_s9, %s673_s9   ;;  %s562_s8 = sphi %s590_s8, %s672_s8   ;;  %s558_s7 = sphi %s588_s7, %s671_s7   ;;  %s554_s6 = sphi %s586_s6, %s670_s6  }
   0x4   : > { %p21_p0 = scmp.ge.s32.totalorder %s20_s11, 2  ;;  %p442_p1 = scmp.ge.s32.totalorder %s570_s10, 1 }
   0x5   : > { %p101_p2 = scmp.lt.s32.totalorder %s570_s10, 5 }
   0x6   : > { %s675_s11 = smov (%p21_p0, %s20_s11), 0  ;;  %s677_s12 = smov (!%p21_p0, %s23_s12), %s566_s9 }
   0x7   : > { %p102_p3 = pnand %p442_p1, %p101_p2  ;;  %p25_p4 = scmp.ge.s32.totalorder %s677_s12, 2 }
   0x8   : > { %p126_p5 = scmp.lt.s32.totalorder (!%p102_p3), %s558_s7, 1  ;;  %s616_s13 = sshll.u32 (!%p102_p3), %s554_s6, 1 }
   0x9   : > { %s679_s12 = smov (%p25_p4, %s677_s12), 0  ;;  %105 = sbr.rel (%p102_p3) target bundleno = 63 (0x3f), region = 24 }
   0xa   : > { %p134_p6 = scmp.lt.s32.totalorder (!%p102_p3), %s616_s13, 3  ;;  %s630_s26 = smov (!%p102_p3), 0  }
   0xe   : > { %s681_s7 = smov (!%p126_p5, %s558_s7), 1 }
   0xf   : > { %s135_s14 = scalar_select %p134_p6, %s616_s13, 3 }
  0x10   : > { %s479_s15 = smul.u32 160, %s681_s7  ;;  %s446_s16 = sshll.u32 %s681_s7, 3 }
  0x11   : > { %s445_s17 = sshll.u32 %s135_s14, 1 }
  0x12   : > { %s623_s20 = scalar_lea.vmem %s668_s0, %s479_s15  ;;  %s138_s21 = sadd.s32 %s446_s16, %s445_s17 }
  0x13   : > { %s447_s22 = sshll.u32 %s138_s21, 1 }
  0x14   : > { %s628_s25 = scalar_lea.vmem %s669_s1, %s447_s22 }
  0x15 LB: >> { %s149_s27 = sadd.s32 %s574_s26, %s616_s13  ;;  %s478_s30 = sshll.u32 %s574_s26, 2  ;;  %s574_s26 = sphi %s630_s26, %s147_s26  }
  0x16   : >> { %s474_s28 = sshll.u32 %s149_s27, 5  ;;  %s317_s2 = scalar_lea.vmem %s628_s25, %s478_s30 }
  0x17   : >> { %s638_s29 = scalar_lea.vmem %s623_s20, %s474_s28  ;;  %s147_s26 = sadd.s32 1, %s574_s26  }
  0x18   : >> { %v154_v0 = vld [vmem:[%s638_s29] sm:$0x77]  ;;  %v155_v1 = vld [vmem:[%s638_s29 + $0x8] sm:$0x77]  ;;  %v455_v2 = vld [vmem:[%s638_s29 + $0x10] sm:$0x77] }
  0x19   : >> { %v156_v3 = vunpack.c.l.bf16 %v154_v0  ;;  %v157_v4 = vunpack.c.h.bf16 %v154_v0  ;;  %v158_v5 = vunpack.c.l.bf16 %v155_v1  ;;  %v159_v6 = vunpack.c.h.bf16 %v155_v1  ;;  %v456_v7 = vld [vmem:[%s638_s29 + $0x18] sm:$0x77]  ;;  %v460_v32 = vld [vmem:[%s638_s29 + $0x20] sm:$0x77]  ;;  %v461_v39 = vld [vmem:[%s638_s29 + $0x28] sm:$0x77] }
  0x1a   : >> { %v194_v8 = vunpack.c.l.bf16 %v455_v2  ;;  %v195_v9 = vunpack.c.h.bf16 %v455_v2  ;;  %v196_v20 = vunpack.c.l.bf16 %v456_v7  ;;  %v197_v21 = vunpack.c.h.bf16 %v456_v7  ;;  %v465_v58 = vld [vmem:[%s638_s29 + $0x30] sm:$0x77]  ;;  %v466_v1 = vld [vmem:[%s638_s29 + $0x38] sm:$0x77]  ;;  %p144_p7 = scmp.ge.s32.totalorder %s147_s26, 2  }
  0x1b   : >> { %v160_v10 = vmul.f32 0.015625, %v156_v3  ;;  %v161_v11 = vmul.f32 0.015625, %v157_v4  ;;  %v164_v12 = vmul.f32 0.046875, %v158_v5  ;;  %v165_v13 = vmul.f32 0.046875, %v159_v6 }
  0x1c   : >> { %v168_v14 = vmul.f32 0.046875, %v156_v3  ;;  %v169_v15 = vmul.f32 0.046875, %v157_v4  ;;  %v178_v16 = vmul.f32 0.015625, %v158_v5  ;;  %v179_v17 = vmul.f32 0.015625, %v159_v6 }
  0x1d   : >> { %v166_v18 = vadd.f32 %v164_v12, %v160_v10  ;;  %v167_v19 = vadd.f32 %v165_v13, %v161_v11  ;;  %v198_v26 = vmul.f32 0.046875, %v194_v8  ;;  %v199_v27 = vmul.f32 0.046875, %v195_v9 }
  0x1e   : >> { %v172_v22 = vrot.slane %v168_v14, 1  ;;  %v173_v23 = vrot.slane %v169_v15, 1  ;;  %v182_v24 = vrot.slane %v178_v16, 1  ;;  %v183_v25 = vrot.slane %v179_v17, 1 }
  0x1f   : >> { %v206_v30 = vmul.f32 0.140625, %v194_v8  ;;  %v207_v31 = vmul.f32 0.140625, %v195_v9  ;;  %v202_v33 = vmul.f32 0.140625, %v196_v20  ;;  %v203_v34 = vmul.f32 0.140625, %v197_v21 }
  0x20   : >> { %v176_v28 = vadd.f32 %v172_v22, %v166_v18  ;;  %v177_v29 = vadd.f32 %v173_v23, %v167_v19  ;;  %v216_v37 = vmul.f32 0.046875, %v196_v20  ;;  %v217_v38 = vmul.f32 0.046875, %v197_v21 }
  0x21   : >> { %v232_v40 = vunpack.c.l.bf16 %v460_v32  ;;  %v233_v41 = vunpack.c.h.bf16 %v460_v32  ;;  %v210_v44 = vrot.slane %v206_v30, 1  ;;  %v211_v45 = vrot.slane %v207_v31, 1 }
  0x22   : >> { %v186_v35 = vadd.f32 %v182_v24, %v176_v28  ;;  %v187_v36 = vadd.f32 %v183_v25, %v177_v29  ;;  %v234_v46 = vunpack.c.l.bf16 %v461_v39  ;;  %v235_v47 = vunpack.c.h.bf16 %v461_v39 }
  0x23   : >> { %v220_v50 = vrot.slane %v216_v37, 1  ;;  %v221_v51 = vrot.slane %v217_v38, 1  ;;  %v236_v52 = vmul.f32 0.046875, %v232_v40  ;;  %v237_v53 = vmul.f32 0.046875, %v233_v41 }
  0x24   : >> { %v200_v42 = vadd.f32 %v198_v26, %v186_v35  ;;  %v201_v43 = vadd.f32 %v199_v27, %v187_v36  ;;  %v244_v56 = vmul.f32 0.140625, %v232_v40  ;;  %v245_v57 = vmul.f32 0.140625, %v233_v41 }
  0x25   : >> { %v240_v59 = vmul.f32 0.140625, %v234_v46  ;;  %v241_v60 = vmul.f32 0.140625, %v235_v47  ;;  %v254_v63 = vmul.f32 0.046875, %v234_v46  ;;  %v255_v0 = vmul.f32 0.046875, %v235_v47 }
  0x26   : >> { %v204_v48 = vadd.f32 %v202_v33, %v200_v42  ;;  %v205_v49 = vadd.f32 %v203_v34, %v201_v43  ;;  %v270_v2 = vunpack.c.l.bf16 %v465_v58  ;;  %v271_v3 = vunpack.c.h.bf16 %v465_v58 }
  0x27   : >> { %v248_v6 = vrot.slane %v244_v56, 1  ;;  %v249_v7 = vrot.slane %v245_v57, 1  ;;  %v272_v8 = vunpack.c.l.bf16 %v466_v1  ;;  %v273_v9 = vunpack.c.h.bf16 %v466_v1 }
  0x28   : >> { %v214_v54 = vadd.f32 %v210_v44, %v204_v48  ;;  %v215_v55 = vadd.f32 %v211_v45, %v205_v49  ;;  %v258_v12 = vrot.slane %v254_v63, 1  ;;  %v259_v13 = vrot.slane %v255_v0, 1 }
  0x29   : >> { %v274_v14 = vmul.f32 0.015625, %v270_v2  ;;  %v275_v15 = vmul.f32 0.015625, %v271_v3  ;;  %v282_v18 = vmul.f32 0.046875, %v270_v2  ;;  %v283_v19 = vmul.f32 0.046875, %v271_v3 }
  0x2a   : >> { %v224_v61 = vadd.f32 %v220_v50, %v214_v54  ;;  %v225_v62 = vadd.f32 %v221_v51, %v215_v55  ;;  %v278_v20 = vmul.f32 0.046875, %v272_v8  ;;  %v279_v21 = vmul.f32 0.046875, %v273_v9 }
  0x2b   : >> { %v292_v24 = vmul.f32 0.015625, %v272_v8  ;;  %v293_v25 = vmul.f32 0.015625, %v273_v9  ;;  %v286_v28 = vrot.slane %v282_v18, 1  ;;  %v287_v29 = vrot.slane %v283_v19, 1 }
  0x2c   : >> { %v238_v4 = vadd.f32 %v236_v52, %v224_v61  ;;  %v239_v5 = vadd.f32 %v237_v53, %v225_v62 }
  0x2d   : >> { %v296_v32 = vrot.slane %v292_v24, 1  ;;  %v297_v33 = vrot.slane %v293_v25, 1 }
  0x2e   : >> { %v242_v10 = vadd.f32 %v240_v59, %v238_v4  ;;  %v243_v11 = vadd.f32 %v241_v60, %v239_v5 }
  0x30   : >> { %v252_v16 = vadd.f32 %v248_v6, %v242_v10  ;;  %v253_v17 = vadd.f32 %v249_v7, %v243_v11 }
  0x32   : >> { %v262_v22 = vadd.f32 %v258_v12, %v252_v16  ;;  %v263_v23 = vadd.f32 %v259_v13, %v253_v17 }
  0x34   : >> { %v276_v26 = vadd.f32 %v274_v14, %v262_v22  ;;  %v277_v27 = vadd.f32 %v275_v15, %v263_v23 }
  0x36   : >> { %v280_v30 = vadd.f32 %v278_v20, %v276_v26  ;;  %v281_v31 = vadd.f32 %v279_v21, %v277_v27 }
  0x38   : >> { %v290_v34 = vadd.f32 %v286_v28, %v280_v30  ;;  %v291_v35 = vadd.f32 %v287_v29, %v281_v31 }
  0x3a   : >> { %v300_v36 = vadd.f32 %v296_v32, %v290_v34  ;;  %v301_v37 = vadd.f32 %v297_v33, %v291_v35  ;;  %146 = sbr.rel (!%p144_p7) target bundleno = 21 (0x15), region = 66 }
  0x3c   : >> { %v467_v38 = vpack.c.bf16 %v301_v37, %v300_v36 }
  0x3e   : >> { %470 = vst.sshfl [vmem:[%s317_s2] sm:$0x33 pattern:$0x76325410] %v467_v38 }
  0x3f PF: > { %s11_s10 = sadd.s32 1, %s570_s10   ;;  %s670_s6 = smov %s562_s8 }
  0x40   : > { %p8_p8 = scmp.ge.s32.totalorder %s11_s10, 6   ;;  %s671_s7 = smov %s566_s9 }
  0x41   : > { %s672_s8 = smov %s675_s11  ;;  %s673_s9 = smov %s679_s12 }
  0x42   :  { %10 = sbr.rel (!%p8_p8) target bundleno = 3 (0x3), region = 77 }

// kernel: discriminator_forward.16
= control target key start
LH: loop header
LB: loop body
LE: loop exit
PB: predicated region body
PF: predicated region fallthrough
CT: control target
= control target key end

     0   :  { %s581_s6 = smov 0   ;;  %s583_s7 = smov 0   ;;  %s651_s0 = inlined_call_operand.vmem [shape: bf16[2,6,3,1024], index: 0, kind: input, shape index: {}]   ;;  %s652_s1 = inlined_call_operand.vmem [shape: bf16[2,2,2,512], index: 1, kind: output, shape index: {}]  }
   0x1   :  { %s585_s8 = smov 0   ;;  %s587_s9 = smov 0  }
   0x2   :  { %s589_s10 = smov 0  }
   0x3 LB: > { %s20_s11 = sadd.s32 1, %s560_s8  ;;  %s23_s12 = sadd.s32 1, %s564_s9  ;;  %s568_s10 = sphi %s589_s10, %s11_s10   ;;  %s564_s9 = sphi %s587_s9, %s656_s9   ;;  %s560_s8 = sphi %s585_s8, %s655_s8   ;;  %s556_s7 = sphi %s583_s7, %s654_s7   ;;  %s552_s6 = sphi %s581_s6, %s653_s6  }
   0x4   : > { %p21_p0 = scmp.ge.s32.totalorder %s20_s11, 2  ;;  %p443_p1 = scmp.ge.s32.totalorder %s568_s10, 1 }
   0x5   : > { %p101_p2 = scmp.lt.s32.totalorder %s568_s10, 5 }
   0x6   : > { %s658_s11 = smov (%p21_p0, %s20_s11), 0  ;;  %s660_s12 = smov (!%p21_p0, %s23_s12), %s564_s9 }
   0x7   : > { %p102_p3 = pnand %p443_p1, %p101_p2  ;;  %p25_p4 = scmp.ge.s32.totalorder %s660_s12, 2 }
   0x8   : > { %p124_p5 = scmp.lt.s32.totalorder (!%p102_p3), %s556_s7, 1  ;;  %s484_s14 = sshll.u32 (!%p102_p3), %s552_s6, 5 }
   0x9   : > { %s662_s12 = smov (%p25_p4, %s660_s12), 0  ;;  %105 = sbr.rel (%p102_p3) target bundleno = 64 (0x40), region = 24 }
   0xa   : > { %p131_p6 = scmp.lt.s32.totalorder (!%p102_p3), %s552_s6, 1 }
   0xe   : > { %s664_s7 = smov (!%p124_p5, %s556_s7), 1  ;;  %s666_s6 = smov (!%p131_p6, %s552_s6), 1 }
   0xf   : > { %s488_s13 = smul.u32 96, %s664_s7  ;;  %s445_s19 = sshll.u32 %s666_s6, 2 }
  0x10   : > { %s446_s20 = sshll.u32 %s664_s7, 3 }
  0x11   : > { %s128_s17 = scalar_lea.vmem %s651_s0, %s488_s13  ;;  %s135_s21 = sadd.s32 %s446_s20, %s445_s19 }
  0x12   : > { %s620_s18 = scalar_lea.vmem %s128_s17, %s484_s14  ;;  %s136_s24 = scalar_lea.vmem %s652_s1, %s135_s21 }
  0x13   : > { %v141_v0 = vld [vmem:[%s620_s18] sm:$0xff]  ;;  %v142_v1 = vld [vmem:[%s620_s18 + $0x8] sm:$0xff]  ;;  %v456_v2 = vld [vmem:[%s620_s18 + $0x10] sm:$0xff] }
  0x14   : > { %v143_v3 = vunpack.c.l.bf16 %v141_v0  ;;  %v144_v4 = vunpack.c.h.bf16 %v141_v0  ;;  %v145_v5 = vunpack.c.l.bf16 %v142_v1  ;;  %v146_v6 = vunpack.c.h.bf16 %v142_v1  ;;  %v457_v7 = vld [vmem:[%s620_s18 + $0x18] sm:$0xff]  ;;  %v464_v32 = vld [vmem:[%s620_s18 + $0x20] sm:$0xff]  ;;  %v465_v39 = vld [vmem:[%s620_s18 + $0x28] sm:$0xff] }
  0x15   : > { %v185_v8 = vunpack.c.l.bf16 %v456_v2  ;;  %v186_v9 = vunpack.c.h.bf16 %v456_v2  ;;  %v187_v20 = vunpack.c.l.bf16 %v457_v7  ;;  %v188_v21 = vunpack.c.h.bf16 %v457_v7  ;;  %v472_v58 = vld [vmem:[%s620_s18 + $0x30] sm:$0xff]  ;;  %v473_v1 = vld [vmem:[%s620_s18 + $0x38] sm:$0xff] }
  0x16   : > { %v147_v10 = vmul.f32 0.015625, %v143_v3  ;;  %v148_v11 = vmul.f32 0.015625, %v144_v4  ;;  %v151_v12 = vmul.f32 0.046875, %v145_v5  ;;  %v152_v13 = vmul.f32 0.046875, %v146_v6 }
  0x17   : > { %v155_v14 = vmul.f32 0.046875, %v143_v3  ;;  %v156_v15 = vmul.f32 0.046875, %v144_v4  ;;  %v167_v16 = vmul.f32 0.015625, %v145_v5  ;;  %v168_v17 = vmul.f32 0.015625, %v146_v6 }
  0x18   : > { %v153_v18 = vadd.f32 %v151_v12, %v147_v10  ;;  %v154_v19 = vadd.f32 %v152_v13, %v148_v11  ;;  %v189_v26 = vmul.f32 0.046875, %v185_v8  ;;  %v190_v27 = vmul.f32 0.046875, %v186_v9 }
  0x19   : > { %v450_v22 = vrot.slane %v155_v14, 9  ;;  %v451_v23 = vrot.slane %v156_v15, 9  ;;  %v452_v24 = vrot.slane %v167_v16, 9  ;;  %v453_v25 = vrot.slane %v168_v17, 9 }
  0x1a   : > { %v197_v30 = vmul.f32 0.140625, %v185_v8  ;;  %v198_v31 = vmul.f32 0.140625, %v186_v9  ;;  %v193_v33 = vmul.f32 0.140625, %v187_v20  ;;  %v194_v34 = vmul.f32 0.140625, %v188_v21 }
  0x1b   : > { %v165_v28 = vadd.f32 %v450_v22, %v153_v18  ;;  %v166_v29 = vadd.f32 %v451_v23, %v154_v19  ;;  %v209_v37 = vmul.f32 0.046875, %v187_v20  ;;  %v210_v38 = vmul.f32 0.046875, %v188_v21 }
  0x1c   : > { %v227_v40 = vunpack.c.l.bf16 %v464_v32  ;;  %v228_v41 = vunpack.c.h.bf16 %v464_v32  ;;  %v458_v44 = vrot.slane %v197_v30, 9  ;;  %v459_v45 = vrot.slane %v198_v31, 9 }
  0x1d   : > { %v177_v35 = vadd.f32 %v452_v24, %v165_v28  ;;  %v178_v36 = vadd.f32 %v453_v25, %v166_v29  ;;  %v229_v46 = vunpack.c.l.bf16 %v465_v39  ;;  %v230_v47 = vunpack.c.h.bf16 %v465_v39 }
  0x1e   : > { %v460_v50 = vrot.slane %v209_v37, 9  ;;  %v461_v51 = vrot.slane %v210_v38, 9  ;;  %v231_v52 = vmul.f32 0.046875, %v227_v40  ;;  %v232_v53 = vmul.f32 0.046875, %v228_v41 }
  0x1f   : > { %v191_v42 = vadd.f32 %v189_v26, %v177_v35  ;;  %v192_v43 = vadd.f32 %v190_v27, %v178_v36  ;;  %v239_v56 = vmul.f32 0.140625, %v227_v40  ;;  %v240_v57 = vmul.f32 0.140625, %v228_v41 }
  0x20   : > { %v235_v59 = vmul.f32 0.140625, %v229_v46  ;;  %v236_v60 = vmul.f32 0.140625, %v230_v47  ;;  %v251_v63 = vmul.f32 0.046875, %v229_v46  ;;  %v252_v0 = vmul.f32 0.046875, %v230_v47 }
  0x21   : > { %v195_v48 = vadd.f32 %v193_v33, %v191_v42  ;;  %v196_v49 = vadd.f32 %v194_v34, %v192_v43  ;;  %v269_v2 = vunpack.c.l.bf16 %v472_v58  ;;  %v270_v3 = vunpack.c.h.bf16 %v472_v58 }
  0x22   : > { %v466_v6 = vrot.slane %v239_v56, 9  ;;  %v467_v7 = vrot.slane %v240_v57, 9  ;;  %v271_v8 = vunpack.c.l.bf16 %v473_v1  ;;  %v272_v9 = vunpack.c.h.bf16 %v473_v1 }
  0x23   : > { %v207_v54 = vadd.f32 %v458_v44, %v195_v48  ;;  %v208_v55 = vadd.f32 %v459_v45, %v196_v49  ;;  %v468_v12 = vrot.slane %v251_v63, 9  ;;  %v469_v13 = vrot.slane %v252_v0, 9 }
  0x24   : > { %v273_v14 = vmul.f32 0.015625, %v269_v2  ;;  %v274_v15 = vmul.f32 0.015625, %v270_v3  ;;  %v281_v18 = vmul.f32 0.046875, %v269_v2  ;;  %v282_v19 = vmul.f32 0.046875, %v270_v3 }
  0x25   : > { %v219_v61 = vadd.f32 %v460_v50, %v207_v54  ;;  %v220_v62 = vadd.f32 %v461_v51, %v208_v55  ;;  %v277_v20 = vmul.f32 0.046875, %v271_v8  ;;  %v278_v21 = vmul.f32 0.046875, %v272_v9 }
  0x26   : > { %v293_v24 = vmul.f32 0.015625, %v271_v8  ;;  %v294_v25 = vmul.f32 0.015625, %v272_v9  ;;  %v570_v26 = vmov 1966171168   ;;  %v324_v28 = vlaneseq }
  0x27   : > { %v233_v4 = vadd.f32 %v231_v52, %v219_v61  ;;  %v234_v5 = vadd.f32 %v232_v53, %v220_v62  ;;  %v322_v27 = vunpack.c.l.s4 %v570_v26  ;;  %v474_v31 = vrot.slane %v281_v18, 9 }
  0x28   : > { %v475_v32 = vrot.slane %v282_v19, 9  ;;  %v476_v35 = vrot.slane %v293_v24, 9  ;;  %v477_v36 = vrot.slane %v294_v25, 9  ;;  %v325_v40 = vshrl.u32 %v324_v28, 7 }
  0x29   : > { %v237_v10 = vadd.f32 %v235_v59, %v233_v4  ;;  %v238_v11 = vadd.f32 %v236_v60, %v234_v5  ;;  %v323_v39 = vunpack.c.0.s8 %v322_v27 }
  0x2b   : > { %v249_v16 = vadd.f32 %v466_v6, %v237_v10  ;;  %v250_v17 = vadd.f32 %v467_v7, %v238_v11  ;;  %v326_v45 = vsub.s32 %v323_v39, %v325_v40 }
  0x2d   : > { %v261_v22 = vadd.f32 %v468_v12, %v249_v16  ;;  %v262_v23 = vadd.f32 %v469_v13, %v250_v17 }
  0x2f   : > { %v275_v29 = vadd.f32 %v273_v14, %v261_v22  ;;  %v276_v30 = vadd.f32 %v274_v15, %v262_v23 }
  0x31   : > { %v279_v33 = vadd.f32 %v277_v20, %v275_v29  ;;  %v280_v34 = vadd.f32 %v278_v21, %v276_v30 }
  0x33   : > { %v291_v37 = vadd.f32 %v474_v31, %v279_v33  ;;  %v292_v38 = vadd.f32 %v475_v32, %v280_v34 }
  0x35   : > { %v303_v41 = vadd.f32 %v476_v35, %v291_v37  ;;  %v304_v42 = vadd.f32 %v477_v36, %v292_v38 }
  0x37   : > { %v307_v43 = vcombine.high %v303_v41, %v303_v41  ;;  %v308_v44 = vcombine.high %v304_v42, %v304_v42 }
  0x39   : > { %v478_v46 = vpack.c.bf16 %v307_v43, %v303_v41  ;;  %v479_v47 = vpack.c.bf16 %v308_v44, %v304_v42 }
  0x3b   : > { %v327_v48 = vrot.slane %v478_v46, %v326_v45  ;;  %v334_v49 = vrot.slane %v479_v47, %v326_v45 }
  0x3d   : > { %v335_v50 = vcombine.low %v327_v48, %v334_v49 }
  0x3f   : > { %480 = vst.sshfl [vmem:[%s136_s24] sm:$0x55 pattern:$0x73625140] %v335_v50 }
  0x40 PF: > { %s11_s10 = sadd.s32 1, %s568_s10   ;;  %s653_s6 = smov %s560_s8 }
  0x41   : > { %p8_p7 = scmp.ge.s32.totalorder %s11_s10, 6   ;;  %s654_s7 = smov %s564_s9 }
  0x42   : > { %s655_s8 = smov %s658_s11  ;;  %s656_s9 = smov %s662_s12 }
  0x43   :  { %10 = sbr.rel (!%p8_p7) target bundleno = 3 (0x3), region = 58 }

// kernel: discriminator_forward.15
= control target key start
LH: loop header
LB: loop body
LE: loop exit
PB: predicated region body
PF: predicated region fallthrough
CT: control target
= control target key end

     0   :  { %s8505_s12 = smov 0   ;;  %s8507_s13 = smov 0   ;;  %s10003_s0 = inlined_call_operand.vmem [shape: bf16[2,6,6,256], index: 0, kind: input, shape index: {}]   ;;  %s10004_s1 = inlined_call_operand.vmem [shape: bf16[4096,512], index: 1, kind: input, shape index: {}]   ;;  %s10005_s2 = inlined_call_operand.vmem [shape: f32[1,512], index: 2, kind: input, shape index: {}]   ;;  %s10006_s3 = inlined_call_operand.vmem [shape: bf16[2,3,3,512], index: 3, kind: output, shape index: {}]  }
   0x1   :  { %s8509_s14 = smov 0   ;;  %s8511_s15 = smov 0  }
   0x2   :  { %s8513_s16 = smov 0   ;;  %s8515_s17 = smov 0  }
   0x3   :  { %s8517_s18 = smov 0   ;;  %s8519_s19 = smov 0  }
   0x4   :  { %s8521_s20 = smov 0  }
   0x5 LB: > { %s7419_s21 = sadd.s32 4294967295, %s8479_s20   ;;  %s22_s22 = sadd.s32 1, %s8471_s18  ;;  %s8479_s20 = sphi %s8521_s20, %s13_s20   ;;  %s8475_s19 = sphi %s8519_s19, %s10015_s19   ;;  %s8471_s18 = sphi %s8517_s18, %s10014_s18   ;;  %s8467_s17 = sphi %s8515_s17, %s10013_s17   ;;  %s8463_s16 = sphi %s8513_s16, %s10012_s16   ;;  %s8459_s15 = sphi %s8511_s15, %s10011_s15   ;;  %s8455_s14 = sphi %s8509_s14, %s10010_s14   ;;  %s8451_s13 = sphi %s8507_s13, %s10009_s13   ;;  %s8447_s12 = sphi %s8505_s12, %s10008_s12  }
   0x6   : > { %p23_p0 = scmp.ge.s32.totalorder %s22_s22, 4  ;;  %s25_s23 = sadd.s32 1, %s8475_s19 }
   0x7   : > { %s58_s24 = sadd.s32 1, %s8459_s15  ;;  %p65_p1 = scmp.ne.s32.totalorder %s8459_s15, %s8455_s14 }
   0x8   : > { %s10017_s22 = smov (%p23_p0, %s22_s22), 0  ;;  %s10019_s23 = smov (!%p23_p0, %s25_s23), %s8475_s19 }
   0x9   : > { %s55_s25 = ssub.s32 %s8471_s18, %s10017_s22  ;;  %p66_p2 = scmp.eq.s32.totalorder %s8479_s20, 0 }
   0xa   : > { %p27_p3 = scmp.ge.s32.totalorder %s10019_s23, 2  ;;  %p56_p4 = scmp.eq.s32.totalorder %s55_s25, 0 }
   0xb   : > { %p67_p5 = por %p66_p2, %p65_p1  ;;  %s112_s26 = sadd.s32 1, %s8451_s13 }
   0xc   : > { %s10021_s23 = smov (%p27_p3, %s10019_s23), 0  ;;  %p122_p6 = scmp.ne.s32.totalorder %s8451_s13, %s8447_s12 }
   0xd   : > { %s8566_s27 = scalar_select %p56_p4, %s8459_s15, %s58_s24  }
   0xe   : > { %s107_s28 = ssub.s32 %s8475_s19, %s10021_s23  ;;  %p123_p7 = scmp.eq.s32.totalorder %s7419_s21, 7 }
   0xf   : > { %s109_s29 = sor.u32 %s107_s28, %s55_s25  ;;  %p7422_p10 = scmp.ge.s32.totalorder %s8479_s20, 8 }
  0x10   : > { %p110_p8 = scmp.eq.s32.totalorder %s109_s29, 0  ;;  %p8572_p9 = por %p123_p7, %p122_p6 }
  0x11   : > { %145 = sbr.rel (%p7422_p10) target bundleno = 367 (0x16f), region = 16 }
  0x12   : > { %s8577_s4 = scalar_select %p110_p8, %s8451_s13, %s112_s26  }
  0x16   : > { %156 = sbr.rel (!%p67_p5) target bundleno = 367 (0x16f), region = 24  ;;  %s158_s5 = sand.u32 (%p67_p5), 1, %s8459_s15  }
  0x17   : > { %s7424_s6 = sshll.u32 (%p67_p5), %s8471_s18, 2  ;;  %s7423_s7 = sshll.u32 (%p67_p5), %s158_s5, 11 }
  0x18   : > { %s8585_s10 = scalar_lea.vmem (%p67_p5), %s10004_s1, %s7424_s6  ;;  %s8589_s11 = scalar_lea.vmem (%p67_p5), [#allocation2], %s7423_s7 }
  0x19   : > { %v179_v0 = vld [vmem:[%s8585_s10] sm:$0xf] (%p67_p5)  ;;  %v181_v1 = vld [vmem:[%s8585_s10 + $0x10] sm:$0xf] (%p67_p5) }
  0x1a   : > { %180 = vst [vmem:[%s8589_s11] sm:$0xf] (%p67_p5), %v179_v0  ;;  %182 = vst [vmem:[%s8589_s11 + $0x4] sm:$0xf] (%p67_p5), %v181_v1  ;;  %v183_v2 = vld [vmem:[%s8585_s10 + $0x20] sm:$0xf] (%p67_p5) }
  0x1b   : > { %v185_v3 = vld [vmem:[%s8585_s10 + $0x30] sm:$0xf]  ;;  %v187_v4 = vld [vmem:[%s8585_s10 + $0x40] sm:$0xf]  ;;  %184 = vst [vmem:[%s8589_s11 + $0x8] sm:$0xf] %v183_v2 }
  0x1c   : > { %186 = vst [vmem:[%s8589_s11 + $0xc] sm:$0xf] %v185_v3  ;;  %188 = vst [vmem:[%s8589_s11 + $0x10] sm:$0xf] %v187_v4  ;;  %v189_v5 = vld [vmem:[%s8585_s10 + $0x50] sm:$0xf] }
  0x1d   : > { %v191_v6 = vld [vmem:[%s8585_s10 + $0x60] sm:$0xf]  ;;  %v193_v7 = vld [vmem:[%s8585_s10 + $0x70] sm:$0xf]  ;;  %190 = vst [vmem:[%s8589_s11 + $0x14] sm:$0xf] %v189_v5 }
  0x1e   : > { %192 = vst [vmem:[%s8589_s11 + $0x18] sm:$0xf] %v191_v6  ;;  %194 = vst [vmem:[%s8589_s11 + $0x1c] sm:$0xf] %v193_v7  ;;  %v195_v8 = vld [vmem:[%s8585_s10 + $0x80] sm:$0xf] }
  0x1f   : > { %v197_v9 = vld [vmem:[%s8585_s10 + $0x90] sm:$0xf]  ;;  %v199_v10 = vld [vmem:[%s8585_s10 + $0xa0] sm:$0xf]  ;;  %196 = vst [vmem:[%s8589_s11 + $0x20] sm:$0xf] %v195_v8 }
  0x20   : > { %198 = vst [vmem:[%s8589_s11 + $0x24] sm:$0xf] %v197_v9  ;;  %200 = vst [vmem:[%s8589_s11 + $0x28] sm:$0xf] %v199_v10  ;;  %v201_v11 = vld [vmem:[%s8585_s10 + $0xb0] sm:$0xf] }
  0x21   : > { %v203_v12 = vld [vmem:[%s8585_s10 + $0xc0] sm:$0xf]  ;;  %v205_v13 = vld [vmem:[%s8585_s10 + $0xd0] sm:$0xf]  ;;  %202 = vst [vmem:[%s8589_s11 + $0x2c] sm:$0xf] %v201_v11 }
  0x22   : > { %204 = vst [vmem:[%s8589_s11 + $0x30] sm:$0xf] %v203_v12  ;;  %206 = vst [vmem:[%s8589_s11 + $0x34] sm:$0xf] %v205_v13  ;;  %v207_v14 = vld [vmem:[%s8585_s10 + $0xe0] sm:$0xf] }
  0x23   : > { %v209_v15 = vld [vmem:[%s8585_s10 + $0xf0] sm:$0xf]  ;;  %v211_v16 = vld [vmem:[%s8585_s10 + $0x100] sm:$0xf]  ;;  %208 = vst [vmem:[%s8589_s11 + $0x38] sm:$0xf] %v207_v14 }
  0x24   : > { %210 = vst [vmem:[%s8589_s11 + $0x3c] sm:$0xf] %v209_v15  ;;  %212 = vst [vmem:[%s8589_s11 + $0x40] sm:$0xf] %v211_v16  ;;  %v213_v17 = vld [vmem:[%s8585_s10 + $0x110] sm:$0xf] }
  0x25   : > { %v215_v18 = vld [vmem:[%s8585_s10 + $0x120] sm:$0xf]  ;;  %v217_v19 = vld [vmem:[%s8585_s10 + $0x130] sm:$0xf]  ;;  %214 = vst [vmem:[%s8589_s11 + $0x44] sm:$0xf] %v213_v17 }
  0x26   : > { %216 = vst [vmem:[%s8589_s11 + $0x48] sm:$0xf] %v215_v18  ;;  %218 = vst [vmem:[%s8589_s11 + $0x4c] sm:$0xf] %v217_v19  ;;  %v219_v20 = vld [vmem:[%s8585_s10 + $0x140] sm:$0xf] }
  0x27   : > { %v221_v21 = vld [vmem:[%s8585_s10 + $0x150] sm:$0xf]  ;;  %v223_v22 = vld [vmem:[%s8585_s10 + $0x160] sm:$0xf]  ;;  %220 = vst [vmem:[%s8589_s11 + $0x50] sm:$0xf] %v219_v20 }
  0x28   : > { %222 = vst [vmem:[%s8589_s11 + $0x54] sm:$0xf] %v221_v21  ;;  %224 = vst [vmem:[%s8589_s11 + $0x58] sm:$0xf] %v223_v22  ;;  %v225_v23 = vld [vmem:[%s8585_s10 + $0x170] sm:$0xf] }
  0x29   : > { %v227_v24 = vld [vmem:[%s8585_s10 + $0x180] sm:$0xf]  ;;  %v229_v25 = vld [vmem:[%s8585_s10 + $0x190] sm:$0xf]  ;;  %226 = vst [vmem:[%s8589_s11 + $0x5c] sm:$0xf] %v225_v23 }
  0x2a   : > { %228 = vst [vmem:[%s8589_s11 + $0x60] sm:$0xf] %v227_v24  ;;  %230 = vst [vmem:[%s8589_s11 + $0x64] sm:$0xf] %v229_v25  ;;  %v231_v26 = vld [vmem:[%s8585_s10 + $0x1a0] sm:$0xf] }
  0x2b   : > { %v233_v27 = vld [vmem:[%s8585_s10 + $0x1b0] sm:$0xf]  ;;  %v235_v28 = vld [vmem:[%s8585_s10 + $0x1c0] sm:$0xf]  ;;  %232 = vst [vmem:[%s8589_s11 + $0x68] sm:$0xf] %v231_v26 }
  0x2c   : > { %234 = vst [vmem:[%s8589_s11 + $0x6c] sm:$0xf] %v233_v27  ;;  %236 = vst [vmem:[%s8589_s11 + $0x70] sm:$0xf] %v235_v28  ;;  %v237_v29 = vld [vmem:[%s8585_s10 + $0x1d0] sm:$0xf] }
  0x2d   : > { %v239_v30 = vld [vmem:[%s8585_s10 + $0x1e0] sm:$0xf]  ;;  %v241_v31 = vld [vmem:[%s8585_s10 + $0x1f0] sm:$0xf]  ;;  %238 = vst [vmem:[%s8589_s11 + $0x74] sm:$0xf] %v237_v29 }
  0x2e   : > { %240 = vst [vmem:[%s8589_s11 + $0x78] sm:$0xf] %v239_v30  ;;  %242 = vst [vmem:[%s8589_s11 + $0x7c] sm:$0xf] %v241_v31  ;;  %v243_v32 = vld [vmem:[%s8585_s10 + $0x200] sm:$0xf] }
  0x2f   : > { %v245_v33 = vld [vmem:[%s8585_s10 + $0x210] sm:$0xf]  ;;  %v247_v34 = vld [vmem:[%s8585_s10 + $0x220] sm:$0xf]  ;;  %244 = vst [vmem:[%s8589_s11 + $0x80] sm:$0xf] %v243_v32 }
  0x30   : > { %246 = vst [vmem:[%s8589_s11 + $0x84] sm:$0xf] %v245_v33  ;;  %248 = vst [vmem:[%s8589_s11 + $0x88] sm:$0xf] %v247_v34  ;;  %v249_v35 = vld [vmem:[%s8585_s10 + $0x230] sm:$0xf] }
  0x31   : > { %v251_v36 = vld [vmem:[%s8585_s10 + $0x240] sm:$0xf]  ;;  %v253_v37 = vld [vmem:[%s8585_s10 + $0x250] sm:$0xf]  ;;  %250 = vst [vmem:[%s8589_s11 + $0x8c] sm:$0xf] %v249_v35 }
  0x32   : > { %252 = vst [vmem:[%s8589_s11 + $0x90] sm:$0xf] %v251_v36  ;;  %254 = vst [vmem:[%s8589_s11 + $0x94] sm:$0xf] %v253_v37  ;;  %v255_v38 = vld [vmem:[%s8585_s10 + $0x260] sm:$0xf] }
  0x33   : > { %v257_v39 = vld [vmem:[%s8585_s10 + $0x270] sm:$0xf]  ;;  %v259_v40 = vld [vmem:[%s8585_s10 + $0x280] sm:$0xf]  ;;  %256 = vst [vmem:[%s8589_s11 + $0x98] sm:$0xf] %v255_v38 }
  0x34   : > { %258 = vst [vmem:[%s8589_s11 + $0x9c] sm:$0xf] %v257_v39  ;;  %260 = vst [vmem:[%s8589_s11 + $0xa0] sm:$0xf] %v259_v40  ;;  %v261_v41 = vld [vmem:[%s8585_s10 + $0x290] sm:$0xf] }
  0x35   : > { %v263_v42 = vld [vmem:[%s8585_s10 + $0x2a0] sm:$0xf]  ;;  %v265_v43 = vld [vmem:[%s8585_s10 + $0x2b0] sm:$0xf]  ;;  %262 = vst [vmem:[%s8589_s11 + $0xa4] sm:$0xf] %v261_v41 }
  0x36   : > { %264 = vst [vmem:[%s8589_s11 + $0xa8] sm:$0xf] %v263_v42  ;;  %266 = vst [vmem:[%s8589_s11 + $0xac] sm:$0xf] %v265_v43  ;;  %v267_v44 = vld [vmem:[%s8585_s10 + $0x2c0] sm:$0xf] }
  0x37   : > { %v269_v45 = vld [vmem:[%s8585_s10 + $0x2d0] sm:$0xf]  ;;  %v271_v46 = vld [vmem:[%s8585_s10 + $0x2e0] sm:$0xf]  ;;  %268 = vst [vmem:[%s8589_s11 + $0xb0] sm:$0xf] %v267_v44 }
  0x38   : > { %270 = vst [vmem:[%s8589_s11 + $0xb4] sm:$0xf] %v269_v45  ;;  %272 = vst [vmem:[%s8589_s11 + $0xb8] sm:$0xf] %v271_v46  ;;  %v273_v47 = vld [vmem:[%s8585_s10 + $0x2f0] sm:$0xf] }
  0x39   : > { %v275_v48 = vld [vmem:[%s8585_s10 + $0x300] sm:$0xf]  ;;  %v277_v49 = vld [vmem:[%s8585_s10 + $0x310] sm:$0xf]  ;;  %274 = vst [vmem:[%s8589_s11 + $0xbc] sm:$0xf] %v273_v47 }
  0x3a   : > { %276 = vst [vmem:[%s8589_s11 + $0xc0] sm:$0xf] %v275_v48  ;;  %278 = vst [vmem:[%s8589_s11 + $0xc4] sm:$0xf] %v277_v49  ;;  %v279_v50 = vld [vmem:[%s8585_s10 + $0x320] sm:$0xf] }
  0x3b   : > { %v281_v51 = vld [vmem:[%s8585_s10 + $0x330] sm:$0xf]  ;;  %v283_v52 = vld [vmem:[%s8585_s10 + $0x340] sm:$0xf]  ;;  %280 = vst [vmem:[%s8589_s11 + $0xc8] sm:$0xf] %v279_v50 }
  0x3c   : > { %282 = vst [vmem:[%s8589_s11 + $0xcc] sm:$0xf] %v281_v51  ;;  %284 = vst [vmem:[%s8589_s11 + $0xd0] sm:$0xf] %v283_v52  ;;  %v285_v53 = vld [vmem:[%s8585_s10 + $0x350] sm:$0xf] }
  0x3d   : > { %v287_v54 = vld [vmem:[%s8585_s10 + $0x360] sm:$0xf]  ;;  %v289_v55 = vld [vmem:[%s8585_s10 + $0x370] sm:$0xf]  ;;  %286 = vst [vmem:[%s8589_s11 + $0xd4] sm:$0xf] %v285_v53 }
  0x3e   : > { %288 = vst [vmem:[%s8589_s11 + $0xd8] sm:$0xf] %v287_v54  ;;  %290 = vst [vmem:[%s8589_s11 + $0xdc] sm:$0xf] %v289_v55  ;;  %v291_v56 = vld [vmem:[%s8585_s10 + $0x380] sm:$0xf] }
  0x3f   : > { %v293_v57 = vld [vmem:[%s8585_s10 + $0x390] sm:$0xf]  ;;  %v295_v58 = vld [vmem:[%s8585_s10 + $0x3a0] sm:$0xf]  ;;  %292 = vst [vmem:[%s8589_s11 + $0xe0] sm:$0xf] %v291_v56 }
  0x40   : > { %294 = vst [vmem:[%s8589_s11 + $0xe4] sm:$0xf] %v293_v57  ;;  %296 = vst [vmem:[%s8589_s11 + $0xe8] sm:$0xf] %v295_v58  ;;  %v297_v59 = vld [vmem:[%s8585_s10 + $0x3b0] sm:$0xf] }
  0x41   : > { %v299_v60 = vld [vmem:[%s8585_s10 + $0x3c0] sm:$0xf]  ;;  %v301_v61 = vld [vmem:[%s8585_s10 + $0x3d0] sm:$0xf]  ;;  %298 = vst [vmem:[%s8589_s11 + $0xec] sm:$0xf] %v297_v59 }
  0x42   : > { %300 = vst [vmem:[%s8589_s11 + $0xf0] sm:$0xf] %v299_v60  ;;  %302 = vst [vmem:[%s8589_s11 + $0xf4] sm:$0xf] %v301_v61  ;;  %v303_v62 = vld [vmem:[%s8585_s10 + $0x3e0] sm:$0xf] }
  0x43   : > { %v305_v63 = vld [vmem:[%s8585_s10 + $0x3f0] sm:$0xf]  ;;  %v307_v0 = vld [vmem:[%s8585_s10 + $0x400] sm:$0xf]  ;;  %304 = vst [vmem:[%s8589_s11 + $0xf8] sm:$0xf] %v303_v62 }
  0x44   : > { %306 = vst [vmem:[%s8589_s11 + $0xfc] sm:$0xf] %v305_v63  ;;  %308 = vst [vmem:[%s8589_s11 + $0x100] sm:$0xf] %v307_v0  ;;  %v309_v1 = vld [vmem:[%s8585_s10 + $0x410] sm:$0xf] }
  0x45   : > { %v311_v2 = vld [vmem:[%s8585_s10 + $0x420] sm:$0xf]  ;;  %v313_v3 = vld [vmem:[%s8585_s10 + $0x430] sm:$0xf]  ;;  %310 = vst [vmem:[%s8589_s11 + $0x104] sm:$0xf] %v309_v1 }
  0x46   : > { %312 = vst [vmem:[%s8589_s11 + $0x108] sm:$0xf] %v311_v2  ;;  %314 = vst [vmem:[%s8589_s11 + $0x10c] sm:$0xf] %v313_v3  ;;  %v315_v4 = vld [vmem:[%s8585_s10 + $0x440] sm:$0xf] }
  0x47   : > { %v317_v5 = vld [vmem:[%s8585_s10 + $0x450] sm:$0xf]  ;;  %v319_v6 = vld [vmem:[%s8585_s10 + $0x460] sm:$0xf]  ;;  %316 = vst [vmem:[%s8589_s11 + $0x110] sm:$0xf] %v315_v4 }
  0x48   : > { %318 = vst [vmem:[%s8589_s11 + $0x114] sm:$0xf] %v317_v5  ;;  %320 = vst [vmem:[%s8589_s11 + $0x118] sm:$0xf] %v319_v6  ;;  %v321_v7 = vld [vmem:[%s8585_s10 + $0x470] sm:$0xf] }
  0x49   : > { %v323_v8 = vld [vmem:[%s8585_s10 + $0x480] sm:$0xf]  ;;  %v325_v9 = vld [vmem:[%s8585_s10 + $0x490] sm:$0xf]  ;;  %322 = vst [vmem:[%s8589_s11 + $0x11c] sm:$0xf] %v321_v7 }
  0x4a   : > { %324 = vst [vmem:[%s8589_s11 + $0x120] sm:$0xf] %v323_v8  ;;  %326 = vst [vmem:[%s8589_s11 + $0x124] sm:$0xf] %v325_v9  ;;  %v327_v10 = vld [vmem:[%s8585_s10 + $0x4a0] sm:$0xf] }
  0x4b   : > { %v329_v11 = vld [vmem:[%s8585_s10 + $0x4b0] sm:$0xf]  ;;  %v331_v12 = vld [vmem:[%s8585_s10 + $0x4c0] sm:$0xf]  ;;  %328 = vst [vmem:[%s8589_s11 + $0x128] sm:$0xf] %v327_v10 }
  0x4c   : > { %330 = vst [vmem:[%s8589_s11 + $0x12c] sm:$0xf] %v329_v11  ;;  %332 = vst [vmem:[%s8589_s11 + $0x130] sm:$0xf] %v331_v12  ;;  %v333_v13 = vld [vmem:[%s8585_s10 + $0x4d0] sm:$0xf] }
  0x4d   : > { %v335_v14 = vld [vmem:[%s8585_s10 + $0x4e0] sm:$0xf]  ;;  %v337_v15 = vld [vmem:[%s8585_s10 + $0x4f0] sm:$0xf]  ;;  %334 = vst [vmem:[%s8589_s11 + $0x134] sm:$0xf] %v333_v13 }
  0x4e   : > { %336 = vst [vmem:[%s8589_s11 + $0x138] sm:$0xf] %v335_v14  ;;  %338 = vst [vmem:[%s8589_s11 + $0x13c] sm:$0xf] %v337_v15  ;;  %v339_v16 = vld [vmem:[%s8585_s10 + $0x500] sm:$0xf] }
  0x4f   : > { %v341_v17 = vld [vmem:[%s8585_s10 + $0x510] sm:$0xf]  ;;  %v343_v18 = vld [vmem:[%s8585_s10 + $0x520] sm:$0xf]  ;;  %340 = vst [vmem:[%s8589_s11 + $0x140] sm:$0xf] %v339_v16 }
  0x50   : > { %342 = vst [vmem:[%s8589_s11 + $0x144] sm:$0xf] %v341_v17  ;;  %344 = vst [vmem:[%s8589_s11 + $0x148] sm:$0xf] %v343_v18  ;;  %v345_v19 = vld [vmem:[%s8585_s10 + $0x530] sm:$0xf] }
  0x51   : > { %v347_v20 = vld [vmem:[%s8585_s10 + $0x540] sm:$0xf]  ;;  %v349_v21 = vld [vmem:[%s8585_s10 + $0x550] sm:$0xf]  ;;  %346 = vst [vmem:[%s8589_s11 + $0x14c] sm:$0xf] %v345_v19 }
  0x52   : > { %348 = vst [vmem:[%s8589_s11 + $0x150] sm:$0xf] %v347_v20  ;;  %350 = vst [vmem:[%s8589_s11 + $0x154] sm:$0xf] %v349_v21  ;;  %v351_v22 = vld [vmem:[%s8585_s10 + $0x560] sm:$0xf] }
  0x53   : > { %v353_v23 = vld [vmem:[%s8585_s10 + $0x570] sm:$0xf]  ;;  %v355_v24 = vld [vmem:[%s8585_s10 + $0x580] sm:$0xf]  ;;  %352 = vst [vmem:[%s8589_s11 + $0x158] sm:$0xf] %v351_v22 }
  0x54   : > { %354 = vst [vmem:[%s8589_s11 + $0x15c] sm:$0xf] %v353_v23  ;;  %356 = vst [vmem:[%s8589_s11 + $0x160] sm:$0xf] %v355_v24  ;;  %v357_v25 = vld [vmem:[%s8585_s10 + $0x590] sm:$0xf] }
  0x55   : > { %v359_v26 = vld [vmem:[%s8585_s10 + $0x5a0] sm:$0xf]  ;;  %v361_v27 = vld [vmem:[%s8585_s10 + $0x5b0] sm:$0xf]  ;;  %358 = vst [vmem:[%s8589_s11 + $0x164] sm:$0xf] %v357_v25 }
  0x56   : > { %360 = vst [vmem:[%s8589_s11 + $0x168] sm:$0xf] %v359_v26  ;;  %362 = vst [vmem:[%s8589_s11 + $0x16c] sm:$0xf] %v361_v27  ;;  %v363_v28 = vld [vmem:[%s8585_s10 + $0x5c0] sm:$0xf] }
  0x57   : > { %v365_v29 = vld [vmem:[%s8585_s10 + $0x5d0] sm:$0xf]  ;;  %v367_v30 = vld [vmem:[%s8585_s10 + $0x5e0] sm:$0xf]  ;;  %364 = vst [vmem:[%s8589_s11 + $0x170] sm:$0xf] %v363_v28 }
  0x58   : > { %366 = vst [vmem:[%s8589_s11 + $0x174] sm:$0xf] %v365_v29  ;;  %368 = vst [vmem:[%s8589_s11 + $0x178] sm:$0xf] %v367_v30  ;;  %v369_v31 = vld [vmem:[%s8585_s10 + $0x5f0] sm:$0xf] }
  0x59   : > { %v371_v32 = vld [vmem:[%s8585_s10 + $0x600] sm:$0xf]  ;;  %v373_v33 = vld [vmem:[%s8585_s10 + $0x610] sm:$0xf]  ;;  %370 = vst [vmem:[%s8589_s11 + $0x17c] sm:$0xf] %v369_v31 }
  0x5a   : > { %372 = vst [vmem:[%s8589_s11 + $0x180] sm:$0xf] %v371_v32  ;;  %374 = vst [vmem:[%s8589_s11 + $0x184] sm:$0xf] %v373_v33  ;;  %v375_v34 = vld [vmem:[%s8585_s10 + $0x620] sm:$0xf] }
  0x5b   : > { %v377_v35 = vld [vmem:[%s8585_s10 + $0x630] sm:$0xf]  ;;  %v379_v36 = vld [vmem:[%s8585_s10 + $0x640] sm:$0xf]  ;;  %376 = vst [vmem:[%s8589_s11 + $0x188] sm:$0xf] %v375_v34 }
  0x5c   : > { %378 = vst [vmem:[%s8589_s11 + $0x18c] sm:$0xf] %v377_v35  ;;  %380 = vst [vmem:[%s8589_s11 + $0x190] sm:$0xf] %v379_v36  ;;  %v381_v37 = vld [vmem:[%s8585_s10 + $0x650] sm:$0xf] }
  0x5d   : > { %v383_v38 = vld [vmem:[%s8585_s10 + $0x660] sm:$0xf]  ;;  %v385_v39 = vld [vmem:[%s8585_s10 + $0x670] sm:$0xf]  ;;  %382 = vst [vmem:[%s8589_s11 + $0x194] sm:$0xf] %v381_v37 }
  0x5e   : > { %384 = vst [vmem:[%s8589_s11 + $0x198] sm:$0xf] %v383_v38  ;;  %386 = vst [vmem:[%s8589_s11 + $0x19c] sm:$0xf] %v385_v39  ;;  %v387_v40 = vld [vmem:[%s8585_s10 + $0x680] sm:$0xf] }
  0x5f   : > { %v389_v41 = vld [vmem:[%s8585_s10 + $0x690] sm:$0xf]  ;;  %v391_v42 = vld [vmem:[%s8585_s10 + $0x6a0] sm:$0xf]  ;;  %388 = vst [vmem:[%s8589_s11 + $0x1a0] sm:$0xf] %v387_v40 }
  0x60   : > { %390 = vst [vmem:[%s8589_s11 + $0x1a4] sm:$0xf] %v389_v41  ;;  %392 = vst [vmem:[%s8589_s11 + $0x1a8] sm:$0xf] %v391_v42  ;;  %v393_v43 = vld [vmem:[%s8585_s10 + $0x6b0] sm:$0xf] }
  0x61   : > { %v395_v44 = vld [vmem:[%s8585_s10 + $0x6c0] sm:$0xf]  ;;  %v397_v45 = vld [vmem:[%s8585_s10 + $0x6d0] sm:$0xf]  ;;  %394 = vst [vmem:[%s8589_s11 + $0x1ac] sm:$0xf] %v393_v43 }
  0x62   : > { %396 = vst [vmem:[%s8589_s11 + $0x1b0] sm:$0xf] %v395_v44  ;;  %398 = vst [vmem:[%s8589_s11 + $0x1b4] sm:$0xf] %v397_v45  ;;  %v399_v46 = vld [vmem:[%s8585_s10 + $0x6e0] sm:$0xf] }
  0x63   : > { %v401_v47 = vld [vmem:[%s8585_s10 + $0x6f0] sm:$0xf]  ;;  %v403_v48 = vld [vmem:[%s8585_s10 + $0x700] sm:$0xf]  ;;  %400 = vst [vmem:[%s8589_s11 + $0x1b8] sm:$0xf] %v399_v46 }
  0x64   : > { %402 = vst [vmem:[%s8589_s11 + $0x1bc] sm:$0xf] %v401_v47  ;;  %404 = vst [vmem:[%s8589_s11 + $0x1c0] sm:$0xf] %v403_v48  ;;  %v405_v49 = vld [vmem:[%s8585_s10 + $0x710] sm:$0xf] }
  0x65   : > { %v407_v50 = vld [vmem:[%s8585_s10 + $0x720] sm:$0xf]  ;;  %v409_v51 = vld [vmem:[%s8585_s10 + $0x730] sm:$0xf]  ;;  %406 = vst [vmem:[%s8589_s11 + $0x1c4] sm:$0xf] %v405_v49 }
  0x66   : > { %408 = vst [vmem:[%s8589_s11 + $0x1c8] sm:$0xf] %v407_v50  ;;  %410 = vst [vmem:[%s8589_s11 + $0x1cc] sm:$0xf] %v409_v51  ;;  %v411_v52 = vld [vmem:[%s8585_s10 + $0x740] sm:$0xf] }
  0x67   : > { %v413_v53 = vld [vmem:[%s8585_s10 + $0x750] sm:$0xf]  ;;  %v415_v54 = vld [vmem:[%s8585_s10 + $0x760] sm:$0xf]  ;;  %412 = vst [vmem:[%s8589_s11 + $0x1d0] sm:$0xf] %v411_v52 }
  0x68   : > { %414 = vst [vmem:[%s8589_s11 + $0x1d4] sm:$0xf] %v413_v53  ;;  %416 = vst [vmem:[%s8589_s11 + $0x1d8] sm:$0xf] %v415_v54  ;;  %v417_v55 = vld [vmem:[%s8585_s10 + $0x770] sm:$0xf] }
  0x69   : > { %v419_v56 = vld [vmem:[%s8585_s10 + $0x780] sm:$0xf]  ;;  %v421_v57 = vld [vmem:[%s8585_s10 + $0x790] sm:$0xf]  ;;  %418 = vst [vmem:[%s8589_s11 + $0x1dc] sm:$0xf] %v417_v55 }
  0x6a   : > { %420 = vst [vmem:[%s8589_s11 + $0x1e0] sm:$0xf] %v419_v56  ;;  %422 = vst [vmem:[%s8589_s11 + $0x1e4] sm:$0xf] %v421_v57  ;;  %v423_v58 = vld [vmem:[%s8585_s10 + $0x7a0] sm:$0xf] }
  0x6b   : > { %v425_v59 = vld [vmem:[%s8585_s10 + $0x7b0] sm:$0xf]  ;;  %v427_v60 = vld [vmem:[%s8585_s10 + $0x7c0] sm:$0xf]  ;;  %424 = vst [vmem:[%s8589_s11 + $0x1e8] sm:$0xf] %v423_v58 }
  0x6c   : > { %426 = vst [vmem:[%s8589_s11 + $0x1ec] sm:$0xf] %v425_v59  ;;  %428 = vst [vmem:[%s8589_s11 + $0x1f0] sm:$0xf] %v427_v60  ;;  %v429_v61 = vld [vmem:[%s8585_s10 + $0x7d0] sm:$0xf] }
  0x6d   : > { %v431_v62 = vld [vmem:[%s8585_s10 + $0x7e0] sm:$0xf]  ;;  %v433_v63 = vld [vmem:[%s8585_s10 + $0x7f0] sm:$0xf]  ;;  %430 = vst [vmem:[%s8589_s11 + $0x1f4] sm:$0xf] %v429_v61 }
  0x6e   : > { %432 = vst [vmem:[%s8589_s11 + $0x1f8] sm:$0xf] %v431_v62  ;;  %434 = vst [vmem:[%s8589_s11 + $0x1fc] sm:$0xf] %v433_v63  ;;  %v435_v0 = vld [vmem:[%s8585_s10 + $0x800] sm:$0xf] }
  0x6f   : > { %v437_v1 = vld [vmem:[%s8585_s10 + $0x810] sm:$0xf]  ;;  %v439_v2 = vld [vmem:[%s8585_s10 + $0x820] sm:$0xf]  ;;  %436 = vst [vmem:[%s8589_s11 + $0x200] sm:$0xf] %v435_v0 }
  0x70   : > { %438 = vst [vmem:[%s8589_s11 + $0x204] sm:$0xf] %v437_v1  ;;  %440 = vst [vmem:[%s8589_s11 + $0x208] sm:$0xf] %v439_v2  ;;  %v441_v3 = vld [vmem:[%s8585_s10 + $0x830] sm:$0xf] }
  0x71   : > { %v443_v4 = vld [vmem:[%s8585_s10 + $0x840] sm:$0xf]  ;;  %v445_v5 = vld [vmem:[%s8585_s10 + $0x850] sm:$0xf]  ;;  %442 = vst [vmem:[%s8589_s11 + $0x20c] sm:$0xf] %v441_v3 }
  0x72   : > { %444 = vst [vmem:[%s8589_s11 + $0x210] sm:$0xf] %v443_v4  ;;  %446 = vst [vmem:[%s8589_s11 + $0x214] sm:$0xf] %v445_v5  ;;  %v447_v6 = vld [vmem:[%s8585_s10 + $0x860] sm:$0xf] }
  0x73   : > { %v449_v7 = vld [vmem:[%s8585_s10 + $0x870] sm:$0xf]  ;;  %v451_v8 = vld [vmem:[%s8585_s10 + $0x880] sm:$0xf]  ;;  %448 = vst [vmem:[%s8589_s11 + $0x218] sm:$0xf] %v447_v6 }
  0x74   : > { %450 = vst [vmem:[%s8589_s11 + $0x21c] sm:$0xf] %v449_v7  ;;  %452 = vst [vmem:[%s8589_s11 + $0x220] sm:$0xf] %v451_v8  ;;  %v453_v9 = vld [vmem:[%s8585_s10 + $0x890] sm:$0xf] }
  0x75   : > { %v455_v10 = vld [vmem:[%s8585_s10 + $0x8a0] sm:$0xf]  ;;  %v457_v11 = vld [vmem:[%s8585_s10 + $0x8b0] sm:$0xf]  ;;  %454 = vst [vmem:[%s8589_s11 + $0x224] sm:$0xf] %v453_v9 }
  0x76   : > { %456 = vst [vmem:[%s8589_s11 + $0x228] sm:$0xf] %v455_v10  ;;  %458 = vst [vmem:[%s8589_s11 + $0x22c] sm:$0xf] %v457_v11  ;;  %v459_v12 = vld [vmem:[%s8585_s10 + $0x8c0] sm:$0xf] }
  0x77   : > { %v461_v13 = vld [vmem:[%s8585_s10 + $0x8d0] sm:$0xf]  ;;  %v463_v14 = vld [vmem:[%s8585_s10 + $0x8e0] sm:$0xf]  ;;  %460 = vst [vmem:[%s8589_s11 + $0x230] sm:$0xf] %v459_v12 }
  0x78   : > { %462 = vst [vmem:[%s8589_s11 + $0x234] sm:$0xf] %v461_v13  ;;  %464 = vst [vmem:[%s8589_s11 + $0x238] sm:$0xf] %v463_v14  ;;  %v465_v15 = vld [vmem:[%s8585_s10 + $0x8f0] sm:$0xf] }
  0x79   : > { %v467_v16 = vld [vmem:[%s8585_s10 + $0x900] sm:$0xf]  ;;  %v469_v17 = vld [vmem:[%s8585_s10 + $0x910] sm:$0xf]  ;;  %466 = vst [vmem:[%s8589_s11 + $0x23c] sm:$0xf] %v465_v15 }
  0x7a   : > { %468 = vst [vmem:[%s8589_s11 + $0x240] sm:$0xf] %v467_v16  ;;  %470 = vst [vmem:[%s8589_s11 + $0x244] sm:$0xf] %v469_v17  ;;  %v471_v18 = vld [vmem:[%s8585_s10 + $0x920] sm:$0xf] }
  0x7b   : > { %v473_v19 = vld [vmem:[%s8585_s10 + $0x930] sm:$0xf]  ;;  %v475_v20 = vld [vmem:[%s8585_s10 + $0x940] sm:$0xf]  ;;  %472 = vst [vmem:[%s8589_s11 + $0x248] sm:$0xf] %v471_v18 }
  0x7c   : > { %474 = vst [vmem:[%s8589_s11 + $0x24c] sm:$0xf] %v473_v19  ;;  %476 = vst [vmem:[%s8589_s11 + $0x250] sm:$0xf] %v475_v20  ;;  %v477_v21 = vld [vmem:[%s8585_s10 + $0x950] sm:$0xf] }
  0x7d   : > { %v479_v22 = vld [vmem:[%s8585_s10 + $0x960] sm:$0xf]  ;;  %v481_v23 = vld [vmem:[%s8585_s10 + $0x970] sm:$0xf]  ;;  %478 = vst [vmem:[%s8589_s11 + $0x254] sm:$0xf] %v477_v21 }
  0x7e   : > { %480 = vst [vmem:[%s8589_s11 + $0x258] sm:$0xf] %v479_v22  ;;  %482 = vst [vmem:[%s8589_s11 + $0x25c] sm:$0xf] %v481_v23  ;;  %v483_v24 = vld [vmem:[%s8585_s10 + $0x980] sm:$0xf] }
  0x7f   : > { %v485_v25 = vld [vmem:[%s8585_s10 + $0x990] sm:$0xf]  ;;  %v487_v26 = vld [vmem:[%s8585_s10 + $0x9a0] sm:$0xf]  ;;  %484 = vst [vmem:[%s8589_s11 + $0x260] sm:$0xf] %v483_v24 }
  0x80   : > { %486 = vst [vmem:[%s8589_s11 + $0x264] sm:$0xf] %v485_v25  ;;  %488 = vst [vmem:[%s8589_s11 + $0x268] sm:$0xf] %v487_v26  ;;  %v489_v27 = vld [vmem:[%s8585_s10 + $0x9b0] sm:$0xf] }
  0x81   : > { %v491_v28 = vld [vmem:[%s8585_s10 + $0x9c0] sm:$0xf]  ;;  %v493_v29 = vld [vmem:[%s8585_s10 + $0x9d0] sm:$0xf]  ;;  %490 = vst [vmem:[%s8589_s11 + $0x26c] sm:$0xf] %v489_v27 }
  0x82   : > { %492 = vst [vmem:[%s8589_s11 + $0x270] sm:$0xf] %v491_v28  ;;  %494 = vst [vmem:[%s8589_s11 + $0x274] sm:$0xf] %v493_v29  ;;  %v495_v30 = vld [vmem:[%s8585_s10 + $0x9e0] sm:$0xf] }
  0x83   : > { %v497_v31 = vld [vmem:[%s8585_s10 + $0x9f0] sm:$0xf]  ;;  %v499_v32 = vld [vmem:[%s8585_s10 + $0xa00] sm:$0xf]  ;;  %496 = vst [vmem:[%s8589_s11 + $0x278] sm:$0xf] %v495_v30 }
  0x84   : > { %498 = vst [vmem:[%s8589_s11 + $0x27c] sm:$0xf] %v497_v31  ;;  %500 = vst [vmem:[%s8589_s11 + $0x280] sm:$0xf] %v499_v32  ;;  %v501_v33 = vld [vmem:[%s8585_s10 + $0xa10] sm:$0xf] }
  0x85   : > { %v503_v34 = vld [vmem:[%s8585_s10 + $0xa20] sm:$0xf]  ;;  %v505_v35 = vld [vmem:[%s8585_s10 + $0xa30] sm:$0xf]  ;;  %502 = vst [vmem:[%s8589_s11 + $0x284] sm:$0xf] %v501_v33 }
  0x86   : > { %504 = vst [vmem:[%s8589_s11 + $0x288] sm:$0xf] %v503_v34  ;;  %506 = vst [vmem:[%s8589_s11 + $0x28c] sm:$0xf] %v505_v35  ;;  %v507_v36 = vld [vmem:[%s8585_s10 + $0xa40] sm:$0xf] }
  0x87   : > { %v509_v37 = vld [vmem:[%s8585_s10 + $0xa50] sm:$0xf]  ;;  %v511_v38 = vld [vmem:[%s8585_s10 + $0xa60] sm:$0xf]  ;;  %508 = vst [vmem:[%s8589_s11 + $0x290] sm:$0xf] %v507_v36 }
  0x88   : > { %510 = vst [vmem:[%s8589_s11 + $0x294] sm:$0xf] %v509_v37  ;;  %512 = vst [vmem:[%s8589_s11 + $0x298] sm:$0xf] %v511_v38  ;;  %v513_v39 = vld [vmem:[%s8585_s10 + $0xa70] sm:$0xf] }
  0x89   : > { %v515_v40 = vld [vmem:[%s8585_s10 + $0xa80] sm:$0xf]  ;;  %v517_v41 = vld [vmem:[%s8585_s10 + $0xa90] sm:$0xf]  ;;  %514 = vst [vmem:[%s8589_s11 + $0x29c] sm:$0xf] %v513_v39 }
  0x8a   : > { %516 = vst [vmem:[%s8589_s11 + $0x2a0] sm:$0xf] %v515_v40  ;;  %518 = vst [vmem:[%s8589_s11 + $0x2a4] sm:$0xf] %v517_v41  ;;  %v519_v42 = vld [vmem:[%s8585_s10 + $0xaa0] sm:$0xf] }
  0x8b   : > { %v521_v43 = vld [vmem:[%s8585_s10 + $0xab0] sm:$0xf]  ;;  %v523_v44 = vld [vmem:[%s8585_s10 + $0xac0] sm:$0xf]  ;;  %520 = vst [vmem:[%s8589_s11 + $0x2a8] sm:$0xf] %v519_v42 }
  0x8c   : > { %522 = vst [vmem:[%s8589_s11 + $0x2ac] sm:$0xf] %v521_v43  ;;  %524 = vst [vmem:[%s8589_s11 + $0x2b0] sm:$0xf] %v523_v44  ;;  %v525_v45 = vld [vmem:[%s8585_s10 + $0xad0] sm:$0xf] }
  0x8d   : > { %v527_v46 = vld [vmem:[%s8585_s10 + $0xae0] sm:$0xf]  ;;  %v529_v47 = vld [vmem:[%s8585_s10 + $0xaf0] sm:$0xf]  ;;  %526 = vst [vmem:[%s8589_s11 + $0x2b4] sm:$0xf] %v525_v45 }
  0x8e   : > { %528 = vst [vmem:[%s8589_s11 + $0x2b8] sm:$0xf] %v527_v46  ;;  %530 = vst [vmem:[%s8589_s11 + $0x2bc] sm:$0xf] %v529_v47  ;;  %v531_v48 = vld [vmem:[%s8585_s10 + $0xb00] sm:$0xf] }
  0x8f   : > { %v533_v49 = vld [vmem:[%s8585_s10 + $0xb10] sm:$0xf]  ;;  %v535_v50 = vld [vmem:[%s8585_s10 + $0xb20] sm:$0xf]  ;;  %532 = vst [vmem:[%s8589_s11 + $0x2c0] sm:$0xf] %v531_v48 }
  0x90   : > { %534 = vst [vmem:[%s8589_s11 + $0x2c4] sm:$0xf] %v533_v49  ;;  %536 = vst [vmem:[%s8589_s11 + $0x2c8] sm:$0xf] %v535_v50  ;;  %v537_v51 = vld [vmem:[%s8585_s10 + $0xb30] sm:$0xf] }
  0x91   : > { %v539_v52 = vld [vmem:[%s8585_s10 + $0xb40] sm:$0xf]  ;;  %v541_v53 = vld [vmem:[%s8585_s10 + $0xb50] sm:$0xf]  ;;  %538 = vst [vmem:[%s8589_s11 + $0x2cc] sm:$0xf] %v537_v51 }
  0x92   : > { %540 = vst [vmem:[%s8589_s11 + $0x2d0] sm:$0xf] %v539_v52  ;;  %542 = vst [vmem:[%s8589_s11 + $0x2d4] sm:$0xf] %v541_v53  ;;  %v543_v54 = vld [vmem:[%s8585_s10 + $0xb60] sm:$0xf] }
  0x93   : > { %v545_v55 = vld [vmem:[%s8585_s10 + $0xb70] sm:$0xf]  ;;  %v547_v56 = vld [vmem:[%s8585_s10 + $0xb80] sm:$0xf]  ;;  %544 = vst [vmem:[%s8589_s11 + $0x2d8] sm:$0xf] %v543_v54 }
  0x94   : > { %546 = vst [vmem:[%s8589_s11 + $0x2dc] sm:$0xf] %v545_v55  ;;  %548 = vst [vmem:[%s8589_s11 + $0x2e0] sm:$0xf] %v547_v56  ;;  %v549_v57 = vld [vmem:[%s8585_s10 + $0xb90] sm:$0xf] }
  0x95   : > { %v551_v58 = vld [vmem:[%s8585_s10 + $0xba0] sm:$0xf]  ;;  %v553_v59 = vld [vmem:[%s8585_s10 + $0xbb0] sm:$0xf]  ;;  %550 = vst [vmem:[%s8589_s11 + $0x2e4] sm:$0xf] %v549_v57 }
  0x96   : > { %552 = vst [vmem:[%s8589_s11 + $0x2e8] sm:$0xf] %v551_v58  ;;  %554 = vst [vmem:[%s8589_s11 + $0x2ec] sm:$0xf] %v553_v59  ;;  %v555_v60 = vld [vmem:[%s8585_s10 + $0xbc0] sm:$0xf] }
  0x97   : > { %v557_v61 = vld [vmem:[%s8585_s10 + $0xbd0] sm:$0xf]  ;;  %v559_v62 = vld [vmem:[%s8585_s10 + $0xbe0] sm:$0xf]  ;;  %556 = vst [vmem:[%s8589_s11 + $0x2f0] sm:$0xf] %v555_v60 }
  0x98   : > { %558 = vst [vmem:[%s8589_s11 + $0x2f4] sm:$0xf] %v557_v61  ;;  %560 = vst [vmem:[%s8589_s11 + $0x2f8] sm:$0xf] %v559_v62  ;;  %v561_v63 = vld [vmem:[%s8585_s10 + $0xbf0] sm:$0xf] }
  0x99   : > { %v563_v0 = vld [vmem:[%s8585_s10 + $0xc00] sm:$0xf]  ;;  %v565_v1 = vld [vmem:[%s8585_s10 + $0xc10] sm:$0xf]  ;;  %562 = vst [vmem:[%s8589_s11 + $0x2fc] sm:$0xf] %v561_v63 }
  0x9a   : > { %564 = vst [vmem:[%s8589_s11 + $0x300] sm:$0xf] %v563_v0  ;;  %566 = vst [vmem:[%s8589_s11 + $0x304] sm:$0xf] %v565_v1  ;;  %v567_v2 = vld [vmem:[%s8585_s10 + $0xc20] sm:$0xf] }
  0x9b   : > { %v569_v3 = vld [vmem:[%s8585_s10 + $0xc30] sm:$0xf]  ;;  %v571_v4 = vld [vmem:[%s8585_s10 + $0xc40] sm:$0xf]  ;;  %568 = vst [vmem:[%s8589_s11 + $0x308] sm:$0xf] %v567_v2 }
  0x9c   : > { %570 = vst [vmem:[%s8589_s11 + $0x30c] sm:$0xf] %v569_v3  ;;  %572 = vst [vmem:[%s8589_s11 + $0x310] sm:$0xf] %v571_v4  ;;  %v573_v5 = vld [vmem:[%s8585_s10 + $0xc50] sm:$0xf] }
  0x9d   : > { %v575_v6 = vld [vmem:[%s8585_s10 + $0xc60] sm:$0xf]  ;;  %v577_v7 = vld [vmem:[%s8585_s10 + $0xc70] sm:$0xf]  ;;  %574 = vst [vmem:[%s8589_s11 + $0x314] sm:$0xf] %v573_v5 }
  0x9e   : > { %576 = vst [vmem:[%s8589_s11 + $0x318] sm:$0xf] %v575_v6  ;;  %578 = vst [vmem:[%s8589_s11 + $0x31c] sm:$0xf] %v577_v7  ;;  %v579_v8 = vld [vmem:[%s8585_s10 + $0xc80] sm:$0xf] }
  0x9f   : > { %v581_v9 = vld [vmem:[%s8585_s10 + $0xc90] sm:$0xf]  ;;  %v583_v10 = vld [vmem:[%s8585_s10 + $0xca0] sm:$0xf]  ;;  %580 = vst [vmem:[%s8589_s11 + $0x320] sm:$0xf] %v579_v8 }
  0xa0   : > { %582 = vst [vmem:[%s8589_s11 + $0x324] sm:$0xf] %v581_v9  ;;  %584 = vst [vmem:[%s8589_s11 + $0x328] sm:$0xf] %v583_v10  ;;  %v585_v11 = vld [vmem:[%s8585_s10 + $0xcb0] sm:$0xf] }
  0xa1   : > { %v587_v12 = vld [vmem:[%s8585_s10 + $0xcc0] sm:$0xf]  ;;  %v589_v13 = vld [vmem:[%s8585_s10 + $0xcd0] sm:$0xf]  ;;  %586 = vst [vmem:[%s8589_s11 + $0x32c] sm:$0xf] %v585_v11 }
  0xa2   : > { %588 = vst [vmem:[%s8589_s11 + $0x330] sm:$0xf] %v587_v12  ;;  %590 = vst [vmem:[%s8589_s11 + $0x334] sm:$0xf] %v589_v13  ;;  %v591_v14 = vld [vmem:[%s8585_s10 + $0xce0] sm:$0xf] }
  0xa3   : > { %v593_v15 = vld [vmem:[%s8585_s10 + $0xcf0] sm:$0xf]  ;;  %v595_v16 = vld [vmem:[%s8585_s10 + $0xd00] sm:$0xf]  ;;  %592 = vst [vmem:[%s8589_s11 + $0x338] sm:$0xf] %v591_v14 }
  0xa4   : > { %594 = vst [vmem:[%s8589_s11 + $0x33c] sm:$0xf] %v593_v15  ;;  %596 = vst [vmem:[%s8589_s11 + $0x340] sm:$0xf] %v595_v16  ;;  %v597_v17 = vld [vmem:[%s8585_s10 + $0xd10] sm:$0xf] }
  0xa5   : > { %v599_v18 = vld [vmem:[%s8585_s10 + $0xd20] sm:$0xf]  ;;  %v601_v19 = vld [vmem:[%s8585_s10 + $0xd30] sm:$0xf]  ;;  %598 = vst [vmem:[%s8589_s11 + $0x344] sm:$0xf] %v597_v17 }
  0xa6   : > { %600 = vst [vmem:[%s8589_s11 + $0x348] sm:$0xf] %v599_v18  ;;  %602 = vst [vmem:[%s8589_s11 + $0x34c] sm:$0xf] %v601_v19  ;;  %v603_v20 = vld [vmem:[%s8585_s10 + $0xd40] sm:$0xf] }
  0xa7   : > { %v605_v21 = vld [vmem:[%s8585_s10 + $0xd50] sm:$0xf]  ;;  %v607_v22 = vld [vmem:[%s8585_s10 + $0xd60] sm:$0xf]  ;;  %604 = vst [vmem:[%s8589_s11 + $0x350] sm:$0xf] %v603_v20 }
  0xa8   : > { %606 = vst [vmem:[%s8589_s11 + $0x354] sm:$0xf] %v605_v21  ;;  %608 = vst [vmem:[%s8589_s11 + $0x358] sm:$0xf] %v607_v22  ;;  %v609_v23 = vld [vmem:[%s8585_s10 + $0xd70] sm:$0xf] }
  0xa9   : > { %v611_v24 = vld [vmem:[%s8585_s10 + $0xd80] sm:$0xf]  ;;  %v613_v25 = vld [vmem:[%s8585_s10 + $0xd90] sm:$0xf]  ;;  %610 = vst [vmem:[%s8589_s11 + $0x35c] sm:$0xf] %v609_v23 }
  0xaa   : > { %612 = vst [vmem:[%s8589_s11 + $0x360] sm:$0xf] %v611_v24  ;;  %614 = vst [vmem:[%s8589_s11 + $0x364] sm:$0xf] %v613_v25  ;;  %v615_v26 = vld [vmem:[%s8585_s10 + $0xda0] sm:$0xf] }
  0xab   : > { %v617_v27 = vld [vmem:[%s8585_s10 + $0xdb0] sm:$0xf]  ;;  %v619_v28 = vld [vmem:[%s8585_s10 + $0xdc0] sm:$0xf]  ;;  %616 = vst [vmem:[%s8589_s11 + $0x368] sm:$0xf] %v615_v26 }
  0xac   : > { %618 = vst [vmem:[%s8589_s11 + $0x36c] sm:$0xf] %v617_v27  ;;  %620 = vst [vmem:[%s8589_s11 + $0x370] sm:$0xf] %v619_v28  ;;  %v621_v29 = vld [vmem:[%s8585_s10 + $0xdd0] sm:$0xf] }
  0xad   : > { %v623_v30 = vld [vmem:[%s8585_s10 + $0xde0] sm:$0xf]  ;;  %v625_v31 = vld [vmem:[%s8585_s10 + $0xdf0] sm:$0xf]  ;;  %622 = vst [vmem:[%s8589_s11 + $0x374] sm:$0xf] %v621_v29 }
  0xae   : > { %624 = vst [vmem:[%s8589_s11 + $0x378] sm:$0xf] %v623_v30  ;;  %626 = vst [vmem:[%s8589_s11 + $0x37c] sm:$0xf] %v625_v31  ;;  %v627_v32 = vld [vmem:[%s8585_s10 + $0xe00] sm:$0xf] }
  0xaf   : > { %v629_v33 = vld [vmem:[%s8585_s10 + $0xe10] sm:$0xf]  ;;  %v631_v34 = vld [vmem:[%s8585_s10 + $0xe20] sm:$0xf]  ;;  %628 = vst [vmem:[%s8589_s11 + $0x380] sm:$0xf] %v627_v32 }
  0xb0   : > { %630 = vst [vmem:[%s8589_s11 + $0x384] sm:$0xf] %v629_v33  ;;  %632 = vst [vmem:[%s8589_s11 + $0x388] sm:$0xf] %v631_v34  ;;  %v633_v35 = vld [vmem:[%s8585_s10 + $0xe30] sm:$0xf] }
  0xb1   : > { %v635_v36 = vld [vmem:[%s8585_s10 + $0xe40] sm:$0xf]  ;;  %v637_v37 = vld [vmem:[%s8585_s10 + $0xe50] sm:$0xf]  ;;  %634 = vst [vmem:[%s8589_s11 + $0x38c] sm:$0xf] %v633_v35 }
  0xb2   : > { %636 = vst [vmem:[%s8589_s11 + $0x390] sm:$0xf] %v635_v36  ;;  %638 = vst [vmem:[%s8589_s11 + $0x394] sm:$0xf] %v637_v37  ;;  %v639_v38 = vld [vmem:[%s8585_s10 + $0xe60] sm:$0xf] }
  0xb3   : > { %v641_v39 = vld [vmem:[%s8585_s10 + $0xe70] sm:$0xf]  ;;  %v643_v40 = vld [vmem:[%s8585_s10 + $0xe80] sm:$0xf]  ;;  %640 = vst [vmem:[%s8589_s11 + $0x398] sm:$0xf] %v639_v38 }
  0xb4   : > { %642 = vst [vmem:[%s8589_s11 + $0x39c] sm:$0xf] %v641_v39  ;;  %644 = vst [vmem:[%s8589_s11 + $0x3a0] sm:$0xf] %v643_v40  ;;  %v645_v41 = vld [vmem:[%s8585_s10 + $0xe90] sm:$0xf] }
  0xb5   : > { %v647_v42 = vld [vmem:[%s8585_s10 + $0xea0] sm:$0xf]  ;;  %v649_v43 = vld [vmem:[%s8585_s10 + $0xeb0] sm:$0xf]  ;;  %646 = vst [vmem:[%s8589_s11 + $0x3a4] sm:$0xf] %v645_v41 }
  0xb6   : > { %648 = vst [vmem:[%s8589_s11 + $0x3a8] sm:$0xf] %v647_v42  ;;  %650 = vst [vmem:[%s8589_s11 + $0x3ac] sm:$0xf] %v649_v43  ;;  %v651_v44 = vld [vmem:[%s8585_s10 + $0xec0] sm:$0xf] }
  0xb7   : > { %v653_v45 = vld [vmem:[%s8585_s10 + $0xed0] sm:$0xf]  ;;  %v655_v46 = vld [vmem:[%s8585_s10 + $0xee0] sm:$0xf]  ;;  %652 = vst [vmem:[%s8589_s11 + $0x3b0] sm:$0xf] %v651_v44 }
  0xb8   : > { %654 = vst [vmem:[%s8589_s11 + $0x3b4] sm:$0xf] %v653_v45  ;;  %656 = vst [vmem:[%s8589_s11 + $0x3b8] sm:$0xf] %v655_v46  ;;  %v657_v47 = vld [vmem:[%s8585_s10 + $0xef0] sm:$0xf] }
  0xb9   : > { %v659_v48 = vld [vmem:[%s8585_s10 + $0xf00] sm:$0xf]  ;;  %v661_v49 = vld [vmem:[%s8585_s10 + $0xf10] sm:$0xf]  ;;  %658 = vst [vmem:[%s8589_s11 + $0x3bc] sm:$0xf] %v657_v47 }
  0xba   : > { %660 = vst [vmem:[%s8589_s11 + $0x3c0] sm:$0xf] %v659_v48  ;;  %662 = vst [vmem:[%s8589_s11 + $0x3c4] sm:$0xf] %v661_v49  ;;  %v663_v50 = vld [vmem:[%s8585_s10 + $0xf20] sm:$0xf] }
  0xbb   : > { %v665_v51 = vld [vmem:[%s8585_s10 + $0xf30] sm:$0xf]  ;;  %v667_v52 = vld [vmem:[%s8585_s10 + $0xf40] sm:$0xf]  ;;  %664 = vst [vmem:[%s8589_s11 + $0x3c8] sm:$0xf] %v663_v50 }
  0xbc   : > { %666 = vst [vmem:[%s8589_s11 + $0x3cc] sm:$0xf] %v665_v51  ;;  %668 = vst [vmem:[%s8589_s11 + $0x3d0] sm:$0xf] %v667_v52  ;;  %v669_v53 = vld [vmem:[%s8585_s10 + $0xf50] sm:$0xf] }
  0xbd   : > { %v671_v54 = vld [vmem:[%s8585_s10 + $0xf60] sm:$0xf]  ;;  %v673_v55 = vld [vmem:[%s8585_s10 + $0xf70] sm:$0xf]  ;;  %670 = vst [vmem:[%s8589_s11 + $0x3d4] sm:$0xf] %v669_v53 }
  0xbe   : > { %672 = vst [vmem:[%s8589_s11 + $0x3d8] sm:$0xf] %v671_v54  ;;  %674 = vst [vmem:[%s8589_s11 + $0x3dc] sm:$0xf] %v673_v55  ;;  %v675_v56 = vld [vmem:[%s8585_s10 + $0xf80] sm:$0xf] }
  0xbf   : > { %v677_v57 = vld [vmem:[%s8585_s10 + $0xf90] sm:$0xf]  ;;  %v679_v58 = vld [vmem:[%s8585_s10 + $0xfa0] sm:$0xf]  ;;  %676 = vst [vmem:[%s8589_s11 + $0x3e0] sm:$0xf] %v675_v56 }
  0xc0   : > { %678 = vst [vmem:[%s8589_s11 + $0x3e4] sm:$0xf] %v677_v57  ;;  %680 = vst [vmem:[%s8589_s11 + $0x3e8] sm:$0xf] %v679_v58  ;;  %v681_v59 = vld [vmem:[%s8585_s10 + $0xfb0] sm:$0xf] }
  0xc1   : > { %v683_v60 = vld [vmem:[%s8585_s10 + $0xfc0] sm:$0xf]  ;;  %v685_v61 = vld [vmem:[%s8585_s10 + $0xfd0] sm:$0xf]  ;;  %682 = vst [vmem:[%s8589_s11 + $0x3ec] sm:$0xf] %v681_v59 }
  0xc2   : > { %684 = vst [vmem:[%s8589_s11 + $0x3f0] sm:$0xf] %v683_v60  ;;  %686 = vst [vmem:[%s8589_s11 + $0x3f4] sm:$0xf] %v685_v61  ;;  %v687_v62 = vld [vmem:[%s8585_s10 + $0xfe0] sm:$0xf] }
  0xc3   : > { %v689_v63 = vld [vmem:[%s8585_s10 + $0xff0] sm:$0xf]  ;;  %v691_v0 = vld [vmem:[%s8585_s10 + $0x1000] sm:$0xf]  ;;  %688 = vst [vmem:[%s8589_s11 + $0x3f8] sm:$0xf] %v687_v62 }
  0xc4   : > { %690 = vst [vmem:[%s8589_s11 + $0x3fc] sm:$0xf] %v689_v63  ;;  %692 = vst [vmem:[%s8589_s11 + $0x400] sm:$0xf] %v691_v0  ;;  %v693_v1 = vld [vmem:[%s8585_s10 + $0x1010] sm:$0xf] }
  0xc5   : > { %v695_v2 = vld [vmem:[%s8585_s10 + $0x1020] sm:$0xf]  ;;  %v697_v3 = vld [vmem:[%s8585_s10 + $0x1030] sm:$0xf]  ;;  %694 = vst [vmem:[%s8589_s11 + $0x404] sm:$0xf] %v693_v1 }
  0xc6   : > { %696 = vst [vmem:[%s8589_s11 + $0x408] sm:$0xf] %v695_v2  ;;  %698 = vst [vmem:[%s8589_s11 + $0x40c] sm:$0xf] %v697_v3  ;;  %v699_v4 = vld [vmem:[%s8585_s10 + $0x1040] sm:$0xf] }
  0xc7   : > { %v701_v5 = vld [vmem:[%s8585_s10 + $0x1050] sm:$0xf]  ;;  %v703_v6 = vld [vmem:[%s8585_s10 + $0x1060] sm:$0xf]  ;;  %700 = vst [vmem:[%s8589_s11 + $0x410] sm:$0xf] %v699_v4 }
  0xc8   : > { %702 = vst [vmem:[%s8589_s11 + $0x414] sm:$0xf] %v701_v5  ;;  %704 = vst [vmem:[%s8589_s11 + $0x418] sm:$0xf] %v703_v6  ;;  %v705_v7 = vld [vmem:[%s8585_s10 + $0x1070] sm:$0xf] }
  0xc9   : > { %v707_v8 = vld [vmem:[%s8585_s10 + $0x1080] sm:$0xf]  ;;  %v709_v9 = vld [vmem:[%s8585_s10 + $0x1090] sm:$0xf]  ;;  %706 = vst [vmem:[%s8589_s11 + $0x41c] sm:$0xf] %v705_v7 }
  0xca   : > { %708 = vst [vmem:[%s8589_s11 + $0x420] sm:$0xf] %v707_v8  ;;  %710 = vst [vmem:[%s8589_s11 + $0x424] sm:$0xf] %v709_v9  ;;  %v711_v10 = vld [vmem:[%s8585_s10 + $0x10a0] sm:$0xf] }
  0xcb   : > { %v713_v11 = vld [vmem:[%s8585_s10 + $0x10b0] sm:$0xf]  ;;  %v715_v12 = vld [vmem:[%s8585_s10 + $0x10c0] sm:$0xf]  ;;  %712 = vst [vmem:[%s8589_s11 + $0x428] sm:$0xf] %v711_v10 }
  0xcc   : > { %714 = vst [vmem:[%s8589_s11 + $0x42c] sm:$0xf] %v713_v11  ;;  %716 = vst [vmem:[%s8589_s11 + $0x430] sm:$0xf] %v715_v12  ;;  %v717_v13 = vld [vmem:[%s8585_s10 + $0x10d0] sm:$0xf] }
  0xcd   : > { %v719_v14 = vld [vmem:[%s8585_s10 + $0x10e0] sm:$0xf]  ;;  %v721_v15 = vld [vmem:[%s8585_s10 + $0x10f0] sm:$0xf]  ;;  %718 = vst [vmem:[%s8589_s11 + $0x434] sm:$0xf] %v717_v13 }
  0xce   : > { %720 = vst [vmem:[%s8589_s11 + $0x438] sm:$0xf] %v719_v14  ;;  %722 = vst [vmem:[%s8589_s11 + $0x43c] sm:$0xf] %v721_v15  ;;  %v723_v16 = vld [vmem:[%s8585_s10 + $0x1100] sm:$0xf] }
  0xcf   : > { %v725_v17 = vld [vmem:[%s8585_s10 + $0x1110] sm:$0xf]  ;;  %v727_v18 = vld [vmem:[%s8585_s10 + $0x1120] sm:$0xf]  ;;  %724 = vst [vmem:[%s8589_s11 + $0x440] sm:$0xf] %v723_v16 }
  0xd0   : > { %726 = vst [vmem:[%s8589_s11 + $0x444] sm:$0xf] %v725_v17  ;;  %728 = vst [vmem:[%s8589_s11 + $0x448] sm:$0xf] %v727_v18  ;;  %v729_v19 = vld [vmem:[%s8585_s10 + $0x1130] sm:$0xf] }
  0xd1   : > { %v731_v20 = vld [vmem:[%s8585_s10 + $0x1140] sm:$0xf]  ;;  %v733_v21 = vld [vmem:[%s8585_s10 + $0x1150] sm:$0xf]  ;;  %730 = vst [vmem:[%s8589_s11 + $0x44c] sm:$0xf] %v729_v19 }
  0xd2   : > { %732 = vst [vmem:[%s8589_s11 + $0x450] sm:$0xf] %v731_v20  ;;  %734 = vst [vmem:[%s8589_s11 + $0x454] sm:$0xf] %v733_v21  ;;  %v735_v22 = vld [vmem:[%s8585_s10 + $0x1160] sm:$0xf] }
  0xd3   : > { %v737_v23 = vld [vmem:[%s8585_s10 + $0x1170] sm:$0xf]  ;;  %v739_v24 = vld [vmem:[%s8585_s10 + $0x1180] sm:$0xf]  ;;  %736 = vst [vmem:[%s8589_s11 + $0x458] sm:$0xf] %v735_v22 }
  0xd4   : > { %738 = vst [vmem:[%s8589_s11 + $0x45c] sm:$0xf] %v737_v23  ;;  %740 = vst [vmem:[%s8589_s11 + $0x460] sm:$0xf] %v739_v24  ;;  %v741_v25 = vld [vmem:[%s8585_s10 + $0x1190] sm:$0xf] }
  0xd5   : > { %v743_v26 = vld [vmem:[%s8585_s10 + $0x11a0] sm:$0xf]  ;;  %v745_v27 = vld [vmem:[%s8585_s10 + $0x11b0] sm:$0xf]  ;;  %742 = vst [vmem:[%s8589_s11 + $0x464] sm:$0xf] %v741_v25 }
  0xd6   : > { %744 = vst [vmem:[%s8589_s11 + $0x468] sm:$0xf] %v743_v26  ;;  %746 = vst [vmem:[%s8589_s11 + $0x46c] sm:$0xf] %v745_v27  ;;  %v747_v28 = vld [vmem:[%s8585_s10 + $0x11c0] sm:$0xf] }
  0xd7   : > { %v749_v29 = vld [vmem:[%s8585_s10 + $0x11d0] sm:$0xf]  ;;  %v751_v30 = vld [vmem:[%s8585_s10 + $0x11e0] sm:$0xf]  ;;  %748 = vst [vmem:[%s8589_s11 + $0x470] sm:$0xf] %v747_v28 }
  0xd8   : > { %750 = vst [vmem:[%s8589_s11 + $0x474] sm:$0xf] %v749_v29  ;;  %752 = vst [vmem:[%s8589_s11 + $0x478] sm:$0xf] %v751_v30  ;;  %v753_v31 = vld [vmem:[%s8585_s10 + $0x11f0] sm:$0xf] }
  0xd9   : > { %v755_v32 = vld [vmem:[%s8585_s10 + $0x1200] sm:$0xf]  ;;  %v757_v33 = vld [vmem:[%s8585_s10 + $0x1210] sm:$0xf]  ;;  %754 = vst [vmem:[%s8589_s11 + $0x47c] sm:$0xf] %v753_v31 }
  0xda   : > { %756 = vst [vmem:[%s8589_s11 + $0x480] sm:$0xf] %v755_v32  ;;  %758 = vst [vmem:[%s8589_s11 + $0x484] sm:$0xf] %v757_v33  ;;  %v759_v34 = vld [vmem:[%s8585_s10 + $0x1220] sm:$0xf] }
  0xdb   : > { %v761_v35 = vld [vmem:[%s8585_s10 + $0x1230] sm:$0xf]  ;;  %v763_v36 = vld [vmem:[%s8585_s10 + $0x1240] sm:$0xf]  ;;  %760 = vst [vmem:[%s8589_s11 + $0x488] sm:$0xf] %v759_v34 }
  0xdc   : > { %762 = vst [vmem:[%s8589_s11 + $0x48c] sm:$0xf] %v761_v35  ;;  %764 = vst [vmem:[%s8589_s11 + $0x490] sm:$0xf] %v763_v36  ;;  %v765_v37 = vld [vmem:[%s8585_s10 + $0x1250] sm:$0xf] }
  0xdd   : > { %v767_v38 = vld [vmem:[%s8585_s10 + $0x1260] sm:$0xf]  ;;  %v769_v39 = vld [vmem:[%s8585_s10 + $0x1270] sm:$0xf]  ;;  %766 = vst [vmem:[%s8589_s11 + $0x494] sm:$0xf] %v765_v37 }
  0xde   : > { %768 = vst [vmem:[%s8589_s11 + $0x498] sm:$0xf] %v767_v38  ;;  %770 = vst [vmem:[%s8589_s11 + $0x49c] sm:$0xf] %v769_v39  ;;  %v771_v40 = vld [vmem:[%s8585_s10 + $0x1280] sm:$0xf] }
  0xdf   : > { %v773_v41 = vld [vmem:[%s8585_s10 + $0x1290] sm:$0xf]  ;;  %v775_v42 = vld [vmem:[%s8585_s10 + $0x12a0] sm:$0xf]  ;;  %772 = vst [vmem:[%s8589_s11 + $0x4a0] sm:$0xf] %v771_v40 }
  0xe0   : > { %774 = vst [vmem:[%s8589_s11 + $0x4a4] sm:$0xf] %v773_v41  ;;  %776 = vst [vmem:[%s8589_s11 + $0x4a8] sm:$0xf] %v775_v42  ;;  %v777_v43 = vld [vmem:[%s8585_s10 + $0x12b0] sm:$0xf] }
  0xe1   : > { %v779_v44 = vld [vmem:[%s8585_s10 + $0x12c0] sm:$0xf]  ;;  %v781_v45 = vld [vmem:[%s8585_s10 + $0x12d0] sm:$0xf]  ;;  %778 = vst [vmem:[%s8589_s11 + $0x4ac] sm:$0xf] %v777_v43 }
  0xe2   : > { %780 = vst [vmem:[%s8589_s11 + $0x4b0] sm:$0xf] %v779_v44  ;;  %782 = vst [vmem:[%s8589_s11 + $0x4b4] sm:$0xf] %v781_v45  ;;  %v783_v46 = vld [vmem:[%s8585_s10 + $0x12e0] sm:$0xf] }
  0xe3   : > { %v785_v47 = vld [vmem:[%s8585_s10 + $0x12f0] sm:$0xf]  ;;  %v787_v48 = vld [vmem:[%s8585_s10 + $0x1300] sm:$0xf]  ;;  %784 = vst [vmem:[%s8589_s11 + $0x4b8] sm:$0xf] %v783_v46 }
  0xe4   : > { %786 = vst [vmem:[%s8589_s11 + $0x4bc] sm:$0xf] %v785_v47  ;;  %788 = vst [vmem:[%s8589_s11 + $0x4c0] sm:$0xf] %v787_v48  ;;  %v789_v49 = vld [vmem:[%s8585_s10 + $0x1310] sm:$0xf] }
  0xe5   : > { %v791_v50 = vld [vmem:[%s8585_s10 + $0x1320] sm:$0xf]  ;;  %v793_v51 = vld [vmem:[%s8585_s10 + $0x1330] sm:$0xf]  ;;  %790 = vst [vmem:[%s8589_s11 + $0x4c4] sm:$0xf] %v789_v49 }
  0xe6   : > { %792 = vst [vmem:[%s8589_s11 + $0x4c8] sm:$0xf] %v791_v50  ;;  %794 = vst [vmem:[%s8589_s11 + $0x4cc] sm:$0xf] %v793_v51  ;;  %v795_v52 = vld [vmem:[%s8585_s10 + $0x1340] sm:$0xf] }
  0xe7   : > { %v797_v53 = vld [vmem:[%s8585_s10 + $0x1350] sm:$0xf]  ;;  %v799_v54 = vld [vmem:[%s8585_s10 + $0x1360] sm:$0xf]  ;;  %796 = vst [vmem:[%s8589_s11 + $0x4d0] sm:$0xf] %v795_v52 }
  0xe8   : > { %798 = vst [vmem:[%s8589_s11 + $0x4d4] sm:$0xf] %v797_v53  ;;  %800 = vst [vmem:[%s8589_s11 + $0x4d8] sm:$0xf] %v799_v54  ;;  %v801_v55 = vld [vmem:[%s8585_s10 + $0x1370] sm:$0xf] }
  0xe9   : > { %v803_v56 = vld [vmem:[%s8585_s10 + $0x1380] sm:$0xf]  ;;  %v805_v57 = vld [vmem:[%s8585_s10 + $0x1390] sm:$0xf]  ;;  %802 = vst [vmem:[%s8589_s11 + $0x4dc] sm:$0xf] %v801_v55 }
  0xea   : > { %804 = vst [vmem:[%s8589_s11 + $0x4e0] sm:$0xf] %v803_v56  ;;  %806 = vst [vmem:[%s8589_s11 + $0x4e4] sm:$0xf] %v805_v57  ;;  %v807_v58 = vld [vmem:[%s8585_s10 + $0x13a0] sm:$0xf] }
  0xeb   : > { %v809_v59 = vld [vmem:[%s8585_s10 + $0x13b0] sm:$0xf]  ;;  %v811_v60 = vld [vmem:[%s8585_s10 + $0x13c0] sm:$0xf]  ;;  %808 = vst [vmem:[%s8589_s11 + $0x4e8] sm:$0xf] %v807_v58 }
  0xec   : > { %810 = vst [vmem:[%s8589_s11 + $0x4ec] sm:$0xf] %v809_v59  ;;  %812 = vst [vmem:[%s8589_s11 + $0x4f0] sm:$0xf] %v811_v60  ;;  %v813_v61 = vld [vmem:[%s8585_s10 + $0x13d0] sm:$0xf] }
  0xed   : > { %v815_v62 = vld [vmem:[%s8585_s10 + $0x13e0] sm:$0xf]  ;;  %v817_v63 = vld [vmem:[%s8585_s10 + $0x13f0] sm:$0xf]  ;;  %814 = vst [vmem:[%s8589_s11 + $0x4f4] sm:$0xf] %v813_v61 }
  0xee   : > { %816 = vst [vmem:[%s8589_s11 + $0x4f8] sm:$0xf] %v815_v62  ;;  %818 = vst [vmem:[%s8589_s11 + $0x4fc] sm:$0xf] %v817_v63  ;;  %v819_v0 = vld [vmem:[%s8585_s10 + $0x1400] sm:$0xf] }
  0xef   : > { %v821_v1 = vld [vmem:[%s8585_s10 + $0x1410] sm:$0xf]  ;;  %v823_v2 = vld [vmem:[%s8585_s10 + $0x1420] sm:$0xf]  ;;  %820 = vst [vmem:[%s8589_s11 + $0x500] sm:$0xf] %v819_v0 }
  0xf0   : > { %822 = vst [vmem:[%s8589_s11 + $0x504] sm:$0xf] %v821_v1  ;;  %824 = vst [vmem:[%s8589_s11 + $0x508] sm:$0xf] %v823_v2  ;;  %v825_v3 = vld [vmem:[%s8585_s10 + $0x1430] sm:$0xf] }
  0xf1   : > { %v827_v4 = vld [vmem:[%s8585_s10 + $0x1440] sm:$0xf]  ;;  %v829_v5 = vld [vmem:[%s8585_s10 + $0x1450] sm:$0xf]  ;;  %826 = vst [vmem:[%s8589_s11 + $0x50c] sm:$0xf] %v825_v3 }
  0xf2   : > { %828 = vst [vmem:[%s8589_s11 + $0x510] sm:$0xf] %v827_v4  ;;  %830 = vst [vmem:[%s8589_s11 + $0x514] sm:$0xf] %v829_v5  ;;  %v831_v6 = vld [vmem:[%s8585_s10 + $0x1460] sm:$0xf] }
  0xf3   : > { %v833_v7 = vld [vmem:[%s8585_s10 + $0x1470] sm:$0xf]  ;;  %v835_v8 = vld [vmem:[%s8585_s10 + $0x1480] sm:$0xf]  ;;  %832 = vst [vmem:[%s8589_s11 + $0x518] sm:$0xf] %v831_v6 }
  0xf4   : > { %834 = vst [vmem:[%s8589_s11 + $0x51c] sm:$0xf] %v833_v7  ;;  %836 = vst [vmem:[%s8589_s11 + $0x520] sm:$0xf] %v835_v8  ;;  %v837_v9 = vld [vmem:[%s8585_s10 + $0x1490] sm:$0xf] }
  0xf5   : > { %v839_v10 = vld [vmem:[%s8585_s10 + $0x14a0] sm:$0xf]  ;;  %v841_v11 = vld [vmem:[%s8585_s10 + $0x14b0] sm:$0xf]  ;;  %838 = vst [vmem:[%s8589_s11 + $0x524] sm:$0xf] %v837_v9 }
  0xf6   : > { %840 = vst [vmem:[%s8589_s11 + $0x528] sm:$0xf] %v839_v10  ;;  %842 = vst [vmem:[%s8589_s11 + $0x52c] sm:$0xf] %v841_v11  ;;  %v843_v12 = vld [vmem:[%s8585_s10 + $0x14c0] sm:$0xf] }
  0xf7   : > { %v845_v13 = vld [vmem:[%s8585_s10 + $0x14d0] sm:$0xf]  ;;  %v847_v14 = vld [vmem:[%s8585_s10 + $0x14e0] sm:$0xf]  ;;  %844 = vst [vmem:[%s8589_s11 + $0x530] sm:$0xf] %v843_v12 }
  0xf8   : > { %846 = vst [vmem:[%s8589_s11 + $0x534] sm:$0xf] %v845_v13  ;;  %848 = vst [vmem:[%s8589_s11 + $0x538] sm:$0xf] %v847_v14  ;;  %v849_v15 = vld [vmem:[%s8585_s10 + $0x14f0] sm:$0xf] }
  0xf9   : > { %v851_v16 = vld [vmem:[%s8585_s10 + $0x1500] sm:$0xf]  ;;  %v853_v17 = vld [vmem:[%s8585_s10 + $0x1510] sm:$0xf]  ;;  %850 = vst [vmem:[%s8589_s11 + $0x53c] sm:$0xf] %v849_v15 }
  0xfa   : > { %852 = vst [vmem:[%s8589_s11 + $0x540] sm:$0xf] %v851_v16  ;;  %854 = vst [vmem:[%s8589_s11 + $0x544] sm:$0xf] %v853_v17  ;;  %v855_v18 = vld [vmem:[%s8585_s10 + $0x1520] sm:$0xf] }
  0xfb   : > { %v857_v19 = vld [vmem:[%s8585_s10 + $0x1530] sm:$0xf]  ;;  %v859_v20 = vld [vmem:[%s8585_s10 + $0x1540] sm:$0xf]  ;;  %856 = vst [vmem:[%s8589_s11 + $0x548] sm:$0xf] %v855_v18 }
  0xfc   : > { %858 = vst [vmem:[%s8589_s11 + $0x54c] sm:$0xf] %v857_v19  ;;  %860 = vst [vmem:[%s8589_s11 + $0x550] sm:$0xf] %v859_v20  ;;  %v861_v21 = vld [vmem:[%s8585_s10 + $0x1550] sm:$0xf] }
  0xfd   : > { %v863_v22 = vld [vmem:[%s8585_s10 + $0x1560] sm:$0xf]  ;;  %v865_v23 = vld [vmem:[%s8585_s10 + $0x1570] sm:$0xf]  ;;  %862 = vst [vmem:[%s8589_s11 + $0x554] sm:$0xf] %v861_v21 }
  0xfe   : > { %864 = vst [vmem:[%s8589_s11 + $0x558] sm:$0xf] %v863_v22  ;;  %866 = vst [vmem:[%s8589_s11 + $0x55c] sm:$0xf] %v865_v23  ;;  %v867_v24 = vld [vmem:[%s8585_s10 + $0x1580] sm:$0xf] }
  0xff   : > { %v869_v25 = vld [vmem:[%s8585_s10 + $0x1590] sm:$0xf]  ;;  %v871_v26 = vld [vmem:[%s8585_s10 + $0x15a0] sm:$0xf]  ;;  %868 = vst [vmem:[%s8589_s11 + $0x560] sm:$0xf] %v867_v24 }
 0x100   : > { %870 = vst [vmem:[%s8589_s11 + $0x564] sm:$0xf] %v869_v25  ;;  %872 = vst [vmem:[%s8589_s11 + $0x568] sm:$0xf] %v871_v26  ;;  %v873_v27 = vld [vmem:[%s8585_s10 + $0x15b0] sm:$0xf] }
 0x101   : > { %v875_v28 = vld [vmem:[%s8585_s10 + $0x15c0] sm:$0xf]  ;;  %v877_v29 = vld [vmem:[%s8585_s10 + $0x15d0] sm:$0xf]  ;;  %874 = vst [vmem:[%s8589_s11 + $0x56c] sm:$0xf] %v873_v27 }
 0x102   : > { %876 = vst [vmem:[%s8589_s11 + $0x570] sm:$0xf] %v875_v28  ;;  %878 = vst [vmem:[%s8589_s11 + $0x574] sm:$0xf] %v877_v29  ;;  %v879_v30 = vld [vmem:[%s8585_s10 + $0x15e0] sm:$0xf] }
 0x103   : > { %v881_v31 = vld [vmem:[%s8585_s10 + $0x15f0] sm:$0xf]  ;;  %v883_v32 = vld [vmem:[%s8585_s10 + $0x1600] sm:$0xf]  ;;  %880 = vst [vmem:[%s8589_s11 + $0x578] sm:$0xf] %v879_v30 }
 0x104   : > { %882 = vst [vmem:[%s8589_s11 + $0x57c] sm:$0xf] %v881_v31  ;;  %884 = vst [vmem:[%s8589_s11 + $0x580] sm:$0xf] %v883_v32  ;;  %v885_v33 = vld [vmem:[%s8585_s10 + $0x1610] sm:$0xf] }
 0x105   : > { %v887_v34 = vld [vmem:[%s8585_s10 + $0x1620] sm:$0xf]  ;;  %v889_v35 = vld [vmem:[%s8585_s10 + $0x1630] sm:$0xf]  ;;  %886 = vst [vmem:[%s8589_s11 + $0x584] sm:$0xf] %v885_v33 }
 0x106   : > { %888 = vst [vmem:[%s8589_s11 + $0x588] sm:$0xf] %v887_v34  ;;  %890 = vst [vmem:[%s8589_s11 + $0x58c] sm:$0xf] %v889_v35  ;;  %v891_v36 = vld [vmem:[%s8585_s10 + $0x1640] sm:$0xf] }
 0x107   : > { %v893_v37 = vld [vmem:[%s8585_s10 + $0x1650] sm:$0xf]  ;;  %v895_v38 = vld [vmem:[%s8585_s10 + $0x1660] sm:$0xf]  ;;  %892 = vst [vmem:[%s8589_s11 + $0x590] sm:$0xf] %v891_v36 }
 0x108   : > { %894 = vst [vmem:[%s8589_s11 + $0x594] sm:$0xf] %v893_v37  ;;  %896 = vst [vmem:[%s8589_s11 + $0x598] sm:$0xf] %v895_v38  ;;  %v897_v39 = vld [vmem:[%s8585_s10 + $0x1670] sm:$0xf] }
 0x109   : > { %v899_v40 = vld [vmem:[%s8585_s10 + $0x1680] sm:$0xf]  ;;  %v901_v41 = vld [vmem:[%s8585_s10 + $0x1690] sm:$0xf]  ;;  %898 = vst [vmem:[%s8589_s11 + $0x59c] sm:$0xf] %v897_v39 }
 0x10a   : > { %900 = vst [vmem:[%s8589_s11 + $0x5a0] sm:$0xf] %v899_v40  ;;  %902 = vst [vmem:[%s8589_s11 + $0x5a4] sm:$0xf] %v901_v41  ;;  %v903_v42 = vld [vmem:[%s8585_s10 + $0x16a0] sm:$0xf] }
 0x10b   : > { %v905_v43 = vld [vmem:[%s8585_s10 + $0x16b0] sm:$0xf]  ;;  %v907_v44 = vld [vmem:[%s8585_s10 + $0x16c0] sm:$0xf]  ;;  %904 = vst [vmem:[%s8589_s11 + $0x5a8] sm:$0xf] %v903_v42 }
 0x10c   : > { %906 = vst [vmem:[%s8589_s11 + $0x5ac] sm:$0xf] %v905_v43  ;;  %908 = vst [vmem:[%s8589_s11 + $0x5b0] sm:$0xf] %v907_v44  ;;  %v909_v45 = vld [vmem:[%s8585_s10 + $0x16d0] sm:$0xf] }
 0x10d   : > { %v911_v46 = vld [vmem:[%s8585_s10 + $0x16e0] sm:$0xf]  ;;  %v913_v47 = vld [vmem:[%s8585_s10 + $0x16f0] sm:$0xf]  ;;  %910 = vst [vmem:[%s8589_s11 + $0x5b4] sm:$0xf] %v909_v45 }
 0x10e   : > { %912 = vst [vmem:[%s8589_s11 + $0x5b8] sm:$0xf] %v911_v46  ;;  %914 = vst [vmem:[%s8589_s11 + $0x5bc] sm:$0xf] %v913_v47  ;;  %v915_v48 = vld [vmem:[%s8585_s10 + $0x1700] sm:$0xf] }
 0x10f   : > { %v917_v49 = vld [vmem:[%s8585_s10 + $0x1710] sm:$0xf]  ;;  %v919_v50 = vld [vmem:[%s8585_s10 + $0x1720] sm:$0xf]  ;;  %916 = vst [vmem:[%s8589_s11 + $0x5c0] sm:$0xf] %v915_v48 }
 0x110   : > { %918 = vst [vmem:[%s8589_s11 + $0x5c4] sm:$0xf] %v917_v49  ;;  %920 = vst [vmem:[%s8589_s11 + $0x5c8] sm:$0xf] %v919_v50  ;;  %v921_v51 = vld [vmem:[%s8585_s10 + $0x1730] sm:$0xf] }
 0x111   : > { %v923_v52 = vld [vmem:[%s8585_s10 + $0x1740] sm:$0xf]  ;;  %v925_v53 = vld [vmem:[%s8585_s10 + $0x1750] sm:$0xf]  ;;  %922 = vst [vmem:[%s8589_s11 + $0x5cc] sm:$0xf] %v921_v51 }
 0x112   : > { %924 = vst [vmem:[%s8589_s11 + $0x5d0] sm:$0xf] %v923_v52  ;;  %926 = vst [vmem:[%s8589_s11 + $0x5d4] sm:$0xf] %v925_v53  ;;  %v927_v54 = vld [vmem:[%s8585_s10 + $0x1760] sm:$0xf] }
 0x113   : > { %v929_v55 = vld [vmem:[%s8585_s10 + $0x1770] sm:$0xf]  ;;  %v931_v56 = vld [vmem:[%s8585_s10 + $0x1780] sm:$0xf]  ;;  %928 = vst [vmem:[%s8589_s11 + $0x5d8] sm:$0xf] %v927_v54 }
 0x114   : > { %930 = vst [vmem:[%s8589_s11 + $0x5dc] sm:$0xf] %v929_v55  ;;  %932 = vst [vmem:[%s8589_s11 + $0x5e0] sm:$0xf] %v931_v56  ;;  %v933_v57 = vld [vmem:[%s8585_s10 + $0x1790] sm:$0xf] }
 0x115   : > { %v935_v58 = vld [vmem:[%s8585_s10 + $0x17a0] sm:$0xf]  ;;  %v937_v59 = vld [vmem:[%s8585_s10 + $0x17b0] sm:$0xf]  ;;  %934 = vst [vmem:[%s8589_s11 + $0x5e4] sm:$0xf] %v933_v57 }
 0x116   : > { %936 = vst [vmem:[%s8589_s11 + $0x5e8] sm:$0xf] %v935_v58  ;;  %938 = vst [vmem:[%s8589_s11 + $0x5ec] sm:$0xf] %v937_v59  ;;  %v939_v60 = vld [vmem:[%s8585_s10 + $0x17c0] sm:$0xf] }
 0x117   : > { %v941_v61 = vld [vmem:[%s8585_s10 + $0x17d0] sm:$0xf]  ;;  %v943_v62 = vld [vmem:[%s8585_s10 + $0x17e0] sm:$0xf]  ;;  %940 = vst [vmem:[%s8589_s11 + $0x5f0] sm:$0xf] %v939_v60 }
 0x118   : > { %942 = vst [vmem:[%s8589_s11 + $0x5f4] sm:$0xf] %v941_v61  ;;  %944 = vst [vmem:[%s8589_s11 + $0x5f8] sm:$0xf] %v943_v62  ;;  %v945_v63 = vld [vmem:[%s8585_s10 + $0x17f0] sm:$0xf] }
 0x119   : > { %v947_v0 = vld [vmem:[%s8585_s10 + $0x1800] sm:$0xf]  ;;  %v949_v1 = vld [vmem:[%s8585_s10 + $0x1810] sm:$0xf]  ;;  %946 = vst [vmem:[%s8589_s11 + $0x5fc] sm:$0xf] %v945_v63 }
 0x11a   : > { %948 = vst [vmem:[%s8589_s11 + $0x600] sm:$0xf] %v947_v0  ;;  %950 = vst [vmem:[%s8589_s11 + $0x604] sm:$0xf] %v949_v1  ;;  %v951_v2 = vld [vmem:[%s8585_s10 + $0x1820] sm:$0xf] }
 0x11b   : > { %v953_v3 = vld [vmem:[%s8585_s10 + $0x1830] sm:$0xf]  ;;  %v955_v4 = vld [vmem:[%s8585_s10 + $0x1840] sm:$0xf]  ;;  %952 = vst [vmem:[%s8589_s11 + $0x608] sm:$0xf] %v951_v2 }
 0x11c   : > { %954 = vst [vmem:[%s8589_s11 + $0x60c] sm:$0xf] %v953_v3  ;;  %956 = vst [vmem:[%s8589_s11 + $0x610] sm:$0xf] %v955_v4  ;;  %v957_v5 = vld [vmem:[%s8585_s10 + $0x1850] sm:$0xf] }
 0x11d   : > { %v959_v6 = vld [vmem:[%s8585_s10 + $0x1860] sm:$0xf]  ;;  %v961_v7 = vld [vmem:[%s8585_s10 + $0x1870] sm:$0xf]  ;;  %958 = vst [vmem:[%s8589_s11 + $0x614] sm:$0xf] %v957_v5 }
 0x11e   : > { %960 = vst [vmem:[%s8589_s11 + $0x618] sm:$0xf] %v959_v6  ;;  %962 = vst [vmem:[%s8589_s11 + $0x61c] sm:$0xf] %v961_v7  ;;  %v963_v8 = vld [vmem:[%s8585_s10 + $0x1880] sm:$0xf] }
 0x11f   : > { %v965_v9 = vld [vmem:[%s8585_s10 + $0x1890] sm:$0xf]  ;;  %v967_v10 = vld [vmem:[%s8585_s10 + $0x18a0] sm:$0xf]  ;;  %964 = vst [vmem:[%s8589_s11 + $0x620] sm:$0xf] %v963_v8 }
 0x120   : > { %966 = vst [vmem:[%s8589_s11 + $0x624] sm:$0xf] %v965_v9  ;;  %968 = vst [vmem:[%s8589_s11 + $0x628] sm:$0xf] %v967_v10  ;;  %v969_v11 = vld [vmem:[%s8585_s10 + $0x18b0] sm:$0xf] }
 0x121   : > { %v971_v12 = vld [vmem:[%s8585_s10 + $0x18c0] sm:$0xf]  ;;  %v973_v13 = vld [vmem:[%s8585_s10 + $0x18d0] sm:$0xf]  ;;  %970 = vst [vmem:[%s8589_s11 + $0x62c] sm:$0xf] %v969_v11 }
 0x122   : > { %972 = vst [vmem:[%s8589_s11 + $0x630] sm:$0xf] %v971_v12  ;;  %974 = vst [vmem:[%s8589_s11 + $0x634] sm:$0xf] %v973_v13  ;;  %v975_v14 = vld [vmem:[%s8585_s10 + $0x18e0] sm:$0xf] }
 0x123   : > { %v977_v15 = vld [vmem:[%s8585_s10 + $0x18f0] sm:$0xf]  ;;  %v979_v16 = vld [vmem:[%s8585_s10 + $0x1900] sm:$0xf]  ;;  %976 = vst [vmem:[%s8589_s11 + $0x638] sm:$0xf] %v975_v14 }
 0x124   : > { %978 = vst [vmem:[%s8589_s11 + $0x63c] sm:$0xf] %v977_v15  ;;  %980 = vst [vmem:[%s8589_s11 + $0x640] sm:$0xf] %v979_v16  ;;  %v981_v17 = vld [vmem:[%s8585_s10 + $0x1910] sm:$0xf] }
 0x125   : > { %v983_v18 = vld [vmem:[%s8585_s10 + $0x1920] sm:$0xf]  ;;  %v985_v19 = vld [vmem:[%s8585_s10 + $0x1930] sm:$0xf]  ;;  %982 = vst [vmem:[%s8589_s11 + $0x644] sm:$0xf] %v981_v17 }
 0x126   : > { %984 = vst [vmem:[%s8589_s11 + $0x648] sm:$0xf] %v983_v18  ;;  %986 = vst [vmem:[%s8589_s11 + $0x64c] sm:$0xf] %v985_v19  ;;  %v987_v20 = vld [vmem:[%s8585_s10 + $0x1940] sm:$0xf] }
 0x127   : > { %v989_v21 = vld [vmem:[%s8585_s10 + $0x1950] sm:$0xf]  ;;  %v991_v22 = vld [vmem:[%s8585_s10 + $0x1960] sm:$0xf]  ;;  %988 = vst [vmem:[%s8589_s11 + $0x650] sm:$0xf] %v987_v20 }
 0x128   : > { %990 = vst [vmem:[%s8589_s11 + $0x654] sm:$0xf] %v989_v21  ;;  %992 = vst [vmem:[%s8589_s11 + $0x658] sm:$0xf] %v991_v22  ;;  %v993_v23 = vld [vmem:[%s8585_s10 + $0x1970] sm:$0xf] }
 0x129   : > { %v995_v24 = vld [vmem:[%s8585_s10 + $0x1980] sm:$0xf]  ;;  %v997_v25 = vld [vmem:[%s8585_s10 + $0x1990] sm:$0xf]  ;;  %994 = vst [vmem:[%s8589_s11 + $0x65c] sm:$0xf] %v993_v23 }
 0x12a   : > { %996 = vst [vmem:[%s8589_s11 + $0x660] sm:$0xf] %v995_v24  ;;  %998 = vst [vmem:[%s8589_s11 + $0x664] sm:$0xf] %v997_v25  ;;  %v999_v26 = vld [vmem:[%s8585_s10 + $0x19a0] sm:$0xf] }
 0x12b   : > { %v1001_v27 = vld [vmem:[%s8585_s10 + $0x19b0] sm:$0xf]  ;;  %v1003_v28 = vld [vmem:[%s8585_s10 + $0x19c0] sm:$0xf]  ;;  %1000 = vst [vmem:[%s8589_s11 + $0x668] sm:$0xf] %v999_v26 }
 0x12c   : > { %1002 = vst [vmem:[%s8589_s11 + $0x66c] sm:$0xf] %v1001_v27  ;;  %1004 = vst [vmem:[%s8589_s11 + $0x670] sm:$0xf] %v1003_v28  ;;  %v1005_v29 = vld [vmem:[%s8585_s10 + $0x19d0] sm:$0xf] }
 0x12d   : > { %v1007_v30 = vld [vmem:[%s8585_s10 + $0x19e0] sm:$0xf]  ;;  %v1009_v31 = vld [vmem:[%s8585_s10 + $0x19f0] sm:$0xf]  ;;  %1006 = vst [vmem:[%s8589_s11 + $0x674] sm:$0xf] %v1005_v29 }
 0x12e   : > { %1008 = vst [vmem:[%s8589_s11 + $0x678] sm:$0xf] %v1007_v30  ;;  %1010 = vst [vmem:[%s8589_s11 + $0x67c] sm:$0xf] %v1009_v31  ;;  %v1011_v32 = vld [vmem:[%s8585_s10 + $0x1a00] sm:$0xf] }
 0x12f   : > { %v1013_v33 = vld [vmem:[%s8585_s10 + $0x1a10] sm:$0xf]  ;;  %v1015_v34 = vld [vmem:[%s8585_s10 + $0x1a20] sm:$0xf]  ;;  %1012 = vst [vmem:[%s8589_s11 + $0x680] sm:$0xf] %v1011_v32 }
 0x130   : > { %1014 = vst [vmem:[%s8589_s11 + $0x684] sm:$0xf] %v1013_v33  ;;  %1016 = vst [vmem:[%s8589_s11 + $0x688] sm:$0xf] %v1015_v34  ;;  %v1017_v35 = vld [vmem:[%s8585_s10 + $0x1a30] sm:$0xf] }
 0x131   : > { %v1019_v36 = vld [vmem:[%s8585_s10 + $0x1a40] sm:$0xf]  ;;  %v1021_v37 = vld [vmem:[%s8585_s10 + $0x1a50] sm:$0xf]  ;;  %1018 = vst [vmem:[%s8589_s11 + $0x68c] sm:$0xf] %v1017_v35 }
 0x132   : > { %1020 = vst [vmem:[%s8589_s11 + $0x690] sm:$0xf] %v1019_v36  ;;  %1022 = vst [vmem:[%s8589_s11 + $0x694] sm:$0xf] %v1021_v37  ;;  %v1023_v38 = vld [vmem:[%s8585_s10 + $0x1a60] sm:$0xf] }
 0x133   : > { %v1025_v39 = vld [vmem:[%s8585_s10 + $0x1a70] sm:$0xf]  ;;  %v1027_v40 = vld [vmem:[%s8585_s10 + $0x1a80] sm:$0xf]  ;;  %1024 = vst [vmem:[%s8589_s11 + $0x698] sm:$0xf] %v1023_v38 }
 0x134   : > { %1026 = vst [vmem:[%s8589_s11 + $0x69c] sm:$0xf] %v1025_v39  ;;  %1028 = vst [vmem:[%s8589_s11 + $0x6a0] sm:$0xf] %v1027_v40  ;;  %v1029_v41 = vld [vmem:[%s8585_s10 + $0x1a90] sm:$0xf] }
 0x135   : > { %v1031_v42 = vld [vmem:[%s8585_s10 + $0x1aa0] sm:$0xf]  ;;  %v1033_v43 = vld [vmem:[%s8585_s10 + $0x1ab0] sm:$0xf]  ;;  %1030 = vst [vmem:[%s8589_s11 + $0x6a4] sm:$0xf] %v1029_v41 }
 0x136   : > { %1032 = vst [vmem:[%s8589_s11 + $0x6a8] sm:$0xf] %v1031_v42  ;;  %1034 = vst [vmem:[%s8589_s11 + $0x6ac] sm:$0xf] %v1033_v43  ;;  %v1035_v44 = vld [vmem:[%s8585_s10 + $0x1ac0] sm:$0xf] }
 0x137   : > { %v1037_v45 = vld [vmem:[%s8585_s10 + $0x1ad0] sm:$0xf]  ;;  %v1039_v46 = vld [vmem:[%s8585_s10 + $0x1ae0] sm:$0xf]  ;;  %1036 = vst [vmem:[%s8589_s11 + $0x6b0] sm:$0xf] %v1035_v44 }
 0x138   : > { %1038 = vst [vmem:[%s8589_s11 + $0x6b4] sm:$0xf] %v1037_v45  ;;  %1040 = vst [vmem:[%s8589_s11 + $0x6b8] sm:$0xf] %v1039_v46  ;;  %v1041_v47 = vld [vmem:[%s8585_s10 + $0x1af0] sm:$0xf] }
 0x139   : > { %v1043_v48 = vld [vmem:[%s8585_s10 + $0x1b00] sm:$0xf]  ;;  %v1045_v49 = vld [vmem:[%s8585_s10 + $0x1b10] sm:$0xf]  ;;  %1042 = vst [vmem:[%s8589_s11 + $0x6bc] sm:$0xf] %v1041_v47 }
 0x13a   : > { %1044 = vst [vmem:[%s8589_s11 + $0x6c0] sm:$0xf] %v1043_v48  ;;  %1046 = vst [vmem:[%s8589_s11 + $0x6c4] sm:$0xf] %v1045_v49  ;;  %v1047_v50 = vld [vmem:[%s8585_s10 + $0x1b20] sm:$0xf] }
 0x13b   : > { %v1049_v51 = vld [vmem:[%s8585_s10 + $0x1b30] sm:$0xf]  ;;  %v1051_v52 = vld [vmem:[%s8585_s10 + $0x1b40] sm:$0xf]  ;;  %1048 = vst [vmem:[%s8589_s11 + $0x6c8] sm:$0xf] %v1047_v50 }
 0x13c   : > { %1050 = vst [vmem:[%s8589_s11 + $0x6cc] sm:$0xf] %v1049_v51  ;;  %1052 = vst [vmem:[%s8589_s11 + $0x6d0] sm:$0xf] %v1051_v52  ;;  %v1053_v53 = vld [vmem:[%s8585_s10 + $0x1b50] sm:$0xf] }
 0x13d   : > { %v1055_v54 = vld [vmem:[%s8585_s10 + $0x1b60] sm:$0xf]  ;;  %v1057_v55 = vld [vmem:[%s8585_s10 + $0x1b70] sm:$0xf]  ;;  %1054 = vst [vmem:[%s8589_s11 + $0x6d4] sm:$0xf] %v1053_v53 }
 0x13e   : > { %1056 = vst [vmem:[%s8589_s11 + $0x6d8] sm:$0xf] %v1055_v54  ;;  %1058 = vst [vmem:[%s8589_s11 + $0x6dc] sm:$0xf] %v1057_v55  ;;  %v1059_v56 = vld [vmem:[%s8585_s10 + $0x1b80] sm:$0xf] }
 0x13f   : > { %v1061_v57 = vld [vmem:[%s8585_s10 + $0x1b90] sm:$0xf]  ;;  %v1063_v58 = vld [vmem:[%s8585_s10 + $0x1ba0] sm:$0xf]  ;;  %1060 = vst [vmem:[%s8589_s11 + $0x6e0] sm:$0xf] %v1059_v56 }
 0x140   : > { %1062 = vst [vmem:[%s8589_s11 + $0x6e4] sm:$0xf] %v1061_v57  ;;  %1064 = vst [vmem:[%s8589_s11 + $0x6e8] sm:$0xf] %v1063_v58  ;;  %v1065_v59 = vld [vmem:[%s8585_s10 + $0x1bb0] sm:$0xf] }
 0x141   : > { %v1067_v60 = vld [vmem:[%s8585_s10 + $0x1bc0] sm:$0xf]  ;;  %v1069_v61 = vld [vmem:[%s8585_s10 + $0x1bd0] sm:$0xf]  ;;  %1066 = vst [vmem:[%s8589_s11 + $0x6ec] sm:$0xf] %v1065_v59 }
 0x142   : > { %1068 = vst [vmem:[%s8589_s11 + $0x6f0] sm:$0xf] %v1067_v60  ;;  %1070 = vst [vmem:[%s8589_s11 + $0x6f4] sm:$0xf] %v1069_v61  ;;  %v1071_v62 = vld [vmem:[%s8585_s10 + $0x1be0] sm:$0xf] }
 0x143   : > { %v1073_v63 = vld [vmem:[%s8585_s10 + $0x1bf0] sm:$0xf]  ;;  %v1075_v0 = vld [vmem:[%s8585_s10 + $0x1c00] sm:$0xf]  ;;  %1072 = vst [vmem:[%s8589_s11 + $0x6f8] sm:$0xf] %v1071_v62 }
 0x144   : > { %1074 = vst [vmem:[%s8589_s11 + $0x6fc] sm:$0xf] %v1073_v63  ;;  %1076 = vst [vmem:[%s8589_s11 + $0x700] sm:$0xf] %v1075_v0  ;;  %v1077_v1 = vld [vmem:[%s8585_s10 + $0x1c10] sm:$0xf] }
 0x145   : > { %v1079_v2 = vld [vmem:[%s8585_s10 + $0x1c20] sm:$0xf]  ;;  %v1081_v3 = vld [vmem:[%s8585_s10 + $0x1c30] sm:$0xf]  ;;  %1078 = vst [vmem:[%s8589_s11 + $0x704] sm:$0xf] %v1077_v1 }
 0x146   : > { %1080 = vst [vmem:[%s8589_s11 + $0x708] sm:$0xf] %v1079_v2  ;;  %1082 = vst [vmem:[%s8589_s11 + $0x70c] sm:$0xf] %v1081_v3  ;;  %v1083_v4 = vld [vmem:[%s8585_s10 + $0x1c40] sm:$0xf] }
 0x147   : > { %v1085_v5 = vld [vmem:[%s8585_s10 + $0x1c50] sm:$0xf]  ;;  %v1087_v6 = vld [vmem:[%s8585_s10 + $0x1c60] sm:$0xf]  ;;  %1084 = vst [vmem:[%s8589_s11 + $0x710] sm:$0xf] %v1083_v4 }
 0x148   : > { %1086 = vst [vmem:[%s8589_s11 + $0x714] sm:$0xf] %v1085_v5  ;;  %1088 = vst [vmem:[%s8589_s11 + $0x718] sm:$0xf] %v1087_v6  ;;  %v1089_v7 = vld [vmem:[%s8585_s10 + $0x1c70] sm:$0xf] }
 0x149   : > { %v1091_v8 = vld [vmem:[%s8585_s10 + $0x1c80] sm:$0xf]  ;;  %v1093_v9 = vld [vmem:[%s8585_s10 + $0x1c90] sm:$0xf]  ;;  %1090 = vst [vmem:[%s8589_s11 + $0x71c] sm:$0xf] %v1089_v7 }
 0x14a   : > { %1092 = vst [vmem:[%s8589_s11 + $0x720] sm:$0xf] %v1091_v8  ;;  %1094 = vst [vmem:[%s8589_s11 + $0x724] sm:$0xf] %v1093_v9  ;;  %v1095_v10 = vld [vmem:[%s8585_s10 + $0x1ca0] sm:$0xf] }
 0x14b   : > { %v1097_v11 = vld [vmem:[%s8585_s10 + $0x1cb0] sm:$0xf]  ;;  %v1099_v12 = vld [vmem:[%s8585_s10 + $0x1cc0] sm:$0xf]  ;;  %1096 = vst [vmem:[%s8589_s11 + $0x728] sm:$0xf] %v1095_v10 }
 0x14c   : > { %1098 = vst [vmem:[%s8589_s11 + $0x72c] sm:$0xf] %v1097_v11  ;;  %1100 = vst [vmem:[%s8589_s11 + $0x730] sm:$0xf] %v1099_v12  ;;  %v1101_v13 = vld [vmem:[%s8585_s10 + $0x1cd0] sm:$0xf] }
 0x14d   : > { %v1103_v14 = vld [vmem:[%s8585_s10 + $0x1ce0] sm:$0xf]  ;;  %v1105_v15 = vld [vmem:[%s8585_s10 + $0x1cf0] sm:$0xf]  ;;  %1102 = vst [vmem:[%s8589_s11 + $0x734] sm:$0xf] %v1101_v13 }
 0x14e   : > { %1104 = vst [vmem:[%s8589_s11 + $0x738] sm:$0xf] %v1103_v14  ;;  %1106 = vst [vmem:[%s8589_s11 + $0x73c] sm:$0xf] %v1105_v15  ;;  %v1107_v16 = vld [vmem:[%s8585_s10 + $0x1d00] sm:$0xf] }
 0x14f   : > { %v1109_v17 = vld [vmem:[%s8585_s10 + $0x1d10] sm:$0xf]  ;;  %v1111_v18 = vld [vmem:[%s8585_s10 + $0x1d20] sm:$0xf]  ;;  %1108 = vst [vmem:[%s8589_s11 + $0x740] sm:$0xf] %v1107_v16 }
 0x150   : > { %1110 = vst [vmem:[%s8589_s11 + $0x744] sm:$0xf] %v1109_v17  ;;  %1112 = vst [vmem:[%s8589_s11 + $0x748] sm:$0xf] %v1111_v18  ;;  %v1113_v19 = vld [vmem:[%s8585_s10 + $0x1d30] sm:$0xf] }
 0x151   : > { %v1115_v20 = vld [vmem:[%s8585_s10 + $0x1d40] sm:$0xf]  ;;  %v1117_v21 = vld [vmem:[%s8585_s10 + $0x1d50] sm:$0xf]  ;;  %1114 = vst [vmem:[%s8589_s11 + $0x74c] sm:$0xf] %v1113_v19 }
 0x152   : > { %1116 = vst [vmem:[%s8589_s11 + $0x750] sm:$0xf] %v1115_v20  ;;  %1118 = vst [vmem:[%s8589_s11 + $0x754] sm:$0xf] %v1117_v21  ;;  %v1119_v22 = vld [vmem:[%s8585_s10 + $0x1d60] sm:$0xf] }
 0x153   : > { %v1121_v23 = vld [vmem:[%s8585_s10 + $0x1d70] sm:$0xf]  ;;  %v1123_v24 = vld [vmem:[%s8585_s10 + $0x1d80] sm:$0xf]  ;;  %1120 = vst [vmem:[%s8589_s11 + $0x758] sm:$0xf] %v1119_v22 }
 0x154   : > { %1122 = vst [vmem:[%s8589_s11 + $0x75c] sm:$0xf] %v1121_v23  ;;  %1124 = vst [vmem:[%s8589_s11 + $0x760] sm:$0xf] %v1123_v24  ;;  %v1125_v25 = vld [vmem:[%s8585_s10 + $0x1d90] sm:$0xf] }
 0x155   : > { %v1127_v26 = vld [vmem:[%s8585_s10 + $0x1da0] sm:$0xf]  ;;  %v1129_v27 = vld [vmem:[%s8585_s10 + $0x1db0] sm:$0xf]  ;;  %1126 = vst [vmem:[%s8589_s11 + $0x764] sm:$0xf] %v1125_v25 }
 0x156   : > { %1128 = vst [vmem:[%s8589_s11 + $0x768] sm:$0xf] %v1127_v26  ;;  %1130 = vst [vmem:[%s8589_s11 + $0x76c] sm:$0xf] %v1129_v27  ;;  %v1131_v28 = vld [vmem:[%s8585_s10 + $0x1dc0] sm:$0xf] }
 0x157   : > { %v1133_v29 = vld [vmem:[%s8585_s10 + $0x1dd0] sm:$0xf]  ;;  %v1135_v30 = vld [vmem:[%s8585_s10 + $0x1de0] sm:$0xf]  ;;  %1132 = vst [vmem:[%s8589_s11 + $0x770] sm:$0xf] %v1131_v28 }
 0x158   : > { %1134 = vst [vmem:[%s8589_s11 + $0x774] sm:$0xf] %v1133_v29  ;;  %1136 = vst [vmem:[%s8589_s11 + $0x778] sm:$0xf] %v1135_v30  ;;  %v1137_v31 = vld [vmem:[%s8585_s10 + $0x1df0] sm:$0xf] }
 0x159   : > { %v1139_v32 = vld [vmem:[%s8585_s10 + $0x1e00] sm:$0xf]  ;;  %v1141_v33 = vld [vmem:[%s8585_s10 + $0x1e10] sm:$0xf]  ;;  %1138 = vst [vmem:[%s8589_s11 + $0x77c] sm:$0xf] %v1137_v31 }
 0x15a   : > { %1140 = vst [vmem:[%s8589_s11 + $0x780] sm:$0xf] %v1139_v32  ;;  %1142 = vst [vmem:[%s8589_s11 + $0x784] sm:$0xf] %v1141_v33  ;;  %v1143_v34 = vld [vmem:[%s8585_s10 + $0x1e20] sm:$0xf] }
 0x15b   : > { %v1145_v35 = vld [vmem:[%s8585_s10 + $0x1e30] sm:$0xf]  ;;  %v1147_v36 = vld [vmem:[%s8585_s10 + $0x1e40] sm:$0xf]  ;;  %1144 = vst [vmem:[%s8589_s11 + $0x788] sm:$0xf] %v1143_v34 }
 0x15c   : > { %1146 = vst [vmem:[%s8589_s11 + $0x78c] sm:$0xf] %v1145_v35  ;;  %1148 = vst [vmem:[%s8589_s11 + $0x790] sm:$0xf] %v1147_v36  ;;  %v1149_v37 = vld [vmem:[%s8585_s10 + $0x1e50] sm:$0xf] }
 0x15d   : > { %v1151_v38 = vld [vmem:[%s8585_s10 + $0x1e60] sm:$0xf]  ;;  %v1153_v39 = vld [vmem:[%s8585_s10 + $0x1e70] sm:$0xf]  ;;  %1150 = vst [vmem:[%s8589_s11 + $0x794] sm:$0xf] %v1149_v37 }
 0x15e   : > { %1152 = vst [vmem:[%s8589_s11 + $0x798] sm:$0xf] %v1151_v38  ;;  %1154 = vst [vmem:[%s8589_s11 + $0x79c] sm:$0xf] %v1153_v39  ;;  %v1155_v40 = vld [vmem:[%s8585_s10 + $0x1e80] sm:$0xf] }
 0x15f   : > { %v1157_v41 = vld [vmem:[%s8585_s10 + $0x1e90] sm:$0xf]  ;;  %v1159_v42 = vld [vmem:[%s8585_s10 + $0x1ea0] sm:$0xf]  ;;  %1156 = vst [vmem:[%s8589_s11 + $0x7a0] sm:$0xf] %v1155_v40 }
 0x160   : > { %1158 = vst [vmem:[%s8589_s11 + $0x7a4] sm:$0xf] %v1157_v41  ;;  %1160 = vst [vmem:[%s8589_s11 + $0x7a8] sm:$0xf] %v1159_v42  ;;  %v1161_v43 = vld [vmem:[%s8585_s10 + $0x1eb0] sm:$0xf] }
 0x161   : > { %v1163_v44 = vld [vmem:[%s8585_s10 + $0x1ec0] sm:$0xf]  ;;  %v1165_v45 = vld [vmem:[%s8585_s10 + $0x1ed0] sm:$0xf]  ;;  %1162 = vst [vmem:[%s8589_s11 + $0x7ac] sm:$0xf] %v1161_v43 }
 0x162   : > { %1164 = vst [vmem:[%s8589_s11 + $0x7b0] sm:$0xf] %v1163_v44  ;;  %1166 = vst [vmem:[%s8589_s11 + $0x7b4] sm:$0xf] %v1165_v45  ;;  %v1167_v46 = vld [vmem:[%s8585_s10 + $0x1ee0] sm:$0xf] }
 0x163   : > { %v1169_v47 = vld [vmem:[%s8585_s10 + $0x1ef0] sm:$0xf]  ;;  %v1171_v48 = vld [vmem:[%s8585_s10 + $0x1f00] sm:$0xf]  ;;  %1168 = vst [vmem:[%s8589_s11 + $0x7b8] sm:$0xf] %v1167_v46 }
 0x164   : > { %1170 = vst [vmem:[%s8589_s11 + $0x7bc] sm:$0xf] %v1169_v47  ;;  %1172 = vst [vmem:[%s8589_s11 + $0x7c0] sm:$0xf] %v1171_v48  ;;  %v1173_v49 = vld [vmem:[%s8585_s10 + $0x1f10] sm:$0xf] }
 0x165   : > { %v1175_v50 = vld [vmem:[%s8585_s10 + $0x1f20] sm:$0xf]  ;;  %v1177_v51 = vld [vmem:[%s8585_s10 + $0x1f30] sm:$0xf]  ;;  %1174 = vst [vmem:[%s8589_s11 + $0x7c4] sm:$0xf] %v1173_v49 }
 0x166   : > { %1176 = vst [vmem:[%s8589_s11 + $0x7c8] sm:$0xf] %v1175_v50  ;;  %1178 = vst [vmem:[%s8589_s11 + $0x7cc] sm:$0xf] %v1177_v51  ;;  %v1179_v52 = vld [vmem:[%s8585_s10 + $0x1f40] sm:$0xf] }
 0x167   : > { %v1181_v53 = vld [vmem:[%s8585_s10 + $0x1f50] sm:$0xf]  ;;  %v1183_v54 = vld [vmem:[%s8585_s10 + $0x1f60] sm:$0xf]  ;;  %1180 = vst [vmem:[%s8589_s11 + $0x7d0] sm:$0xf] %v1179_v52 }
 0x168   : > { %1182 = vst [vmem:[%s8589_s11 + $0x7d4] sm:$0xf] %v1181_v53  ;;  %1184 = vst [vmem:[%s8589_s11 + $0x7d8] sm:$0xf] %v1183_v54  ;;  %v1185_v55 = vld [vmem:[%s8585_s10 + $0x1f70] sm:$0xf] }
 0x169   : > { %v1187_v56 = vld [vmem:[%s8585_s10 + $0x1f80] sm:$0xf]  ;;  %v1189_v57 = vld [vmem:[%s8585_s10 + $0x1f90] sm:$0xf]  ;;  %1186 = vst [vmem:[%s8589_s11 + $0x7dc] sm:$0xf] %v1185_v55 }
 0x16a   : > { %1188 = vst [vmem:[%s8589_s11 + $0x7e0] sm:$0xf] %v1187_v56  ;;  %1190 = vst [vmem:[%s8589_s11 + $0x7e4] sm:$0xf] %v1189_v57  ;;  %v1191_v58 = vld [vmem:[%s8585_s10 + $0x1fa0] sm:$0xf] }
 0x16b   : > { %v1193_v59 = vld [vmem:[%s8585_s10 + $0x1fb0] sm:$0xf]  ;;  %v1195_v60 = vld [vmem:[%s8585_s10 + $0x1fc0] sm:$0xf]  ;;  %1192 = vst [vmem:[%s8589_s11 + $0x7e8] sm:$0xf] %v1191_v58 }
 0x16c   : > { %1194 = vst [vmem:[%s8589_s11 + $0x7ec] sm:$0xf] %v1193_v59  ;;  %1196 = vst [vmem:[%s8589_s11 + $0x7f0] sm:$0xf] %v1195_v60  ;;  %v1197_v61 = vld [vmem:[%s8585_s10 + $0x1fd0] sm:$0xf] }
 0x16d   : > { %v1199_v62 = vld [vmem:[%s8585_s10 + $0x1fe0] sm:$0xf]  ;;  %v1201_v63 = vld [vmem:[%s8585_s10 + $0x1ff0] sm:$0xf]  ;;  %1198 = vst [vmem:[%s8589_s11 + $0x7f4] sm:$0xf] %v1197_v61 }
 0x16e   : > { %1200 = vst [vmem:[%s8589_s11 + $0x7f8] sm:$0xf] %v1199_v62  ;;  %1202 = vst [vmem:[%s8589_s11 + $0x7fc] sm:$0xf] %v1201_v63 }
 0x16f PF: > { %p7425_p11 = scmp.ge.s32.totalorder %s8479_s20, 1  ;;  %p4333_p12 = scmp.lt.s32.totalorder %s8479_s20, 9 }
 0x171   : > { %p4334_p13 = pnand %p7425_p11, %p4333_p12 }
 0x172   : > { %s4340_s21 = sand.u32 (!%p4334_p13), 1, %s8455_s14   ;;  %s4367_s24 = sand.u32 (!%p4334_p13), 1, %s8447_s12  }
 0x173   : > { %4337 = sbr.rel (%p4334_p13) target bundleno = 857 (0x359), region = 80  ;;  %s7426_s25 = sshll.u32 (!%p4334_p13), %s4340_s21, 11 }
 0x174   : > { %s8058_s26 = smul.u32 (!%p4334_p13), 6, %s4367_s24  ;;  %p4370_p0 = scmp.lt.s32.totalorder (!%p4334_p13), %s8467_s17, 1 }
 0x175   : > { %p4375_p1 = scmp.lt.s32.totalorder (!%p4334_p13), %s8463_s16, 3  ;;  %s9631_s14 = scalar_lea.vmem (!%p4334_p13), [#allocation2], %s7426_s25 }
 0x176   : > { %s9633_s12 = scalar_lea.vmem (!%p4334_p13), [#allocation3], %s8058_s26  ;;  %s9635_s21 = smov (!%p4334_p13), 0  }
 0x178   : > { %s4371_s28 = scalar_select %p4370_p0, %s8467_s17, 1 }
 0x179   : > { %s4376_s29 = scalar_select %p4375_p1, %s8463_s16, 3 }
 0x17a   : > { %s8059_s5 = smul.u32 48, %s4371_s28 }
 0x17b   : > { %s4377_s8 = scalar_lea.vmem %s10005_s2, %s4376_s29 }
 0x17c   : > { %s9627_s11 = scalar_lea.vmem %s10003_s0, %s8059_s5  ;;  %v9629_v0 = vld [vmem:[%s4377_s8] ss:$0 sm:$0xff] }
 0x17d LB: >> { %v8141_v1 = vld [vmem:[%s9631_s14 + $0x78] sm:$0xff]   ;;  %v8145_v5 = vld [vmem:[%s9631_s14 + $0x70] sm:$0xff]   ;;  %v8149_v9 = vld [vmem:[%s9631_s14 + $0x68] sm:$0xff]   ;;  %s7705_s24 = sshll.u32 %s8483_s21, 3  ;;  %s7701_s26 = sshll.u32 %s8483_s21, 1  ;;  %vm7244_vm0 = vcmask 1041408   ;;  %s8483_s21 = sphi %s9635_s21, %s4385_s21  }
 0x17e   : >> { %v8142_v2 = vld [vmem:[%s9631_s14 + $0xf8] sm:$0xff]   ;;  %7706 = vmatprep.subr.bf16.mxu0 %v8141_v1  ;;  %v8146_v6 = vld [vmem:[%s9631_s14 + $0xf0] sm:$0xff]   ;;  %v8150_v10 = vld [vmem:[%s9631_s14 + $0xe8] sm:$0xff]   ;;  %s9672_s25 = scalar_lea.vmem %s9627_s11, %s7705_s24  ;;  %s7243_s28 = scalar_lea.vmem %s9633_s12, %s7701_s26 [#allocation3]  ;;  %vm7245_vm1 = vsmask.f32 1280 }
 0x17f   : >> { %v8143_v3 = vld [vmem:[%s9631_s14 + $0x38] sm:$0xff]   ;;  %7728 = vmatprep.subr.bf16.mxu1 %v8142_v2  ;;  %v8147_v7 = vld [vmem:[%s9631_s14 + $0x30] sm:$0xff]   ;;  %v8151_v11 = vld [vmem:[%s9631_s14 + $0x28] sm:$0xff]   ;;  %s4385_s21 = sadd.s32 1, %s8483_s21  }
 0x180   : >> { %v8144_v4 = vld [vmem:[%s9631_s14 + $0xb8] sm:$0xff]   ;;  %7707 = vmatpush3.bf16.msra.mxu0 %v8143_v3  ;;  %v8148_v8 = vld [vmem:[%s9631_s14 + $0xb0] sm:$0xff]   ;;  %v8152_v12 = vld [vmem:[%s9631_s14 + $0xa8] sm:$0xff]   ;;  %p4382_p2 = scmp.ge.s32.totalorder %s4385_s21, 3  }
 0x181   : >> { %7729 = vmatpush3.bf16.msra.mxu1 %v8144_v4  ;;  %7708 = vmatprep.subr.bf16.mxu0 %v8145_v5  ;;  %v8153_v13 = vld [vmem:[%s9631_s14 + $0x60] sm:$0xff]   ;;  %v8157_v17 = vld [vmem:[%s9631_s14 + $0x58] sm:$0xff]   ;;  %v8161_v21 = vld [vmem:[%s9631_s14 + $0x50] sm:$0xff]  }
 0x182   : >> { %7730 = vmatprep.subr.bf16.mxu1 %v8146_v6  ;;  %v8154_v14 = vld [vmem:[%s9631_s14 + $0xe0] sm:$0xff]   ;;  %v8158_v18 = vld [vmem:[%s9631_s14 + $0xd8] sm:$0xff]   ;;  %v8162_v22 = vld [vmem:[%s9631_s14 + $0xd0] sm:$0xff]  }
 0x183   : >> { %v8155_v15 = vld [vmem:[%s9631_s14 + $0x20] sm:$0xff]   ;;  %v8159_v19 = vld [vmem:[%s9631_s14 + $0x18] sm:$0xff]   ;;  %v8163_v23 = vld [vmem:[%s9631_s14 + $0x10] sm:$0xff]  }
 0x184   : >> { %7709 = vmatpush3.bf16.msra.mxu0 %v8147_v7  ;;  %v8156_v16 = vld [vmem:[%s9631_s14 + $0xa0] sm:$0xff]   ;;  %v8160_v20 = vld [vmem:[%s9631_s14 + $0x98] sm:$0xff]   ;;  %v8164_v24 = vld [vmem:[%s9631_s14 + $0x90] sm:$0xff]  }
 0x185   : >> { %7731 = vmatpush3.bf16.msra.mxu1 %v8148_v8  ;;  %7710 = vmatprep.subr.bf16.mxu0 %v8149_v9  ;;  %v8165_v25 = vld [vmem:[%s9631_s14 + $0x48] sm:$0xff]   ;;  %v8169_v29 = vld [vmem:[%s9631_s14 + $0x40] sm:$0xff]   ;;  %v8175_v36 = vld [vmem:[%s9631_s14 + $0x178] sm:$0xff]  }
 0x186   : >> { %7732 = vmatprep.subr.bf16.mxu1 %v8150_v10  ;;  %v8166_v26 = vld [vmem:[%s9631_s14 + $0xc8] sm:$0xff]   ;;  %v8170_v30 = vld [vmem:[%s9631_s14 + $0xc0] sm:$0xff]   ;;  %v8176_v37 = vld [vmem:[%s9631_s14 + $0x1f8] sm:$0xff]  }
 0x187   : >> { %v8167_v27 = vld [vmem:[%s9631_s14 + $0x8] sm:$0xff]   ;;  %v8171_v31 = vld [vmem:[%s9631_s14] sm:$0xff]   ;;  %v8177_v42 = vld [vmem:[%s9631_s14 + $0x138] sm:$0xff]  }
 0x188   : >> { %7711 = vmatpush3.bf16.msra.mxu0 %v8151_v11  ;;  %v8168_v28 = vld [vmem:[%s9631_s14 + $0x88] sm:$0xff]   ;;  %v8172_v32 = vld [vmem:[%s9631_s14 + $0x80] sm:$0xff]   ;;  %v8178_v46 = vld [vmem:[%s9631_s14 + $0x1b8] sm:$0xff]  }
 0x189   : >> { %7733 = vmatpush3.bf16.msra.mxu1 %v8152_v12  ;;  %7712 = vmatprep.subr.bf16.mxu0 %v8153_v13  ;;  %v4389_v33 = vld [vmem:[%s9672_s25] sm:$0x77]  ;;  %v8179_v47 = vld [vmem:[%s9631_s14 + $0x170] sm:$0xff]   ;;  %v8183_v56 = vld [vmem:[%s9631_s14 + $0x168] sm:$0xff]  }
 0x18a   : >> { %7734 = vmatprep.subr.bf16.mxu1 %v8154_v14  ;;  %v7437_v34 = vcombine.high %v4389_v33, %v4389_v33  ;;  %v9677_v35 = vcombine.low %v4389_v33, %v4389_v33  ;;  %v8180_v51 = vld [vmem:[%s9631_s14 + $0x1f0] sm:$0xff]   ;;  %v8184_v57 = vld [vmem:[%s9631_s14 + $0x1e8] sm:$0xff]   ;;  %v8187_v60 = vld [vmem:[%s9631_s14 + $0x160] sm:$0xff]  }
 0x18b   : >> { %v8181_v53 = vld [vmem:[%s9631_s14 + $0x130] sm:$0xff]   ;;  %v8185_v58 = vld [vmem:[%s9631_s14 + $0x128] sm:$0xff]   ;;  %v8188_v61 = vld [vmem:[%s9631_s14 + $0x1e0] sm:$0xff]  }
 0x18c   : >> { %7713 = vmatpush3.bf16.msra.mxu0 %v8155_v15  ;;  %6631 = vmatprep.mubr.bf16.mxu0 %v7437_v34  ;;  %v4420_v38 = vshrl.u32 %v7437_v34, 16  ;;  %v4422_v39 = vshll.u32 %v7437_v34, 16  ;;  %v4413_v40 = vshrl.u32 %v9677_v35, 16  ;;  %v4415_v41 = vshll.u32 %v9677_v35, 16  ;;  %v8182_v54 = vld [vmem:[%s9631_s14 + $0x1b0] sm:$0xff]   ;;  %v8186_v59 = vld [vmem:[%s9631_s14 + $0x1a8] sm:$0xff]   ;;  %vm7246_vm2 = vmand %vm7244_vm0, %vm7245_vm1 }
 0x18d   : >> { %7735 = vmatpush3.bf16.msra.mxu1 %v8156_v16  ;;  %7714 = vmatprep.subr.bf16.mxu0 %v8157_v17  ;;  %v4429_v48 = vrot.slane %v7437_v34, 1  ;;  %v8189_v62 = vld [vmem:[%s9631_s14 + $0x120] sm:$0xff]   ;;  %v8191_v1 = vld [vmem:[%s9631_s14 + $0x158] sm:$0xff]   ;;  %v8195_v5 = vld [vmem:[%s9631_s14 + $0x150] sm:$0xff]  }
 0x18e   : >> { %7736 = vmatprep.subr.bf16.mxu1 %v8158_v18  ;;  %v4424_v43 = vrot.slane %v4422_v39, 1  ;;  %v4435_v44 = vrot.slane %v4420_v38, 1  ;;  %v4417_v45 = vrot.slane %v4415_v41, 1  ;;  %v4436_v52 = vrot.slane %v4422_v39, 2  ;;  %v8190_v63 = vld [vmem:[%s9631_s14 + $0x1a0] sm:$0xff]   ;;  %v8192_v2 = vld [vmem:[%s9631_s14 + $0x1d8] sm:$0xff]  }
 0x18f   : >> { %v8193_v3 = vld [vmem:[%s9631_s14 + $0x118] sm:$0xff]   ;;  %v8196_v6 = vld [vmem:[%s9631_s14 + $0x1d0] sm:$0xff]   ;;  %v8199_v9 = vld [vmem:[%s9631_s14 + $0x148] sm:$0xff]   ;;  %v4432_v15 = vrot.slane %v4413_v40, 1  ;;  %v4428_v18 = vrot.slane %v9677_v35, 1 }
 0x190   : >> { %7715 = vmatpush3.bf16.msra.mxu0 %v8159_v19  ;;  %v4425_v49 = vor.u32 %v4424_v43, %v4420_v38  ;;  %v4418_v50 = vor.u32 %v4417_v45, %v4413_v40  ;;  %v4437_v55 = vor.u32 %v4436_v52, %v4435_v44  ;;  %v8194_v4 = vld [vmem:[%s9631_s14 + $0x198] sm:$0xff]   ;;  %v8197_v7 = vld [vmem:[%s9631_s14 + $0x110] sm:$0xff]   ;;  %v8200_v10 = vld [vmem:[%s9631_s14 + $0x1c8] sm:$0xff]   ;;  %v4433_v19 = vrot.slane %v4415_v41, 2 }
 0x191   : >> { %7737 = vmatpush3.bf16.msra.mxu1 %v8160_v20  ;;  %7716 = vmatprep.subr.bf16.mxu0 %v8161_v21  ;;  %v8198_v8 = vld [vmem:[%s9631_s14 + $0x190] sm:$0xff]   ;;  %v8201_v11 = vld [vmem:[%s9631_s14 + $0x108] sm:$0xff]   ;;  %v8203_v13 = vld [vmem:[%s9631_s14 + $0x140] sm:$0xff]  }
 0x192   : >> { %7738 = vmatprep.subr.bf16.mxu1 %v8162_v22  ;;  %6671 = vmatprep.mubr.bf16.mxu1 %v4425_v49  ;;  %v8202_v12 = vld [vmem:[%s9631_s14 + $0x188] sm:$0xff]   ;;  %v8204_v14 = vld [vmem:[%s9631_s14 + $0x1c0] sm:$0xff]   ;;  %v8207_v20 = vld [vmem:[%s9631_s14 + $0x278] sm:$0xff]  }
 0x193   : >> { %v8205_v16 = vld [vmem:[%s9631_s14 + $0x100] sm:$0xff]   ;;  %v8208_v21 = vld [vmem:[%s9631_s14 + $0x2f8] sm:$0xff]   ;;  %v8227_v41 = vld [vmem:[%s9631_s14 + $0x250] sm:$0xff]  }
 0x194   : >> { %7717 = vmatpush3.bf16.msra.mxu0 %v8163_v23  ;;  %v8206_v17 = vld [vmem:[%s9631_s14 + $0x180] sm:$0xff]   ;;  %v8209_v22 = vld [vmem:[%s9631_s14 + $0x238] sm:$0xff]   ;;  %v8229_v43 = vld [vmem:[%s9631_s14 + $0x210] sm:$0xff]  }
 0x195   : >> { %7739 = vmatpush3.bf16.msra.mxu1 %v8164_v24  ;;  %7718 = vmatprep.subr.bf16.mxu0 %v8165_v25  ;;  %v8210_v23 = vld [vmem:[%s9631_s14 + $0x2b8] sm:$0xff]   ;;  %v4434_v24 = vor.u32 %v4433_v19, %v4432_v15  ;;  %v8211_v25 = vld [vmem:[%s9631_s14 + $0x270] sm:$0xff]   ;;  %v8219_v33 = vld [vmem:[%s9631_s14 + $0x260] sm:$0xff]  }
 0x196   : >> { %7740 = vmatprep.subr.bf16.mxu1 %v8166_v26  ;;  %v8212_v26 = vld [vmem:[%s9631_s14 + $0x2f0] sm:$0xff]   ;;  %v8220_v34 = vld [vmem:[%s9631_s14 + $0x2e0] sm:$0xff]   ;;  %v8224_v38 = vld [vmem:[%s9631_s14 + $0x2d8] sm:$0xff]  }
 0x197   : >> { %v8225_v39 = vld [vmem:[%s9631_s14 + $0x218] sm:$0xff]   ;;  %v8230_v44 = vld [vmem:[%s9631_s14 + $0x290] sm:$0xff]   ;;  %v8231_v45 = vld [vmem:[%s9631_s14 + $0x248] sm:$0xff]  }
 0x198   : >> { %7719 = vmatpush3.bf16.msra.mxu0 %v8167_v27  ;;  %v8213_v27 = vld [vmem:[%s9631_s14 + $0x230] sm:$0xff]   ;;  %v8226_v40 = vld [vmem:[%s9631_s14 + $0x298] sm:$0xff]   ;;  %v8235_v49 = vld [vmem:[%s9631_s14 + $0x240] sm:$0xff]  }
 0x199   : >> { %7741 = vmatpush3.bf16.msra.mxu1 %v8168_v28  ;;  %7720 = vmatprep.subr.bf16.mxu0 %v8169_v29  ;;  %v8214_v28 = vld [vmem:[%s9631_s14 + $0x2b0] sm:$0xff]   ;;  %v8215_v29 = vld [vmem:[%s9631_s14 + $0x268] sm:$0xff]   ;;  %v8238_v52 = vld [vmem:[%s9631_s14 + $0x280] sm:$0xff]  }
 0x19a   : >> { %7742 = vmatprep.subr.bf16.mxu1 %v8170_v30  ;;  %v8216_v30 = vld [vmem:[%s9631_s14 + $0x2e8] sm:$0xff]   ;;  %v8255_v19 = vld [vmem:[%s9631_s14 + $0x320] sm:$0xff]  }
 0x19b   : >> { %v8251_v15 = vld [vmem:[%s9631_s14 + $0x328] sm:$0xff]  }
 0x19c   : >> { %7721 = vmatpush3.bf16.msra.mxu0 %v8171_v31  ;;  %v8217_v31 = vld [vmem:[%s9631_s14 + $0x228] sm:$0xff]  }
 0x19d   : >> { %7743 = vmatpush3.bf16.msra.mxu1 %v8172_v32  ;;  %7750 = vmatprep.subr.bf16.mxu0 %v8175_v36  ;;  %v8218_v32 = vld [vmem:[%s9631_s14 + $0x2a8] sm:$0xff]   ;;  %v8222_v36 = vld [vmem:[%s9631_s14 + $0x2a0] sm:$0xff]  }
 0x19e   : >> { %7772 = vmatprep.subr.bf16.mxu1 %v8176_v37  ;;  %v8223_v37 = vld [vmem:[%s9631_s14 + $0x258] sm:$0xff]  }
 0x19f   : >> { %6632 = vmatmul.mubr.bf16.vlgmr.msra.gmra.mxu0 %v9677_v35  ;;  %v8221_v35 = vld [vmem:[%s9631_s14 + $0x220] sm:$0xff]  }
 0x1a0   : >> { %7751 = vmatpush3.bf16.msra.mxu0 %v8177_v42  ;;  %6711 = vmatprep.mubr.bf16.mxu0 %v4429_v48  ;;  %v8228_v42 = vld [vmem:[%s9631_s14 + $0x2d0] sm:$0xff]   ;;  %v8234_v48 = vld [vmem:[%s9631_s14 + $0x288] sm:$0xff]  }
 0x1a1   : >> { %7752 = vmatprep.subr.bf16.mxu0 %v8179_v47  ;;  %6672 = vmatmul.mubr.bf16.vlgmr.msra.gmra.mxu1 %v4418_v50  ;;  %v8233_v47 = vld [vmem:[%s9631_s14 + $0x208] sm:$0xff]   ;;  %v8236_v50 = vld [vmem:[%s9631_s14 + $0x2c0] sm:$0xff]  }
 0x1a2   : >> { %7773 = vmatpush3.bf16.msra.mxu1 %v8178_v46  ;;  %6751 = vmatprep.mubr.bf16.mxu1 %v4437_v55  ;;  %v8232_v46 = vld [vmem:[%s9631_s14 + $0x2c8] sm:$0xff]  }
 0x1a3   : >> { %7774 = vmatprep.subr.bf16.mxu1 %v8180_v51  ;;  %v8237_v51 = vld [vmem:[%s9631_s14 + $0x200] sm:$0xff]  }
 0x1a4   : >> { %7753 = vmatpush3.bf16.msra.mxu0 %v8181_v53  ;;  %v7431_v53 = vld [vmem:[%s9672_s25 + $0x8] sm:$0x77] }
 0x1a5   : >> { %7754 = vmatprep.subr.bf16.mxu0 %v8183_v56  ;;  %v9756_v55 = vcombine.low %v7431_v53, %v7431_v53  ;;  %v8241_v56 = vld [vmem:[%s9631_s14 + $0x378] sm:$0xff]  }
 0x1a6   : >> { %7775 = vmatpush3.bf16.msra.mxu1 %v8182_v54  ;;  %v7439_v54 = vcombine.high %v7431_v53, %v7431_v53  ;;  %v8285_v53 = vld [vmem:[%s9631_s14 + $0x460] sm:$0xff]  }
 0x1a7   : >> { %7776 = vmatprep.subr.bf16.mxu1 %v8184_v57  ;;  %v8242_v57 = vld [vmem:[%s9631_s14 + $0x3f8] sm:$0xff]  }
 0x1a8   : >> { %7755 = vmatpush3.bf16.msra.mxu0 %v8185_v58  ;;  %v4455_v58 = vshrl.u32 %v7439_v54, 16 }
 0x1a9   : >> { %7756 = vmatprep.subr.bf16.mxu0 %v8187_v60  ;;  %v4448_v60 = vshrl.u32 %v9756_v55, 16 }
 0x1aa   : >> { %7777 = vmatpush3.bf16.msra.mxu1 %v8186_v59  ;;  %v4457_v59 = vshll.u32 %v7439_v54, 16 }
 0x1ab   : >> { %7778 = vmatprep.subr.bf16.mxu1 %v8188_v61  ;;  %v4450_v61 = vshll.u32 %v9756_v55, 16 }
 0x1ac   : >> { %7757 = vmatpush3.bf16.msra.mxu0 %v8189_v62  ;;  %v8243_v62 = vld [vmem:[%s9631_s14 + $0x338] sm:$0xff]  }
 0x1ad   : >> { %7758 = vmatprep.subr.bf16.mxu0 %v8191_v1  ;;  %v4459_v1 = vrot.slane %v4457_v59, 1 }
 0x1ae   : >> { %7779 = vmatpush3.bf16.msra.mxu1 %v8190_v63  ;;  %v4464_v63 = vrot.slane %v7439_v54, 1 }
 0x1af   : >> { %7780 = vmatprep.subr.bf16.mxu1 %v8192_v2  ;;  %v4452_v2 = vrot.slane %v4450_v61, 1 }
 0x1b0   : >> { %7759 = vmatpush3.bf16.msra.mxu0 %v8193_v3  ;;  %v8244_v3 = vld [vmem:[%s9631_s14 + $0x3b8] sm:$0xff]  }
 0x1b1   : >> { %7760 = vmatprep.subr.bf16.mxu0 %v8195_v5  ;;  %v4460_v5 = vor.u32 %v4459_v1, %v4455_v58  ;;  %v8296_v1 = vld [vmem:[%s9631_s14 + $0x490] sm:$0xff]  }
 0x1b2   : >> { %7781 = vmatpush3.bf16.msra.mxu1 %v8194_v4  ;;  %v8245_v4 = vld [vmem:[%s9631_s14 + $0x370] sm:$0xff]  }
 0x1b3   : >> { %7782 = vmatprep.subr.bf16.mxu1 %v8196_v6  ;;  %v4453_v6 = vor.u32 %v4452_v2, %v4448_v60  ;;  %v8297_v2 = vld [vmem:[%s9631_s14 + $0x448] sm:$0xff]  }
 0x1b4   : >> { %7761 = vmatpush3.bf16.msra.mxu0 %v8197_v7  ;;  %v8246_v7 = vld [vmem:[%s9631_s14 + $0x3f0] sm:$0xff]  }
 0x1b5   : >> { %7762 = vmatprep.subr.bf16.mxu0 %v8199_v9  ;;  %v8247_v9 = vld [vmem:[%s9631_s14 + $0x330] sm:$0xff]  }
 0x1b6   : >> { %7783 = vmatpush3.bf16.msra.mxu1 %v8198_v8  ;;  %v4470_v8 = vrot.slane %v4455_v58, 1  ;;  %v8290_v58 = vld [vmem:[%s9631_s14 + $0x4d8] sm:$0xff]  }
 0x1b7   : >> { %7784 = vmatprep.subr.bf16.mxu1 %v8200_v10  ;;  %v4471_v10 = vrot.slane %v4457_v59, 2  ;;  %v8291_v59 = vld [vmem:[%s9631_s14 + $0x418] sm:$0xff]  }
 0x1b8   : >> { %7763 = vmatpush3.bf16.msra.mxu0 %v8201_v11  ;;  %v8248_v11 = vld [vmem:[%s9631_s14 + $0x3b0] sm:$0xff]  }
 0x1b9   : >> { %7764 = vmatprep.subr.bf16.mxu0 %v8203_v13  ;;  %v4472_v13 = vor.u32 %v4471_v10, %v4470_v8  ;;  %v8303_v8 = vld [vmem:[%s9631_s14 + $0x400] sm:$0xff]   ;;  %v7433_v10 = vld [vmem:[%s9672_s25 + $0x10] sm:$0x77] }
 0x1ba   : >> { %7785 = vmatpush3.bf16.msra.mxu1 %v8202_v12  ;;  %v8249_v12 = vld [vmem:[%s9631_s14 + $0x368] sm:$0xff]  }
 0x1bb   : >> { %7786 = vmatprep.subr.bf16.mxu1 %v8204_v14  ;;  %v8250_v14 = vld [vmem:[%s9631_s14 + $0x3e8] sm:$0xff]  }
 0x1bc   : >> { %7765 = vmatpush3.bf16.msra.mxu0 %v8205_v16  ;;  %v8252_v16 = vld [vmem:[%s9631_s14 + $0x3a8] sm:$0xff]  }
 0x1bd   : >> { %7794 = vmatprep.subr.bf16.mxu0 %v8207_v20  ;;  %v8256_v20 = vld [vmem:[%s9631_s14 + $0x3a0] sm:$0xff]  }
 0x1be   : >> { %7787 = vmatpush3.bf16.msra.mxu1 %v8206_v17  ;;  %v8253_v17 = vld [vmem:[%s9631_s14 + $0x360] sm:$0xff]  }
 0x1bf   : >> { %6712 = vmatmul.mubr.bf16.vlgmr.msra.gmra.mxu0 %v4428_v18  ;;  %7816 = vmatprep.subr.bf16.mxu1 %v8208_v21  ;;  %v8254_v18 = vld [vmem:[%s9631_s14 + $0x3e0] sm:$0xff]   ;;  %v8257_v21 = vld [vmem:[%s9631_s14 + $0x358] sm:$0xff]  }
 0x1c0   : >> { %7795 = vmatpush3.bf16.msra.mxu0 %v8209_v22  ;;  %6791 = vmatprep.mubr.bf16.mxu0 %v7439_v54  ;;  %v8258_v22 = vld [vmem:[%s9631_s14 + $0x3d8] sm:$0xff]   ;;  %v8286_v54 = vld [vmem:[%s9631_s14 + $0x4e0] sm:$0xff]  }
 0x1c1   : >> { %7796 = vmatprep.subr.bf16.mxu0 %v8211_v25  ;;  %6752 = vmatmul.mubr.bf16.vlgmr.msra.gmra.mxu1 %v4434_v24  ;;  %v8260_v24 = vld [vmem:[%s9631_s14 + $0x398] sm:$0xff]   ;;  %v8261_v25 = vld [vmem:[%s9631_s14 + $0x350] sm:$0xff]  }
 0x1c2   : >> { %7817 = vmatpush3.bf16.msra.mxu1 %v8210_v23  ;;  %6831 = vmatprep.mubr.bf16.mxu1 %v4460_v5  ;;  %v8259_v23 = vld [vmem:[%s9631_s14 + $0x318] sm:$0xff]   ;;  %v8300_v5 = vld [vmem:[%s9631_s14 + $0x488] sm:$0xff]  }
 0x1c3   : >> { %7818 = vmatprep.subr.bf16.mxu1 %v8212_v26  ;;  %v8262_v26 = vld [vmem:[%s9631_s14 + $0x3d0] sm:$0xff]  }
 0x1c4   : >> { %7797 = vmatpush3.bf16.msra.mxu0 %v8213_v27  ;;  %v8263_v27 = vld [vmem:[%s9631_s14 + $0x310] sm:$0xff]  }
 0x1c5   : >> { %7798 = vmatprep.subr.bf16.mxu0 %v8215_v29  ;;  %v8265_v29 = vld [vmem:[%s9631_s14 + $0x348] sm:$0xff]  }
 0x1c6   : >> { %7819 = vmatpush3.bf16.msra.mxu1 %v8214_v28  ;;  %v8264_v28 = vld [vmem:[%s9631_s14 + $0x390] sm:$0xff]  }
 0x1c7   : >> { %7820 = vmatprep.subr.bf16.mxu1 %v8216_v30  ;;  %v8266_v30 = vld [vmem:[%s9631_s14 + $0x3c8] sm:$0xff]  }
 0x1c8   : >> { %7799 = vmatpush3.bf16.msra.mxu0 %v8217_v31  ;;  %v8267_v31 = vld [vmem:[%s9631_s14 + $0x308] sm:$0xff]  }
 0x1c9   : >> { %7800 = vmatprep.subr.bf16.mxu0 %v8219_v33  ;;  %v8269_v33 = vld [vmem:[%s9631_s14 + $0x340] sm:$0xff]  }
 0x1ca   : >> { %7821 = vmatpush3.bf16.msra.mxu1 %v8218_v32  ;;  %v8268_v32 = vld [vmem:[%s9631_s14 + $0x388] sm:$0xff]  }
 0x1cb   : >> { %7822 = vmatprep.subr.bf16.mxu1 %v8220_v34  ;;  %v8270_v34 = vld [vmem:[%s9631_s14 + $0x3c0] sm:$0xff]  }
 0x1cc   : >> { %7801 = vmatpush3.bf16.msra.mxu0 %v8221_v35  ;;  %v8271_v35 = vld [vmem:[%s9631_s14 + $0x300] sm:$0xff]  }
 0x1cd   : >> { %7802 = vmatprep.subr.bf16.mxu0 %v8223_v37  ;;  %v8272_v37 = vld [vmem:[%s9631_s14 + $0x380] sm:$0xff]  }
 0x1ce   : >> { %7823 = vmatpush3.bf16.msra.mxu1 %v8222_v36  ;;  %v4463_v36 = vrot.slane %v9756_v55, 1 }
 0x1cf   : >> { %7824 = vmatprep.subr.bf16.mxu1 %v8224_v38  ;;  %v4467_v38 = vrot.slane %v4448_v60, 1  ;;  %v8292_v60 = vld [vmem:[%s9631_s14 + $0x498] sm:$0xff]  }
 0x1d0   : >> { %7803 = vmatpush3.bf16.msra.mxu0 %v8225_v39  ;;  %v4468_v39 = vrot.slane %v4450_v61, 2  ;;  %v8293_v61 = vld [vmem:[%s9631_s14 + $0x450] sm:$0xff]  }
 0x1d1   : >> { %7804 = vmatprep.subr.bf16.mxu0 %v8227_v41  ;;  %v8274_v41 = vld [vmem:[%s9631_s14 + $0x4f8] sm:$0xff]  }
 0x1d2   : >> { %7825 = vmatpush3.bf16.msra.mxu1 %v8226_v40  ;;  %v8273_v40 = vld [vmem:[%s9631_s14 + $0x478] sm:$0xff]  }
 0x1d3   : >> { %7826 = vmatprep.subr.bf16.mxu1 %v8228_v42  ;;  %v8275_v42 = vld [vmem:[%s9631_s14 + $0x438] sm:$0xff]  }
 0x1d4   : >> { %7805 = vmatpush3.bf16.msra.mxu0 %v8229_v43  ;;  %v8276_v43 = vld [vmem:[%s9631_s14 + $0x4b8] sm:$0xff]  }
 0x1d5   : >> { %7806 = vmatprep.subr.bf16.mxu0 %v8231_v45  ;;  %v8277_v45 = vld [vmem:[%s9631_s14 + $0x470] sm:$0xff]  }
 0x1d6   : >> { %7827 = vmatpush3.bf16.msra.mxu1 %v8230_v44  ;;  %v4469_v44 = vor.u32 %v4468_v39, %v4467_v38  ;;  %v8320_v38 = vld [vmem:[%s9631_s14 + $0x5e0] sm:$0xff]  }
 0x1d7   : >> { %7828 = vmatprep.subr.bf16.mxu1 %v8232_v46  ;;  %v8278_v46 = vld [vmem:[%s9631_s14 + $0x4f0] sm:$0xff]   ;;  %v8321_v39 = vld [vmem:[%s9631_s14 + $0x520] sm:$0xff]  }
 0x1d8   : >> { %7807 = vmatpush3.bf16.msra.mxu0 %v8233_v47  ;;  %v8279_v47 = vld [vmem:[%s9631_s14 + $0x430] sm:$0xff]  }
 0x1d9   : >> { %7808 = vmatprep.subr.bf16.mxu0 %v8235_v49  ;;  %v8281_v49 = vld [vmem:[%s9631_s14 + $0x468] sm:$0xff]  }
 0x1da   : >> { %7829 = vmatpush3.bf16.msra.mxu1 %v8234_v48  ;;  %v8280_v48 = vld [vmem:[%s9631_s14 + $0x4b0] sm:$0xff]  }
 0x1db   : >> { %7830 = vmatprep.subr.bf16.mxu1 %v8236_v50  ;;  %v8282_v50 = vld [vmem:[%s9631_s14 + $0x4e8] sm:$0xff]  }
 0x1dc   : >> { %7809 = vmatpush3.bf16.msra.mxu0 %v8237_v51  ;;  %v8283_v51 = vld [vmem:[%s9631_s14 + $0x428] sm:$0xff]  }
 0x1dd   : >> { %7838 = vmatprep.subr.bf16.mxu0 %v8241_v56  ;;  %v8288_v56 = vld [vmem:[%s9631_s14 + $0x4a0] sm:$0xff]  }
 0x1de   : >> { %7831 = vmatpush3.bf16.msra.mxu1 %v8238_v52  ;;  %v8284_v52 = vld [vmem:[%s9631_s14 + $0x4a8] sm:$0xff]  }
 0x1df   : >> { %6792 = vmatmul.mubr.bf16.vlgmr.msra.gmra.mxu0 %v9756_v55  ;;  %7860 = vmatprep.subr.bf16.mxu1 %v8242_v57  ;;  %v8287_v55 = vld [vmem:[%s9631_s14 + $0x420] sm:$0xff]   ;;  %v8289_v57 = vld [vmem:[%s9631_s14 + $0x458] sm:$0xff]  }
 0x1e0   : >> { %7839 = vmatpush3.bf16.msra.mxu0 %v8243_v62  ;;  %6871 = vmatprep.mubr.bf16.mxu0 %v4464_v63  ;;  %v8294_v62 = vld [vmem:[%s9631_s14 + $0x4d0] sm:$0xff]  }
 0x1e1   : >> { %7840 = vmatprep.subr.bf16.mxu0 %v8245_v4  ;;  %6832 = vmatmul.mubr.bf16.vlgmr.msra.gmra.mxu1 %v4453_v6  ;;  %v8295_v63 = vld [vmem:[%s9631_s14 + $0x410] sm:$0xff]   ;;  %v8299_v4 = vld [vmem:[%s9631_s14 + $0x408] sm:$0xff]   ;;  %v8301_v6 = vld [vmem:[%s9631_s14 + $0x440] sm:$0xff]  }
 0x1e2   : >> { %7861 = vmatpush3.bf16.msra.mxu1 %v8244_v3  ;;  %6911 = vmatprep.mubr.bf16.mxu1 %v4472_v13  ;;  %v8298_v3 = vld [vmem:[%s9631_s14 + $0x4c8] sm:$0xff]   ;;  %v8307_v13 = vld [vmem:[%s9631_s14 + $0x578] sm:$0xff]  }
 0x1e3   : >> { %7862 = vmatprep.subr.bf16.mxu1 %v8246_v7  ;;  %v8302_v7 = vld [vmem:[%s9631_s14 + $0x4c0] sm:$0xff]  }
 0x1e4   : >> { %7841 = vmatpush3.bf16.msra.mxu0 %v8247_v9  ;;  %v8304_v9 = vld [vmem:[%s9631_s14 + $0x480] sm:$0xff]  }
 0x1e5   : >> { %7842 = vmatprep.subr.bf16.mxu0 %v8249_v12  ;;  %v9835_v12 = vcombine.low %v7433_v10, %v7433_v10 }
 0x1e6   : >> { %7863 = vmatpush3.bf16.msra.mxu1 %v8248_v11  ;;  %v7441_v11 = vcombine.high %v7433_v10, %v7433_v10  ;;  %v8351_v10 = vld [vmem:[%s9631_s14 + $0x660] sm:$0xff]  }
 0x1e7   : >> { %7864 = vmatprep.subr.bf16.mxu1 %v8250_v14  ;;  %v8308_v14 = vld [vmem:[%s9631_s14 + $0x5f8] sm:$0xff]  }
 0x1e8   : >> { %7843 = vmatpush3.bf16.msra.mxu0 %v8251_v15  ;;  %v4490_v15 = vshrl.u32 %v7441_v11, 16 }
 0x1e9   : >> { %7844 = vmatprep.subr.bf16.mxu0 %v8253_v17  ;;  %v4483_v17 = vshrl.u32 %v9835_v12, 16 }
 0x1ea   : >> { %7865 = vmatpush3.bf16.msra.mxu1 %v8252_v16  ;;  %v4492_v16 = vshll.u32 %v7441_v11, 16 }
 0x1eb   : >> { %7866 = vmatprep.subr.bf16.mxu1 %v8254_v18  ;;  %v4485_v18 = vshll.u32 %v9835_v12, 16 }
 0x1ec   : >> { %7845 = vmatpush3.bf16.msra.mxu0 %v8255_v19  ;;  %v8309_v19 = vld [vmem:[%s9631_s14 + $0x538] sm:$0xff]  }
 0x1ed   : >> { %7846 = vmatprep.subr.bf16.mxu0 %v8257_v21  ;;  %v4494_v21 = vrot.slane %v4492_v16, 1 }
 0x1ee   : >> { %7867 = vmatpush3.bf16.msra.mxu1 %v8256_v20  ;;  %v4499_v20 = vrot.slane %v7441_v11, 1 }
 0x1ef   : >> { %7868 = vmatprep.subr.bf16.mxu1 %v8258_v22  ;;  %v4487_v22 = vrot.slane %v4485_v18, 1 }
 0x1f0   : >> { %7847 = vmatpush3.bf16.msra.mxu0 %v8259_v23  ;;  %v8310_v23 = vld [vmem:[%s9631_s14 + $0x5b8] sm:$0xff]  }
 0x1f1   : >> { %7848 = vmatprep.subr.bf16.mxu0 %v8261_v25  ;;  %v4495_v25 = vor.u32 %v4494_v21, %v4490_v15  ;;  %v8362_v21 = vld [vmem:[%s9631_s14 + $0x690] sm:$0xff]  }
 0x1f2   : >> { %7869 = vmatpush3.bf16.msra.mxu1 %v8260_v24  ;;  %v8311_v24 = vld [vmem:[%s9631_s14 + $0x570] sm:$0xff]  }
 0x1f3   : >> { %7870 = vmatprep.subr.bf16.mxu1 %v8262_v26  ;;  %v4488_v26 = vor.u32 %v4487_v22, %v4483_v17  ;;  %v8363_v22 = vld [vmem:[%s9631_s14 + $0x648] sm:$0xff]  }
 0x1f4   : >> { %7849 = vmatpush3.bf16.msra.mxu0 %v8263_v27  ;;  %v8312_v27 = vld [vmem:[%s9631_s14 + $0x5f0] sm:$0xff]  }
 0x1f5   : >> { %7850 = vmatprep.subr.bf16.mxu0 %v8265_v29  ;;  %v8313_v29 = vld [vmem:[%s9631_s14 + $0x530] sm:$0xff]  }
 0x1f6   : >> { %7871 = vmatpush3.bf16.msra.mxu1 %v8264_v28  ;;  %v4505_v28 = vrot.slane %v4490_v15, 1  ;;  %v8356_v15 = vld [vmem:[%s9631_s14 + $0x6d8] sm:$0xff]  }
 0x1f7   : >> { %7872 = vmatprep.subr.bf16.mxu1 %v8266_v30  ;;  %v4506_v30 = vrot.slane %v4492_v16, 2  ;;  %v8357_v16 = vld [vmem:[%s9631_s14 + $0x618] sm:$0xff]  }
 0x1f8   : >> { %7851 = vmatpush3.bf16.msra.mxu0 %v8267_v31  ;;  %v8314_v31 = vld [vmem:[%s9631_s14 + $0x5b0] sm:$0xff]  }
 0x1f9   : >> { %7852 = vmatprep.subr.bf16.mxu0 %v8269_v33  ;;  %v4507_v33 = vor.u32 %v4506_v30, %v4505_v28  ;;  %v8369_v28 = vld [vmem:[%s9631_s14 + $0x600] sm:$0xff]   ;;  %v7435_v30 = vld [vmem:[%s9672_s25 + $0x18] sm:$0x77] }
 0x1fa   : >> { %7873 = vmatpush3.bf16.msra.mxu1 %v8268_v32  ;;  %v8315_v32 = vld [vmem:[%s9631_s14 + $0x568] sm:$0xff]  }
 0x1fb   : >> { %7874 = vmatprep.subr.bf16.mxu1 %v8270_v34  ;;  %v8316_v34 = vld [vmem:[%s9631_s14 + $0x5e8] sm:$0xff]  }
 0x1fc   : >> { %7853 = vmatpush3.bf16.msra.mxu0 %v8271_v35  ;;  %v8317_v35 = vld [vmem:[%s9631_s14 + $0x528] sm:$0xff]  }
 0x1fd   : >> { %7882 = vmatprep.subr.bf16.mxu0 %v8273_v40  ;;  %v8322_v40 = vld [vmem:[%s9631_s14 + $0x5a0] sm:$0xff]  }
 0x1fe   : >> { %7875 = vmatpush3.bf16.msra.mxu1 %v8272_v37  ;;  %v8319_v37 = vld [vmem:[%s9631_s14 + $0x560] sm:$0xff]  }
 0x1ff   : >> { %6872 = vmatmul.mubr.bf16.vlgmr.msra.gmra.mxu0 %v4463_v36  ;;  %7904 = vmatprep.subr.bf16.mxu1 %v8274_v41  ;;  %v8318_v36 = vld [vmem:[%s9631_s14 + $0x5a8] sm:$0xff]   ;;  %v8323_v41 = vld [vmem:[%s9631_s14 + $0x558] sm:$0xff]  }
 0x200   : >> { %7883 = vmatpush3.bf16.msra.mxu0 %v8275_v42  ;;  %6951 = vmatprep.mubr.bf16.mxu0 %v7441_v11  ;;  %v8324_v42 = vld [vmem:[%s9631_s14 + $0x5d8] sm:$0xff]   ;;  %v8352_v11 = vld [vmem:[%s9631_s14 + $0x6e0] sm:$0xff]  }
 0x201   : >> { %7884 = vmatprep.subr.bf16.mxu0 %v8277_v45  ;;  %6912 = vmatmul.mubr.bf16.vlgmr.msra.gmra.mxu1 %v4469_v44  ;;  %v8326_v44 = vld [vmem:[%s9631_s14 + $0x598] sm:$0xff]   ;;  %v8327_v45 = vld [vmem:[%s9631_s14 + $0x550] sm:$0xff]  }
 0x202   : >> { %7905 = vmatpush3.bf16.msra.mxu1 %v8276_v43  ;;  %6991 = vmatprep.mubr.bf16.mxu1 %v4495_v25  ;;  %v8325_v43 = vld [vmem:[%s9631_s14 + $0x518] sm:$0xff]   ;;  %v8366_v25 = vld [vmem:[%s9631_s14 + $0x688] sm:$0xff]  }
 0x203   : >> { %7906 = vmatprep.subr.bf16.mxu1 %v8278_v46  ;;  %v8328_v46 = vld [vmem:[%s9631_s14 + $0x5d0] sm:$0xff]  }
 0x204   : >> { %7885 = vmatpush3.bf16.msra.mxu0 %v8279_v47  ;;  %v8329_v47 = vld [vmem:[%s9631_s14 + $0x510] sm:$0xff]  }
 0x205   : >> { %7886 = vmatprep.subr.bf16.mxu0 %v8281_v49  ;;  %v8331_v49 = vld [vmem:[%s9631_s14 + $0x548] sm:$0xff]  }
 0x206   : >> { %7907 = vmatpush3.bf16.msra.mxu1 %v8280_v48  ;;  %v8330_v48 = vld [vmem:[%s9631_s14 + $0x590] sm:$0xff]  }
 0x207   : >> { %7908 = vmatprep.subr.bf16.mxu1 %v8282_v50  ;;  %v8332_v50 = vld [vmem:[%s9631_s14 + $0x5c8] sm:$0xff]  }
 0x208   : >> { %7887 = vmatpush3.bf16.msra.mxu0 %v8283_v51  ;;  %v8333_v51 = vld [vmem:[%s9631_s14 + $0x508] sm:$0xff]  }
 0x209   : >> { %7888 = vmatprep.subr.bf16.mxu0 %v8285_v53  ;;  %v8335_v53 = vld [vmem:[%s9631_s14 + $0x540] sm:$0xff]  }
 0x20a   : >> { %7909 = vmatpush3.bf16.msra.mxu1 %v8284_v52  ;;  %v8334_v52 = vld [vmem:[%s9631_s14 + $0x588] sm:$0xff]  }
 0x20b   : >> { %7910 = vmatprep.subr.bf16.mxu1 %v8286_v54  ;;  %v8336_v54 = vld [vmem:[%s9631_s14 + $0x5c0] sm:$0xff]  }
 0x20c   : >> { %7889 = vmatpush3.bf16.msra.mxu0 %v8287_v55  ;;  %v8337_v55 = vld [vmem:[%s9631_s14 + $0x500] sm:$0xff]  }
 0x20d   : >> { %7890 = vmatprep.subr.bf16.mxu0 %v8289_v57  ;;  %v8338_v57 = vld [vmem:[%s9631_s14 + $0x580] sm:$0xff]  }
 0x20e   : >> { %7911 = vmatpush3.bf16.msra.mxu1 %v8288_v56  ;;  %v4498_v56 = vrot.slane %v9835_v12, 1 }
 0x20f   : >> { %7912 = vmatprep.subr.bf16.mxu1 %v8290_v58  ;;  %v4502_v58 = vrot.slane %v4483_v17, 1  ;;  %v8358_v17 = vld [vmem:[%s9631_s14 + $0x698] sm:$0xff]  }
 0x210   : >> { %7891 = vmatpush3.bf16.msra.mxu0 %v8291_v59  ;;  %v4503_v59 = vrot.slane %v4485_v18, 2  ;;  %v8359_v18 = vld [vmem:[%s9631_s14 + $0x650] sm:$0xff]  }
 0x211   : >> { %7892 = vmatprep.subr.bf16.mxu0 %v8293_v61  ;;  %v8340_v61 = vld [vmem:[%s9631_s14 + $0x6f8] sm:$0xff]  }
 0x212   : >> { %7913 = vmatpush3.bf16.msra.mxu1 %v8292_v60  ;;  %v8339_v60 = vld [vmem:[%s9631_s14 + $0x678] sm:$0xff]  }
 0x213   : >> { %7914 = vmatprep.subr.bf16.mxu1 %v8294_v62  ;;  %v8341_v62 = vld [vmem:[%s9631_s14 + $0x638] sm:$0xff]  }
 0x214   : >> { %7893 = vmatpush3.bf16.msra.mxu0 %v8295_v63  ;;  %v8342_v63 = vld [vmem:[%s9631_s14 + $0x6b8] sm:$0xff]  }
 0x215   : >> { %7894 = vmatprep.subr.bf16.mxu0 %v8297_v2  ;;  %v8343_v2 = vld [vmem:[%s9631_s14 + $0x670] sm:$0xff]  }
 0x216   : >> { %7915 = vmatpush3.bf16.msra.mxu1 %v8296_v1  ;;  %v4504_v1 = vor.u32 %v4503_v59, %v4502_v58  ;;  %v8380_v59 = vld [vmem:[%s9631_s14 + $0x7b0] sm:$0xff]  }
 0x217   : >> { %7916 = vmatprep.subr.bf16.mxu1 %v8298_v3  ;;  %v8344_v3 = vld [vmem:[%s9631_s14 + $0x6f0] sm:$0xff]  }
 0x218   : >> { %7895 = vmatpush3.bf16.msra.mxu0 %v8299_v4  ;;  %v8345_v4 = vld [vmem:[%s9631_s14 + $0x630] sm:$0xff]  }
 0x219   : >> { %7896 = vmatprep.subr.bf16.mxu0 %v8301_v6  ;;  %v8347_v6 = vld [vmem:[%s9631_s14 + $0x668] sm:$0xff]  }
 0x21a   : >> { %7917 = vmatpush3.bf16.msra.mxu1 %v8300_v5  ;;  %v8346_v5 = vld [vmem:[%s9631_s14 + $0x6b0] sm:$0xff]  }
 0x21b   : >> { %7918 = vmatprep.subr.bf16.mxu1 %v8302_v7  ;;  %v8348_v7 = vld [vmem:[%s9631_s14 + $0x6e8] sm:$0xff]  }
 0x21c   : >> { %7897 = vmatpush3.bf16.msra.mxu0 %v8303_v8  ;;  %v8349_v8 = vld [vmem:[%s9631_s14 + $0x628] sm:$0xff]  }
 0x21d   : >> { %7926 = vmatprep.subr.bf16.mxu0 %v8307_v13  ;;  %v8354_v13 = vld [vmem:[%s9631_s14 + $0x6a0] sm:$0xff]  }
 0x21e   : >> { %7919 = vmatpush3.bf16.msra.mxu1 %v8304_v9  ;;  %v8350_v9 = vld [vmem:[%s9631_s14 + $0x6a8] sm:$0xff]  }
 0x21f   : >> { %6952 = vmatmul.mubr.bf16.vlgmr.msra.gmra.mxu0 %v9835_v12  ;;  %7948 = vmatprep.subr.bf16.mxu1 %v8308_v14  ;;  %v8353_v12 = vld [vmem:[%s9631_s14 + $0x620] sm:$0xff]   ;;  %v8355_v14 = vld [vmem:[%s9631_s14 + $0x658] sm:$0xff]  }
 0x220   : >> { %7927 = vmatpush3.bf16.msra.mxu0 %v8309_v19  ;;  %7031 = vmatprep.mubr.bf16.mxu0 %v4499_v20  ;;  %v8360_v19 = vld [vmem:[%s9631_s14 + $0x6d0] sm:$0xff]  }
 0x221   : >> { %7928 = vmatprep.subr.bf16.mxu0 %v8311_v24  ;;  %6992 = vmatmul.mubr.bf16.vlgmr.msra.gmra.mxu1 %v4488_v26  ;;  %v8361_v20 = vld [vmem:[%s9631_s14 + $0x610] sm:$0xff]   ;;  %v8365_v24 = vld [vmem:[%s9631_s14 + $0x608] sm:$0xff]   ;;  %v8367_v26 = vld [vmem:[%s9631_s14 + $0x640] sm:$0xff]  }
 0x222   : >> { %7949 = vmatpush3.bf16.msra.mxu1 %v8310_v23  ;;  %7071 = vmatprep.mubr.bf16.mxu1 %v4507_v33  ;;  %v8364_v23 = vld [vmem:[%s9631_s14 + $0x6c8] sm:$0xff]   ;;  %v9914_v33 = vcombine.low %v7435_v30, %v7435_v30 }
 0x223   : >> { %7950 = vmatprep.subr.bf16.mxu1 %v8312_v27  ;;  %v8368_v27 = vld [vmem:[%s9631_s14 + $0x6c0] sm:$0xff]  }
 0x224   : >> { %7929 = vmatpush3.bf16.msra.mxu0 %v8313_v29  ;;  %v8370_v29 = vld [vmem:[%s9631_s14 + $0x680] sm:$0xff]  }
 0x225   : >> { %7930 = vmatprep.subr.bf16.mxu0 %v8315_v32 }
 0x226   : >> { %7951 = vmatpush3.bf16.msra.mxu1 %v8314_v31  ;;  %v7443_v31 = vcombine.high %v7435_v30, %v7435_v30 }
 0x227   : >> { %7952 = vmatprep.subr.bf16.mxu1 %v8316_v34  ;;  %v8373_v34 = vld [vmem:[%s9631_s14 + $0x778] sm:$0xff]  }
 0x228   : >> { %7931 = vmatpush3.bf16.msra.mxu0 %v8317_v35  ;;  %v8374_v35 = vld [vmem:[%s9631_s14 + $0x7f8] sm:$0xff]  }
 0x229   : >> { %7932 = vmatprep.subr.bf16.mxu0 %v8319_v37  ;;  %v4527_v37 = vshll.u32 %v7443_v31, 16 }
 0x22a   : >> { %7953 = vmatpush3.bf16.msra.mxu1 %v8318_v36  ;;  %v4525_v36 = vshrl.u32 %v7443_v31, 16 }
 0x22b   : >> { %7954 = vmatprep.subr.bf16.mxu1 %v8320_v38  ;;  %v4518_v38 = vshrl.u32 %v9914_v33, 16 }
 0x22c   : >> { %7933 = vmatpush3.bf16.msra.mxu0 %v8321_v39  ;;  %v4520_v39 = vshll.u32 %v9914_v33, 16 }
 0x22d   : >> { %7934 = vmatprep.subr.bf16.mxu0 %v8323_v41  ;;  %v8375_v41 = vld [vmem:[%s9631_s14 + $0x738] sm:$0xff]  }
 0x22e   : >> { %7955 = vmatpush3.bf16.msra.mxu1 %v8322_v40 }
 0x22f   : >> { %7956 = vmatprep.subr.bf16.mxu1 %v8324_v42 }
 0x230   : >> { %7935 = vmatpush3.bf16.msra.mxu0 %v8325_v43  ;;  %v4534_v43 = vrot.slane %v7443_v31, 1 }
 0x231   : >> { %7936 = vmatprep.subr.bf16.mxu0 %v8327_v45  ;;  %v4522_v45 = vrot.slane %v4520_v39, 1 }
 0x232   : >> { %7957 = vmatpush3.bf16.msra.mxu1 %v8326_v44  ;;  %v4529_v44 = vrot.slane %v4527_v37, 1 }
 0x233   : >> { %7958 = vmatprep.subr.bf16.mxu1 %v8328_v46  ;;  %v8376_v46 = vld [vmem:[%s9631_s14 + $0x7b8] sm:$0xff]  }
 0x234   : >> { %7937 = vmatpush3.bf16.msra.mxu0 %v8329_v47 }
 0x235   : >> { %7938 = vmatprep.subr.bf16.mxu0 %v8331_v49  ;;  %v4530_v49 = vor.u32 %v4529_v44, %v4525_v36 }
 0x236   : >> { %7959 = vmatpush3.bf16.msra.mxu1 %v8330_v48  ;;  %v8377_v48 = vld [vmem:[%s9631_s14 + $0x770] sm:$0xff]  }
 0x237   : >> { %7960 = vmatprep.subr.bf16.mxu1 %v8332_v50 }
 0x238   : >> { %7939 = vmatpush3.bf16.msra.mxu0 %v8333_v51  ;;  %v4523_v51 = vor.u32 %v4522_v45, %v4518_v38 }
 0x239   : >> { %7940 = vmatprep.subr.bf16.mxu0 %v8335_v53 }
 0x23a   : >> { %7961 = vmatpush3.bf16.msra.mxu1 %v8334_v52  ;;  %v8378_v52 = vld [vmem:[%s9631_s14 + $0x7f0] sm:$0xff]  }
 0x23b   : >> { %7962 = vmatprep.subr.bf16.mxu1 %v8336_v54  ;;  %v4540_v54 = vrot.slane %v4525_v36, 1 }
 0x23c   : >> { %7941 = vmatpush3.bf16.msra.mxu0 %v8337_v55 }
 0x23d   : >> { %7970 = vmatprep.subr.bf16.mxu0 %v8339_v60 }
 0x23e   : >> { %7963 = vmatpush3.bf16.msra.mxu1 %v8338_v57  ;;  %v4541_v57 = vrot.slane %v4527_v37, 2 }
 0x23f   : >> { %7032 = vmatmul.mubr.bf16.vlgmr.msra.gmra.mxu0 %v4498_v56  ;;  %7992 = vmatprep.subr.bf16.mxu1 %v8340_v61  ;;  %v8379_v56 = vld [vmem:[%s9631_s14 + $0x730] sm:$0xff]   ;;  %v8381_v61 = vld [vmem:[%s9631_s14 + $0x768] sm:$0xff]  }
 0x240   : >> { %7971 = vmatpush3.bf16.msra.mxu0 %v8341_v62  ;;  %7111 = vmatprep.mubr.bf16.mxu0 %v7443_v31  ;;  %v4542_v62 = vor.u32 %v4541_v57, %v4540_v54 }
 0x241   : >> { %7972 = vmatprep.subr.bf16.mxu0 %v8343_v2  ;;  %7072 = vmatmul.mubr.bf16.vlgmr.msra.gmra.mxu1 %v4504_v1  ;;  %v8382_v1 = vld [vmem:[%s9631_s14 + $0x7e8] sm:$0xff]  }
 0x242   : >> { %7993 = vmatpush3.bf16.msra.mxu1 %v8342_v63  ;;  %7151 = vmatprep.mubr.bf16.mxu1 %v4530_v49 }
 0x243   : >> { %7994 = vmatprep.subr.bf16.mxu1 %v8344_v3  ;;  %v8383_v3 = vld [vmem:[%s9631_s14 + $0x728] sm:$0xff]  }
 0x244   : >> { %7973 = vmatpush3.bf16.msra.mxu0 %v8345_v4 }
 0x245   : >> { %7974 = vmatprep.subr.bf16.mxu0 %v8347_v6  ;;  %v8385_v6 = vld [vmem:[%s9631_s14 + $0x760] sm:$0xff]  }
 0x246   : >> { %7995 = vmatpush3.bf16.msra.mxu1 %v8346_v5  ;;  %v8384_v5 = vld [vmem:[%s9631_s14 + $0x7a8] sm:$0xff]  }
 0x247   : >> { %7996 = vmatprep.subr.bf16.mxu1 %v8348_v7  ;;  %v8386_v7 = vld [vmem:[%s9631_s14 + $0x7e0] sm:$0xff]  }
 0x248   : >> { %7975 = vmatpush3.bf16.msra.mxu0 %v8349_v8  ;;  %v8387_v8 = vld [vmem:[%s9631_s14 + $0x720] sm:$0xff]  }
 0x249   : >> { %7976 = vmatprep.subr.bf16.mxu0 %v8351_v10  ;;  %v8389_v10 = vld [vmem:[%s9631_s14 + $0x758] sm:$0xff]  }
 0x24a   : >> { %7997 = vmatpush3.bf16.msra.mxu1 %v8350_v9  ;;  %v8388_v9 = vld [vmem:[%s9631_s14 + $0x7a0] sm:$0xff]  }
 0x24b   : >> { %7998 = vmatprep.subr.bf16.mxu1 %v8352_v11  ;;  %v8390_v11 = vld [vmem:[%s9631_s14 + $0x7d8] sm:$0xff]  }
 0x24c   : >> { %7977 = vmatpush3.bf16.msra.mxu0 %v8353_v12  ;;  %v8391_v12 = vld [vmem:[%s9631_s14 + $0x718] sm:$0xff]  }
 0x24d   : >> { %7978 = vmatprep.subr.bf16.mxu0 %v8355_v14  ;;  %v8393_v14 = vld [vmem:[%s9631_s14 + $0x750] sm:$0xff]  }
 0x24e   : >> { %7999 = vmatpush3.bf16.msra.mxu1 %v8354_v13  ;;  %v8392_v13 = vld [vmem:[%s9631_s14 + $0x798] sm:$0xff]  }
 0x24f   : >> { %8000 = vmatprep.subr.bf16.mxu1 %v8356_v15  ;;  %v8394_v15 = vld [vmem:[%s9631_s14 + $0x7d0] sm:$0xff]  }
 0x250   : >> { %7979 = vmatpush3.bf16.msra.mxu0 %v8357_v16  ;;  %v8395_v16 = vld [vmem:[%s9631_s14 + $0x710] sm:$0xff]  }
 0x251   : >> { %7980 = vmatprep.subr.bf16.mxu0 %v8359_v18  ;;  %v8397_v18 = vld [vmem:[%s9631_s14 + $0x748] sm:$0xff]  }
 0x252   : >> { %8001 = vmatpush3.bf16.msra.mxu1 %v8358_v17  ;;  %v8396_v17 = vld [vmem:[%s9631_s14 + $0x790] sm:$0xff]  }
 0x253   : >> { %8002 = vmatprep.subr.bf16.mxu1 %v8360_v19  ;;  %v8398_v19 = vld [vmem:[%s9631_s14 + $0x7c8] sm:$0xff]  }
 0x254   : >> { %7981 = vmatpush3.bf16.msra.mxu0 %v8361_v20  ;;  %v8399_v20 = vld [vmem:[%s9631_s14 + $0x708] sm:$0xff]  }
 0x255   : >> { %7982 = vmatprep.subr.bf16.mxu0 %v8363_v22  ;;  %v8401_v22 = vld [vmem:[%s9631_s14 + $0x740] sm:$0xff]  }
 0x256   : >> { %8003 = vmatpush3.bf16.msra.mxu1 %v8362_v21  ;;  %v8400_v21 = vld [vmem:[%s9631_s14 + $0x788] sm:$0xff]  }
 0x257   : >> { %8004 = vmatprep.subr.bf16.mxu1 %v8364_v23  ;;  %v8402_v23 = vld [vmem:[%s9631_s14 + $0x7c0] sm:$0xff]  }
 0x258   : >> { %7983 = vmatpush3.bf16.msra.mxu0 %v8365_v24  ;;  %v8403_v24 = vld [vmem:[%s9631_s14 + $0x700] sm:$0xff]  }
 0x259   : >> { %7984 = vmatprep.subr.bf16.mxu0 %v8367_v26 }
 0x25a   : >> { %8005 = vmatpush3.bf16.msra.mxu1 %v8366_v25  ;;  %v4533_v25 = vrot.slane %v9914_v33, 1 }
 0x25b   : >> { %8006 = vmatprep.subr.bf16.mxu1 %v8368_v27  ;;  %v4537_v27 = vrot.slane %v4518_v38, 1 }
 0x25c   : >> { %7985 = vmatpush3.bf16.msra.mxu0 %v8369_v28  ;;  %v4538_v28 = vrot.slane %v4520_v39, 2 }
 0x25d   : >> { %8014 = vmatprep.subr.bf16.mxu0 %v8373_v34 }
 0x25e   : >> { %8007 = vmatpush3.bf16.msra.mxu1 %v8370_v29  ;;  %v8404_v29 = vld [vmem:[%s9631_s14 + $0x780] sm:$0xff]  }
 0x25f   : >> { %v7722_v32 = vpop.f32.mrf.mxu0  ;;  %7112 = vmatmul.mubr.bf16.vlgmr.msra.gmra.mxu0 %v9914_v33  ;;  %8036 = vmatprep.subr.bf16.mxu1 %v8374_v35 }
 0x260   : >> { %8015 = vmatpush3.bf16.msra.mxu0 %v8375_v41  ;;  %7191 = vmatprep.mubr.bf16.mxu0 %v4534_v43 }
 0x261   : >> { %v7723_v40 = vpop.f32.mrf.mxu0  ;;  %v7744_v50 = vpop.f32.mrf.mxu1  ;;  %8016 = vmatprep.subr.bf16.mxu0 %v8377_v48  ;;  %7152 = vmatmul.mubr.bf16.vlgmr.msra.gmra.mxu1 %v4523_v51 }
 0x262   : >> { %v7724_v42 = vadd.f32 %v7723_v40, %v7722_v32  ;;  %8037 = vmatpush3.bf16.msra.mxu1 %v8376_v46  ;;  %7231 = vmatprep.mubr.bf16.mxu1 %v4542_v62  ;;  %v4539_v32 = vor.u32 %v4538_v28, %v4537_v27 }
 0x263   : >> { %v7725_v47 = vpop.f32.mrf.mxu0  ;;  %v7745_v58 = vpop.f32.mrf.mxu1  ;;  %8038 = vmatprep.subr.bf16.mxu1 %v8378_v52 }
 0x264   : >> { %v6634_v55 = vadd.f32 %v7724_v42, %v9629_v0  ;;  %v7746_v60 = vadd.f32 %v7745_v58, %v7744_v50  ;;  %8017 = vmatpush3.bf16.msra.mxu0 %v8379_v56 }
 0x265   : >> { %v7726_v53 = vpop.f32.mrf.mxu0  ;;  %v7747_v63 = vpop.f32.mrf.mxu1  ;;  %8018 = vmatprep.subr.bf16.mxu0 %v8381_v61 }
 0x266   : >> { %v6674_v2 = vadd.f32 %v7746_v60, %v6634_v55  ;;  %8039 = vmatpush3.bf16.msra.mxu1 %v8380_v59 }
 0x267   : >> { %v7748_v4 = vpop.f32.mrf.mxu1  ;;  %8040 = vmatprep.subr.bf16.mxu1 %v8382_v1 }
 0x268   : >> { %8019 = vmatpush3.bf16.msra.mxu0 %v8383_v3 }
 0x269   : >> { %8020 = vmatprep.subr.bf16.mxu0 %v8385_v6 }
 0x26a   : >> { %8041 = vmatpush3.bf16.msra.mxu1 %v8384_v5 }
 0x26b   : >> { %8042 = vmatprep.subr.bf16.mxu1 %v8386_v7 }
 0x26c   : >> { %8021 = vmatpush3.bf16.msra.mxu0 %v8387_v8 }
 0x26d   : >> { %8022 = vmatprep.subr.bf16.mxu0 %v8389_v10 }
 0x26e   : >> { %8043 = vmatpush3.bf16.msra.mxu1 %v8388_v9 }
 0x26f   : >> { %8044 = vmatprep.subr.bf16.mxu1 %v8390_v11 }
 0x270   : >> { %8023 = vmatpush3.bf16.msra.mxu0 %v8391_v12 }
 0x271   : >> { %8024 = vmatprep.subr.bf16.mxu0 %v8393_v14 }
 0x272   : >> { %8045 = vmatpush3.bf16.msra.mxu1 %v8392_v13 }
 0x273   : >> { %8046 = vmatprep.subr.bf16.mxu1 %v8394_v15 }
 0x274   : >> { %8025 = vmatpush3.bf16.msra.mxu0 %v8395_v16 }
 0x275   : >> { %8026 = vmatprep.subr.bf16.mxu0 %v8397_v18 }
 0x276   : >> { %8047 = vmatpush3.bf16.msra.mxu1 %v8396_v17 }
 0x277   : >> { %8048 = vmatprep.subr.bf16.mxu1 %v8398_v19 }
 0x278   : >> { %8027 = vmatpush3.bf16.msra.mxu0 %v8399_v20 }
 0x279   : >> { %8028 = vmatprep.subr.bf16.mxu0 %v8401_v22 }
 0x27a   : >> { %8049 = vmatpush3.bf16.msra.mxu1 %v8400_v21 }
 0x27b   : >> { %8050 = vmatprep.subr.bf16.mxu1 %v8402_v23 }
 0x27c   : >> { %8029 = vmatpush3.bf16.msra.mxu0 %v8403_v24 }
 0x27e   : >> { %8051 = vmatpush3.bf16.msra.mxu1 %v8404_v29 }
 0x27f   : >> { %v7766_v26 = vpop.f32.mrf.mxu0  ;;  %7192 = vmatmul.mubr.bf16.vlgmr.msra.gmra.mxu0 %v4533_v25 }
 0x281   : >> { %v7767_v30 = vpop.f32.mrf.mxu0  ;;  %v7788_v35 = vpop.f32.mrf.mxu1  ;;  %7232 = vmatmul.mubr.bf16.vlgmr.msra.gmra.mxu1 %v4539_v32 }
 0x282   : >> { %v7768_v31 = vadd.f32 %v7767_v30, %v7766_v26 }
 0x283   : >> { %v7769_v34 = vpop.f32.mrf.mxu0  ;;  %v7789_v40 = vpop.f32.mrf.mxu1 }
 0x284   : >> { %v6714_v36 = vadd.f32 %v7768_v31, %v6674_v2  ;;  %v7790_v41 = vadd.f32 %v7789_v40, %v7788_v35 }
 0x285   : >> { %v7770_v37 = vpop.f32.mrf.mxu0  ;;  %v7791_v42 = vpop.f32.mrf.mxu1 }
 0x286   : >> { %v6754_v38 = vadd.f32 %v7790_v41, %v6714_v36 }
 0x287   : >> { %v7792_v43 = vpop.f32.mrf.mxu1 }
 0x29f   : >> { %v7810_v33 = vpop.f32.mrf.mxu0 }
 0x2a1   : >> { %v7811_v39 = vpop.f32.mrf.mxu0  ;;  %v7832_v47 = vpop.f32.mrf.mxu1 }
 0x2a2   : >> { %v7812_v44 = vadd.f32 %v7811_v39, %v7810_v33 }
 0x2a3   : >> { %v7813_v45 = vpop.f32.mrf.mxu0  ;;  %v7833_v49 = vpop.f32.mrf.mxu1 }
 0x2a4   : >> { %v6794_v46 = vadd.f32 %v7812_v44, %v6754_v38  ;;  %v7834_v50 = vadd.f32 %v7833_v49, %v7832_v47 }
 0x2a5   : >> { %v7814_v48 = vpop.f32.mrf.mxu0  ;;  %v7835_v51 = vpop.f32.mrf.mxu1 }
 0x2a6   : >> { %v6834_v52 = vadd.f32 %v7834_v50, %v6794_v46 }
 0x2a7   : >> { %v7836_v53 = vpop.f32.mrf.mxu1 }
 0x2a8   : >> { %v7247_v53 = vld [vmem:[%s7243_s28] sm:$0x3] }
 0x2bf   : >> { %v7854_v54 = vpop.f32.mrf.mxu0 }
 0x2c1   : >> { %v7855_v55 = vpop.f32.mrf.mxu0  ;;  %v7876_v58 = vpop.f32.mrf.mxu1 }
 0x2c2   : >> { %v7856_v56 = vadd.f32 %v7855_v55, %v7854_v54 }
 0x2c3   : >> { %v7857_v57 = vpop.f32.mrf.mxu0  ;;  %v7877_v61 = vpop.f32.mrf.mxu1 }
 0x2c4   : >> { %v6874_v59 = vadd.f32 %v7856_v56, %v6834_v52  ;;  %v7878_v62 = vadd.f32 %v7877_v61, %v7876_v58 }
 0x2c5   : >> { %v7858_v60 = vpop.f32.mrf.mxu0  ;;  %v7879_v63 = vpop.f32.mrf.mxu1 }
 0x2c6   : >> { %v6914_v1 = vadd.f32 %v7878_v62, %v6874_v59 }
 0x2c7   : >> { %v7880_v2 = vpop.f32.mrf.mxu1 }
 0x2df   : >> { %v7898_v3 = vpop.f32.mrf.mxu0 }
 0x2e1   : >> { %v7899_v4 = vpop.f32.mrf.mxu0  ;;  %v7920_v8 = vpop.f32.mrf.mxu1 }
 0x2e2   : >> { %v7900_v5 = vadd.f32 %v7899_v4, %v7898_v3 }
 0x2e3   : >> { %v7901_v6 = vpop.f32.mrf.mxu0  ;;  %v7921_v10 = vpop.f32.mrf.mxu1 }
 0x2e4   : >> { %v6954_v7 = vadd.f32 %v7900_v5, %v6914_v1  ;;  %v7922_v11 = vadd.f32 %v7921_v10, %v7920_v8 }
 0x2e5   : >> { %v7902_v9 = vpop.f32.mrf.mxu0  ;;  %v7923_v12 = vpop.f32.mrf.mxu1 }
 0x2e6   : >> { %v6994_v13 = vadd.f32 %v7922_v11, %v6954_v7 }
 0x2e7   : >> { %v7924_v14 = vpop.f32.mrf.mxu1 }
 0x2ff   : >> { %v7942_v15 = vpop.f32.mrf.mxu0 }
 0x301   : >> { %v7943_v16 = vpop.f32.mrf.mxu0  ;;  %v7964_v18 = vpop.f32.mrf.mxu1 }
 0x302   : >> { %v7944_v31 = vadd.f32 %v7943_v16, %v7942_v15 }
 0x303   : >> { %v7945_v17 = vpop.f32.mrf.mxu0  ;;  %v7965_v20 = vpop.f32.mrf.mxu1 }
 0x304   : >> { %v7034_v32 = vadd.f32 %v7944_v31, %v6994_v13  ;;  %v7966_v34 = vadd.f32 %v7965_v20, %v7964_v18 }
 0x305   : >> { %v7946_v19 = vpop.f32.mrf.mxu0  ;;  %v7967_v21 = vpop.f32.mrf.mxu1 }
 0x306   : >> { %v7074_v36 = vadd.f32 %v7966_v34, %v7034_v32 }
 0x307   : >> { %v7968_v22 = vpop.f32.mrf.mxu1 }
 0x31f   : >> { %v7986_v23 = vpop.f32.mrf.mxu0 }
 0x321   : >> { %v7987_v24 = vpop.f32.mrf.mxu0  ;;  %v8008_v26 = vpop.f32.mrf.mxu1 }
 0x322   : >> { %v7988_v35 = vadd.f32 %v7987_v24, %v7986_v23 }
 0x323   : >> { %v7989_v25 = vpop.f32.mrf.mxu0  ;;  %v8009_v28 = vpop.f32.mrf.mxu1 }
 0x324   : >> { %v7114_v37 = vadd.f32 %v7988_v35, %v7074_v36  ;;  %v8010_v40 = vadd.f32 %v8009_v28, %v8008_v26 }
 0x325   : >> { %v7990_v27 = vpop.f32.mrf.mxu0  ;;  %v8011_v29 = vpop.f32.mrf.mxu1 }
 0x326   : >> { %v7154_v43 = vadd.f32 %v8010_v40, %v7114_v37 }
 0x327   : >> { %v8012_v30 = vpop.f32.mrf.mxu1 }
 0x33f   : >> { %v8030_v41 = vpop.f32.mrf.mxu0 }
 0x341   : >> { %v8031_v42 = vpop.f32.mrf.mxu0  ;;  %v8052_v39 = vpop.f32.mrf.mxu1 }
 0x342   : >> { %v8032_v38 = vadd.f32 %v8031_v42, %v8030_v41 }
 0x343   : >> { %v8033_v33 = vpop.f32.mrf.mxu0  ;;  %v8053_v46 = vpop.f32.mrf.mxu1 }
 0x344   : >> { %v7194_v44 = vadd.f32 %v8032_v38, %v7154_v43  ;;  %v8054_v47 = vadd.f32 %v8053_v46, %v8052_v39 }
 0x345   : >> { %v8034_v45 = vpop.f32.mrf.mxu0  ;;  %v8055_v48 = vpop.f32.mrf.mxu1 }
 0x346   : >> { %v7234_v49 = vadd.f32 %v8054_v47, %v7194_v44 }
 0x347   : >> { %v8056_v50 = vpop.f32.mrf.mxu1 }
 0x348   : >> { %v7239_v51 = vmul.f32 0.2, %v7234_v49 }
 0x34a   : >> { %v7240_v52 = vmax.f32 %v7234_v49, %v7239_v51 }
 0x34b   : > { %4384 = sbr.rel (!%p4382_p2) target bundleno = 381 (0x17d), region = 175 }
 0x34c   : >> { %v7241_v54 = vpack.c.bf16 %v7240_v52, %v7240_v52 }
 0x34e   : >> { %v7248_v55 = vsel %vm7246_vm2, %v7241_v54, %v7247_v53 }
 0x34f   : >> { %7249 = vst [vmem:[%s7243_s28] sm:$0x3] %v7248_v55 }
 0x350   : > { %7256 = sbr.rel (!%p8572_p9) target bundleno = 857 (0x359), region = 95 }
 0x351   : > { %s8060_s29 = smul.u32 (%p8572_p9), 12, %s8467_s17 }
 0x353   : > { %s7258_s5 = sadd.s32 (%p8572_p9), %s8463_s16, %s8060_s29 }
 0x354   : > { %s7702_s6 = sshll.u32 (%p8572_p9), %s7258_s5, 1 }
 0x355   : > { %s7260_s9 = scalar_lea.vmem %s10006_s3, %s7702_s6 }
 0x356   : > { %v7277_v56 = vld [vmem:[%s9633_s12] sm:$0x3]  ;;  %v7279_v57 = vld [vmem:[%s9633_s12 + $0x2] sm:$0x3]  ;;  %v7281_v58 = vld [vmem:[%s9633_s12 + $0x4] sm:$0x3] }
 0x357   : > { %7278 = vst [vmem:[%s7260_s9] sm:$0x3] %v7277_v56  ;;  %7280 = vst [vmem:[%s7260_s9 + $0x8] sm:$0x3] %v7279_v57 }
 0x358   : > { %7282 = vst [vmem:[%s7260_s9 + $0x10] sm:$0x3] %v7281_v58 }
 0x359 PF: > { %s13_s20 = sadd.s32 1, %s8479_s20   ;;  %s10008_s12 = smov %s8451_s13 }
 0x35a   : > { %p10_p3 = scmp.ge.s32.totalorder %s13_s20, 10   ;;  %s10009_s13 = smov %s8577_s4 }
 0x35b   : > { %s10010_s14 = smov %s8459_s15  ;;  %s10011_s15 = smov %s8566_s27 }
 0x35c   : > { %s10012_s16 = smov %s8471_s18  ;;  %s10013_s17 = smov %s8475_s19 }
 0x35d   : > { %s10014_s18 = smov %s10017_s22  ;;  %s10015_s19 = smov %s10021_s23 }
 0x35e   :  { %12 = sbr.rel (!%p10_p3) target bundleno = 5 (0x5), region = 186 }

// kernel: discriminator_forward.17
= control target key start
LH: loop header
LB: loop body
LE: loop exit
PB: predicated region body
PF: predicated region fallthrough
CT: control target
= control target key end

     0   :  { %s7907_s14 = smov 0   ;;  %s7909_s15 = smov 0   ;;  %s9756_s0 = inlined_call_operand.vmem [shape: bf16[2,5,5,512], index: 0, kind: input, shape index: {}]   ;;  %s9757_s1 = inlined_call_operand.vmem [shape: bf16[8192,1], index: 1, kind: input, shape index: {}]   ;;  %s9758_s2 = inlined_call_operand.<no memory space> [shape: f32[1,1], index: 2, kind: input, shape index: {}]   ;;  %s9759_s3 = inlined_call_operand.vmem [shape: bf16[2,2,2,1], index: 3, kind: output, shape index: {}]  }
   0x1   :  { %v8_v0 = vstv %s9758_s2  ;;  %s7911_s16 = smov 0  }
   0x2   :  { %9 = vst [vmem:[#allocation2] sm:$0x1] %v8_v0 }
   0x3 LB: > { %s27_s2 = sadd.s32 1, %s7874_s15  ;;  %p6041_p0 = scmp.ge.s32.totalorder %s7878_s16, 1  ;;  %s7878_s16 = sphi %s7911_s16, %s15_s16   ;;  %s7874_s15 = sphi %s7909_s15, %s9761_s15   ;;  %s7870_s14 = sphi %s7907_s14, %s9760_s14  }
   0x4   : > { %p29_p1 = scmp.ge.s32.totalorder %s27_s2, 2  ;;  %p170_p2 = scmp.lt.s32.totalorder %s7878_s16, 3 }
   0x6   : > { %s9763_s2 = smov (%p29_p1, %s27_s2), 0  ;;  %p171_p3 = pnand %p6041_p0, %p170_p2 }
   0x7   : > { %p203_p4 = scmp.lt.s32.totalorder (!%p171_p3), %s7870_s14, 1  ;;  %s7937_s25 = smov (!%p171_p3), 0  }
   0x8   : > { %174 = sbr.rel (%p171_p3) target bundleno = 735 (0x2df), region = 32 }
   0xd   : > { %v7925_v1 = vld [vmem:[#allocation2] ss:$0 sm:$0xff]  ;;  %s9765_s14 = smov (!%p203_p4, %s7870_s14), 1 }
   0xe   : > { %s7291_s17 = smul.u32 80, %s9765_s14  ;;  %s6043_s18 = sshll.u32 %s9765_s14, 1 }
   0xf   : > { %s7930_s21 = scalar_lea.vmem %s9759_s3, %s6043_s18 }
  0x10   : > { %s7935_s24 = scalar_lea.vmem %s9756_s0, %s7291_s17 }
  0x11 LB: >> { %v7324_v2 = vld [vmem:[%s9757_s1 + $0x78] sm:$0xff]   ;;  %v7328_v6 = vld [vmem:[%s9757_s1 + $0x70] sm:$0xff]   ;;  %v7332_v10 = vld [vmem:[%s9757_s1 + $0x68] sm:$0xff]   ;;  %s6586_s9 = sshll.u32 %s7882_s25, 4  ;;  %s5916_s5 = scalar_lea.vmem %s7930_s21, %s7882_s25  ;;  %vm5917_vm0 = vcmask 0   ;;  %s7882_s25 = sphi %s7937_s25, %s229_s25  }
  0x12   : >> { %v7325_v3 = vld [vmem:[%s9757_s1 + $0xf8] sm:$0xff]   ;;  %6587 = vmatprep.subr.bf16.mxu0 %v7324_v2  ;;  %v7329_v7 = vld [vmem:[%s9757_s1 + $0xf0] sm:$0xff]   ;;  %v7333_v11 = vld [vmem:[%s9757_s1 + $0xe8] sm:$0xff]   ;;  %s8034_s18 = scalar_lea.vmem %s7935_s24, %s6586_s9  ;;  %s229_s25 = sadd.s32 1, %s7882_s25  }
  0x13   : >> { %v7326_v4 = vld [vmem:[%s9757_s1 + $0x38] sm:$0xff]   ;;  %6609 = vmatprep.subr.bf16.mxu1 %v7325_v3  ;;  %v7330_v8 = vld [vmem:[%s9757_s1 + $0x30] sm:$0xff]   ;;  %v7334_v12 = vld [vmem:[%s9757_s1 + $0x28] sm:$0xff]   ;;  %p226_p5 = scmp.ge.s32.totalorder %s229_s25, 2  }
  0x14   : >> { %v7327_v5 = vld [vmem:[%s9757_s1 + $0xb8] sm:$0xff]   ;;  %6588 = vmatpush3.bf16.msra.mxu0 %v7326_v4  ;;  %v7331_v9 = vld [vmem:[%s9757_s1 + $0xb0] sm:$0xff]   ;;  %v7335_v13 = vld [vmem:[%s9757_s1 + $0xa8] sm:$0xff]  }
  0x15   : >> { %6610 = vmatpush3.bf16.msra.mxu1 %v7327_v5  ;;  %6589 = vmatprep.subr.bf16.mxu0 %v7328_v6  ;;  %v7336_v14 = vld [vmem:[%s9757_s1 + $0x60] sm:$0xff]   ;;  %v7340_v18 = vld [vmem:[%s9757_s1 + $0x58] sm:$0xff]   ;;  %v7344_v22 = vld [vmem:[%s9757_s1 + $0x50] sm:$0xff]  }
  0x16   : >> { %6611 = vmatprep.subr.bf16.mxu1 %v7329_v7  ;;  %v7337_v15 = vld [vmem:[%s9757_s1 + $0xe0] sm:$0xff]   ;;  %v7341_v19 = vld [vmem:[%s9757_s1 + $0xd8] sm:$0xff]   ;;  %v7345_v23 = vld [vmem:[%s9757_s1 + $0xd0] sm:$0xff]  }
  0x17   : >> { %v7338_v16 = vld [vmem:[%s9757_s1 + $0x20] sm:$0xff]   ;;  %v7342_v20 = vld [vmem:[%s9757_s1 + $0x18] sm:$0xff]   ;;  %v7346_v24 = vld [vmem:[%s9757_s1 + $0x10] sm:$0xff]  }
  0x18   : >> { %6590 = vmatpush3.bf16.msra.mxu0 %v7330_v8  ;;  %v7339_v17 = vld [vmem:[%s9757_s1 + $0xa0] sm:$0xff]   ;;  %v7343_v21 = vld [vmem:[%s9757_s1 + $0x98] sm:$0xff]   ;;  %v7347_v25 = vld [vmem:[%s9757_s1 + $0x90] sm:$0xff]  }
  0x19   : >> { %6612 = vmatpush3.bf16.msra.mxu1 %v7331_v9  ;;  %6591 = vmatprep.subr.bf16.mxu0 %v7332_v10  ;;  %v7348_v26 = vld [vmem:[%s9757_s1 + $0x48] sm:$0xff]   ;;  %v7352_v30 = vld [vmem:[%s9757_s1 + $0x40] sm:$0xff]   ;;  %v7360_v40 = vld [vmem:[%s9757_s1 + $0x178] sm:$0xff]  }
  0x1a   : >> { %6613 = vmatprep.subr.bf16.mxu1 %v7333_v11  ;;  %v7349_v27 = vld [vmem:[%s9757_s1 + $0xc8] sm:$0xff]   ;;  %v7353_v31 = vld [vmem:[%s9757_s1 + $0xc0] sm:$0xff]   ;;  %v7361_v41 = vld [vmem:[%s9757_s1 + $0x1f8] sm:$0xff]  }
  0x1b   : >> { %v7350_v28 = vld [vmem:[%s9757_s1 + $0x8] sm:$0xff]   ;;  %v7354_v32 = vld [vmem:[%s9757_s1] sm:$0xff]   ;;  %v7362_v42 = vld [vmem:[%s9757_s1 + $0x138] sm:$0xff]  }
  0x1c   : >> { %6592 = vmatpush3.bf16.msra.mxu0 %v7334_v12  ;;  %v7351_v29 = vld [vmem:[%s9757_s1 + $0x88] sm:$0xff]   ;;  %v7355_v33 = vld [vmem:[%s9757_s1 + $0x80] sm:$0xff]   ;;  %v7363_v44 = vld [vmem:[%s9757_s1 + $0x1b8] sm:$0xff]  }
  0x1d   : >> { %6614 = vmatpush3.bf16.msra.mxu1 %v7335_v13  ;;  %6593 = vmatprep.subr.bf16.mxu0 %v7336_v14  ;;  %v233_v34 = vld [vmem:[%s8034_s18] sm:$0x77]  ;;  %v234_v35 = vld [vmem:[%s8034_s18 + $0x8] sm:$0x77]  ;;  %v7364_v46 = vld [vmem:[%s9757_s1 + $0x170] sm:$0xff]  }
  0x1e   : >> { %6615 = vmatprep.subr.bf16.mxu1 %v7337_v15  ;;  %v8044_v36 = vcombine.high %v233_v34, %v233_v34  ;;  %v8046_v37 = vcombine.high %v234_v35, %v234_v35  ;;  %v8048_v38 = vcombine.low %v233_v34, %v233_v34  ;;  %v8050_v39 = vcombine.low %v234_v35, %v234_v35  ;;  %v7365_v48 = vld [vmem:[%s9757_s1 + $0x1f0] sm:$0xff]   ;;  %v7368_v54 = vld [vmem:[%s9757_s1 + $0x168] sm:$0xff]   ;;  %v7372_v60 = vld [vmem:[%s9757_s1 + $0x160] sm:$0xff]  }
  0x1f   : >> { %v7366_v50 = vld [vmem:[%s9757_s1 + $0x130] sm:$0xff]   ;;  %v7369_v56 = vld [vmem:[%s9757_s1 + $0x1e8] sm:$0xff]   ;;  %v7373_v61 = vld [vmem:[%s9757_s1 + $0x1e0] sm:$0xff]  }
  0x20   : >> { %6594 = vmatpush3.bf16.msra.mxu0 %v7338_v16  ;;  %4667 = vmatprep.mubr.bf16.mxu0 %v8044_v36  ;;  %v275_v43 = vshrl.u32 %v8044_v36, 16  ;;  %v277_v45 = vshll.u32 %v8044_v36, 16  ;;  %v289_v47 = vshrl.u32 %v8046_v37, 16  ;;  %v291_v51 = vshll.u32 %v8046_v37, 16  ;;  %v7367_v52 = vld [vmem:[%s9757_s1 + $0x1b0] sm:$0xff]   ;;  %v7370_v57 = vld [vmem:[%s9757_s1 + $0x128] sm:$0xff]  }
  0x21   : >> { %6616 = vmatpush3.bf16.msra.mxu1 %v7339_v17  ;;  %6595 = vmatprep.subr.bf16.mxu0 %v7340_v18  ;;  %v7371_v59 = vld [vmem:[%s9757_s1 + $0x1a8] sm:$0xff]   ;;  %v7374_v62 = vld [vmem:[%s9757_s1 + $0x120] sm:$0xff]   ;;  %v7376_v0 = vld [vmem:[%s9757_s1 + $0x158] sm:$0xff]   ;;  %v270_v9 = vshll.u32 %v8048_v38, 16  ;;  %v284_v11 = vshll.u32 %v8050_v39, 16  ;;  %v268_v13 = vshrl.u32 %v8048_v38, 16 }
  0x22   : >> { %6617 = vmatprep.subr.bf16.mxu1 %v7341_v19  ;;  %4707 = vmatprep.mubr.bf16.mxu1 %v8046_v37  ;;  %v279_v49 = vrot.slane %v277_v45, 1  ;;  %v293_v55 = vrot.slane %v291_v51, 1  ;;  %v7375_v63 = vld [vmem:[%s9757_s1 + $0x1a0] sm:$0xff]   ;;  %v7377_v2 = vld [vmem:[%s9757_s1 + $0x1d8] sm:$0xff]   ;;  %v7380_v5 = vld [vmem:[%s9757_s1 + $0x150] sm:$0xff]   ;;  %v282_v15 = vshrl.u32 %v8050_v39, 16 }
  0x23   : >> { %v7378_v3 = vld [vmem:[%s9757_s1 + $0x118] sm:$0xff]   ;;  %v7381_v6 = vld [vmem:[%s9757_s1 + $0x1d0] sm:$0xff]   ;;  %v7384_v10 = vld [vmem:[%s9757_s1 + $0x148] sm:$0xff]   ;;  %v272_v17 = vrot.slane %v270_v9, 1  ;;  %v286_v19 = vrot.slane %v284_v11, 1 }
  0x24   : >> { %6596 = vmatpush3.bf16.msra.mxu0 %v7342_v20  ;;  %v280_v53 = vor.u32 %v279_v49, %v275_v43  ;;  %v294_v58 = vor.u32 %v293_v55, %v289_v47  ;;  %v7379_v4 = vld [vmem:[%s9757_s1 + $0x198] sm:$0xff]   ;;  %v7382_v7 = vld [vmem:[%s9757_s1 + $0x110] sm:$0xff]   ;;  %v7385_v12 = vld [vmem:[%s9757_s1 + $0x1c8] sm:$0xff]  }
  0x25   : >> { %6618 = vmatpush3.bf16.msra.mxu1 %v7343_v21  ;;  %6597 = vmatprep.subr.bf16.mxu0 %v7344_v22  ;;  %v7383_v8 = vld [vmem:[%s9757_s1 + $0x190] sm:$0xff]   ;;  %v7386_v14 = vld [vmem:[%s9757_s1 + $0x108] sm:$0xff]   ;;  %v7388_v18 = vld [vmem:[%s9757_s1 + $0x140] sm:$0xff]  }
  0x26   : >> { %6619 = vmatprep.subr.bf16.mxu1 %v7345_v23  ;;  %v7387_v16 = vld [vmem:[%s9757_s1 + $0x188] sm:$0xff]   ;;  %v7389_v20 = vld [vmem:[%s9757_s1 + $0x1c0] sm:$0xff]   ;;  %v273_v23 = vor.u32 %v272_v17, %v268_v13  ;;  %v7399_v34 = vld [vmem:[%s9757_s1 + $0x2b0] sm:$0xff]  }
  0x27   : >> { %v7390_v21 = vld [vmem:[%s9757_s1 + $0x100] sm:$0xff]   ;;  %v7400_v35 = vld [vmem:[%s9757_s1 + $0x268] sm:$0xff]   ;;  %v7412_v55 = vld [vmem:[%s9757_s1 + $0x250] sm:$0xff]  }
  0x28   : >> { %6598 = vmatpush3.bf16.msra.mxu0 %v7346_v24  ;;  %v7391_v22 = vld [vmem:[%s9757_s1 + $0x180] sm:$0xff]   ;;  %v287_v24 = vor.u32 %v286_v19, %v282_v15  ;;  %v7431_v17 = vld [vmem:[%s9757_s1 + $0x3b0] sm:$0xff]   ;;  %v7433_v19 = vld [vmem:[%s9757_s1 + $0x3e8] sm:$0xff]  }
  0x29   : >> { %6620 = vmatpush3.bf16.msra.mxu1 %v7347_v25  ;;  %6599 = vmatprep.subr.bf16.mxu0 %v7348_v26  ;;  %v7392_v25 = vld [vmem:[%s9757_s1 + $0x278] sm:$0xff]   ;;  %v7407_v49 = vld [vmem:[%s9757_s1 + $0x2a0] sm:$0xff]  }
  0x2a   : >> { %6621 = vmatprep.subr.bf16.mxu1 %v7349_v27  ;;  %v7393_v26 = vld [vmem:[%s9757_s1 + $0x2f8] sm:$0xff]  }
  0x2b   : >> { %v7394_v27 = vld [vmem:[%s9757_s1 + $0x238] sm:$0xff]  }
  0x2c   : >> { %6600 = vmatpush3.bf16.msra.mxu0 %v7350_v28  ;;  %v300_v28 = vrot.slane %v8044_v36, 1  ;;  %v7424_v36 = vld [vmem:[%s9757_s1 + $0x378] sm:$0xff]  }
  0x2d   : >> { %6622 = vmatpush3.bf16.msra.mxu1 %v7351_v29  ;;  %6601 = vmatprep.subr.bf16.mxu0 %v7352_v30  ;;  %v7395_v29 = vld [vmem:[%s9757_s1 + $0x2b8] sm:$0xff]   ;;  %v302_v30 = vrot.slane %v8046_v37, 1 }
  0x2e   : >> { %6623 = vmatprep.subr.bf16.mxu1 %v7353_v31  ;;  %v7396_v31 = vld [vmem:[%s9757_s1 + $0x270] sm:$0xff]   ;;  %v7427_v37 = vld [vmem:[%s9757_s1 + $0x3b8] sm:$0xff]  }
  0x30   : >> { %6602 = vmatpush3.bf16.msra.mxu0 %v7354_v32  ;;  %v7397_v32 = vld [vmem:[%s9757_s1 + $0x2f0] sm:$0xff]  }
  0x31   : >> { %6624 = vmatpush3.bf16.msra.mxu1 %v7355_v33  ;;  %6631 = vmatprep.subr.bf16.mxu0 %v7360_v40  ;;  %v7398_v33 = vld [vmem:[%s9757_s1 + $0x230] sm:$0xff]   ;;  %v7401_v40 = vld [vmem:[%s9757_s1 + $0x2e8] sm:$0xff]  }
  0x32   : >> { %6653 = vmatprep.subr.bf16.mxu1 %v7361_v41  ;;  %v7402_v41 = vld [vmem:[%s9757_s1 + $0x228] sm:$0xff]  }
  0x33   : >> { %4668 = vmatmul.mubr.bf16.vlgmr.msra.gmra.mxu0 %v8048_v38 }
  0x34   : >> { %4708 = vmatmul.mubr.bf16.vlgmr.msra.gmra.mxu1 %v8050_v39  ;;  %6632 = vmatpush3.bf16.msra.mxu0 %v7362_v42  ;;  %v7403_v42 = vld [vmem:[%s9757_s1 + $0x2a8] sm:$0xff]  }
  0x35   : >> { %6654 = vmatpush3.bf16.msra.mxu1 %v7363_v44  ;;  %6633 = vmatprep.subr.bf16.mxu0 %v7364_v46  ;;  %v7404_v44 = vld [vmem:[%s9757_s1 + $0x260] sm:$0xff]  }
  0x36   : >> { %6655 = vmatprep.subr.bf16.mxu1 %v7365_v48  ;;  %4747 = vmatprep.mubr.bf16.mxu0 %v280_v53  ;;  %v7405_v46 = vld [vmem:[%s9757_s1 + $0x2e0] sm:$0xff]   ;;  %v7410_v53 = vld [vmem:[%s9757_s1 + $0x218] sm:$0xff]  }
  0x37   : >> { %4787 = vmatprep.mubr.bf16.mxu1 %v294_v58  ;;  %v7406_v48 = vld [vmem:[%s9757_s1 + $0x220] sm:$0xff]   ;;  %v7415_v58 = vld [vmem:[%s9757_s1 + $0x290] sm:$0xff]  }
  0x38   : >> { %6634 = vmatpush3.bf16.msra.mxu0 %v7366_v50  ;;  %v7408_v50 = vld [vmem:[%s9757_s1 + $0x258] sm:$0xff]  }
  0x39   : >> { %6656 = vmatpush3.bf16.msra.mxu1 %v7367_v52  ;;  %6635 = vmatprep.subr.bf16.mxu0 %v7368_v54  ;;  %v7409_v52 = vld [vmem:[%s9757_s1 + $0x2d8] sm:$0xff]  }
  0x3a   : >> { %6657 = vmatprep.subr.bf16.mxu1 %v7369_v56  ;;  %v7411_v54 = vld [vmem:[%s9757_s1 + $0x298] sm:$0xff]   ;;  %v7413_v56 = vld [vmem:[%s9757_s1 + $0x2d0] sm:$0xff]  }
  0x3c   : >> { %6636 = vmatpush3.bf16.msra.mxu0 %v7370_v57  ;;  %v7414_v57 = vld [vmem:[%s9757_s1 + $0x210] sm:$0xff]  }
  0x3d   : >> { %6658 = vmatpush3.bf16.msra.mxu1 %v7371_v59  ;;  %6637 = vmatprep.subr.bf16.mxu0 %v7372_v60  ;;  %v7416_v59 = vld [vmem:[%s9757_s1 + $0x248] sm:$0xff]  }
  0x3e   : >> { %6659 = vmatprep.subr.bf16.mxu1 %v7373_v61  ;;  %v7417_v60 = vld [vmem:[%s9757_s1 + $0x2c8] sm:$0xff]  }
  0x3f   : >> { %v7418_v61 = vld [vmem:[%s9757_s1 + $0x208] sm:$0xff]  }
  0x40   : >> { %6638 = vmatpush3.bf16.msra.mxu0 %v7374_v62  ;;  %v7419_v62 = vld [vmem:[%s9757_s1 + $0x288] sm:$0xff]  }
  0x41   : >> { %6660 = vmatpush3.bf16.msra.mxu1 %v7375_v63  ;;  %6639 = vmatprep.subr.bf16.mxu0 %v7376_v0  ;;  %v299_v63 = vrot.slane %v8048_v38, 1  ;;  %v7420_v0 = vld [vmem:[%s9757_s1 + $0x240] sm:$0xff]  }
  0x42   : >> { %6661 = vmatprep.subr.bf16.mxu1 %v7377_v2  ;;  %v310_v2 = vrot.slane %v275_v43, 1  ;;  %v7423_v43 = vld [vmem:[%s9757_s1 + $0x280] sm:$0xff]  }
  0x43   : >> { %v7453_v38 = vld [vmem:[%s9757_s1 + $0x3c0] sm:$0xff]  }
  0x44   : >> { %6640 = vmatpush3.bf16.msra.mxu0 %v7378_v3  ;;  %v7421_v3 = vld [vmem:[%s9757_s1 + $0x2c0] sm:$0xff]  }
  0x45   : >> { %6662 = vmatpush3.bf16.msra.mxu1 %v7379_v4  ;;  %6641 = vmatprep.subr.bf16.mxu0 %v7380_v5  ;;  %v311_v4 = vrot.slane %v277_v45, 2  ;;  %v7422_v5 = vld [vmem:[%s9757_s1 + $0x200] sm:$0xff]   ;;  %v7425_v45 = vld [vmem:[%s9757_s1 + $0x3f8] sm:$0xff]  }
  0x46   : >> { %6663 = vmatprep.subr.bf16.mxu1 %v7381_v6  ;;  %v316_v6 = vrot.slane %v289_v47, 1  ;;  %v7426_v47 = vld [vmem:[%s9757_s1 + $0x338] sm:$0xff]  }
  0x48   : >> { %6642 = vmatpush3.bf16.msra.mxu0 %v7382_v7  ;;  %v317_v7 = vrot.slane %v291_v51, 2 }
  0x49   : >> { %6664 = vmatpush3.bf16.msra.mxu1 %v7383_v8  ;;  %6643 = vmatprep.subr.bf16.mxu0 %v7384_v10  ;;  %v301_v8 = vrot.slane %v8050_v39, 1  ;;  %v312_v10 = vor.u32 %v311_v4, %v310_v2  ;;  %v7456_v39 = vld [vmem:[%s9757_s1 + $0x478] sm:$0xff]   ;;  %v7471_v2 = vld [vmem:[%s9757_s1 + $0x4a0] sm:$0xff]  }
  0x4a   : >> { %6665 = vmatprep.subr.bf16.mxu1 %v7385_v12  ;;  %v318_v51 = vor.u32 %v317_v7, %v316_v6  ;;  %v7428_v12 = vld [vmem:[%s9757_s1 + $0x370] sm:$0xff]   ;;  %v7473_v4 = vld [vmem:[%s9757_s1 + $0x4d8] sm:$0xff]  }
  0x4b   : >> { %v7475_v6 = vld [vmem:[%s9757_s1 + $0x498] sm:$0xff]   ;;  %v7477_v7 = vld [vmem:[%s9757_s1 + $0x4d0] sm:$0xff]  }
  0x4c   : >> { %6644 = vmatpush3.bf16.msra.mxu0 %v7386_v14  ;;  %v7429_v14 = vld [vmem:[%s9757_s1 + $0x3f0] sm:$0xff]  }
  0x4d   : >> { %6666 = vmatpush3.bf16.msra.mxu1 %v7387_v16  ;;  %6645 = vmatprep.subr.bf16.mxu0 %v7388_v18  ;;  %v7430_v16 = vld [vmem:[%s9757_s1 + $0x330] sm:$0xff]   ;;  %v7432_v18 = vld [vmem:[%s9757_s1 + $0x368] sm:$0xff]  }
  0x4e   : >> { %6667 = vmatprep.subr.bf16.mxu1 %v7389_v20  ;;  %v7434_v20 = vld [vmem:[%s9757_s1 + $0x328] sm:$0xff]  }
  0x50   : >> { %6646 = vmatpush3.bf16.msra.mxu0 %v7390_v21  ;;  %v7435_v21 = vld [vmem:[%s9757_s1 + $0x3a8] sm:$0xff]  }
  0x51   : >> { %6668 = vmatpush3.bf16.msra.mxu1 %v7391_v22  ;;  %6675 = vmatprep.subr.bf16.mxu0 %v7392_v25  ;;  %v7436_v22 = vld [vmem:[%s9757_s1 + $0x360] sm:$0xff]  }
  0x52   : >> { %6697 = vmatprep.subr.bf16.mxu1 %v7393_v26  ;;  %v7439_v25 = vld [vmem:[%s9757_s1 + $0x3a0] sm:$0xff]   ;;  %v7440_v26 = vld [vmem:[%s9757_s1 + $0x358] sm:$0xff]  }
  0x53   : >> { %4748 = vmatmul.mubr.bf16.vlgmr.msra.gmra.mxu0 %v273_v23  ;;  %v7437_v23 = vld [vmem:[%s9757_s1 + $0x3e0] sm:$0xff]  }
  0x54   : >> { %4788 = vmatmul.mubr.bf16.vlgmr.msra.gmra.mxu1 %v287_v24  ;;  %6676 = vmatpush3.bf16.msra.mxu0 %v7394_v27  ;;  %v7438_v24 = vld [vmem:[%s9757_s1 + $0x320] sm:$0xff]   ;;  %v7441_v27 = vld [vmem:[%s9757_s1 + $0x3d8] sm:$0xff]  }
  0x55   : >> { %6698 = vmatpush3.bf16.msra.mxu1 %v7395_v29  ;;  %6677 = vmatprep.subr.bf16.mxu0 %v7396_v31  ;;  %v7443_v29 = vld [vmem:[%s9757_s1 + $0x398] sm:$0xff]   ;;  %v7445_v31 = vld [vmem:[%s9757_s1 + $0x3d0] sm:$0xff]  }
  0x56   : >> { %4827 = vmatprep.mubr.bf16.mxu0 %v300_v28  ;;  %6699 = vmatprep.subr.bf16.mxu1 %v7397_v32  ;;  %v7442_v28 = vld [vmem:[%s9757_s1 + $0x318] sm:$0xff]   ;;  %v7446_v32 = vld [vmem:[%s9757_s1 + $0x310] sm:$0xff]  }
  0x57   : >> { %4867 = vmatprep.mubr.bf16.mxu1 %v302_v30  ;;  %v7444_v30 = vld [vmem:[%s9757_s1 + $0x350] sm:$0xff]  }
  0x58   : >> { %6678 = vmatpush3.bf16.msra.mxu0 %v7398_v33  ;;  %v7447_v33 = vld [vmem:[%s9757_s1 + $0x390] sm:$0xff]  }
  0x59   : >> { %6700 = vmatpush3.bf16.msra.mxu1 %v7399_v34  ;;  %6679 = vmatprep.subr.bf16.mxu0 %v7400_v35  ;;  %v7448_v34 = vld [vmem:[%s9757_s1 + $0x348] sm:$0xff]  }
  0x5a   : >> { %6701 = vmatprep.subr.bf16.mxu1 %v7401_v40  ;;  %v7449_v35 = vld [vmem:[%s9757_s1 + $0x3c8] sm:$0xff]   ;;  %v307_v40 = vrot.slane %v268_v13, 1  ;;  %v7452_v13 = vld [vmem:[%s9757_s1 + $0x340] sm:$0xff]  }
  0x5c   : >> { %6680 = vmatpush3.bf16.msra.mxu0 %v7402_v41  ;;  %v7450_v41 = vld [vmem:[%s9757_s1 + $0x308] sm:$0xff]  }
  0x5d   : >> { %6702 = vmatpush3.bf16.msra.mxu1 %v7403_v42  ;;  %6681 = vmatprep.subr.bf16.mxu0 %v7404_v44  ;;  %v308_v42 = vrot.slane %v270_v9, 2  ;;  %v7451_v44 = vld [vmem:[%s9757_s1 + $0x388] sm:$0xff]   ;;  %v7454_v9 = vld [vmem:[%s9757_s1 + $0x300] sm:$0xff]  }
  0x5e   : >> { %6703 = vmatprep.subr.bf16.mxu1 %v7405_v46  ;;  %v313_v46 = vrot.slane %v282_v15, 1  ;;  %v7455_v15 = vld [vmem:[%s9757_s1 + $0x380] sm:$0xff]  }
  0x60   : >> { %6682 = vmatpush3.bf16.msra.mxu0 %v7406_v48  ;;  %v314_v48 = vrot.slane %v284_v11, 2  ;;  %v7457_v11 = vld [vmem:[%s9757_s1 + $0x4f8] sm:$0xff]  }
  0x61   : >> { %6704 = vmatpush3.bf16.msra.mxu1 %v7407_v49  ;;  %6683 = vmatprep.subr.bf16.mxu0 %v7408_v50  ;;  %v309_v49 = vor.u32 %v308_v42, %v307_v40  ;;  %v7499_v40 = vld [vmem:[%s9757_s1 + $0x5b0] sm:$0xff]   ;;  %v7500_v42 = vld [vmem:[%s9757_s1 + $0x568] sm:$0xff]  }
  0x62   : >> { %6705 = vmatprep.subr.bf16.mxu1 %v7409_v52  ;;  %v315_v50 = vor.u32 %v314_v48, %v313_v46  ;;  %v7458_v52 = vld [vmem:[%s9757_s1 + $0x438] sm:$0xff]   ;;  %v7503_v48 = vld [vmem:[%s9757_s1 + $0x5a8] sm:$0xff]  }
  0x64   : >> { %6684 = vmatpush3.bf16.msra.mxu0 %v7410_v53  ;;  %v7459_v53 = vld [vmem:[%s9757_s1 + $0x4b8] sm:$0xff]  }
  0x65   : >> { %6706 = vmatpush3.bf16.msra.mxu1 %v7411_v54  ;;  %6685 = vmatprep.subr.bf16.mxu0 %v7412_v55  ;;  %v7460_v54 = vld [vmem:[%s9757_s1 + $0x470] sm:$0xff]  }
  0x66   : >> { %6707 = vmatprep.subr.bf16.mxu1 %v7413_v56  ;;  %v7461_v55 = vld [vmem:[%s9757_s1 + $0x4f0] sm:$0xff]  }
  0x67   : >> { %v7462_v56 = vld [vmem:[%s9757_s1 + $0x430] sm:$0xff]  }
  0x68   : >> { %6686 = vmatpush3.bf16.msra.mxu0 %v7414_v57  ;;  %v7463_v57 = vld [vmem:[%s9757_s1 + $0x4b0] sm:$0xff]  }
  0x69   : >> { %6708 = vmatpush3.bf16.msra.mxu1 %v7415_v58  ;;  %6687 = vmatprep.subr.bf16.mxu0 %v7416_v59  ;;  %v7464_v58 = vld [vmem:[%s9757_s1 + $0x468] sm:$0xff]  }
  0x6a   : >> { %6709 = vmatprep.subr.bf16.mxu1 %v7417_v60  ;;  %v7465_v59 = vld [vmem:[%s9757_s1 + $0x4e8] sm:$0xff]  }
  0x6b   : >> { %v7466_v60 = vld [vmem:[%s9757_s1 + $0x428] sm:$0xff]  }
  0x6c   : >> { %6688 = vmatpush3.bf16.msra.mxu0 %v7418_v61  ;;  %v7467_v61 = vld [vmem:[%s9757_s1 + $0x4a8] sm:$0xff]  }
  0x6d   : >> { %6710 = vmatpush3.bf16.msra.mxu1 %v7419_v62  ;;  %6689 = vmatprep.subr.bf16.mxu0 %v7420_v0  ;;  %v7468_v62 = vld [vmem:[%s9757_s1 + $0x460] sm:$0xff]  }
  0x6e   : >> { %6711 = vmatprep.subr.bf16.mxu1 %v7421_v3  ;;  %v7470_v0 = vld [vmem:[%s9757_s1 + $0x420] sm:$0xff]   ;;  %v7472_v3 = vld [vmem:[%s9757_s1 + $0x458] sm:$0xff]  }
  0x70   : >> { %6690 = vmatpush3.bf16.msra.mxu0 %v7422_v5  ;;  %v7474_v5 = vld [vmem:[%s9757_s1 + $0x418] sm:$0xff]  }
  0x71   : >> { %6712 = vmatpush3.bf16.msra.mxu1 %v7423_v43  ;;  %6719 = vmatprep.subr.bf16.mxu0 %v7424_v36  ;;  %v7476_v43 = vld [vmem:[%s9757_s1 + $0x450] sm:$0xff]  }
  0x72   : >> { %6741 = vmatprep.subr.bf16.mxu1 %v7425_v45  ;;  %v7479_v36 = vld [vmem:[%s9757_s1 + $0x490] sm:$0xff]   ;;  %v7480_v45 = vld [vmem:[%s9757_s1 + $0x448] sm:$0xff]  }
  0x73   : >> { %4828 = vmatmul.mubr.bf16.vlgmr.msra.gmra.mxu0 %v299_v63  ;;  %v7469_v63 = vld [vmem:[%s9757_s1 + $0x4e0] sm:$0xff]  }
  0x74   : >> { %4868 = vmatmul.mubr.bf16.vlgmr.msra.gmra.mxu1 %v301_v8  ;;  %6720 = vmatpush3.bf16.msra.mxu0 %v7426_v47  ;;  %v7478_v8 = vld [vmem:[%s9757_s1 + $0x410] sm:$0xff]   ;;  %v7481_v47 = vld [vmem:[%s9757_s1 + $0x4c8] sm:$0xff]  }
  0x75   : >> { %6742 = vmatpush3.bf16.msra.mxu1 %v7427_v37  ;;  %6721 = vmatprep.subr.bf16.mxu0 %v7428_v12  ;;  %v7483_v37 = vld [vmem:[%s9757_s1 + $0x488] sm:$0xff]   ;;  %v7485_v12 = vld [vmem:[%s9757_s1 + $0x4c0] sm:$0xff]  }
  0x76   : >> { %4907 = vmatprep.mubr.bf16.mxu0 %v312_v10  ;;  %6743 = vmatprep.subr.bf16.mxu1 %v7429_v14  ;;  %v7482_v10 = vld [vmem:[%s9757_s1 + $0x408] sm:$0xff]   ;;  %v7486_v14 = vld [vmem:[%s9757_s1 + $0x400] sm:$0xff]  }
  0x77   : >> { %4947 = vmatprep.mubr.bf16.mxu1 %v318_v51  ;;  %v7484_v51 = vld [vmem:[%s9757_s1 + $0x440] sm:$0xff]  }
  0x78   : >> { %6722 = vmatpush3.bf16.msra.mxu0 %v7430_v16  ;;  %v7487_v16 = vld [vmem:[%s9757_s1 + $0x480] sm:$0xff]  }
  0x79   : >> { %6744 = vmatpush3.bf16.msra.mxu1 %v7431_v17  ;;  %6723 = vmatprep.subr.bf16.mxu0 %v7432_v18  ;;  %v6047_v17 = vld [vmem:[%s8034_s18 + $0x10] sm:$0x77] }
  0x7a   : >> { %6745 = vmatprep.subr.bf16.mxu1 %v7433_v19  ;;  %v8485_v18 = vcombine.high %v6047_v17, %v6047_v17  ;;  %v6048_v19 = vld [vmem:[%s8034_s18 + $0x18] sm:$0x77] }
  0x7c   : >> { %6724 = vmatpush3.bf16.msra.mxu0 %v7434_v20  ;;  %v8488_v20 = vcombine.low %v6047_v17, %v6047_v17  ;;  %v7531_v17 = vld [vmem:[%s9757_s1 + $0x6b0] sm:$0xff]  }
  0x7d   : >> { %6746 = vmatpush3.bf16.msra.mxu1 %v7435_v21  ;;  %6725 = vmatprep.subr.bf16.mxu0 %v7436_v22  ;;  %v8490_v21 = vcombine.high %v6048_v19, %v6048_v19  ;;  %v8492_v22 = vcombine.low %v6048_v19, %v6048_v19  ;;  %v7532_v19 = vld [vmem:[%s9757_s1 + $0x668] sm:$0xff]  }
  0x7e   : >> { %6747 = vmatprep.subr.bf16.mxu1 %v7437_v23  ;;  %v7492_v23 = vld [vmem:[%s9757_s1 + $0x578] sm:$0xff]  }
  0x80   : >> { %6726 = vmatpush3.bf16.msra.mxu0 %v7438_v24  ;;  %v7493_v24 = vld [vmem:[%s9757_s1 + $0x5f8] sm:$0xff]  }
  0x81   : >> { %6748 = vmatpush3.bf16.msra.mxu1 %v7439_v25  ;;  %6727 = vmatprep.subr.bf16.mxu0 %v7440_v26  ;;  %v345_v25 = vshrl.u32 %v8485_v18, 16  ;;  %v7494_v26 = vld [vmem:[%s9757_s1 + $0x538] sm:$0xff]  }
  0x82   : >> { %6749 = vmatprep.subr.bf16.mxu1 %v7441_v27  ;;  %v347_v27 = vshll.u32 %v8485_v18, 16 }
  0x84   : >> { %6728 = vmatpush3.bf16.msra.mxu0 %v7442_v28  ;;  %v7495_v28 = vld [vmem:[%s9757_s1 + $0x5b8] sm:$0xff]  }
  0x85   : >> { %6750 = vmatpush3.bf16.msra.mxu1 %v7443_v29  ;;  %6729 = vmatprep.subr.bf16.mxu0 %v7444_v30  ;;  %v359_v29 = vshrl.u32 %v8490_v21, 16  ;;  %v7496_v30 = vld [vmem:[%s9757_s1 + $0x570] sm:$0xff]  }
  0x86   : >> { %6751 = vmatprep.subr.bf16.mxu1 %v7445_v31  ;;  %v349_v31 = vrot.slane %v347_v27, 1 }
  0x88   : >> { %6730 = vmatpush3.bf16.msra.mxu0 %v7446_v32  ;;  %v7497_v32 = vld [vmem:[%s9757_s1 + $0x5f0] sm:$0xff]  }
  0x89   : >> { %6752 = vmatpush3.bf16.msra.mxu1 %v7447_v33  ;;  %6731 = vmatprep.subr.bf16.mxu0 %v7448_v34  ;;  %v361_v33 = vshll.u32 %v8490_v21, 16  ;;  %v7498_v34 = vld [vmem:[%s9757_s1 + $0x530] sm:$0xff]  }
  0x8a   : >> { %6753 = vmatprep.subr.bf16.mxu1 %v7449_v35  ;;  %v350_v35 = vor.u32 %v349_v31, %v345_v25  ;;  %v7538_v31 = vld [vmem:[%s9757_s1 + $0x620] sm:$0xff]  }
  0x8c   : >> { %6732 = vmatpush3.bf16.msra.mxu0 %v7450_v41  ;;  %v363_v41 = vrot.slane %v361_v33, 1 }
  0x8d   : >> { %6754 = vmatpush3.bf16.msra.mxu1 %v7451_v44  ;;  %6733 = vmatprep.subr.bf16.mxu0 %v7452_v13  ;;  %v7501_v44 = vld [vmem:[%s9757_s1 + $0x5e8] sm:$0xff]  }
  0x8e   : >> { %6755 = vmatprep.subr.bf16.mxu1 %v7453_v38  ;;  %v364_v46 = vor.u32 %v363_v41, %v359_v29  ;;  %v7502_v13 = vld [vmem:[%s9757_s1 + $0x528] sm:$0xff]   ;;  %v7504_v38 = vld [vmem:[%s9757_s1 + $0x560] sm:$0xff]   ;;  %v7543_v41 = vld [vmem:[%s9757_s1 + $0x698] sm:$0xff]  }
  0x90   : >> { %6734 = vmatpush3.bf16.msra.mxu0 %v7454_v9  ;;  %v7505_v9 = vld [vmem:[%s9757_s1 + $0x5e0] sm:$0xff]  }
  0x91   : >> { %6756 = vmatpush3.bf16.msra.mxu1 %v7455_v15  ;;  %6763 = vmatprep.subr.bf16.mxu0 %v7456_v39  ;;  %v7506_v15 = vld [vmem:[%s9757_s1 + $0x520] sm:$0xff]   ;;  %v7509_v39 = vld [vmem:[%s9757_s1 + $0x5d8] sm:$0xff]  }
  0x92   : >> { %6785 = vmatprep.subr.bf16.mxu1 %v7457_v11  ;;  %v7510_v11 = vld [vmem:[%s9757_s1 + $0x518] sm:$0xff]  }
  0x93   : >> { %4908 = vmatmul.mubr.bf16.vlgmr.msra.gmra.mxu0 %v309_v49  ;;  %v7507_v49 = vld [vmem:[%s9757_s1 + $0x5a0] sm:$0xff]  }
  0x94   : >> { %4948 = vmatmul.mubr.bf16.vlgmr.msra.gmra.mxu1 %v315_v50  ;;  %6764 = vmatpush3.bf16.msra.mxu0 %v7458_v52  ;;  %v7508_v50 = vld [vmem:[%s9757_s1 + $0x558] sm:$0xff]  }
  0x95   : >> { %6786 = vmatpush3.bf16.msra.mxu1 %v7459_v53  ;;  %6765 = vmatprep.subr.bf16.mxu0 %v7460_v54  ;;  %v7511_v52 = vld [vmem:[%s9757_s1 + $0x598] sm:$0xff]   ;;  %v7512_v53 = vld [vmem:[%s9757_s1 + $0x550] sm:$0xff]  }
  0x96   : >> { %6787 = vmatprep.subr.bf16.mxu1 %v7461_v55  ;;  %4987 = vmatprep.mubr.bf16.mxu0 %v8485_v18  ;;  %v7513_v54 = vld [vmem:[%s9757_s1 + $0x5d0] sm:$0xff]  }
  0x97   : >> { %5027 = vmatprep.mubr.bf16.mxu1 %v8490_v21  ;;  %v7514_v55 = vld [vmem:[%s9757_s1 + $0x510] sm:$0xff]  }
  0x98   : >> { %6766 = vmatpush3.bf16.msra.mxu0 %v7462_v56  ;;  %v7515_v56 = vld [vmem:[%s9757_s1 + $0x590] sm:$0xff]  }
  0x99   : >> { %6788 = vmatpush3.bf16.msra.mxu1 %v7463_v57  ;;  %6767 = vmatprep.subr.bf16.mxu0 %v7464_v58  ;;  %v340_v57 = vshll.u32 %v8488_v20, 16  ;;  %v7516_v58 = vld [vmem:[%s9757_s1 + $0x548] sm:$0xff]  }
  0x9a   : >> { %6789 = vmatprep.subr.bf16.mxu1 %v7465_v59  ;;  %v354_v59 = vshll.u32 %v8492_v22, 16 }
  0x9c   : >> { %6768 = vmatpush3.bf16.msra.mxu0 %v7466_v60  ;;  %v7517_v60 = vld [vmem:[%s9757_s1 + $0x5c8] sm:$0xff]  }
  0x9d   : >> { %6790 = vmatpush3.bf16.msra.mxu1 %v7467_v61  ;;  %6769 = vmatprep.subr.bf16.mxu0 %v7468_v62  ;;  %v338_v61 = vshrl.u32 %v8488_v20, 16  ;;  %v7518_v62 = vld [vmem:[%s9757_s1 + $0x508] sm:$0xff]  }
  0x9e   : >> { %6791 = vmatprep.subr.bf16.mxu1 %v7469_v63  ;;  %v352_v63 = vshrl.u32 %v8492_v22, 16 }
  0xa0   : >> { %6770 = vmatpush3.bf16.msra.mxu0 %v7470_v0  ;;  %v7519_v0 = vld [vmem:[%s9757_s1 + $0x588] sm:$0xff]  }
  0xa1   : >> { %6792 = vmatpush3.bf16.msra.mxu1 %v7471_v2  ;;  %6771 = vmatprep.subr.bf16.mxu0 %v7472_v3  ;;  %v342_v2 = vrot.slane %v340_v57, 1  ;;  %v7520_v3 = vld [vmem:[%s9757_s1 + $0x540] sm:$0xff]  }
  0xa2   : >> { %6793 = vmatprep.subr.bf16.mxu1 %v7473_v4  ;;  %v356_v4 = vrot.slane %v354_v59, 1 }
  0xa4   : >> { %6772 = vmatpush3.bf16.msra.mxu0 %v7474_v5  ;;  %v7521_v5 = vld [vmem:[%s9757_s1 + $0x5c0] sm:$0xff]  }
  0xa5   : >> { %6794 = vmatpush3.bf16.msra.mxu1 %v7475_v6  ;;  %6773 = vmatprep.subr.bf16.mxu0 %v7476_v43  ;;  %v7522_v6 = vld [vmem:[%s9757_s1 + $0x500] sm:$0xff]  }
  0xa6   : >> { %6795 = vmatprep.subr.bf16.mxu1 %v7477_v7  ;;  %v7523_v43 = vld [vmem:[%s9757_s1 + $0x580] sm:$0xff]   ;;  %v343_v7 = vor.u32 %v342_v2, %v338_v61 }
  0xa8   : >> { %6774 = vmatpush3.bf16.msra.mxu0 %v7478_v8  ;;  %v357_v8 = vor.u32 %v356_v4, %v352_v63 }
  0xa9   : >> { %6796 = vmatpush3.bf16.msra.mxu1 %v7479_v36  ;;  %6775 = vmatprep.subr.bf16.mxu0 %v7480_v45  ;;  %v7524_v36 = vld [vmem:[%s9757_s1 + $0x678] sm:$0xff]  }
  0xaa   : >> { %6797 = vmatprep.subr.bf16.mxu1 %v7481_v47  ;;  %v7525_v45 = vld [vmem:[%s9757_s1 + $0x6f8] sm:$0xff]   ;;  %v370_v47 = vrot.slane %v8485_v18, 1  ;;  %v7555_v18 = vld [vmem:[%s9757_s1 + $0x680] sm:$0xff]  }
  0xac   : >> { %6776 = vmatpush3.bf16.msra.mxu0 %v7482_v10  ;;  %v7526_v10 = vld [vmem:[%s9757_s1 + $0x638] sm:$0xff]  }
  0xad   : >> { %6798 = vmatpush3.bf16.msra.mxu1 %v7483_v37  ;;  %6777 = vmatprep.subr.bf16.mxu0 %v7484_v51  ;;  %v372_v37 = vrot.slane %v8490_v21, 1  ;;  %v7527_v51 = vld [vmem:[%s9757_s1 + $0x6b8] sm:$0xff]  }
  0xae   : >> { %6799 = vmatprep.subr.bf16.mxu1 %v7485_v12  ;;  %v7528_v12 = vld [vmem:[%s9757_s1 + $0x670] sm:$0xff]   ;;  %v7557_v21 = vld [vmem:[%s9757_s1 + $0x7f8] sm:$0xff]  }
  0xb0   : >> { %6778 = vmatpush3.bf16.msra.mxu0 %v7486_v14  ;;  %v7529_v14 = vld [vmem:[%s9757_s1 + $0x6f0] sm:$0xff]  }
  0xb1   : >> { %6800 = vmatpush3.bf16.msra.mxu1 %v7487_v16  ;;  %6807 = vmatprep.subr.bf16.mxu0 %v7492_v23  ;;  %v7530_v16 = vld [vmem:[%s9757_s1 + $0x630] sm:$0xff]   ;;  %v7533_v23 = vld [vmem:[%s9757_s1 + $0x6e8] sm:$0xff]  }
  0xb2   : >> { %6829 = vmatprep.subr.bf16.mxu1 %v7493_v24  ;;  %v7534_v24 = vld [vmem:[%s9757_s1 + $0x628] sm:$0xff]  }
  0xb3   : >> { %4988 = vmatmul.mubr.bf16.vlgmr.msra.gmra.mxu0 %v8488_v20 }
  0xb4   : >> { %5028 = vmatmul.mubr.bf16.vlgmr.msra.gmra.mxu1 %v8492_v22  ;;  %6808 = vmatpush3.bf16.msra.mxu0 %v7494_v26  ;;  %v7535_v26 = vld [vmem:[%s9757_s1 + $0x6a8] sm:$0xff]  }
  0xb5   : >> { %6830 = vmatpush3.bf16.msra.mxu1 %v7495_v28  ;;  %6809 = vmatprep.subr.bf16.mxu0 %v7496_v30  ;;  %v7536_v28 = vld [vmem:[%s9757_s1 + $0x660] sm:$0xff]  }
  0xb6   : >> { %6831 = vmatprep.subr.bf16.mxu1 %v7497_v32  ;;  %5067 = vmatprep.mubr.bf16.mxu0 %v350_v35  ;;  %v7537_v30 = vld [vmem:[%s9757_s1 + $0x6e0] sm:$0xff]   ;;  %v7541_v35 = vld [vmem:[%s9757_s1 + $0x6d8] sm:$0xff]  }
  0xb7   : >> { %5107 = vmatprep.mubr.bf16.mxu1 %v364_v46  ;;  %v7539_v32 = vld [vmem:[%s9757_s1 + $0x6a0] sm:$0xff]   ;;  %v7546_v46 = vld [vmem:[%s9757_s1 + $0x610] sm:$0xff]  }
  0xb8   : >> { %6810 = vmatpush3.bf16.msra.mxu0 %v7498_v34  ;;  %v7540_v34 = vld [vmem:[%s9757_s1 + $0x658] sm:$0xff]  }
  0xb9   : >> { %6832 = vmatpush3.bf16.msra.mxu1 %v7499_v40  ;;  %6811 = vmatprep.subr.bf16.mxu0 %v7500_v42  ;;  %v7542_v40 = vld [vmem:[%s9757_s1 + $0x618] sm:$0xff]   ;;  %v7544_v42 = vld [vmem:[%s9757_s1 + $0x650] sm:$0xff]  }
  0xba   : >> { %6833 = vmatprep.subr.bf16.mxu1 %v7501_v44  ;;  %v7545_v44 = vld [vmem:[%s9757_s1 + $0x6d0] sm:$0xff]  }
  0xbc   : >> { %6812 = vmatpush3.bf16.msra.mxu0 %v7502_v13  ;;  %v7547_v13 = vld [vmem:[%s9757_s1 + $0x690] sm:$0xff]  }
  0xbd   : >> { %6834 = vmatpush3.bf16.msra.mxu1 %v7503_v48  ;;  %6813 = vmatprep.subr.bf16.mxu0 %v7504_v38  ;;  %v7548_v48 = vld [vmem:[%s9757_s1 + $0x648] sm:$0xff]  }
  0xbe   : >> { %6835 = vmatprep.subr.bf16.mxu1 %v7505_v9  ;;  %v7549_v38 = vld [vmem:[%s9757_s1 + $0x6c8] sm:$0xff]  }
  0xbf   : >> { %v7550_v9 = vld [vmem:[%s9757_s1 + $0x608] sm:$0xff]  }
  0xc0   : >> { %6814 = vmatpush3.bf16.msra.mxu0 %v7506_v15  ;;  %v7551_v15 = vld [vmem:[%s9757_s1 + $0x688] sm:$0xff]  }
  0xc1   : >> { %6836 = vmatpush3.bf16.msra.mxu1 %v7507_v49  ;;  %6815 = vmatprep.subr.bf16.mxu0 %v7508_v50  ;;  %v380_v49 = vrot.slane %v345_v25, 1  ;;  %v7552_v50 = vld [vmem:[%s9757_s1 + $0x640] sm:$0xff]  }
  0xc2   : >> { %6837 = vmatprep.subr.bf16.mxu1 %v7509_v39  ;;  %v381_v39 = vrot.slane %v347_v27, 2  ;;  %v7554_v25 = vld [vmem:[%s9757_s1 + $0x600] sm:$0xff]   ;;  %v369_v27 = vrot.slane %v8488_v20, 1 }
  0xc3   : >> { %v7585_v20 = vld [vmem:[%s9757_s1 + $0x7c0] sm:$0xff]  }
  0xc4   : >> { %6816 = vmatpush3.bf16.msra.mxu0 %v7510_v11  ;;  %v7553_v11 = vld [vmem:[%s9757_s1 + $0x6c0] sm:$0xff]  }
  0xc5   : >> { %6838 = vmatpush3.bf16.msra.mxu1 %v7511_v52  ;;  %6817 = vmatprep.subr.bf16.mxu0 %v7512_v53  ;;  %v386_v52 = vrot.slane %v359_v29, 1  ;;  %v387_v53 = vrot.slane %v361_v33, 2  ;;  %v7556_v29 = vld [vmem:[%s9757_s1 + $0x778] sm:$0xff]   ;;  %v382_v33 = vor.u32 %v381_v39, %v380_v49 }
  0xc6   : >> { %6839 = vmatprep.subr.bf16.mxu1 %v7513_v54  ;;  %v371_v54 = vrot.slane %v8492_v22, 1  ;;  %v7588_v22 = vld [vmem:[%s9757_s1 + $0x878] sm:$0xff]  }
  0xc8   : >> { %6818 = vmatpush3.bf16.msra.mxu0 %v7514_v55 }
  0xc9   : >> { %6840 = vmatpush3.bf16.msra.mxu1 %v7515_v56  ;;  %6819 = vmatprep.subr.bf16.mxu0 %v7516_v58  ;;  %v7558_v58 = vld [vmem:[%s9757_s1 + $0x738] sm:$0xff]  }
  0xca   : >> { %6841 = vmatprep.subr.bf16.mxu1 %v7517_v60  ;;  %v388_v60 = vor.u32 %v387_v53, %v386_v52  ;;  %v7591_v52 = vld [vmem:[%s9757_s1 + $0x8b8] sm:$0xff]  }
  0xcc   : >> { %6820 = vmatpush3.bf16.msra.mxu0 %v7518_v62  ;;  %v7559_v62 = vld [vmem:[%s9757_s1 + $0x7b8] sm:$0xff]  }
  0xcd   : >> { %6842 = vmatpush3.bf16.msra.mxu1 %v7519_v0  ;;  %6821 = vmatprep.subr.bf16.mxu0 %v7520_v3  ;;  %v7560_v3 = vld [vmem:[%s9757_s1 + $0x770] sm:$0xff]  }
  0xce   : >> { %6843 = vmatprep.subr.bf16.mxu1 %v7521_v5 }
  0xd0   : >> { %6822 = vmatpush3.bf16.msra.mxu0 %v7522_v6  ;;  %v7561_v6 = vld [vmem:[%s9757_s1 + $0x7f0] sm:$0xff]  }
  0xd1   : >> { %6844 = vmatpush3.bf16.msra.mxu1 %v7523_v43  ;;  %6851 = vmatprep.subr.bf16.mxu0 %v7524_v36 }
  0xd2   : >> { %6873 = vmatprep.subr.bf16.mxu1 %v7525_v45  ;;  %v7563_v45 = vld [vmem:[%s9757_s1 + $0x7b0] sm:$0xff]  }
  0xd3   : >> { %5068 = vmatmul.mubr.bf16.vlgmr.msra.gmra.mxu0 %v343_v7 }
  0xd4   : >> { %5108 = vmatmul.mubr.bf16.vlgmr.msra.gmra.mxu1 %v357_v8  ;;  %6852 = vmatpush3.bf16.msra.mxu0 %v7526_v10  ;;  %v7562_v8 = vld [vmem:[%s9757_s1 + $0x730] sm:$0xff]  }
  0xd5   : >> { %6874 = vmatpush3.bf16.msra.mxu1 %v7527_v51  ;;  %5147 = vmatprep.mubr.bf16.mxu0 %v370_v47 }
  0xd6   : >> { %6853 = vmatprep.subr.bf16.mxu0 %v7528_v12  ;;  %5187 = vmatprep.mubr.bf16.mxu1 %v372_v37  ;;  %v7564_v37 = vld [vmem:[%s9757_s1 + $0x768] sm:$0xff]  }
  0xd7   : >> { %6875 = vmatprep.subr.bf16.mxu1 %v7529_v14  ;;  %v7565_v12 = vld [vmem:[%s9757_s1 + $0x7e8] sm:$0xff]  }
  0xd8   : >> { %6854 = vmatpush3.bf16.msra.mxu0 %v7530_v16  ;;  %v7566_v14 = vld [vmem:[%s9757_s1 + $0x728] sm:$0xff]  }
  0xd9   : >> { %6876 = vmatpush3.bf16.msra.mxu1 %v7531_v17  ;;  %6855 = vmatprep.subr.bf16.mxu0 %v7532_v19  ;;  %v7567_v16 = vld [vmem:[%s9757_s1 + $0x7a8] sm:$0xff]   ;;  %v7568_v17 = vld [vmem:[%s9757_s1 + $0x760] sm:$0xff]  }
  0xda   : >> { %6877 = vmatprep.subr.bf16.mxu1 %v7533_v23  ;;  %v7569_v19 = vld [vmem:[%s9757_s1 + $0x7e0] sm:$0xff]  }
  0xdb   : >> { %v7570_v23 = vld [vmem:[%s9757_s1 + $0x720] sm:$0xff]  }
  0xdc   : >> { %6856 = vmatpush3.bf16.msra.mxu0 %v7534_v24  ;;  %v7571_v24 = vld [vmem:[%s9757_s1 + $0x7a0] sm:$0xff]  }
  0xdd   : >> { %6878 = vmatpush3.bf16.msra.mxu1 %v7535_v26  ;;  %6857 = vmatprep.subr.bf16.mxu0 %v7536_v28  ;;  %v7572_v26 = vld [vmem:[%s9757_s1 + $0x758] sm:$0xff]  }
  0xde   : >> { %6879 = vmatprep.subr.bf16.mxu1 %v7537_v30  ;;  %v7573_v28 = vld [vmem:[%s9757_s1 + $0x7d8] sm:$0xff]  }
  0xdf   : >> { %v7574_v30 = vld [vmem:[%s9757_s1 + $0x718] sm:$0xff]  }
  0xe0   : >> { %6858 = vmatpush3.bf16.msra.mxu0 %v7538_v31  ;;  %v7575_v31 = vld [vmem:[%s9757_s1 + $0x798] sm:$0xff]  }
  0xe1   : >> { %6880 = vmatpush3.bf16.msra.mxu1 %v7539_v32  ;;  %6859 = vmatprep.subr.bf16.mxu0 %v7540_v34  ;;  %v7576_v32 = vld [vmem:[%s9757_s1 + $0x750] sm:$0xff]  }
  0xe2   : >> { %6881 = vmatprep.subr.bf16.mxu1 %v7541_v35  ;;  %v7577_v34 = vld [vmem:[%s9757_s1 + $0x7d0] sm:$0xff]  }
  0xe3   : >> { %v7578_v35 = vld [vmem:[%s9757_s1 + $0x710] sm:$0xff]  }
  0xe4   : >> { %6860 = vmatpush3.bf16.msra.mxu0 %v7542_v40  ;;  %v7579_v40 = vld [vmem:[%s9757_s1 + $0x790] sm:$0xff]  }
  0xe5   : >> { %6882 = vmatpush3.bf16.msra.mxu1 %v7543_v41  ;;  %6861 = vmatprep.subr.bf16.mxu0 %v7544_v42  ;;  %v7580_v41 = vld [vmem:[%s9757_s1 + $0x748] sm:$0xff]  }
  0xe6   : >> { %6883 = vmatprep.subr.bf16.mxu1 %v7545_v44  ;;  %v7581_v42 = vld [vmem:[%s9757_s1 + $0x7c8] sm:$0xff]   ;;  %v377_v44 = vrot.slane %v338_v61, 1  ;;  %v7584_v61 = vld [vmem:[%s9757_s1 + $0x740] sm:$0xff]  }
  0xe8   : >> { %6862 = vmatpush3.bf16.msra.mxu0 %v7546_v46  ;;  %v7582_v46 = vld [vmem:[%s9757_s1 + $0x708] sm:$0xff]  }
  0xe9   : >> { %6884 = vmatpush3.bf16.msra.mxu1 %v7547_v13  ;;  %6863 = vmatprep.subr.bf16.mxu0 %v7548_v48  ;;  %v378_v13 = vrot.slane %v340_v57, 2  ;;  %v7583_v48 = vld [vmem:[%s9757_s1 + $0x788] sm:$0xff]   ;;  %v7586_v57 = vld [vmem:[%s9757_s1 + $0x700] sm:$0xff]  }
  0xea   : >> { %6885 = vmatprep.subr.bf16.mxu1 %v7549_v38  ;;  %v383_v38 = vrot.slane %v352_v63, 1  ;;  %v7587_v63 = vld [vmem:[%s9757_s1 + $0x780] sm:$0xff]  }
  0xec   : >> { %6864 = vmatpush3.bf16.msra.mxu0 %v7550_v9  ;;  %v384_v9 = vrot.slane %v354_v59, 2  ;;  %v7589_v59 = vld [vmem:[%s9757_s1 + $0x8f8] sm:$0xff]  }
  0xed   : >> { %6886 = vmatpush3.bf16.msra.mxu1 %v7551_v15  ;;  %6865 = vmatprep.subr.bf16.mxu0 %v7552_v50  ;;  %v379_v15 = vor.u32 %v378_v13, %v377_v44  ;;  %v7590_v50 = vld [vmem:[%s9757_s1 + $0x838] sm:$0xff]  }
  0xee   : >> { %6887 = vmatprep.subr.bf16.mxu1 %v7553_v11  ;;  %v385_v49 = vor.u32 %v384_v9, %v383_v38  ;;  %v7625_v44 = vld [vmem:[%s9757_s1 + $0x9f8] sm:$0xff]  }
  0xf0   : >> { %6866 = vmatpush3.bf16.msra.mxu0 %v7554_v25  ;;  %v7592_v25 = vld [vmem:[%s9757_s1 + $0x870] sm:$0xff]  }
  0xf1   : >> { %6888 = vmatpush3.bf16.msra.mxu1 %v7555_v18  ;;  %6895 = vmatprep.subr.bf16.mxu0 %v7556_v29 }
  0xf2   : >> { %6917 = vmatprep.subr.bf16.mxu1 %v7557_v21  ;;  %v7594_v21 = vld [vmem:[%s9757_s1 + $0x830] sm:$0xff]  }
  0xf3   : >> { %v6603_v55 = vpop.f32.mrf.mxu0  ;;  %5148 = vmatmul.mubr.bf16.vlgmr.msra.gmra.mxu0 %v369_v27  ;;  %v7593_v27 = vld [vmem:[%s9757_s1 + $0x8f0] sm:$0xff]  }
  0xf4   : >> { %v6625_v56 = vpop.f32.mrf.mxu1  ;;  %5188 = vmatmul.mubr.bf16.vlgmr.msra.gmra.mxu1 %v371_v54  ;;  %6896 = vmatpush3.bf16.msra.mxu0 %v7558_v58 }
  0xf5   : >> { %v6604_v0 = vpop.f32.mrf.mxu0  ;;  %6918 = vmatpush3.bf16.msra.mxu1 %v7559_v62  ;;  %5227 = vmatprep.mubr.bf16.mxu0 %v382_v33 }
  0xf6   : >> { %v6626_v2 = vpop.f32.mrf.mxu1  ;;  %v6605_v4 = vadd.f32 %v6604_v0, %v6603_v55  ;;  %6897 = vmatprep.subr.bf16.mxu0 %v7560_v3  ;;  %5267 = vmatprep.mubr.bf16.mxu1 %v388_v60  ;;  %v7596_v60 = vld [vmem:[%s9757_s1 + $0x868] sm:$0xff]  }
  0xf7   : >> { %v6627_v5 = vadd.f32 %v6626_v2, %v6625_v56  ;;  %v6606_v43 = vpop.f32.mrf.mxu0  ;;  %6919 = vmatprep.subr.bf16.mxu1 %v7561_v6  ;;  %v7595_v56 = vld [vmem:[%s9757_s1 + $0x8b0] sm:$0xff]   ;;  %v7597_v2 = vld [vmem:[%s9757_s1 + $0x8e8] sm:$0xff]   ;;  %v7600_v6 = vld [vmem:[%s9757_s1 + $0x860] sm:$0xff]  }
  0xf8   : >> { %v6628_v7 = vpop.f32.mrf.mxu1  ;;  %v4670_v36 = vadd.f32 %v6605_v4, %v7925_v1  ;;  %6898 = vmatpush3.bf16.msra.mxu0 %v7562_v8  ;;  %v7598_v4 = vld [vmem:[%s9757_s1 + $0x828] sm:$0xff]   ;;  %v7601_v43 = vld [vmem:[%s9757_s1 + $0x8e0] sm:$0xff]  }
  0xf9   : >> { %v6607_v47 = vpop.f32.mrf.mxu0  ;;  %6920 = vmatpush3.bf16.msra.mxu1 %v7563_v45  ;;  %6899 = vmatprep.subr.bf16.mxu0 %v7564_v37  ;;  %v7602_v7 = vld [vmem:[%s9757_s1 + $0x820] sm:$0xff]   ;;  %v7605_v45 = vld [vmem:[%s9757_s1 + $0x8d8] sm:$0xff]   ;;  %v7608_v37 = vld [vmem:[%s9757_s1 + $0x850] sm:$0xff]  }
  0xfa   : >> { %v6629_v10 = vpop.f32.mrf.mxu1  ;;  %v8754_v51 = vadd.f32 %v6627_v5, %v4670_v36  ;;  %6921 = vmatprep.subr.bf16.mxu1 %v7565_v12  ;;  %v7599_v5 = vld [vmem:[%s9757_s1 + $0x8a8] sm:$0xff]   ;;  %v7603_v8 = vld [vmem:[%s9757_s1 + $0x8a0] sm:$0xff]   ;;  %v7604_v36 = vld [vmem:[%s9757_s1 + $0x858] sm:$0xff]  }
  0xfb   : >> { %v7606_v47 = vld [vmem:[%s9757_s1 + $0x818] sm:$0xff]   ;;  %v7610_v12 = vld [vmem:[%s9757_s1 + $0x810] sm:$0xff]  }
  0xfc   : >> { %6900 = vmatpush3.bf16.msra.mxu0 %v7566_v14  ;;  %v7607_v10 = vld [vmem:[%s9757_s1 + $0x898] sm:$0xff]   ;;  %v7611_v14 = vld [vmem:[%s9757_s1 + $0x890] sm:$0xff]  }
  0xfd   : >> { %6922 = vmatpush3.bf16.msra.mxu1 %v7567_v16  ;;  %6901 = vmatprep.subr.bf16.mxu0 %v7568_v17  ;;  %v7612_v16 = vld [vmem:[%s9757_s1 + $0x848] sm:$0xff]  }
  0xfe   : >> { %6923 = vmatprep.subr.bf16.mxu1 %v7569_v19  ;;  %v7613_v17 = vld [vmem:[%s9757_s1 + $0x8c8] sm:$0xff]  }
  0xff   : >> { %v7614_v19 = vld [vmem:[%s9757_s1 + $0x808] sm:$0xff]  }
 0x100   : >> { %6902 = vmatpush3.bf16.msra.mxu0 %v7570_v23  ;;  %v7615_v23 = vld [vmem:[%s9757_s1 + $0x888] sm:$0xff]  }
 0x101   : >> { %6924 = vmatpush3.bf16.msra.mxu1 %v7571_v24  ;;  %6903 = vmatprep.subr.bf16.mxu0 %v7572_v26  ;;  %v7616_v24 = vld [vmem:[%s9757_s1 + $0x840] sm:$0xff]  }
 0x102   : >> { %6925 = vmatprep.subr.bf16.mxu1 %v7573_v28  ;;  %v7617_v26 = vld [vmem:[%s9757_s1 + $0x8c0] sm:$0xff]  }
 0x103   : >> { %v7618_v28 = vld [vmem:[%s9757_s1 + $0x800] sm:$0xff]  }
 0x104   : >> { %6904 = vmatpush3.bf16.msra.mxu0 %v7574_v30  ;;  %v7619_v30 = vld [vmem:[%s9757_s1 + $0x880] sm:$0xff]  }
 0x105   : >> { %6926 = vmatpush3.bf16.msra.mxu1 %v7575_v31  ;;  %6905 = vmatprep.subr.bf16.mxu0 %v7576_v32  ;;  %v6050_v31 = vld [vmem:[%s8034_s18 + $0x20] sm:$0x77]  ;;  %v6051_v32 = vld [vmem:[%s8034_s18 + $0x28] sm:$0x77] }
 0x106   : >> { %6927 = vmatprep.subr.bf16.mxu1 %v7577_v34  ;;  %v8934_v34 = vcombine.high %v6050_v31, %v6050_v31 }
 0x108   : >> { %6906 = vmatpush3.bf16.msra.mxu0 %v7578_v35  ;;  %v8936_v35 = vcombine.high %v6051_v32, %v6051_v32  ;;  %v415_v13 = vshrl.u32 %v8934_v34, 16  ;;  %v417_v9 = vshll.u32 %v8934_v34, 16 }
 0x109   : >> { %6928 = vmatpush3.bf16.msra.mxu1 %v7579_v40  ;;  %6907 = vmatprep.subr.bf16.mxu0 %v7580_v41  ;;  %v8938_v40 = vcombine.low %v6050_v31, %v6050_v31  ;;  %v8940_v41 = vcombine.low %v6051_v32, %v6051_v32  ;;  %v7655_v31 = vld [vmem:[%s9757_s1 + $0x980] sm:$0xff]  }
 0x10a   : >> { %6929 = vmatprep.subr.bf16.mxu1 %v7581_v42  ;;  %v7624_v42 = vld [vmem:[%s9757_s1 + $0x978] sm:$0xff]  }
 0x10c   : >> { %6908 = vmatpush3.bf16.msra.mxu0 %v7582_v46  ;;  %v7626_v46 = vld [vmem:[%s9757_s1 + $0x938] sm:$0xff]  }
 0x10d   : >> { %6930 = vmatpush3.bf16.msra.mxu1 %v7583_v48  ;;  %6909 = vmatprep.subr.bf16.mxu0 %v7584_v61  ;;  %v7627_v61 = vld [vmem:[%s9757_s1 + $0x9b8] sm:$0xff]  }
 0x10e   : >> { %6931 = vmatprep.subr.bf16.mxu1 %v7585_v20  ;;  %v7628_v20 = vld [vmem:[%s9757_s1 + $0x970] sm:$0xff]  }
 0x110   : >> { %6910 = vmatpush3.bf16.msra.mxu0 %v7586_v57  ;;  %v429_v57 = vshrl.u32 %v8936_v35, 16 }
 0x111   : >> { %6932 = vmatpush3.bf16.msra.mxu1 %v7587_v63  ;;  %6939 = vmatprep.subr.bf16.mxu0 %v7588_v22  ;;  %v419_v22 = vrot.slane %v417_v9, 1 }
 0x112   : >> { %6961 = vmatprep.subr.bf16.mxu1 %v7589_v59 }
 0x113   : >> { %v6647_v39 = vpop.f32.mrf.mxu0  ;;  %5228 = vmatmul.mubr.bf16.vlgmr.msra.gmra.mxu0 %v379_v15 }
 0x114   : >> { %v6669_v11 = vpop.f32.mrf.mxu1  ;;  %5268 = vmatmul.mubr.bf16.vlgmr.msra.gmra.mxu1 %v385_v49  ;;  %6940 = vmatpush3.bf16.msra.mxu0 %v7590_v50  ;;  %v7629_v49 = vld [vmem:[%s9757_s1 + $0x9f0] sm:$0xff]  }
 0x115   : >> { %6962 = vmatpush3.bf16.msra.mxu1 %v7591_v52  ;;  %v6648_v53 = vpop.f32.mrf.mxu0  ;;  %6941 = vmatprep.subr.bf16.mxu0 %v7592_v25 }
 0x116   : >> { %v6670_v18 = vpop.f32.mrf.mxu1  ;;  %v6649_v54 = vadd.f32 %v6648_v53, %v6647_v39  ;;  %6963 = vmatprep.subr.bf16.mxu1 %v7593_v27  ;;  %5307 = vmatprep.mubr.bf16.mxu0 %v8934_v34  ;;  %v7630_v39 = vld [vmem:[%s9757_s1 + $0x930] sm:$0xff]  }
 0x117   : >> { %v6671_v29 = vadd.f32 %v6670_v18, %v6669_v11  ;;  %v6650_v33 = vpop.f32.mrf.mxu0  ;;  %5347 = vmatprep.mubr.bf16.mxu1 %v8936_v35  ;;  %v431_v11 = vshll.u32 %v8936_v35, 16  ;;  %v7631_v53 = vld [vmem:[%s9757_s1 + $0x9b0] sm:$0xff]   ;;  %v420_v18 = vor.u32 %v419_v22, %v415_v13 }
 0x118   : >> { %v6672_v55 = vpop.f32.mrf.mxu1  ;;  %v4750_v58 = vadd.f32 %v6649_v54, %v8754_v51  ;;  %6942 = vmatpush3.bf16.msra.mxu0 %v7594_v21  ;;  %v7609_v51 = vld [vmem:[%s9757_s1 + $0x8d0] sm:$0xff]   ;;  %v7632_v54 = vld [vmem:[%s9757_s1 + $0x968] sm:$0xff]  }
 0x119   : >> { %6964 = vmatpush3.bf16.msra.mxu1 %v7595_v56  ;;  %v6651_v62 = vpop.f32.mrf.mxu0  ;;  %6943 = vmatprep.subr.bf16.mxu0 %v7596_v60  ;;  %v7633_v55 = vld [vmem:[%s9757_s1 + $0x9e8] sm:$0xff]  }
 0x11a   : >> { %v6673_v0 = vpop.f32.mrf.mxu1  ;;  %v8864_v3 = vadd.f32 %v6671_v29, %v4750_v58  ;;  %6965 = vmatprep.subr.bf16.mxu1 %v7597_v2  ;;  %v433_v29 = vrot.slane %v431_v11, 1  ;;  %v7634_v58 = vld [vmem:[%s9757_s1 + $0x928] sm:$0xff]   ;;  %v7637_v2 = vld [vmem:[%s9757_s1 + $0x9e0] sm:$0xff]  }
 0x11b   : >> { %v7635_v62 = vld [vmem:[%s9757_s1 + $0x9a8] sm:$0xff]   ;;  %v7636_v0 = vld [vmem:[%s9757_s1 + $0x960] sm:$0xff]  }
 0x11c   : >> { %6944 = vmatpush3.bf16.msra.mxu0 %v7598_v4  ;;  %v434_v60 = vor.u32 %v433_v29, %v429_v57  ;;  %v7639_v4 = vld [vmem:[%s9757_s1 + $0x9a0] sm:$0xff]   ;;  %v7664_v29 = vld [vmem:[%s9757_s1 + $0xa68] sm:$0xff]  }
 0x11d   : >> { %6966 = vmatpush3.bf16.msra.mxu1 %v7599_v5  ;;  %6945 = vmatprep.subr.bf16.mxu0 %v7600_v6  ;;  %v7640_v5 = vld [vmem:[%s9757_s1 + $0x958] sm:$0xff]  }
 0x11e   : >> { %6967 = vmatprep.subr.bf16.mxu1 %v7601_v43  ;;  %v7641_v6 = vld [vmem:[%s9757_s1 + $0x9d8] sm:$0xff]  }
 0x11f   : >> { %v7642_v43 = vld [vmem:[%s9757_s1 + $0x918] sm:$0xff]  }
 0x120   : >> { %6946 = vmatpush3.bf16.msra.mxu0 %v7602_v7  ;;  %v7643_v7 = vld [vmem:[%s9757_s1 + $0x998] sm:$0xff]  }
 0x121   : >> { %6968 = vmatpush3.bf16.msra.mxu1 %v7603_v8  ;;  %6947 = vmatprep.subr.bf16.mxu0 %v7604_v36  ;;  %v7644_v8 = vld [vmem:[%s9757_s1 + $0x950] sm:$0xff]  }
 0x122   : >> { %6969 = vmatprep.subr.bf16.mxu1 %v7605_v45  ;;  %v7645_v36 = vld [vmem:[%s9757_s1 + $0x9d0] sm:$0xff]  }
 0x123   : >> { %v7646_v45 = vld [vmem:[%s9757_s1 + $0x910] sm:$0xff]  }
 0x124   : >> { %6948 = vmatpush3.bf16.msra.mxu0 %v7606_v47  ;;  %v7647_v47 = vld [vmem:[%s9757_s1 + $0x990] sm:$0xff]  }
 0x125   : >> { %6970 = vmatpush3.bf16.msra.mxu1 %v7607_v10  ;;  %6949 = vmatprep.subr.bf16.mxu0 %v7608_v37  ;;  %v410_v10 = vshll.u32 %v8938_v40, 16  ;;  %v7648_v37 = vld [vmem:[%s9757_s1 + $0x948] sm:$0xff]  }
 0x126   : >> { %6971 = vmatprep.subr.bf16.mxu1 %v7609_v51  ;;  %v424_v51 = vshll.u32 %v8940_v41, 16 }
 0x128   : >> { %6950 = vmatpush3.bf16.msra.mxu0 %v7610_v12  ;;  %v7649_v12 = vld [vmem:[%s9757_s1 + $0x9c8] sm:$0xff]  }
 0x129   : >> { %6972 = vmatpush3.bf16.msra.mxu1 %v7611_v14  ;;  %6951 = vmatprep.subr.bf16.mxu0 %v7612_v16  ;;  %v408_v14 = vshrl.u32 %v8938_v40, 16  ;;  %v7650_v16 = vld [vmem:[%s9757_s1 + $0x908] sm:$0xff]  }
 0x12a   : >> { %6973 = vmatprep.subr.bf16.mxu1 %v7613_v17  ;;  %v422_v17 = vshrl.u32 %v8940_v41, 16 }
 0x12c   : >> { %6952 = vmatpush3.bf16.msra.mxu0 %v7614_v19  ;;  %v7651_v19 = vld [vmem:[%s9757_s1 + $0x988] sm:$0xff]  }
 0x12d   : >> { %6974 = vmatpush3.bf16.msra.mxu1 %v7615_v23  ;;  %6953 = vmatprep.subr.bf16.mxu0 %v7616_v24  ;;  %v412_v23 = vrot.slane %v410_v10, 1  ;;  %v7652_v24 = vld [vmem:[%s9757_s1 + $0x940] sm:$0xff]  }
 0x12e   : >> { %6975 = vmatprep.subr.bf16.mxu1 %v7617_v26  ;;  %v426_v26 = vrot.slane %v424_v51, 1 }
 0x12f   : >> { %v413_v32 = vor.u32 %v412_v23, %v408_v14  ;;  %v7684_v23 = vld [vmem:[%s9757_s1 + $0xa40] sm:$0xff]  }
 0x130   : >> { %6954 = vmatpush3.bf16.msra.mxu0 %v7618_v28  ;;  %v7653_v28 = vld [vmem:[%s9757_s1 + $0x9c0] sm:$0xff]  }
 0x131   : >> { %6976 = vmatpush3.bf16.msra.mxu1 %v7619_v30  ;;  %6983 = vmatprep.subr.bf16.mxu0 %v7624_v42  ;;  %v7654_v30 = vld [vmem:[%s9757_s1 + $0x900] sm:$0xff]   ;;  %v427_v42 = vor.u32 %v426_v26, %v422_v17 }
 0x132   : >> { %7005 = vmatprep.subr.bf16.mxu1 %v7625_v44  ;;  %v7656_v44 = vld [vmem:[%s9757_s1 + $0xa78] sm:$0xff]   ;;  %v7685_v26 = vld [vmem:[%s9757_s1 + $0xac0] sm:$0xff]  }
 0x133   : >> { %v6691_v48 = vpop.f32.mrf.mxu0  ;;  %5308 = vmatmul.mubr.bf16.vlgmr.msra.gmra.mxu0 %v8938_v40 }
 0x134   : >> { %v6713_v38 = vpop.f32.mrf.mxu1  ;;  %5348 = vmatmul.mubr.bf16.vlgmr.msra.gmra.mxu1 %v8940_v41  ;;  %6984 = vmatpush3.bf16.msra.mxu0 %v7626_v46  ;;  %v7657_v46 = vld [vmem:[%s9757_s1 + $0xaf8] sm:$0xff]  }
 0x135   : >> { %7006 = vmatpush3.bf16.msra.mxu1 %v7627_v61  ;;  %v6692_v63 = vpop.f32.mrf.mxu0  ;;  %6985 = vmatprep.subr.bf16.mxu0 %v7628_v20 }
 0x136   : >> { %v6714_v15 = vpop.f32.mrf.mxu1  ;;  %v6693_v59 = vadd.f32 %v6692_v63, %v6691_v48  ;;  %7007 = vmatprep.subr.bf16.mxu1 %v7629_v49  ;;  %5387 = vmatprep.mubr.bf16.mxu0 %v420_v18  ;;  %v7658_v48 = vld [vmem:[%s9757_s1 + $0xa38] sm:$0xff]   ;;  %v7660_v49 = vld [vmem:[%s9757_s1 + $0xa70] sm:$0xff]  }
 0x137   : >> { %v6715_v50 = vadd.f32 %v6714_v15, %v6713_v38  ;;  %v6694_v52 = vpop.f32.mrf.mxu0  ;;  %5427 = vmatprep.mubr.bf16.mxu1 %v434_v60  ;;  %v440_v38 = vrot.slane %v8934_v34, 1  ;;  %v7659_v63 = vld [vmem:[%s9757_s1 + $0xab8] sm:$0xff]   ;;  %v442_v15 = vrot.slane %v8936_v35, 1  ;;  %v7666_v60 = vld [vmem:[%s9757_s1 + $0xa28] sm:$0xff]  }
 0x138   : >> { %v6716_v25 = vpop.f32.mrf.mxu1  ;;  %v4830_v27 = vadd.f32 %v6693_v59, %v8864_v3  ;;  %6986 = vmatpush3.bf16.msra.mxu0 %v7630_v39  ;;  %v7638_v3 = vld [vmem:[%s9757_s1 + $0x920] sm:$0xff]   ;;  %v7688_v34 = vld [vmem:[%s9757_s1 + $0xb78] sm:$0xff]  }
 0x139   : >> { %7008 = vmatpush3.bf16.msra.mxu1 %v7631_v53  ;;  %v6695_v21 = vpop.f32.mrf.mxu0  ;;  %6987 = vmatprep.subr.bf16.mxu0 %v7632_v54  ;;  %v7662_v25 = vld [vmem:[%s9757_s1 + $0xa30] sm:$0xff]  }
 0x13a   : >> { %v6717_v33 = vpop.f32.mrf.mxu1  ;;  %v8987_v56 = vadd.f32 %v6715_v50, %v4830_v27  ;;  %7009 = vmatprep.subr.bf16.mxu1 %v7633_v55  ;;  %v7661_v50 = vld [vmem:[%s9757_s1 + $0xaf0] sm:$0xff]   ;;  %v7665_v55 = vld [vmem:[%s9757_s1 + $0xae8] sm:$0xff]  }
 0x13b   : >> { %v7663_v27 = vld [vmem:[%s9757_s1 + $0xab0] sm:$0xff]  }
 0x13c   : >> { %6988 = vmatpush3.bf16.msra.mxu0 %v7634_v58 }
 0x13d   : >> { %7010 = vmatpush3.bf16.msra.mxu1 %v7635_v62  ;;  %6989 = vmatprep.subr.bf16.mxu0 %v7636_v0  ;;  %v7668_v62 = vld [vmem:[%s9757_s1 + $0xa60] sm:$0xff]  }
 0x13e   : >> { %7011 = vmatprep.subr.bf16.mxu1 %v7637_v2  ;;  %v7669_v0 = vld [vmem:[%s9757_s1 + $0xae0] sm:$0xff]  }
 0x13f   : >> { %v7670_v2 = vld [vmem:[%s9757_s1 + $0xa20] sm:$0xff]  }
 0x140   : >> { %6990 = vmatpush3.bf16.msra.mxu0 %v7638_v3  ;;  %v7671_v3 = vld [vmem:[%s9757_s1 + $0xaa0] sm:$0xff]  }
 0x141   : >> { %7012 = vmatpush3.bf16.msra.mxu1 %v7639_v4  ;;  %6991 = vmatprep.subr.bf16.mxu0 %v7640_v5  ;;  %v7672_v4 = vld [vmem:[%s9757_s1 + $0xa58] sm:$0xff]  }
 0x142   : >> { %7013 = vmatprep.subr.bf16.mxu1 %v7641_v6  ;;  %v7673_v5 = vld [vmem:[%s9757_s1 + $0xad8] sm:$0xff]  }
 0x143   : >> { %v7674_v6 = vld [vmem:[%s9757_s1 + $0xa18] sm:$0xff]  }
 0x144   : >> { %6992 = vmatpush3.bf16.msra.mxu0 %v7642_v43  ;;  %v7675_v43 = vld [vmem:[%s9757_s1 + $0xa98] sm:$0xff]  }
 0x145   : >> { %7014 = vmatpush3.bf16.msra.mxu1 %v7643_v7  ;;  %6993 = vmatprep.subr.bf16.mxu0 %v7644_v8  ;;  %v7676_v7 = vld [vmem:[%s9757_s1 + $0xa50] sm:$0xff]  }
 0x146   : >> { %7015 = vmatprep.subr.bf16.mxu1 %v7645_v36  ;;  %v7677_v8 = vld [vmem:[%s9757_s1 + $0xad0] sm:$0xff]  }
 0x147   : >> { %v7678_v36 = vld [vmem:[%s9757_s1 + $0xa10] sm:$0xff]  }
 0x148   : >> { %6994 = vmatpush3.bf16.msra.mxu0 %v7646_v45  ;;  %v7679_v45 = vld [vmem:[%s9757_s1 + $0xa90] sm:$0xff]  }
 0x149   : >> { %7016 = vmatpush3.bf16.msra.mxu1 %v7647_v47  ;;  %6995 = vmatprep.subr.bf16.mxu0 %v7648_v37  ;;  %v7680_v47 = vld [vmem:[%s9757_s1 + $0xa48] sm:$0xff]  }
 0x14a   : >> { %7017 = vmatprep.subr.bf16.mxu1 %v7649_v12  ;;  %v7681_v37 = vld [vmem:[%s9757_s1 + $0xac8] sm:$0xff]  }
 0x14b   : >> { %v7682_v12 = vld [vmem:[%s9757_s1 + $0xa08] sm:$0xff]  }
 0x14c   : >> { %6996 = vmatpush3.bf16.msra.mxu0 %v7650_v16  ;;  %v7683_v16 = vld [vmem:[%s9757_s1 + $0xa88] sm:$0xff]  }
 0x14d   : >> { %7018 = vmatpush3.bf16.msra.mxu1 %v7651_v19  ;;  %6997 = vmatprep.subr.bf16.mxu0 %v7652_v24  ;;  %v439_v19 = vrot.slane %v8938_v40, 1  ;;  %v450_v24 = vrot.slane %v415_v13, 1  ;;  %v7687_v13 = vld [vmem:[%s9757_s1 + $0xa80] sm:$0xff]  }
 0x14e   : >> { %7019 = vmatprep.subr.bf16.mxu1 %v7653_v28  ;;  %v451_v28 = vrot.slane %v417_v9, 2  ;;  %v7689_v9 = vld [vmem:[%s9757_s1 + $0xbf8] sm:$0xff]   ;;  %v7717_v40 = vld [vmem:[%s9757_s1 + $0xbc0] sm:$0xff]  }
 0x150   : >> { %6998 = vmatpush3.bf16.msra.mxu0 %v7654_v30  ;;  %v7686_v30 = vld [vmem:[%s9757_s1 + $0xa00] sm:$0xff]  }
 0x151   : >> { %7020 = vmatpush3.bf16.msra.mxu1 %v7655_v31  ;;  %7027 = vmatprep.subr.bf16.mxu0 %v7656_v44  ;;  %v456_v31 = vrot.slane %v429_v57, 1  ;;  %v7690_v57 = vld [vmem:[%s9757_s1 + $0xb38] sm:$0xff]   ;;  %v452_v44 = vor.u32 %v451_v28, %v450_v24 }
 0x152   : >> { %7049 = vmatprep.subr.bf16.mxu1 %v7657_v46  ;;  %v7691_v46 = vld [vmem:[%s9757_s1 + $0xbb8] sm:$0xff]  }
 0x153   : >> { %v6735_v61 = vpop.f32.mrf.mxu0  ;;  %5388 = vmatmul.mubr.bf16.vlgmr.msra.gmra.mxu0 %v413_v32  ;;  %v457_v32 = vrot.slane %v431_v11, 2 }
 0x154   : >> { %v6757_v20 = vpop.f32.mrf.mxu1  ;;  %5428 = vmatmul.mubr.bf16.vlgmr.msra.gmra.mxu1 %v427_v42  ;;  %7028 = vmatpush3.bf16.msra.mxu0 %v7658_v48  ;;  %v441_v42 = vrot.slane %v8940_v41, 1  ;;  %v7720_v41 = vld [vmem:[%s9757_s1 + $0xc78] sm:$0xff]  }
 0x155   : >> { %7050 = vmatpush3.bf16.msra.mxu1 %v7659_v63  ;;  %v6736_v22 = vpop.f32.mrf.mxu0  ;;  %7029 = vmatprep.subr.bf16.mxu0 %v7660_v49  ;;  %v458_v48 = vor.u32 %v457_v32, %v456_v31  ;;  %v7693_v63 = vld [vmem:[%s9757_s1 + $0xbf0] sm:$0xff]  }
 0x156   : >> { %v6758_v59 = vpop.f32.mrf.mxu1  ;;  %v6737_v39 = vadd.f32 %v6736_v22, %v6735_v61  ;;  %5467 = vmatprep.mubr.bf16.mxu0 %v440_v38  ;;  %7051 = vmatprep.subr.bf16.mxu1 %v7661_v50  ;;  %v7692_v38 = vld [vmem:[%s9757_s1 + $0xb70] sm:$0xff]  }
 0x157   : >> { %v6759_v52 = vadd.f32 %v6758_v59, %v6757_v20  ;;  %v6738_v53 = vpop.f32.mrf.mxu0  ;;  %5507 = vmatprep.mubr.bf16.mxu1 %v442_v15  ;;  %v7694_v22 = vld [vmem:[%s9757_s1 + $0xb30] sm:$0xff]  }
 0x158   : >> { %v6760_v18 = vpop.f32.mrf.mxu1  ;;  %v4910_v54 = vadd.f32 %v6737_v39, %v8987_v56  ;;  %7030 = vmatpush3.bf16.msra.mxu0 %v7662_v25  ;;  %v7667_v56 = vld [vmem:[%s9757_s1 + $0xaa8] sm:$0xff]   ;;  %v7695_v39 = vld [vmem:[%s9757_s1 + $0xbb0] sm:$0xff]  }
 0x159   : >> { %7052 = vmatpush3.bf16.msra.mxu1 %v7663_v27  ;;  %v6739_v21 = vpop.f32.mrf.mxu0  ;;  %7031 = vmatprep.subr.bf16.mxu0 %v7664_v29  ;;  %v7696_v25 = vld [vmem:[%s9757_s1 + $0xb68] sm:$0xff]  }
 0x15a   : >> { %v6761_v33 = vpop.f32.mrf.mxu1  ;;  %v9102_v58 = vadd.f32 %v6759_v52, %v4910_v54  ;;  %7053 = vmatprep.subr.bf16.mxu1 %v7665_v55  ;;  %v7697_v27 = vld [vmem:[%s9757_s1 + $0xbe8] sm:$0xff]   ;;  %v7701_v55 = vld [vmem:[%s9757_s1 + $0xbe0] sm:$0xff]  }
 0x15b   : >> { %v7698_v29 = vld [vmem:[%s9757_s1 + $0xb28] sm:$0xff]   ;;  %v7700_v33 = vld [vmem:[%s9757_s1 + $0xb60] sm:$0xff]  }
 0x15c   : >> { %7032 = vmatpush3.bf16.msra.mxu0 %v7666_v60  ;;  %v7699_v21 = vld [vmem:[%s9757_s1 + $0xba8] sm:$0xff]   ;;  %v7703_v60 = vld [vmem:[%s9757_s1 + $0xba0] sm:$0xff]  }
 0x15d   : >> { %7054 = vmatpush3.bf16.msra.mxu1 %v7667_v56  ;;  %7033 = vmatprep.subr.bf16.mxu0 %v7668_v62  ;;  %v7704_v56 = vld [vmem:[%s9757_s1 + $0xb58] sm:$0xff]  }
 0x15e   : >> { %7055 = vmatprep.subr.bf16.mxu1 %v7669_v0  ;;  %v7705_v62 = vld [vmem:[%s9757_s1 + $0xbd8] sm:$0xff]  }
 0x15f   : >> { %v7706_v0 = vld [vmem:[%s9757_s1 + $0xb18] sm:$0xff]  }
 0x160   : >> { %7034 = vmatpush3.bf16.msra.mxu0 %v7670_v2  ;;  %v7707_v2 = vld [vmem:[%s9757_s1 + $0xb98] sm:$0xff]  }
 0x161   : >> { %7056 = vmatpush3.bf16.msra.mxu1 %v7671_v3  ;;  %7035 = vmatprep.subr.bf16.mxu0 %v7672_v4  ;;  %v7708_v3 = vld [vmem:[%s9757_s1 + $0xb50] sm:$0xff]  }
 0x162   : >> { %7057 = vmatprep.subr.bf16.mxu1 %v7673_v5  ;;  %v7709_v4 = vld [vmem:[%s9757_s1 + $0xbd0] sm:$0xff]  }
 0x163   : >> { %v7710_v5 = vld [vmem:[%s9757_s1 + $0xb10] sm:$0xff]  }
 0x164   : >> { %7036 = vmatpush3.bf16.msra.mxu0 %v7674_v6  ;;  %v7711_v6 = vld [vmem:[%s9757_s1 + $0xb90] sm:$0xff]  }
 0x165   : >> { %7058 = vmatpush3.bf16.msra.mxu1 %v7675_v43  ;;  %7037 = vmatprep.subr.bf16.mxu0 %v7676_v7  ;;  %v7712_v43 = vld [vmem:[%s9757_s1 + $0xb48] sm:$0xff]  }
 0x166   : >> { %7059 = vmatprep.subr.bf16.mxu1 %v7677_v8  ;;  %v7713_v7 = vld [vmem:[%s9757_s1 + $0xbc8] sm:$0xff]   ;;  %v447_v8 = vrot.slane %v408_v14, 1  ;;  %v7716_v14 = vld [vmem:[%s9757_s1 + $0xb40] sm:$0xff]  }
 0x168   : >> { %7038 = vmatpush3.bf16.msra.mxu0 %v7678_v36  ;;  %v7714_v36 = vld [vmem:[%s9757_s1 + $0xb08] sm:$0xff]  }
 0x169   : >> { %7060 = vmatpush3.bf16.msra.mxu1 %v7679_v45  ;;  %7039 = vmatprep.subr.bf16.mxu0 %v7680_v47  ;;  %v448_v45 = vrot.slane %v410_v10, 2  ;;  %v7715_v47 = vld [vmem:[%s9757_s1 + $0xb88] sm:$0xff]   ;;  %v7718_v10 = vld [vmem:[%s9757_s1 + $0xb00] sm:$0xff]  }
 0x16a   : >> { %7061 = vmatprep.subr.bf16.mxu1 %v7681_v37  ;;  %v453_v37 = vrot.slane %v422_v17, 1  ;;  %v7719_v17 = vld [vmem:[%s9757_s1 + $0xb80] sm:$0xff]  }
 0x16c   : >> { %7040 = vmatpush3.bf16.msra.mxu0 %v7682_v12  ;;  %v454_v12 = vrot.slane %v424_v51, 2  ;;  %v7721_v51 = vld [vmem:[%s9757_s1 + $0xcf8] sm:$0xff]  }
 0x16d   : >> { %7062 = vmatpush3.bf16.msra.mxu1 %v7683_v16  ;;  %7041 = vmatprep.subr.bf16.mxu0 %v7684_v23  ;;  %v449_v16 = vor.u32 %v448_v45, %v447_v8  ;;  %v7722_v23 = vld [vmem:[%s9757_s1 + $0xc38] sm:$0xff]  }
 0x16e   : >> { %7063 = vmatprep.subr.bf16.mxu1 %v7685_v26  ;;  %v7723_v26 = vld [vmem:[%s9757_s1 + $0xcb8] sm:$0xff]  }
 0x16f   : >> { %v7757_v8 = vld [vmem:[%s9757_s1 + $0xdf8] sm:$0xff]  }
 0x170   : >> { %7042 = vmatpush3.bf16.msra.mxu0 %v7686_v30  ;;  %v7724_v30 = vld [vmem:[%s9757_s1 + $0xc70] sm:$0xff]   ;;  %v7758_v45 = vld [vmem:[%s9757_s1 + $0xd38] sm:$0xff]  }
 0x171   : >> { %7064 = vmatpush3.bf16.msra.mxu1 %v7687_v13  ;;  %7071 = vmatprep.subr.bf16.mxu0 %v7688_v34  ;;  %v7725_v13 = vld [vmem:[%s9757_s1 + $0xcf0] sm:$0xff]  }
 0x172   : >> { %7093 = vmatprep.subr.bf16.mxu1 %v7689_v9  ;;  %v7726_v34 = vld [vmem:[%s9757_s1 + $0xc30] sm:$0xff]  }
 0x173   : >> { %v6779_v35 = vpop.f32.mrf.mxu0  ;;  %5468 = vmatmul.mubr.bf16.vlgmr.msra.gmra.mxu0 %v439_v19  ;;  %v455_v19 = vor.u32 %v454_v12, %v453_v37 }
 0x174   : >> { %v6801_v11 = vpop.f32.mrf.mxu1  ;;  %5508 = vmatmul.mubr.bf16.vlgmr.msra.gmra.mxu1 %v441_v42  ;;  %7072 = vmatpush3.bf16.msra.mxu0 %v7690_v57 }
 0x175   : >> { %7094 = vmatpush3.bf16.msra.mxu1 %v7691_v46  ;;  %v6780_v61 = vpop.f32.mrf.mxu0  ;;  %7073 = vmatprep.subr.bf16.mxu0 %v7692_v38  ;;  %v7728_v46 = vld [vmem:[%s9757_s1 + $0xc68] sm:$0xff]  }
 0x176   : >> { %v6802_v20 = vpop.f32.mrf.mxu1  ;;  %v6781_v15 = vadd.f32 %v6780_v61, %v6779_v35  ;;  %5547 = vmatprep.mubr.bf16.mxu0 %v452_v44  ;;  %7095 = vmatprep.subr.bf16.mxu1 %v7693_v63  ;;  %v7727_v44 = vld [vmem:[%s9757_s1 + $0xcb0] sm:$0xff]   ;;  %v7729_v38 = vld [vmem:[%s9757_s1 + $0xce8] sm:$0xff]  }
 0x177   : >> { %v6803_v49 = vadd.f32 %v6802_v20, %v6801_v11  ;;  %v6782_v59 = vpop.f32.mrf.mxu0  ;;  %5587 = vmatprep.mubr.bf16.mxu1 %v458_v48  ;;  %v7730_v63 = vld [vmem:[%s9757_s1 + $0xc28] sm:$0xff]  }
 0x178   : >> { %v6804_v50 = vpop.f32.mrf.mxu1  ;;  %v4990_v52 = vadd.f32 %v6781_v15, %v9102_v58  ;;  %7074 = vmatpush3.bf16.msra.mxu0 %v7694_v22  ;;  %v7702_v58 = vld [vmem:[%s9757_s1 + $0xb20] sm:$0xff]   ;;  %v7731_v15 = vld [vmem:[%s9757_s1 + $0xca8] sm:$0xff]  }
 0x179   : >> { %7096 = vmatpush3.bf16.msra.mxu1 %v7695_v39  ;;  %v6783_v53 = vpop.f32.mrf.mxu0  ;;  %7075 = vmatprep.subr.bf16.mxu0 %v7696_v25  ;;  %v7733_v22 = vld [vmem:[%s9757_s1 + $0xce0] sm:$0xff]   ;;  %v7736_v39 = vld [vmem:[%s9757_s1 + $0xc58] sm:$0xff]  }
 0x17a   : >> { %v6805_v18 = vpop.f32.mrf.mxu1  ;;  %v9211_v54 = vadd.f32 %v6803_v49, %v4990_v52  ;;  %7097 = vmatprep.subr.bf16.mxu1 %v7697_v27  ;;  %v7732_v49 = vld [vmem:[%s9757_s1 + $0xc60] sm:$0xff]   ;;  %v7737_v52 = vld [vmem:[%s9757_s1 + $0xcd8] sm:$0xff]   ;;  %v7741_v27 = vld [vmem:[%s9757_s1 + $0xcd0] sm:$0xff]  }
 0x17b   : >> { %v7734_v59 = vld [vmem:[%s9757_s1 + $0xc20] sm:$0xff]   ;;  %v7738_v25 = vld [vmem:[%s9757_s1 + $0xc18] sm:$0xff]   ;;  %v7740_v18 = vld [vmem:[%s9757_s1 + $0xc50] sm:$0xff]  }
 0x17c   : >> { %7076 = vmatpush3.bf16.msra.mxu0 %v7698_v29  ;;  %v7735_v50 = vld [vmem:[%s9757_s1 + $0xca0] sm:$0xff]   ;;  %v7739_v53 = vld [vmem:[%s9757_s1 + $0xc98] sm:$0xff]   ;;  %v7743_v29 = vld [vmem:[%s9757_s1 + $0xc90] sm:$0xff]  }
 0x17d   : >> { %7098 = vmatpush3.bf16.msra.mxu1 %v7699_v21  ;;  %7077 = vmatprep.subr.bf16.mxu0 %v7700_v33  ;;  %v7744_v21 = vld [vmem:[%s9757_s1 + $0xc48] sm:$0xff]  }
 0x17e   : >> { %7099 = vmatprep.subr.bf16.mxu1 %v7701_v55  ;;  %v7745_v33 = vld [vmem:[%s9757_s1 + $0xcc8] sm:$0xff]  }
 0x17f   : >> { %v7746_v55 = vld [vmem:[%s9757_s1 + $0xc08] sm:$0xff]  }
 0x180   : >> { %7078 = vmatpush3.bf16.msra.mxu0 %v7702_v58  ;;  %v7747_v58 = vld [vmem:[%s9757_s1 + $0xc88] sm:$0xff]  }
 0x181   : >> { %7100 = vmatpush3.bf16.msra.mxu1 %v7703_v60  ;;  %7079 = vmatprep.subr.bf16.mxu0 %v7704_v56  ;;  %v7748_v60 = vld [vmem:[%s9757_s1 + $0xc40] sm:$0xff]  }
 0x182   : >> { %7101 = vmatprep.subr.bf16.mxu1 %v7705_v62  ;;  %v7749_v56 = vld [vmem:[%s9757_s1 + $0xcc0] sm:$0xff]  }
 0x183   : >> { %v7750_v62 = vld [vmem:[%s9757_s1 + $0xc00] sm:$0xff]  }
 0x184   : >> { %7080 = vmatpush3.bf16.msra.mxu0 %v7706_v0  ;;  %v7751_v0 = vld [vmem:[%s9757_s1 + $0xc80] sm:$0xff]  }
 0x185   : >> { %7102 = vmatpush3.bf16.msra.mxu1 %v7707_v2  ;;  %7081 = vmatprep.subr.bf16.mxu0 %v7708_v3  ;;  %v6053_v2 = vld [vmem:[%s8034_s18 + $0x30] sm:$0x77]  ;;  %v6054_v3 = vld [vmem:[%s8034_s18 + $0x38] sm:$0x77] }
 0x186   : >> { %7103 = vmatprep.subr.bf16.mxu1 %v7709_v4  ;;  %v9388_v4 = vcombine.high %v6053_v2, %v6053_v2 }
 0x188   : >> { %7082 = vmatpush3.bf16.msra.mxu0 %v7710_v5  ;;  %v9390_v5 = vcombine.high %v6054_v3, %v6054_v3  ;;  %v487_v12 = vshll.u32 %v9388_v4, 16 }
 0x189   : >> { %7104 = vmatpush3.bf16.msra.mxu1 %v7711_v6  ;;  %7083 = vmatprep.subr.bf16.mxu0 %v7712_v43  ;;  %v9392_v6 = vcombine.low %v6053_v2, %v6053_v2  ;;  %v7756_v43 = vld [vmem:[%s9757_s1 + $0xd78] sm:$0xff]   ;;  %v7787_v2 = vld [vmem:[%s9757_s1 + $0xd80] sm:$0xff]  }
 0x18a   : >> { %7105 = vmatprep.subr.bf16.mxu1 %v7713_v7  ;;  %v9397_v7 = vcombine.low %v6054_v3, %v6054_v3 }
 0x18c   : >> { %7084 = vmatpush3.bf16.msra.mxu0 %v7714_v36 }
 0x18d   : >> { %7106 = vmatpush3.bf16.msra.mxu1 %v7715_v47  ;;  %7085 = vmatprep.subr.bf16.mxu0 %v7716_v14  ;;  %v485_v47 = vshrl.u32 %v9388_v4, 16  ;;  %v7759_v14 = vld [vmem:[%s9757_s1 + $0xdb8] sm:$0xff]  }
 0x18e   : >> { %7107 = vmatprep.subr.bf16.mxu1 %v7717_v40 }
 0x190   : >> { %7086 = vmatpush3.bf16.msra.mxu0 %v7718_v10  ;;  %v7760_v10 = vld [vmem:[%s9757_s1 + $0xd70] sm:$0xff]  }
 0x191   : >> { %7108 = vmatpush3.bf16.msra.mxu1 %v7719_v17  ;;  %7115 = vmatprep.subr.bf16.mxu0 %v7720_v41  ;;  %v499_v17 = vshrl.u32 %v9390_v5, 16  ;;  %v7761_v41 = vld [vmem:[%s9757_s1 + $0xdf0] sm:$0xff]  }
 0x192   : >> { %7137 = vmatprep.subr.bf16.mxu1 %v7721_v51  ;;  %v489_v51 = vrot.slane %v487_v12, 1 }
 0x193   : >> { %v6823_v24 = vpop.f32.mrf.mxu0  ;;  %5548 = vmatmul.mubr.bf16.vlgmr.msra.gmra.mxu0 %v449_v16 }
 0x194   : >> { %v6845_v28 = vpop.f32.mrf.mxu1  ;;  %5588 = vmatmul.mubr.bf16.vlgmr.msra.gmra.mxu1 %v455_v19  ;;  %7116 = vmatpush3.bf16.msra.mxu0 %v7722_v23 }
 0x195   : >> { %7138 = vmatpush3.bf16.msra.mxu1 %v7723_v26  ;;  %v6824_v31 = vpop.f32.mrf.mxu0  ;;  %7117 = vmatprep.subr.bf16.mxu0 %v7724_v30  ;;  %v7762_v26 = vld [vmem:[%s9757_s1 + $0xd30] sm:$0xff]  }
 0x196   : >> { %v6825_v32 = vadd.f32 %v6824_v31, %v6823_v24  ;;  %v6846_v42 = vpop.f32.mrf.mxu1  ;;  %7139 = vmatprep.subr.bf16.mxu1 %v7725_v13  ;;  %5627 = vmatprep.mubr.bf16.mxu0 %v9388_v4  ;;  %v7763_v13 = vld [vmem:[%s9757_s1 + $0xdb0] sm:$0xff]  }
 0x197   : >> { %v6847_v9 = vadd.f32 %v6846_v42, %v6845_v28  ;;  %v6826_v57 = vpop.f32.mrf.mxu0  ;;  %5667 = vmatprep.mubr.bf16.mxu1 %v9390_v5  ;;  %v501_v28 = vshll.u32 %v9390_v5, 16 }
 0x198   : >> { %v5070_v35 = vadd.f32 %v6825_v32, %v9211_v54  ;;  %v6848_v11 = vpop.f32.mrf.mxu1  ;;  %7118 = vmatpush3.bf16.msra.mxu0 %v7726_v34  ;;  %v7742_v54 = vld [vmem:[%s9757_s1 + $0xc10] sm:$0xff]   ;;  %v490_v32 = vor.u32 %v489_v51, %v485_v47  ;;  %v7764_v34 = vld [vmem:[%s9757_s1 + $0xd68] sm:$0xff]  }
 0x199   : >> { %7140 = vmatpush3.bf16.msra.mxu1 %v7727_v44  ;;  %v6827_v48 = vpop.f32.mrf.mxu0  ;;  %7119 = vmatprep.subr.bf16.mxu0 %v7728_v46  ;;  %v7766_v11 = vld [vmem:[%s9757_s1 + $0xd28] sm:$0xff]  }
 0x19a   : >> { %v9318_v61 = vadd.f32 %v6847_v9, %v5070_v35  ;;  %v6849_v20 = vpop.f32.mrf.mxu1  ;;  %7141 = vmatprep.subr.bf16.mxu1 %v7729_v38  ;;  %v503_v9 = vrot.slane %v501_v28, 1  ;;  %v7765_v35 = vld [vmem:[%s9757_s1 + $0xde8] sm:$0xff]   ;;  %v7768_v38 = vld [vmem:[%s9757_s1 + $0xd60] sm:$0xff]  }
 0x19b   : >> { %v7767_v48 = vld [vmem:[%s9757_s1 + $0xda8] sm:$0xff]   ;;  %v7770_v20 = vld [vmem:[%s9757_s1 + $0xd20] sm:$0xff]  }
 0x19c   : >> { %7120 = vmatpush3.bf16.msra.mxu0 %v7730_v63  ;;  %v504_v46 = vor.u32 %v503_v9, %v499_v17  ;;  %v7771_v63 = vld [vmem:[%s9757_s1 + $0xda0] sm:$0xff]   ;;  %v7796_v9 = vld [vmem:[%s9757_s1 + $0xe68] sm:$0xff]  }
 0x19d   : >> { %7142 = vmatpush3.bf16.msra.mxu1 %v7731_v15  ;;  %7121 = vmatprep.subr.bf16.mxu0 %v7732_v49  ;;  %v7772_v15 = vld [vmem:[%s9757_s1 + $0xd58] sm:$0xff]  }
 0x19e   : >> { %7143 = vmatprep.subr.bf16.mxu1 %v7733_v22  ;;  %v7773_v49 = vld [vmem:[%s9757_s1 + $0xdd8] sm:$0xff]  }
 0x19f   : >> { %v7774_v22 = vld [vmem:[%s9757_s1 + $0xd18] sm:$0xff]  }
 0x1a0   : >> { %7122 = vmatpush3.bf16.msra.mxu0 %v7734_v59  ;;  %v7775_v59 = vld [vmem:[%s9757_s1 + $0xd98] sm:$0xff]  }
 0x1a1   : >> { %7144 = vmatpush3.bf16.msra.mxu1 %v7735_v50  ;;  %7123 = vmatprep.subr.bf16.mxu0 %v7736_v39  ;;  %v7776_v50 = vld [vmem:[%s9757_s1 + $0xd50] sm:$0xff]  }
 0x1a2   : >> { %7145 = vmatprep.subr.bf16.mxu1 %v7737_v52  ;;  %v7777_v39 = vld [vmem:[%s9757_s1 + $0xdd0] sm:$0xff]  }
 0x1a3   : >> { %v7778_v52 = vld [vmem:[%s9757_s1 + $0xd10] sm:$0xff]  }
 0x1a4   : >> { %7124 = vmatpush3.bf16.msra.mxu0 %v7738_v25  ;;  %v7779_v25 = vld [vmem:[%s9757_s1 + $0xd90] sm:$0xff]  }
 0x1a5   : >> { %7146 = vmatpush3.bf16.msra.mxu1 %v7739_v53  ;;  %7125 = vmatprep.subr.bf16.mxu0 %v7740_v18  ;;  %v480_v53 = vshll.u32 %v9392_v6, 16  ;;  %v7780_v18 = vld [vmem:[%s9757_s1 + $0xd48] sm:$0xff]  }
 0x1a6   : >> { %7147 = vmatprep.subr.bf16.mxu1 %v7741_v27  ;;  %v494_v27 = vshll.u32 %v9397_v7, 16 }
 0x1a8   : >> { %7126 = vmatpush3.bf16.msra.mxu0 %v7742_v54  ;;  %v7781_v54 = vld [vmem:[%s9757_s1 + $0xdc8] sm:$0xff]  }
 0x1a9   : >> { %7148 = vmatpush3.bf16.msra.mxu1 %v7743_v29  ;;  %7127 = vmatprep.subr.bf16.mxu0 %v7744_v21  ;;  %v478_v29 = vshrl.u32 %v9392_v6, 16  ;;  %v7782_v21 = vld [vmem:[%s9757_s1 + $0xd08] sm:$0xff]  }
 0x1aa   : >> { %7149 = vmatprep.subr.bf16.mxu1 %v7745_v33  ;;  %v492_v33 = vshrl.u32 %v9397_v7, 16 }
 0x1ac   : >> { %7128 = vmatpush3.bf16.msra.mxu0 %v7746_v55  ;;  %v7783_v55 = vld [vmem:[%s9757_s1 + $0xd88] sm:$0xff]  }
 0x1ad   : >> { %7150 = vmatpush3.bf16.msra.mxu1 %v7747_v58  ;;  %7129 = vmatprep.subr.bf16.mxu0 %v7748_v60  ;;  %v482_v58 = vrot.slane %v480_v53, 1  ;;  %v7784_v60 = vld [vmem:[%s9757_s1 + $0xd40] sm:$0xff]  }
 0x1ae   : >> { %7151 = vmatprep.subr.bf16.mxu1 %v7749_v56  ;;  %v496_v56 = vrot.slane %v494_v27, 1 }
 0x1af   : >> { %v483_v3 = vor.u32 %v482_v58, %v478_v29  ;;  %v7816_v58 = vld [vmem:[%s9757_s1 + $0xe40] sm:$0xff]  }
 0x1b0   : >> { %7130 = vmatpush3.bf16.msra.mxu0 %v7750_v62  ;;  %v7785_v62 = vld [vmem:[%s9757_s1 + $0xdc0] sm:$0xff]  }
 0x1b1   : >> { %7152 = vmatpush3.bf16.msra.mxu1 %v7751_v0  ;;  %7159 = vmatprep.subr.bf16.mxu0 %v7756_v43  ;;  %v7786_v0 = vld [vmem:[%s9757_s1 + $0xd00] sm:$0xff]   ;;  %v497_v43 = vor.u32 %v496_v56, %v492_v33 }
 0x1b2   : >> { %7181 = vmatprep.subr.bf16.mxu1 %v7757_v8  ;;  %v7788_v8 = vld [vmem:[%s9757_s1 + $0xe78] sm:$0xff]   ;;  %v7817_v56 = vld [vmem:[%s9757_s1 + $0xec0] sm:$0xff]  }
 0x1b3   : >> { %v6867_v36 = vpop.f32.mrf.mxu0  ;;  %5628 = vmatmul.mubr.bf16.vlgmr.msra.gmra.mxu0 %v9392_v6 }
 0x1b4   : >> { %v6889_v37 = vpop.f32.mrf.mxu1  ;;  %5668 = vmatmul.mubr.bf16.vlgmr.msra.gmra.mxu1 %v9397_v7  ;;  %7160 = vmatpush3.bf16.msra.mxu0 %v7758_v45 }
 0x1b5   : >> { %v6868_v40 = vpop.f32.mrf.mxu0  ;;  %7182 = vmatpush3.bf16.msra.mxu1 %v7759_v14  ;;  %7161 = vmatprep.subr.bf16.mxu0 %v7760_v10  ;;  %v510_v14 = vrot.slane %v9388_v4, 1  ;;  %v7791_v10 = vld [vmem:[%s9757_s1 + $0xeb8] sm:$0xff]  }
 0x1b6   : >> { %v6869_v16 = vadd.f32 %v6868_v40, %v6867_v36  ;;  %v6890_v19 = vpop.f32.mrf.mxu1  ;;  %7183 = vmatprep.subr.bf16.mxu1 %v7761_v41  ;;  %5707 = vmatprep.mubr.bf16.mxu0 %v490_v32  ;;  %v7789_v36 = vld [vmem:[%s9757_s1 + $0xef8] sm:$0xff]   ;;  %v7792_v41 = vld [vmem:[%s9757_s1 + $0xe70] sm:$0xff]  }
 0x1b7   : >> { %v6891_v23 = vadd.f32 %v6890_v19, %v6889_v37  ;;  %v6870_v24 = vpop.f32.mrf.mxu0  ;;  %5747 = vmatprep.mubr.bf16.mxu1 %v504_v46  ;;  %v7790_v37 = vld [vmem:[%s9757_s1 + $0xe38] sm:$0xff]   ;;  %v7799_v46 = vld [vmem:[%s9757_s1 + $0xea8] sm:$0xff]  }
 0x1b8   : >> { %v5150_v30 = vadd.f32 %v6869_v16, %v9318_v61  ;;  %v6892_v31 = vpop.f32.mrf.mxu1  ;;  %7162 = vmatpush3.bf16.msra.mxu0 %v7762_v26  ;;  %v7769_v61 = vld [vmem:[%s9757_s1 + $0xde0] sm:$0xff]   ;;  %v512_v16 = vrot.slane %v9390_v5, 1  ;;  %v7793_v24 = vld [vmem:[%s9757_s1 + $0xef0] sm:$0xff]   ;;  %v7820_v4 = vld [vmem:[%s9757_s1 + $0xf78] sm:$0xff]  }
 0x1b9   : >> { %v6871_v42 = vpop.f32.mrf.mxu0  ;;  %7184 = vmatpush3.bf16.msra.mxu1 %v7763_v13  ;;  %7163 = vmatprep.subr.bf16.mxu0 %v7764_v34  ;;  %v7794_v31 = vld [vmem:[%s9757_s1 + $0xe30] sm:$0xff]  }
 0x1ba   : >> { %v9438_v57 = vadd.f32 %v6891_v23, %v5150_v30  ;;  %v6893_v44 = vpop.f32.mrf.mxu1  ;;  %7185 = vmatprep.subr.bf16.mxu1 %v7765_v35  ;;  %v7795_v42 = vld [vmem:[%s9757_s1 + $0xeb0] sm:$0xff]  }
 0x1bc   : >> { %7164 = vmatpush3.bf16.msra.mxu0 %v7766_v11  ;;  %v7798_v11 = vld [vmem:[%s9757_s1 + $0xe28] sm:$0xff]  }
 0x1bd   : >> { %7186 = vmatpush3.bf16.msra.mxu1 %v7767_v48  ;;  %7165 = vmatprep.subr.bf16.mxu0 %v7768_v38  ;;  %v7800_v48 = vld [vmem:[%s9757_s1 + $0xe60] sm:$0xff]  }
 0x1be   : >> { %7187 = vmatprep.subr.bf16.mxu1 %v7769_v61  ;;  %v7801_v38 = vld [vmem:[%s9757_s1 + $0xee0] sm:$0xff]  }
 0x1bf   : >> { %v7802_v61 = vld [vmem:[%s9757_s1 + $0xe20] sm:$0xff]  }
 0x1c0   : >> { %7166 = vmatpush3.bf16.msra.mxu0 %v7770_v20  ;;  %v7803_v20 = vld [vmem:[%s9757_s1 + $0xea0] sm:$0xff]  }
 0x1c1   : >> { %7188 = vmatpush3.bf16.msra.mxu1 %v7771_v63  ;;  %7167 = vmatprep.subr.bf16.mxu0 %v7772_v15  ;;  %v7804_v63 = vld [vmem:[%s9757_s1 + $0xe58] sm:$0xff]  }
 0x1c2   : >> { %7189 = vmatprep.subr.bf16.mxu1 %v7773_v49  ;;  %v7805_v15 = vld [vmem:[%s9757_s1 + $0xed8] sm:$0xff]  }
 0x1c3   : >> { %v7806_v49 = vld [vmem:[%s9757_s1 + $0xe18] sm:$0xff]  }
 0x1c4   : >> { %7168 = vmatpush3.bf16.msra.mxu0 %v7774_v22  ;;  %v7807_v22 = vld [vmem:[%s9757_s1 + $0xe98] sm:$0xff]  }
 0x1c5   : >> { %7190 = vmatpush3.bf16.msra.mxu1 %v7775_v59  ;;  %7169 = vmatprep.subr.bf16.mxu0 %v7776_v50  ;;  %v7808_v59 = vld [vmem:[%s9757_s1 + $0xe50] sm:$0xff]  }
 0x1c6   : >> { %7191 = vmatprep.subr.bf16.mxu1 %v7777_v39  ;;  %v7809_v50 = vld [vmem:[%s9757_s1 + $0xed0] sm:$0xff]  }
 0x1c7   : >> { %v7810_v39 = vld [vmem:[%s9757_s1 + $0xe10] sm:$0xff]  }
 0x1c8   : >> { %7170 = vmatpush3.bf16.msra.mxu0 %v7778_v52  ;;  %v7811_v52 = vld [vmem:[%s9757_s1 + $0xe90] sm:$0xff]  }
 0x1c9   : >> { %7192 = vmatpush3.bf16.msra.mxu1 %v7779_v25  ;;  %7171 = vmatprep.subr.bf16.mxu0 %v7780_v18  ;;  %v7812_v25 = vld [vmem:[%s9757_s1 + $0xe48] sm:$0xff]  }
 0x1ca   : >> { %7193 = vmatprep.subr.bf16.mxu1 %v7781_v54  ;;  %v7813_v18 = vld [vmem:[%s9757_s1 + $0xec8] sm:$0xff]  }
 0x1cb   : >> { %v7814_v54 = vld [vmem:[%s9757_s1 + $0xe08] sm:$0xff]  }
 0x1cc   : >> { %7172 = vmatpush3.bf16.msra.mxu0 %v7782_v21  ;;  %v7815_v21 = vld [vmem:[%s9757_s1 + $0xe88] sm:$0xff]  }
 0x1cd   : >> { %7194 = vmatpush3.bf16.msra.mxu1 %v7783_v55  ;;  %7173 = vmatprep.subr.bf16.mxu0 %v7784_v60  ;;  %v509_v55 = vrot.slane %v9392_v6, 1  ;;  %v520_v60 = vrot.slane %v485_v47, 1  ;;  %v7819_v47 = vld [vmem:[%s9757_s1 + $0xe80] sm:$0xff]  }
 0x1ce   : >> { %7195 = vmatprep.subr.bf16.mxu1 %v7785_v62  ;;  %v521_v62 = vrot.slane %v487_v12, 2  ;;  %v7821_v12 = vld [vmem:[%s9757_s1 + $0xff8] sm:$0xff]   ;;  %v7849_v6 = vld [vmem:[%s9757_s1 + $0xfc0] sm:$0xff]  }
 0x1d0   : >> { %7174 = vmatpush3.bf16.msra.mxu0 %v7786_v0  ;;  %v7818_v0 = vld [vmem:[%s9757_s1 + $0xe00] sm:$0xff]   ;;  %v522_v5 = vor.u32 %v521_v62, %v520_v60 }
 0x1d1   : >> { %7196 = vmatpush3.bf16.msra.mxu1 %v7787_v2  ;;  %7203 = vmatprep.subr.bf16.mxu0 %v7788_v8  ;;  %v526_v2 = vrot.slane %v499_v17, 1  ;;  %v7822_v8 = vld [vmem:[%s9757_s1 + $0xf38] sm:$0xff]  }
 0x1d2   : >> { %7225 = vmatprep.subr.bf16.mxu1 %v7789_v36  ;;  %v7823_v36 = vld [vmem:[%s9757_s1 + $0xfb8] sm:$0xff]  }
 0x1d3   : >> { %v6911_v45 = vpop.f32.mrf.mxu0  ;;  %5708 = vmatmul.mubr.bf16.vlgmr.msra.gmra.mxu0 %v483_v3  ;;  %v527_v3 = vrot.slane %v501_v28, 2 }
 0x1d4   : >> { %v6933_v40 = vpop.f32.mrf.mxu1  ;;  %5748 = vmatmul.mubr.bf16.vlgmr.msra.gmra.mxu1 %v497_v43  ;;  %7204 = vmatpush3.bf16.msra.mxu0 %v7790_v37  ;;  %v511_v43 = vrot.slane %v9397_v7, 1 }
 0x1d5   : >> { %v6912_v19 = vpop.f32.mrf.mxu0  ;;  %7226 = vmatpush3.bf16.msra.mxu1 %v7791_v10  ;;  %7205 = vmatprep.subr.bf16.mxu0 %v7792_v41 }
 0x1d6   : >> { %v6913_v51 = vadd.f32 %v6912_v19, %v6911_v45  ;;  %v6934_v23 = vpop.f32.mrf.mxu1  ;;  %5787 = vmatprep.mubr.bf16.mxu0 %v510_v14  ;;  %7227 = vmatprep.subr.bf16.mxu1 %v7793_v24  ;;  %v528_v45 = vor.u32 %v527_v3, %v526_v2  ;;  %v7824_v14 = vld [vmem:[%s9757_s1 + $0xf70] sm:$0xff]  }
 0x1d7   : >> { %v6935_v26 = vadd.f32 %v6934_v23, %v6933_v40  ;;  %v6914_v30 = vpop.f32.mrf.mxu0  ;;  %5827 = vmatprep.mubr.bf16.mxu1 %v512_v16  ;;  %v7825_v16 = vld [vmem:[%s9757_s1 + $0xff0] sm:$0xff]  }
 0x1d8   : >> { %v5230_v13 = vadd.f32 %v6913_v51, %v9438_v57  ;;  %v6936_v32 = vpop.f32.mrf.mxu1  ;;  %7206 = vmatpush3.bf16.msra.mxu0 %v7794_v31  ;;  %v7797_v57 = vld [vmem:[%s9757_s1 + $0xee8] sm:$0xff]   ;;  %v7826_v51 = vld [vmem:[%s9757_s1 + $0xf30] sm:$0xff]  }
 0x1d9   : >> { %v6915_v34 = vpop.f32.mrf.mxu0  ;;  %7228 = vmatpush3.bf16.msra.mxu1 %v7795_v42  ;;  %7207 = vmatprep.subr.bf16.mxu0 %v7796_v9  ;;  %v7828_v31 = vld [vmem:[%s9757_s1 + $0xf68] sm:$0xff]  }
 0x1da   : >> { %v9553_v44 = vadd.f32 %v6935_v26, %v5230_v13  ;;  %v6937_v35 = vpop.f32.mrf.mxu1  ;;  %7229 = vmatprep.subr.bf16.mxu1 %v7797_v57  ;;  %v7827_v26 = vld [vmem:[%s9757_s1 + $0xfb0] sm:$0xff]   ;;  %v7829_v42 = vld [vmem:[%s9757_s1 + $0xfe8] sm:$0xff]   ;;  %v7834_v57 = vld [vmem:[%s9757_s1 + $0xf20] sm:$0xff]  }
 0x1db   : >> { %v7830_v34 = vld [vmem:[%s9757_s1 + $0xf28] sm:$0xff]   ;;  %v7833_v35 = vld [vmem:[%s9757_s1 + $0xfe0] sm:$0xff]  }
 0x1dc   : >> { %7208 = vmatpush3.bf16.msra.mxu0 %v7798_v11  ;;  %v7831_v9 = vld [vmem:[%s9757_s1 + $0xfa8] sm:$0xff]   ;;  %v7835_v11 = vld [vmem:[%s9757_s1 + $0xfa0] sm:$0xff]  }
 0x1dd   : >> { %7230 = vmatpush3.bf16.msra.mxu1 %v7799_v46  ;;  %7209 = vmatprep.subr.bf16.mxu0 %v7800_v48  ;;  %v7836_v46 = vld [vmem:[%s9757_s1 + $0xf58] sm:$0xff]  }
 0x1de   : >> { %7231 = vmatprep.subr.bf16.mxu1 %v7801_v38  ;;  %v7837_v48 = vld [vmem:[%s9757_s1 + $0xfd8] sm:$0xff]  }
 0x1df   : >> { %v7838_v38 = vld [vmem:[%s9757_s1 + $0xf18] sm:$0xff]  }
 0x1e0   : >> { %7210 = vmatpush3.bf16.msra.mxu0 %v7802_v61  ;;  %v7839_v61 = vld [vmem:[%s9757_s1 + $0xf98] sm:$0xff]  }
 0x1e1   : >> { %7232 = vmatpush3.bf16.msra.mxu1 %v7803_v20  ;;  %7211 = vmatprep.subr.bf16.mxu0 %v7804_v63  ;;  %v7840_v20 = vld [vmem:[%s9757_s1 + $0xf50] sm:$0xff]  }
 0x1e2   : >> { %7233 = vmatprep.subr.bf16.mxu1 %v7805_v15  ;;  %v7841_v63 = vld [vmem:[%s9757_s1 + $0xfd0] sm:$0xff]  }
 0x1e3   : >> { %v7842_v15 = vld [vmem:[%s9757_s1 + $0xf10] sm:$0xff]  }
 0x1e4   : >> { %7212 = vmatpush3.bf16.msra.mxu0 %v7806_v49  ;;  %v7843_v49 = vld [vmem:[%s9757_s1 + $0xf90] sm:$0xff]  }
 0x1e5   : >> { %7234 = vmatpush3.bf16.msra.mxu1 %v7807_v22  ;;  %7213 = vmatprep.subr.bf16.mxu0 %v7808_v59  ;;  %v7844_v22 = vld [vmem:[%s9757_s1 + $0xf48] sm:$0xff]  }
 0x1e6   : >> { %7235 = vmatprep.subr.bf16.mxu1 %v7809_v50  ;;  %v7845_v59 = vld [vmem:[%s9757_s1 + $0xfc8] sm:$0xff]   ;;  %v517_v50 = vrot.slane %v478_v29, 1  ;;  %v7848_v29 = vld [vmem:[%s9757_s1 + $0xf40] sm:$0xff]  }
 0x1e8   : >> { %7214 = vmatpush3.bf16.msra.mxu0 %v7810_v39  ;;  %v7846_v39 = vld [vmem:[%s9757_s1 + $0xf08] sm:$0xff]  }
 0x1e9   : >> { %7236 = vmatpush3.bf16.msra.mxu1 %v7811_v52  ;;  %7215 = vmatprep.subr.bf16.mxu0 %v7812_v25  ;;  %v518_v52 = vrot.slane %v480_v53, 2  ;;  %v7847_v25 = vld [vmem:[%s9757_s1 + $0xf88] sm:$0xff]   ;;  %v7850_v53 = vld [vmem:[%s9757_s1 + $0xf00] sm:$0xff]  }
 0x1ea   : >> { %7237 = vmatprep.subr.bf16.mxu1 %v7813_v18  ;;  %v523_v18 = vrot.slane %v492_v33, 1  ;;  %v7851_v33 = vld [vmem:[%s9757_s1 + $0xf80] sm:$0xff]  }
 0x1ec   : >> { %7216 = vmatpush3.bf16.msra.mxu0 %v7814_v54  ;;  %v524_v54 = vrot.slane %v494_v27, 2 }
 0x1ed   : >> { %7238 = vmatpush3.bf16.msra.mxu1 %v7815_v21  ;;  %7217 = vmatprep.subr.bf16.mxu0 %v7816_v58  ;;  %v519_v21 = vor.u32 %v518_v52, %v517_v50 }
 0x1ee   : >> { %7239 = vmatprep.subr.bf16.mxu1 %v7817_v56 }
 0x1f0   : >> { %7218 = vmatpush3.bf16.msra.mxu0 %v7818_v0 }
 0x1f1   : >> { %7240 = vmatpush3.bf16.msra.mxu1 %v7819_v47  ;;  %7247 = vmatprep.subr.bf16.mxu0 %v7820_v4 }
 0x1f2   : >> { %7269 = vmatprep.subr.bf16.mxu1 %v7821_v12 }
 0x1f3   : >> { %v6955_v17 = vpop.f32.mrf.mxu0  ;;  %5788 = vmatmul.mubr.bf16.vlgmr.msra.gmra.mxu0 %v509_v55  ;;  %v525_v55 = vor.u32 %v524_v54, %v523_v18 }
 0x1f4   : >> { %v6977_v28 = vpop.f32.mrf.mxu1  ;;  %5828 = vmatmul.mubr.bf16.vlgmr.msra.gmra.mxu1 %v511_v43  ;;  %7248 = vmatpush3.bf16.msra.mxu0 %v7822_v8 }
 0x1f5   : >> { %v6956_v37 = vpop.f32.mrf.mxu0  ;;  %7270 = vmatpush3.bf16.msra.mxu1 %v7823_v36  ;;  %7249 = vmatprep.subr.bf16.mxu0 %v7824_v14 }
 0x1f6   : >> { %v6957_v40 = vadd.f32 %v6956_v37, %v6955_v17  ;;  %v6978_v10 = vpop.f32.mrf.mxu1  ;;  %5867 = vmatprep.mubr.bf16.mxu0 %v522_v5  ;;  %7271 = vmatprep.subr.bf16.mxu1 %v7825_v16 }
 0x1f7   : >> { %v6979_v19 = vadd.f32 %v6978_v10, %v6977_v28  ;;  %v6958_v41 = vpop.f32.mrf.mxu0  ;;  %5907 = vmatprep.mubr.bf16.mxu1 %v528_v45 }
 0x1f8   : >> { %v5310_v23 = vadd.f32 %v6957_v40, %v9553_v44  ;;  %v6980_v24 = vpop.f32.mrf.mxu1  ;;  %7250 = vmatpush3.bf16.msra.mxu0 %v7826_v51  ;;  %v7832_v44 = vld [vmem:[%s9757_s1 + $0xf60] sm:$0xff]  }
 0x1f9   : >> { %v6959_v30 = vpop.f32.mrf.mxu0  ;;  %7272 = vmatpush3.bf16.msra.mxu1 %v7827_v26  ;;  %7251 = vmatprep.subr.bf16.mxu0 %v7828_v31 }
 0x1fa   : >> { %v9662_v13 = vadd.f32 %v6979_v19, %v5310_v23  ;;  %v6981_v32 = vpop.f32.mrf.mxu1  ;;  %7273 = vmatprep.subr.bf16.mxu1 %v7829_v42 }
 0x1fc   : >> { %7252 = vmatpush3.bf16.msra.mxu0 %v7830_v34 }
 0x1fd   : >> { %7274 = vmatpush3.bf16.msra.mxu1 %v7831_v9  ;;  %7253 = vmatprep.subr.bf16.mxu0 %v7832_v44 }
 0x1fe   : >> { %7275 = vmatprep.subr.bf16.mxu1 %v7833_v35 }
 0x200   : >> { %7254 = vmatpush3.bf16.msra.mxu0 %v7834_v57 }
 0x201   : >> { %7276 = vmatpush3.bf16.msra.mxu1 %v7835_v11  ;;  %7255 = vmatprep.subr.bf16.mxu0 %v7836_v46 }
 0x202   : >> { %7277 = vmatprep.subr.bf16.mxu1 %v7837_v48 }
 0x204   : >> { %7256 = vmatpush3.bf16.msra.mxu0 %v7838_v38 }
 0x205   : >> { %7278 = vmatpush3.bf16.msra.mxu1 %v7839_v61  ;;  %7257 = vmatprep.subr.bf16.mxu0 %v7840_v20 }
 0x206   : >> { %7279 = vmatprep.subr.bf16.mxu1 %v7841_v63 }
 0x208   : >> { %7258 = vmatpush3.bf16.msra.mxu0 %v7842_v15 }
 0x209   : >> { %7280 = vmatpush3.bf16.msra.mxu1 %v7843_v49  ;;  %7259 = vmatprep.subr.bf16.mxu0 %v7844_v22 }
 0x20a   : >> { %7281 = vmatprep.subr.bf16.mxu1 %v7845_v59 }
 0x20c   : >> { %7260 = vmatpush3.bf16.msra.mxu0 %v7846_v39 }
 0x20d   : >> { %7282 = vmatpush3.bf16.msra.mxu1 %v7847_v25  ;;  %7261 = vmatprep.subr.bf16.mxu0 %v7848_v29 }
 0x20e   : >> { %7283 = vmatprep.subr.bf16.mxu1 %v7849_v6 }
 0x210   : >> { %7262 = vmatpush3.bf16.msra.mxu0 %v7850_v53 }
 0x211   : >> { %7284 = vmatpush3.bf16.msra.mxu1 %v7851_v33 }
 0x213   : >> { %v6999_v7 = vpop.f32.mrf.mxu0  ;;  %5868 = vmatmul.mubr.bf16.vlgmr.msra.gmra.mxu0 %v519_v21 }
 0x214   : >> { %v7021_v27 = vpop.f32.mrf.mxu1  ;;  %5908 = vmatmul.mubr.bf16.vlgmr.msra.gmra.mxu1 %v525_v55 }
 0x215   : >> { %v7000_v58 = vpop.f32.mrf.mxu0 }
 0x216   : >> { %v7022_v60 = vpop.f32.mrf.mxu1  ;;  %v7001_v56 = vadd.f32 %v7000_v58, %v6999_v7 }
 0x217   : >> { %v7023_v62 = vadd.f32 %v7022_v60, %v7021_v27  ;;  %v7002_v0 = vpop.f32.mrf.mxu0 }
 0x218   : >> { %v7024_v2 = vpop.f32.mrf.mxu1  ;;  %v5390_v47 = vadd.f32 %v7001_v56, %v9662_v13 }
 0x219   : >> { %v7003_v3 = vpop.f32.mrf.mxu0 }
 0x21a   : >> { %v7025_v43 = vpop.f32.mrf.mxu1  ;;  %v5430_v4 = vadd.f32 %v7023_v62, %v5390_v47 }
 0x233   : >> { %v7043_v12 = vpop.f32.mrf.mxu0 }
 0x234   : >> { %v7065_v17 = vpop.f32.mrf.mxu1 }
 0x235   : >> { %v7044_v8 = vpop.f32.mrf.mxu0 }
 0x236   : >> { %v7066_v5 = vpop.f32.mrf.mxu1  ;;  %v7045_v28 = vadd.f32 %v7044_v8, %v7043_v12 }
 0x237   : >> { %v7067_v36 = vadd.f32 %v7066_v5, %v7065_v17  ;;  %v7046_v45 = vpop.f32.mrf.mxu0 }
 0x238   : >> { %v7068_v37 = vpop.f32.mrf.mxu1  ;;  %v5470_v14 = vadd.f32 %v7045_v28, %v5430_v4 }
 0x239   : >> { %v7047_v40 = vpop.f32.mrf.mxu0 }
 0x23a   : >> { %v7069_v10 = vpop.f32.mrf.mxu1  ;;  %v5510_v16 = vadd.f32 %v7067_v36, %v5470_v14 }
 0x253   : >> { %v7087_v19 = vpop.f32.mrf.mxu0 }
 0x254   : >> { %v7109_v41 = vpop.f32.mrf.mxu1 }
 0x255   : >> { %v7088_v51 = vpop.f32.mrf.mxu0 }
 0x256   : >> { %v7110_v23 = vpop.f32.mrf.mxu1  ;;  %v7089_v24 = vadd.f32 %v7088_v51, %v7087_v19 }
 0x257   : >> { %v7111_v26 = vadd.f32 %v7110_v23, %v7109_v41  ;;  %v7090_v30 = vpop.f32.mrf.mxu0 }
 0x258   : >> { %v7112_v31 = vpop.f32.mrf.mxu1  ;;  %v5550_v13 = vadd.f32 %v7089_v24, %v5510_v16 }
 0x259   : >> { %v7091_v32 = vpop.f32.mrf.mxu0 }
 0x25a   : >> { %v7113_v42 = vpop.f32.mrf.mxu1  ;;  %v5590_v34 = vadd.f32 %v7111_v26, %v5550_v13 }
 0x273   : >> { %v7131_v9 = vpop.f32.mrf.mxu0 }
 0x274   : >> { %v7153_v44 = vpop.f32.mrf.mxu1 }
 0x275   : >> { %v7132_v35 = vpop.f32.mrf.mxu0 }
 0x276   : >> { %v7154_v57 = vpop.f32.mrf.mxu1  ;;  %v7133_v11 = vadd.f32 %v7132_v35, %v7131_v9 }
 0x277   : >> { %v7155_v46 = vadd.f32 %v7154_v57, %v7153_v44  ;;  %v7134_v48 = vpop.f32.mrf.mxu0 }
 0x278   : >> { %v7156_v38 = vpop.f32.mrf.mxu1  ;;  %v5630_v61 = vadd.f32 %v7133_v11, %v5590_v34 }
 0x279   : >> { %v7135_v20 = vpop.f32.mrf.mxu0 }
 0x27a   : >> { %v7157_v63 = vpop.f32.mrf.mxu1  ;;  %v5670_v15 = vadd.f32 %v7155_v46, %v5630_v61 }
 0x293   : >> { %v7175_v49 = vpop.f32.mrf.mxu0 }
 0x294   : >> { %v7197_v22 = vpop.f32.mrf.mxu1 }
 0x295   : >> { %v7176_v59 = vpop.f32.mrf.mxu0 }
 0x296   : >> { %v7198_v50 = vpop.f32.mrf.mxu1  ;;  %v7177_v27 = vadd.f32 %v7176_v59, %v7175_v49 }
 0x297   : >> { %v7178_v39 = vpop.f32.mrf.mxu0  ;;  %v7199_v60 = vadd.f32 %v7198_v50, %v7197_v22 }
 0x298   : >> { %v7200_v52 = vpop.f32.mrf.mxu1  ;;  %v5710_v58 = vadd.f32 %v7177_v27, %v5670_v15 }
 0x299   : >> { %v7179_v25 = vpop.f32.mrf.mxu0 }
 0x29a   : >> { %v7201_v18 = vpop.f32.mrf.mxu1  ;;  %v5750_v62 = vadd.f32 %v7199_v60, %v5710_v58 }
 0x2b3   : >> { %v7219_v29 = vpop.f32.mrf.mxu0 }
 0x2b4   : >> { %v7241_v54 = vpop.f32.mrf.mxu1 }
 0x2b5   : >> { %v7220_v6 = vpop.f32.mrf.mxu0 }
 0x2b6   : >> { %v7242_v53 = vpop.f32.mrf.mxu1  ;;  %v7221_v56 = vadd.f32 %v7220_v6, %v7219_v29 }
 0x2b7   : >> { %v7222_v33 = vpop.f32.mrf.mxu0  ;;  %v7243_v2 = vadd.f32 %v7242_v53, %v7241_v54 }
 0x2b8   : >> { %v7244_v21 = vpop.f32.mrf.mxu1  ;;  %v5790_v0 = vadd.f32 %v7221_v56, %v5750_v62 }
 0x2b9   : >> { %v7223_v55 = vpop.f32.mrf.mxu0 }
 0x2ba   : >> { %v7245_v7 = vpop.f32.mrf.mxu1  ;;  %v5830_v12 = vadd.f32 %v7243_v2, %v5790_v0 }
 0x2d3   : >> { %v7263_v47 = vpop.f32.mrf.mxu0 }
 0x2d4   : >> { %v7285_v3 = vpop.f32.mrf.mxu1 }
 0x2d5   : >> { %v7264_v43 = vpop.f32.mrf.mxu0 }
 0x2d6   : >> { %v7286_v4 = vpop.f32.mrf.mxu1  ;;  %v7265_v17 = vadd.f32 %v7264_v43, %v7263_v47 }
 0x2d7   : >> { %v7266_v8 = vpop.f32.mrf.mxu0  ;;  %v7287_v36 = vadd.f32 %v7286_v4, %v7285_v3 }
 0x2d8   : >> { %v7288_v5 = vpop.f32.mrf.mxu1  ;;  %v5870_v28 = vadd.f32 %v7265_v17, %v5830_v12 }
 0x2d9   : >> { %v7267_v45 = vpop.f32.mrf.mxu0 }
 0x2da   : >> { %v7289_v37 = vpop.f32.mrf.mxu1  ;;  %v5910_v14 = vadd.f32 %v7287_v36, %v5870_v28  ;;  %228 = sbr.rel (!%p226_p5) target bundleno = 17 (0x11), region = 80 }
 0x2dc   : >> { %v5915_v40 = vpack.c.bf16 %v5910_v14, %v5910_v14 }
 0x2de   : >> { %5918 = vst.msk [vmem:[%s5916_s5] sm:$0x1] %vm5917_vm0, %v5915_v40 }
 0x2df PF: > { %s15_s16 = sadd.s32 1, %s7878_s16   ;;  %s9760_s14 = smov %s7874_s15 }
 0x2e0   : > { %p12_p6 = scmp.ge.s32.totalorder %s15_s16, 4   ;;  %s9761_s15 = smov %s9763_s2 }
 0x2e2   :  { %14 = sbr.rel (!%p12_p6) target bundleno = 3 (0x3), region = 91 }

</bundles_post_ra>
